<compile_context>
chip_gen: v6e
topology: v6e:2x2x1
jax: 0.10.0
libtpu: 0.0.40
codegen_flags: <defaults>
</compile_context>

<pallas_src>
import math

import jax
import jax.numpy as jnp
from jax import lax
from jax.experimental import pallas as pl
from jax.experimental.pallas import tpu as pltpu

GP = 128  # padded lane width per LSTM gate slot (i, f, o, g each get a 128-lane slot)


# ----------------------------------------------------------------------------------
# Fused kernel
# ----------------------------------------------------------------------------------
def bilstm_crf_kernel(x_ref, wih0_ref, wihab_ref, whh_ref, b_ref,
                      wt_ref, bt_ref, trans_t_ref, stop_col_ref, fv_init_ref,
                      score_ref, path_ref, start_ref,
                      bp_buf):
    T, E = x_ref.shape
    K = trans_t_ref.shape[0]
    H2 = whh_ref.shape[1]            # 2H: fwd hidden in lanes [0,H), bwd in [H,2H)
    num_layers = whh_ref.shape[0]
    f32 = jnp.float32
    NEG = jnp.float32(-1e30)         # finite mask fill (do NOT use -inf; see review)

    row_iota = lax.broadcasted_iota(jnp.int32, (T, H2), 0)

    # -------- one bidirectional LSTM layer, both directions fused per step ---------
    # Invariant: weight/bias lanes outside the two H-wide data regions of each gate
    # slot are EXACTLY zero, so sigmoid(0)=0.5 / tanh(0)=0 keep pad lanes of c and h
    # at exactly 0 for all t (h[:, :2H] is therefore exact).
    def lstm_layer(xw_all, whh):
        h = jnp.zeros((1, GP), f32)          # [h_f | h_b | 0-pad]
        c = jnp.zeros((1, GP), f32)          # [c_f | c_b | 0-pad]
        raw = jnp.zeros((T, H2), f32)        # raw[t]     = [h_f(t)     | h_b(T-1-t)]
        raw_rev = jnp.zeros((T, H2), f32)    # raw_rev[t] = [h_f(T-1-t) | h_b(t)    ]
        for t in range(T):                   # static unroll
            gates = xw_all[t:t + 1, :] + jnp.dot(h[:, :H2], whh,
                                                 preferred_element_type=f32)
            s = jax.nn.sigmoid(gates[:, 0:3 * GP])        # i, f, o in one EUP sweep
            i_g = s[:, 0 * GP:1 * GP]
            f_g = s[:, 1 * GP:2 * GP]
            o_g = s[:, 2 * GP:3 * GP]
            g_g = jnp.tanh(gates[:, 3 * GP:4 * GP])
            c = f_g * c + i_g * g_g
            h = o_g * jnp.tanh(c)
            h2 = h[:, :H2]
            raw = jnp.where(row_iota == t, h2, raw)               # register accumulate
            raw_rev = jnp.where(row_iota == (T - 1 - t), h2, raw_rev)
        return raw, raw_rev

    # -------- layer 0: hoisted input projection over all T --------------------------
    x = x_ref[...]                                                 # (T, E)
    row_iota_e = lax.broadcasted_iota(jnp.int32, (T, E), 0)
    x_rev = jnp.zeros((T, E), f32)
    for t in range(T):                                             # time-reverse x once
        x_rev = jnp.where(row_iota_e == t, x[T - 1 - t:T - t, :], x_rev)
    xw = (jnp.dot(x, wih0_ref[0], preferred_element_type=f32)
          + jnp.dot(x_rev, wih0_ref[1], preferred_element_type=f32)
          + b_ref[0])                                              # (T, 4GP)
    raw, raw_rev = lstm_layer(xw, whh_ref[0])

    # -------- layers 1..4: two projections per boundary ------------------------------
    for layer in range(1, num_layers):
        xw = (jnp.dot(raw, wihab_ref[2 * (layer - 1)], preferred_element_type=f32)
              + jnp.dot(raw_rev, wihab_ref[2 * (layer - 1) + 1], preferred_element_type=f32)
              + b_ref[layer])
        raw, raw_rev = lstm_layer(xw, whh_ref[layer])

    # -------- hidden2tag --------------------------------------------------------------
    feats = (jnp.dot(raw, wt_ref[0], preferred_element_type=f32)
             + jnp.dot(raw_rev, wt_ref[1], preferred_element_type=f32)
             + bt_ref[...])                                        # (T, K)

    # -------- CRF Viterbi forward sweep (statically unrolled) -------------------------
    trans_t = trans_t_ref[...]                                     # (K, K) [prev, next]
    prev_iota = lax.broadcasted_iota(jnp.int32, (K, K), 0)
    diag = prev_iota == lax.broadcasted_iota(jnp.int32, (K, K), 1)
    lane_k = lax.broadcasted_iota(jnp.int32, (1, K), 1)

    fv_col = fv_init_ref[...]                                      # (K, 1) over current tag
    for t in range(T):
        M = fv_col + trans_t                                       # (K, K) [prev, next]
        v_row = jnp.max(M, axis=0, keepdims=True)                  # (1, K) best over prev
        # argmax over prev; ties -> smallest index (matches torch.max first occurrence)
        bp_buf[t:t + 1, :] = jnp.min(jnp.where(M == v_row, prev_iota, K),
                                     axis=0, keepdims=True)
        fv_row = v_row + feats[t:t + 1, :]                         # (1, K)
        # single (1,K)->(K,1) relayout: mask onto diagonal, lane-reduce (finite fill)
        fv_col = jnp.max(jnp.where(diag, fv_row, NEG), axis=1, keepdims=True)

    term = fv_col + stop_col_ref[...]                              # (K, 1)
    best_score = jnp.max(term, axis=0, keepdims=True)              # (1, 1)
    col_k = lax.broadcasted_iota(jnp.int32, (K, 1), 0)
    best = jnp.min(jnp.where(term == best_score, col_k, K),
                   axis=0, keepdims=True)                          # (1, 1) int32
    score_ref[...] = best_score

    # -------- on-device backtracking; lane-dense (1, T) path written once -------------
    lane_t = lax.broadcasted_iota(jnp.int32, (1, T), 1)
    path_row = jnp.where(lane_t == T - 1, best, 0)
    for t in range(T - 1, 0, -1):
        row = bp_buf[t:t + 1, :]
        best = jnp.min(jnp.where(lane_k == best, row, K), axis=1, keepdims=True)
        path_row = jnp.where(lane_t == t - 1, best, path_row)
    path_ref[...] = path_row
    start_ref[...] = jnp.min(jnp.where(lane_k == best, bp_buf[0:1, :], K),
                             axis=1, keepdims=True)


def _forward_impl(sentence, params):
    T = sentence.shape[0]
    K = params["trans_t"].shape[0]
    return pl.pallas_call(
        bilstm_crf_kernel,
        out_shape=(jax.ShapeDtypeStruct((1, 1), jnp.float32),   # path score
                   jax.ShapeDtypeStruct((1, T), jnp.int32),     # best path (lane-dense)
                   jax.ShapeDtypeStruct((1, 1), jnp.int32)),    # start-tag check
        in_specs=[pl.BlockSpec(memory_space=pltpu.MemorySpace.VMEM)] * 10,
        out_specs=(pl.BlockSpec(memory_space=pltpu.MemorySpace.VMEM),) * 3,
        scratch_shapes=[pltpu.VMEM((T, K), jnp.int32)],         # Viterbi backpointers
    )(sentence.astype(jnp.float32), params["wih0"], params["wihab"], params["whh"],
      params["b"], params["wt"], params["bt"], params["trans_t"],
      params["stop_col"], params["fv_init"])


_forward = jax.jit(_forward_impl)


# ----------------------------------------------------------------------------------
# Parameter init (mirrors nn.LSTM / nn.Linear / randn transitions), pre-laid-out for
# the kernel: weights transposed, gates reordered to (i, f, o, g), and the fwd / bwd
# directions packed into disjoint lane halves of each 128-lane gate slot.
# ----------------------------------------------------------------------------------
_GATE_PERM = (0, 1, 3, 2)   # PyTorch order (i, f, g, o) -> kernel slots (i, f, o, g)


def _place_gates(w_t, H, direction):
    """(in, 4H) in PyTorch gate order -> (in, 4*GP).

    Slot s holds gate _GATE_PERM[s] in lanes [s*GP + direction*H, s*GP + (direction+1)*H).
    All other lanes are EXACTLY zero -- required so sigmoid(0)=0.5 / tanh(0)=0 keep the
    pad lanes of the cell/hidden state at exactly 0 (pad-lane invariant).
    """
    in_size = w_t.shape[0]
    w4 = w_t.reshape(in_size, 4, H)[:, jnp.array(_GATE_PERM), :]
    out = jnp.zeros((in_size, 4, GP), jnp.float32)
    out = out.at[:, :, direction * H:(direction + 1) * H].set(w4.astype(jnp.float32))
    return out.reshape(in_size, 4 * GP)


def init_params(key, embedding_dim, hidden_dim, tagset_size, start_idx, stop_idx):
    H = hidden_dim // 2
    assert 2 * H <= GP, "fwd+bwd lane packing requires 2*H <= 128"
    n_layers = 5
    keys = jax.random.split(key, n_layers * 2 * 4 + 3)
    idx = 0
    k_lstm = 1.0 / math.sqrt(H)

    wih0 = None
    wihab, whh_list, b_list = [], [], []
    for layer in range(n_layers):
        in_size = embedding_dim if layer == 0 else hidden_dim
        placed_ih = []
        whh_halves = []
        b_cat = jnp.zeros((1, 4 * GP), jnp.float32)
        for d in range(2):  # 0 = forward, 1 = reverse
            wih = jax.random.uniform(keys[idx], (4 * H, in_size), minval=-k_lstm, maxval=k_lstm); idx += 1
            whh = jax.random.uniform(keys[idx], (4 * H, H), minval=-k_lstm, maxval=k_lstm); idx += 1
            bih = jax.random.uniform(keys[idx], (4 * H,), minval=-k_lstm, maxval=k_lstm); idx += 1
            bhh = jax.random.uniform(keys[idx], (4 * H,), minval=-k_lstm, maxval=k_lstm); idx += 1
            placed_ih.append(_place_gates(wih.T, H, d))            # (in_size, 4GP)
            whh_halves.append(_place_gates(whh.T, H, d))           # (H, 4GP)
            b_cat = b_cat + _place_gates((bih + bhh).reshape(1, 4 * H), H, d)
        # fused recurrent matrix: rows [0,H) act on h_fwd, rows [H,2H) act on h_bwd
        whh_list.append(jnp.concatenate(whh_halves, axis=0))       # (2H, 4GP)
        b_list.append(b_cat)                                       # (1, 4GP)
        if layer == 0:
            wih0 = jnp.stack(placed_ih)                            # (2, E, 4GP)
        else:
            Wf, Wb = placed_ih                                     # each (2H, 4GP)
            # xw_all[t] = raw[t] @ A + raw_rev[t] @ B reproduces
            #   [fwd preact for input t | bwd preact for input T-1-t]
            A = jnp.concatenate([Wf[:H], Wb[H:]], axis=0)          # acts on raw
            B = jnp.concatenate([Wb[:H], Wf[H:]], axis=0)          # acts on raw_rev
            wihab.extend([A, B])

    k_lin = 1.0 / math.sqrt(hidden_dim)
    W = jax.random.uniform(keys[idx], (tagset_size, hidden_dim), minval=-k_lin, maxval=k_lin); idx += 1
    b_tag = jax.random.uniform(keys[idx], (tagset_size,), minval=-k_lin, maxval=k_lin); idx += 1
    transitions = jax.random.normal(keys[idx], (tagset_size, tagset_size)).astype(jnp.float32); idx += 1

    wt = W.T.astype(jnp.float32)                                   # (2H, K)
    zeros_hk = jnp.zeros((H, tagset_size), jnp.float32)
    wt_a = jnp.concatenate([wt[:H], zeros_hk], axis=0)             # fwd half, applied to raw
    wt_b = jnp.concatenate([zeros_hk, wt[H:]], axis=0)             # bwd half, applied to raw_rev

    fv_init = jnp.full((tagset_size, 1), -10000.0, jnp.float32).at[start_idx, 0].set(0.0)

    return {
        "wih0": wih0,                                  # (2, E, 4GP)
        "wihab": jnp.stack(wihab),                     # (8, 2H, 4GP): [2*(l-1)]=A_l, [+1]=B_l
        "whh": jnp.stack(whh_list),                    # (5, 2H, 4GP)
        "b": jnp.stack(b_list),                        # (5, 1, 4GP)
        "wt": jnp.stack([wt_a, wt_b]),                 # (2, 2H, K)
        "bt": b_tag.reshape(1, tagset_size).astype(jnp.float32),
        "trans_t": transitions.T,                      # (K, K) [prev, next]
        "stop_col": transitions[stop_idx].reshape(tagset_size, 1),
        "fv_init": fv_init,
    }


def decode_outputs(outs, start_idx):
    score_dev, path_dev, start_dev = outs
    score, path, start_check = jax.device_get((score_dev, path_dev, start_dev))
    assert int(start_check[0, 0]) == start_idx      # sanity: path terminates at <START>
    best_path = [int(v) for v in path[0, :]]
    return float(score[0, 0]), best_path


def bilstm_crf_forward(sentence, params, start_idx):
    outs = _forward(sentence, params)
    return decode_outputs(outs, start_idx)


if __name__ == "__main__":
    START_TAG, STOP_TAG = "<START>", "<STOP>"
    tag_to_ix = {"B": 0, "I": 1, "O": 2, START_TAG: 3, STOP_TAG: 4}

    T, EMBED_DIM, HIDDEN_DIM = 8, 16, 32
    K = len(tag_to_ix)

    key = jax.random.PRNGKey(0)
    pkey, skey = jax.random.split(key)
    params = init_params(pkey, EMBED_DIM, HIDDEN_DIM, K,
                         start_idx=tag_to_ix[START_TAG], stop_idx=tag_to_ix[STOP_TAG])
    sentence = jax.random.normal(skey, (T, EMBED_DIM), dtype=jnp.float32)

    outs = _forward(sentence, params)
    outs = jax.block_until_ready(outs)
    score, tag_seq = decode_outputs(outs, start_idx=tag_to_ix[START_TAG])

    assert len(tag_seq) == T
    assert all(0 <= t < K for t in tag_seq)
    print("KERNEL_OK")
</pallas_src>

<mosaic_0001>
module attributes {stable_mosaic.version = 11 : i64} {
  func.func @bilstm_crf_kernel(%arg0: memref<8x16xf32, #tpu.memory_space<vmem>>, %arg1: memref<2x16x512xf32, #tpu.memory_space<vmem>>, %arg2: memref<8x32x512xf32, #tpu.memory_space<vmem>>, %arg3: memref<5x32x512xf32, #tpu.memory_space<vmem>>, %arg4: memref<5x1x512xf32, #tpu.memory_space<vmem>>, %arg5: memref<2x32x5xf32, #tpu.memory_space<vmem>>, %arg6: memref<1x5xf32, #tpu.memory_space<vmem>>, %arg7: memref<5x5xf32, #tpu.memory_space<vmem>>, %arg8: memref<5x1xf32, #tpu.memory_space<vmem>>, %arg9: memref<5x1xf32, #tpu.memory_space<vmem>>, %arg10: memref<1x1xf32, #tpu.memory_space<vmem>>, %arg11: memref<1x8xi32, #tpu.memory_space<vmem>>, %arg12: memref<1x1xi32, #tpu.memory_space<vmem>>, %arg13: memref<8x5xi32, #tpu.memory_space<vmem>>) attributes {dimension_semantics = [], scalar_prefetch = 0 : i64, scratch_operands = 1 : i64, tpu.core_type = #tpu.core_type<tc>} {
    %0 = tpu.iota {dimensions = array<i32: 0>} : vector<8x32xi32>
    %c0 = arith.constant 0 : index
    %c0_0 = arith.constant 0 : index
    %1 = vector.load %arg0[%c0, %c0_0] : memref<8x16xf32, #tpu.memory_space<vmem>>, vector<8x16xf32>
    %2 = tpu.iota {dimensions = array<i32: 0>} : vector<8x16xi32>
    %cst = arith.constant 0.000000e+00 : f32
    %3 = vector.broadcast %cst : f32 to vector<8x16xf32>
    %c0_i32 = arith.constant 0 : i32
    %4 = vector.broadcast %c0_i32 : i32 to vector<8x16xi32>
    %5 = arith.cmpi eq, %2, %4 : vector<8x16xi32>
    %6 = vector.extract_strided_slice %1 {offsets = [7, 0], sizes = [1, 16], strides = [1, 1]} : vector<8x16xf32> to vector<1x16xf32>
    %7 = vector.shape_cast %6 : vector<1x16xf32> to vector<1x16xf32>
    %8 = vector.broadcast %7 : vector<1x16xf32> to vector<8x16xf32>
    %9 = arith.select %5, %8, %3 : vector<8x16xi1>, vector<8x16xf32>
    %c1_i32 = arith.constant 1 : i32
    %10 = vector.broadcast %c1_i32 : i32 to vector<8x16xi32>
    %11 = arith.cmpi eq, %2, %10 : vector<8x16xi32>
    %12 = vector.extract_strided_slice %1 {offsets = [6, 0], sizes = [1, 16], strides = [1, 1]} : vector<8x16xf32> to vector<1x16xf32>
    %13 = vector.shape_cast %12 : vector<1x16xf32> to vector<1x16xf32>
    %14 = vector.broadcast %13 : vector<1x16xf32> to vector<8x16xf32>
    %15 = arith.select %11, %14, %9 : vector<8x16xi1>, vector<8x16xf32>
    %c2_i32 = arith.constant 2 : i32
    %16 = vector.broadcast %c2_i32 : i32 to vector<8x16xi32>
    %17 = arith.cmpi eq, %2, %16 : vector<8x16xi32>
    %18 = vector.extract_strided_slice %1 {offsets = [5, 0], sizes = [1, 16], strides = [1, 1]} : vector<8x16xf32> to vector<1x16xf32>
    %19 = vector.shape_cast %18 : vector<1x16xf32> to vector<1x16xf32>
    %20 = vector.broadcast %19 : vector<1x16xf32> to vector<8x16xf32>
    %21 = arith.select %17, %20, %15 : vector<8x16xi1>, vector<8x16xf32>
    %c3_i32 = arith.constant 3 : i32
    %22 = vector.broadcast %c3_i32 : i32 to vector<8x16xi32>
    %23 = arith.cmpi eq, %2, %22 : vector<8x16xi32>
    %24 = vector.extract_strided_slice %1 {offsets = [4, 0], sizes = [1, 16], strides = [1, 1]} : vector<8x16xf32> to vector<1x16xf32>
    %25 = vector.shape_cast %24 : vector<1x16xf32> to vector<1x16xf32>
    %26 = vector.broadcast %25 : vector<1x16xf32> to vector<8x16xf32>
    %27 = arith.select %23, %26, %21 : vector<8x16xi1>, vector<8x16xf32>
    %c4_i32 = arith.constant 4 : i32
    %28 = vector.broadcast %c4_i32 : i32 to vector<8x16xi32>
    %29 = arith.cmpi eq, %2, %28 : vector<8x16xi32>
    %30 = vector.extract_strided_slice %1 {offsets = [3, 0], sizes = [1, 16], strides = [1, 1]} : vector<8x16xf32> to vector<1x16xf32>
    %31 = vector.shape_cast %30 : vector<1x16xf32> to vector<1x16xf32>
    %32 = vector.broadcast %31 : vector<1x16xf32> to vector<8x16xf32>
    %33 = arith.select %29, %32, %27 : vector<8x16xi1>, vector<8x16xf32>
    %c5_i32 = arith.constant 5 : i32
    %34 = vector.broadcast %c5_i32 : i32 to vector<8x16xi32>
    %35 = arith.cmpi eq, %2, %34 : vector<8x16xi32>
    %36 = vector.extract_strided_slice %1 {offsets = [2, 0], sizes = [1, 16], strides = [1, 1]} : vector<8x16xf32> to vector<1x16xf32>
    %37 = vector.shape_cast %36 : vector<1x16xf32> to vector<1x16xf32>
    %38 = vector.broadcast %37 : vector<1x16xf32> to vector<8x16xf32>
    %39 = arith.select %35, %38, %33 : vector<8x16xi1>, vector<8x16xf32>
    %c6_i32 = arith.constant 6 : i32
    %40 = vector.broadcast %c6_i32 : i32 to vector<8x16xi32>
    %41 = arith.cmpi eq, %2, %40 : vector<8x16xi32>
    %42 = vector.extract_strided_slice %1 {offsets = [1, 0], sizes = [1, 16], strides = [1, 1]} : vector<8x16xf32> to vector<1x16xf32>
    %43 = vector.shape_cast %42 : vector<1x16xf32> to vector<1x16xf32>
    %44 = vector.broadcast %43 : vector<1x16xf32> to vector<8x16xf32>
    %45 = arith.select %41, %44, %39 : vector<8x16xi1>, vector<8x16xf32>
    %c7_i32 = arith.constant 7 : i32
    %46 = vector.broadcast %c7_i32 : i32 to vector<8x16xi32>
    %47 = arith.cmpi eq, %2, %46 : vector<8x16xi32>
    %48 = vector.extract_strided_slice %1 {offsets = [0, 0], sizes = [1, 16], strides = [1, 1]} : vector<8x16xf32> to vector<1x16xf32>
    %49 = vector.shape_cast %48 : vector<1x16xf32> to vector<1x16xf32>
    %50 = vector.broadcast %49 : vector<1x16xf32> to vector<8x16xf32>
    %51 = arith.select %47, %50, %45 : vector<8x16xi1>, vector<8x16xf32>
    %c0_1 = arith.constant 0 : index
    %c0_2 = arith.constant 0 : index
    %c0_3 = arith.constant 0 : index
    %52 = vector.load %arg1[%c0_1, %c0_2, %c0_3] : memref<2x16x512xf32, #tpu.memory_space<vmem>>, vector<1x16x512xf32>
    %53 = vector.shape_cast %52 : vector<1x16x512xf32> to vector<16x512xf32>
    %cst_4 = arith.constant dense<0.000000e+00> : vector<8x512xf32>
    %54 = tpu.matmul %1, %53, %cst_4 {dimension_numbers = #tpu.dot_dimension_numbers<[1], [0], [0], [1], [0, 0, 1, 1], [], []>} : vector<8x16xf32>, vector<16x512xf32>, vector<8x512xf32> -> vector<8x512xf32>
    %c1 = arith.constant 1 : index
    %c0_5 = arith.constant 0 : index
    %c0_6 = arith.constant 0 : index
    %55 = vector.load %arg1[%c1, %c0_5, %c0_6] : memref<2x16x512xf32, #tpu.memory_space<vmem>>, vector<1x16x512xf32>
    %56 = vector.shape_cast %55 : vector<1x16x512xf32> to vector<16x512xf32>
    %cst_7 = arith.constant dense<0.000000e+00> : vector<8x512xf32>
    %57 = tpu.matmul %51, %56, %cst_7 {dimension_numbers = #tpu.dot_dimension_numbers<[1], [0], [0], [1], [0, 0, 1, 1], [], []>} : vector<8x16xf32>, vector<16x512xf32>, vector<8x512xf32> -> vector<8x512xf32>
    %58 = arith.addf %54, %57 : vector<8x512xf32>
    %c0_8 = arith.constant 0 : index
    %c0_9 = arith.constant 0 : index
    %c0_10 = arith.constant 0 : index
    %59 = vector.load %arg4[%c0_8, %c0_9, %c0_10] : memref<5x1x512xf32, #tpu.memory_space<vmem>>, vector<1x1x512xf32>
    %60 = vector.shape_cast %59 : vector<1x1x512xf32> to vector<1x512xf32>
    %61 = vector.broadcast %60 : vector<1x512xf32> to vector<8x512xf32>
    %62 = arith.addf %58, %61 : vector<8x512xf32>
    %c0_11 = arith.constant 0 : index
    %c0_12 = arith.constant 0 : index
    %c0_13 = arith.constant 0 : index
    %63 = vector.load %arg3[%c0_11, %c0_12, %c0_13] : memref<5x32x512xf32, #tpu.memory_space<vmem>>, vector<1x32x512xf32>
    %64 = vector.shape_cast %63 : vector<1x32x512xf32> to vector<32x512xf32>
    %cst_14 = arith.constant 0.000000e+00 : f32
    %65 = vector.broadcast %cst_14 : f32 to vector<1x128xf32>
    %cst_15 = arith.constant 0.000000e+00 : f32
    %66 = vector.broadcast %cst_15 : f32 to vector<1x128xf32>
    %cst_16 = arith.constant 0.000000e+00 : f32
    %67 = vector.broadcast %cst_16 : f32 to vector<8x32xf32>
    %cst_17 = arith.constant 0.000000e+00 : f32
    %68 = vector.broadcast %cst_17 : f32 to vector<8x32xf32>
    %69 = vector.extract_strided_slice %62 {offsets = [0, 0], sizes = [1, 512], strides = [1, 1]} : vector<8x512xf32> to vector<1x512xf32>
    %70 = vector.extract_strided_slice %65 {offsets = [0, 0], sizes = [1, 32], strides = [1, 1]} : vector<1x128xf32> to vector<1x32xf32>
    %cst_18 = arith.constant dense<0.000000e+00> : vector<1x512xf32>
    %71 = tpu.matmul %70, %64, %cst_18 {dimension_numbers = #tpu.dot_dimension_numbers<[1], [0], [0], [1], [0, 0, 1, 1], [], []>} : vector<1x32xf32>, vector<32x512xf32>, vector<1x512xf32> -> vector<1x512xf32>
    %72 = arith.addf %69, %71 : vector<1x512xf32>
    %73 = vector.extract_strided_slice %72 {offsets = [0, 0], sizes = [1, 384], strides = [1, 1]} : vector<1x512xf32> to vector<1x384xf32>
    %74 = arith.negf %73 : vector<1x384xf32>
    %75 = math.exp %74 : vector<1x384xf32>
    %cst_19 = arith.constant 1.000000e+00 : f32
    %76 = vector.broadcast %cst_19 : f32 to vector<1x384xf32>
    %77 = arith.addf %76, %75 : vector<1x384xf32>
    %78 = arith.divf %76, %77 : vector<1x384xf32>
    %79 = vector.extract_strided_slice %78 {offsets = [0, 0], sizes = [1, 128], strides = [1, 1]} : vector<1x384xf32> to vector<1x128xf32>
    %80 = vector.extract_strided_slice %78 {offsets = [0, 128], sizes = [1, 128], strides = [1, 1]} : vector<1x384xf32> to vector<1x128xf32>
    %81 = vector.extract_strided_slice %78 {offsets = [0, 256], sizes = [1, 128], strides = [1, 1]} : vector<1x384xf32> to vector<1x128xf32>
    %82 = vector.extract_strided_slice %72 {offsets = [0, 384], sizes = [1, 128], strides = [1, 1]} : vector<1x512xf32> to vector<1x128xf32>
    %83 = math.tanh %82 : vector<1x128xf32>
    %84 = arith.mulf %80, %66 : vector<1x128xf32>
    %85 = arith.mulf %79, %83 : vector<1x128xf32>
    %86 = arith.addf %84, %85 : vector<1x128xf32>
    %87 = math.tanh %86 : vector<1x128xf32>
    %88 = arith.mulf %81, %87 : vector<1x128xf32>
    %89 = vector.extract_strided_slice %88 {offsets = [0, 0], sizes = [1, 32], strides = [1, 1]} : vector<1x128xf32> to vector<1x32xf32>
    %c0_i32_20 = arith.constant 0 : i32
    %90 = vector.broadcast %c0_i32_20 : i32 to vector<8x32xi32>
    %91 = arith.cmpi eq, %0, %90 : vector<8x32xi32>
    %92 = vector.shape_cast %89 : vector<1x32xf32> to vector<1x32xf32>
    %93 = vector.broadcast %92 : vector<1x32xf32> to vector<8x32xf32>
    %94 = arith.select %91, %93, %67 : vector<8x32xi1>, vector<8x32xf32>
    %c7_i32_21 = arith.constant 7 : i32
    %95 = vector.broadcast %c7_i32_21 : i32 to vector<8x32xi32>
    %96 = arith.cmpi eq, %0, %95 : vector<8x32xi32>
    %97 = vector.shape_cast %89 : vector<1x32xf32> to vector<1x32xf32>
    %98 = vector.broadcast %97 : vector<1x32xf32> to vector<8x32xf32>
    %99 = arith.select %96, %98, %68 : vector<8x32xi1>, vector<8x32xf32>
    %100 = vector.extract_strided_slice %62 {offsets = [1, 0], sizes = [1, 512], strides = [1, 1]} : vector<8x512xf32> to vector<1x512xf32>
    %101 = vector.extract_strided_slice %88 {offsets = [0, 0], sizes = [1, 32], strides = [1, 1]} : vector<1x128xf32> to vector<1x32xf32>
    %cst_22 = arith.constant dense<0.000000e+00> : vector<1x512xf32>
    %102 = tpu.matmul %101, %64, %cst_22 {dimension_numbers = #tpu.dot_dimension_numbers<[1], [0], [0], [1], [0, 0, 1, 1], [], []>} : vector<1x32xf32>, vector<32x512xf32>, vector<1x512xf32> -> vector<1x512xf32>
    %103 = arith.addf %100, %102 : vector<1x512xf32>
    %104 = vector.extract_strided_slice %103 {offsets = [0, 0], sizes = [1, 384], strides = [1, 1]} : vector<1x512xf32> to vector<1x384xf32>
    %105 = arith.negf %104 : vector<1x384xf32>
    %106 = math.exp %105 : vector<1x384xf32>
    %cst_23 = arith.constant 1.000000e+00 : f32
    %107 = vector.broadcast %cst_23 : f32 to vector<1x384xf32>
    %108 = arith.addf %107, %106 : vector<1x384xf32>
    %109 = arith.divf %107, %108 : vector<1x384xf32>
    %110 = vector.extract_strided_slice %109 {offsets = [0, 0], sizes = [1, 128], strides = [1, 1]} : vector<1x384xf32> to vector<1x128xf32>
    %111 = vector.extract_strided_slice %109 {offsets = [0, 128], sizes = [1, 128], strides = [1, 1]} : vector<1x384xf32> to vector<1x128xf32>
    %112 = vector.extract_strided_slice %109 {offsets = [0, 256], sizes = [1, 128], strides = [1, 1]} : vector<1x384xf32> to vector<1x128xf32>
    %113 = vector.extract_strided_slice %103 {offsets = [0, 384], sizes = [1, 128], strides = [1, 1]} : vector<1x512xf32> to vector<1x128xf32>
    %114 = math.tanh %113 : vector<1x128xf32>
    %115 = arith.mulf %111, %86 : vector<1x128xf32>
    %116 = arith.mulf %110, %114 : vector<1x128xf32>
    %117 = arith.addf %115, %116 : vector<1x128xf32>
    %118 = math.tanh %117 : vector<1x128xf32>
    %119 = arith.mulf %112, %118 : vector<1x128xf32>
    %120 = vector.extract_strided_slice %119 {offsets = [0, 0], sizes = [1, 32], strides = [1, 1]} : vector<1x128xf32> to vector<1x32xf32>
    %c1_i32_24 = arith.constant 1 : i32
    %121 = vector.broadcast %c1_i32_24 : i32 to vector<8x32xi32>
    %122 = arith.cmpi eq, %0, %121 : vector<8x32xi32>
    %123 = vector.shape_cast %120 : vector<1x32xf32> to vector<1x32xf32>
    %124 = vector.broadcast %123 : vector<1x32xf32> to vector<8x32xf32>
    %125 = arith.select %122, %124, %94 : vector<8x32xi1>, vector<8x32xf32>
    %c6_i32_25 = arith.constant 6 : i32
    %126 = vector.broadcast %c6_i32_25 : i32 to vector<8x32xi32>
    %127 = arith.cmpi eq, %0, %126 : vector<8x32xi32>
    %128 = vector.shape_cast %120 : vector<1x32xf32> to vector<1x32xf32>
    %129 = vector.broadcast %128 : vector<1x32xf32> to vector<8x32xf32>
    %130 = arith.select %127, %129, %99 : vector<8x32xi1>, vector<8x32xf32>
    %131 = vector.extract_strided_slice %62 {offsets = [2, 0], sizes = [1, 512], strides = [1, 1]} : vector<8x512xf32> to vector<1x512xf32>
    %132 = vector.extract_strided_slice %119 {offsets = [0, 0], sizes = [1, 32], strides = [1, 1]} : vector<1x128xf32> to vector<1x32xf32>
    %cst_26 = arith.constant dense<0.000000e+00> : vector<1x512xf32>
    %133 = tpu.matmul %132, %64, %cst_26 {dimension_numbers = #tpu.dot_dimension_numbers<[1], [0], [0], [1], [0, 0, 1, 1], [], []>} : vector<1x32xf32>, vector<32x512xf32>, vector<1x512xf32> -> vector<1x512xf32>
    %134 = arith.addf %131, %133 : vector<1x512xf32>
    %135 = vector.extract_strided_slice %134 {offsets = [0, 0], sizes = [1, 384], strides = [1, 1]} : vector<1x512xf32> to vector<1x384xf32>
    %136 = arith.negf %135 : vector<1x384xf32>
    %137 = math.exp %136 : vector<1x384xf32>
    %cst_27 = arith.constant 1.000000e+00 : f32
    %138 = vector.broadcast %cst_27 : f32 to vector<1x384xf32>
    %139 = arith.addf %138, %137 : vector<1x384xf32>
    %140 = arith.divf %138, %139 : vector<1x384xf32>
    %141 = vector.extract_strided_slice %140 {offsets = [0, 0], sizes = [1, 128], strides = [1, 1]} : vector<1x384xf32> to vector<1x128xf32>
    %142 = vector.extract_strided_slice %140 {offsets = [0, 128], sizes = [1, 128], strides = [1, 1]} : vector<1x384xf32> to vector<1x128xf32>
    %143 = vector.extract_strided_slice %140 {offsets = [0, 256], sizes = [1, 128], strides = [1, 1]} : vector<1x384xf32> to vector<1x128xf32>
    %144 = vector.extract_strided_slice %134 {offsets = [0, 384], sizes = [1, 128], strides = [1, 1]} : vector<1x512xf32> to vector<1x128xf32>
    %145 = math.tanh %144 : vector<1x128xf32>
    %146 = arith.mulf %142, %117 : vector<1x128xf32>
    %147 = arith.mulf %141, %145 : vector<1x128xf32>
    %148 = arith.addf %146, %147 : vector<1x128xf32>
    %149 = math.tanh %148 : vector<1x128xf32>
    %150 = arith.mulf %143, %149 : vector<1x128xf32>
    %151 = vector.extract_strided_slice %150 {offsets = [0, 0], sizes = [1, 32], strides = [1, 1]} : vector<1x128xf32> to vector<1x32xf32>
    %c2_i32_28 = arith.constant 2 : i32
    %152 = vector.broadcast %c2_i32_28 : i32 to vector<8x32xi32>
    %153 = arith.cmpi eq, %0, %152 : vector<8x32xi32>
    %154 = vector.shape_cast %151 : vector<1x32xf32> to vector<1x32xf32>
    %155 = vector.broadcast %154 : vector<1x32xf32> to vector<8x32xf32>
    %156 = arith.select %153, %155, %125 : vector<8x32xi1>, vector<8x32xf32>
    %c5_i32_29 = arith.constant 5 : i32
    %157 = vector.broadcast %c5_i32_29 : i32 to vector<8x32xi32>
    %158 = arith.cmpi eq, %0, %157 : vector<8x32xi32>
    %159 = vector.shape_cast %151 : vector<1x32xf32> to vector<1x32xf32>
    %160 = vector.broadcast %159 : vector<1x32xf32> to vector<8x32xf32>
    %161 = arith.select %158, %160, %130 : vector<8x32xi1>, vector<8x32xf32>
    %162 = vector.extract_strided_slice %62 {offsets = [3, 0], sizes = [1, 512], strides = [1, 1]} : vector<8x512xf32> to vector<1x512xf32>
    %163 = vector.extract_strided_slice %150 {offsets = [0, 0], sizes = [1, 32], strides = [1, 1]} : vector<1x128xf32> to vector<1x32xf32>
    %cst_30 = arith.constant dense<0.000000e+00> : vector<1x512xf32>
    %164 = tpu.matmul %163, %64, %cst_30 {dimension_numbers = #tpu.dot_dimension_numbers<[1], [0], [0], [1], [0, 0, 1, 1], [], []>} : vector<1x32xf32>, vector<32x512xf32>, vector<1x512xf32> -> vector<1x512xf32>
    %165 = arith.addf %162, %164 : vector<1x512xf32>
    %166 = vector.extract_strided_slice %165 {offsets = [0, 0], sizes = [1, 384], strides = [1, 1]} : vector<1x512xf32> to vector<1x384xf32>
    %167 = arith.negf %166 : vector<1x384xf32>
    %168 = math.exp %167 : vector<1x384xf32>
    %cst_31 = arith.constant 1.000000e+00 : f32
    %169 = vector.broadcast %cst_31 : f32 to vector<1x384xf32>
    %170 = arith.addf %169, %168 : vector<1x384xf32>
    %171 = arith.divf %169, %170 : vector<1x384xf32>
    %172 = vector.extract_strided_slice %171 {offsets = [0, 0], sizes = [1, 128], strides = [1, 1]} : vector<1x384xf32> to vector<1x128xf32>
    %173 = vector.extract_strided_slice %171 {offsets = [0, 128], sizes = [1, 128], strides = [1, 1]} : vector<1x384xf32> to vector<1x128xf32>
    %174 = vector.extract_strided_slice %171 {offsets = [0, 256], sizes = [1, 128], strides = [1, 1]} : vector<1x384xf32> to vector<1x128xf32>
    %175 = vector.extract_strided_slice %165 {offsets = [0, 384], sizes = [1, 128], strides = [1, 1]} : vector<1x512xf32> to vector<1x128xf32>
    %176 = math.tanh %175 : vector<1x128xf32>
    %177 = arith.mulf %173, %148 : vector<1x128xf32>
    %178 = arith.mulf %172, %176 : vector<1x128xf32>
    %179 = arith.addf %177, %178 : vector<1x128xf32>
    %180 = math.tanh %179 : vector<1x128xf32>
    %181 = arith.mulf %174, %180 : vector<1x128xf32>
    %182 = vector.extract_strided_slice %181 {offsets = [0, 0], sizes = [1, 32], strides = [1, 1]} : vector<1x128xf32> to vector<1x32xf32>
    %c3_i32_32 = arith.constant 3 : i32
    %183 = vector.broadcast %c3_i32_32 : i32 to vector<8x32xi32>
    %184 = arith.cmpi eq, %0, %183 : vector<8x32xi32>
    %185 = vector.shape_cast %182 : vector<1x32xf32> to vector<1x32xf32>
    %186 = vector.broadcast %185 : vector<1x32xf32> to vector<8x32xf32>
    %187 = arith.select %184, %186, %156 : vector<8x32xi1>, vector<8x32xf32>
    %c4_i32_33 = arith.constant 4 : i32
    %188 = vector.broadcast %c4_i32_33 : i32 to vector<8x32xi32>
    %189 = arith.cmpi eq, %0, %188 : vector<8x32xi32>
    %190 = vector.shape_cast %182 : vector<1x32xf32> to vector<1x32xf32>
    %191 = vector.broadcast %190 : vector<1x32xf32> to vector<8x32xf32>
    %192 = arith.select %189, %191, %161 : vector<8x32xi1>, vector<8x32xf32>
    %193 = vector.extract_strided_slice %62 {offsets = [4, 0], sizes = [1, 512], strides = [1, 1]} : vector<8x512xf32> to vector<1x512xf32>
    %194 = vector.extract_strided_slice %181 {offsets = [0, 0], sizes = [1, 32], strides = [1, 1]} : vector<1x128xf32> to vector<1x32xf32>
    %cst_34 = arith.constant dense<0.000000e+00> : vector<1x512xf32>
    %195 = tpu.matmul %194, %64, %cst_34 {dimension_numbers = #tpu.dot_dimension_numbers<[1], [0], [0], [1], [0, 0, 1, 1], [], []>} : vector<1x32xf32>, vector<32x512xf32>, vector<1x512xf32> -> vector<1x512xf32>
    %196 = arith.addf %193, %195 : vector<1x512xf32>
    %197 = vector.extract_strided_slice %196 {offsets = [0, 0], sizes = [1, 384], strides = [1, 1]} : vector<1x512xf32> to vector<1x384xf32>
    %198 = arith.negf %197 : vector<1x384xf32>
    %199 = math.exp %198 : vector<1x384xf32>
    %cst_35 = arith.constant 1.000000e+00 : f32
    %200 = vector.broadcast %cst_35 : f32 to vector<1x384xf32>
    %201 = arith.addf %200, %199 : vector<1x384xf32>
    %202 = arith.divf %200, %201 : vector<1x384xf32>
    %203 = vector.extract_strided_slice %202 {offsets = [0, 0], sizes = [1, 128], strides = [1, 1]} : vector<1x384xf32> to vector<1x128xf32>
    %204 = vector.extract_strided_slice %202 {offsets = [0, 128], sizes = [1, 128], strides = [1, 1]} : vector<1x384xf32> to vector<1x128xf32>
    %205 = vector.extract_strided_slice %202 {offsets = [0, 256], sizes = [1, 128], strides = [1, 1]} : vector<1x384xf32> to vector<1x128xf32>
    %206 = vector.extract_strided_slice %196 {offsets = [0, 384], sizes = [1, 128], strides = [1, 1]} : vector<1x512xf32> to vector<1x128xf32>
    %207 = math.tanh %206 : vector<1x128xf32>
    %208 = arith.mulf %204, %179 : vector<1x128xf32>
    %209 = arith.mulf %203, %207 : vector<1x128xf32>
    %210 = arith.addf %208, %209 : vector<1x128xf32>
    %211 = math.tanh %210 : vector<1x128xf32>
    %212 = arith.mulf %205, %211 : vector<1x128xf32>
    %213 = vector.extract_strided_slice %212 {offsets = [0, 0], sizes = [1, 32], strides = [1, 1]} : vector<1x128xf32> to vector<1x32xf32>
    %c4_i32_36 = arith.constant 4 : i32
    %214 = vector.broadcast %c4_i32_36 : i32 to vector<8x32xi32>
    %215 = arith.cmpi eq, %0, %214 : vector<8x32xi32>
    %216 = vector.shape_cast %213 : vector<1x32xf32> to vector<1x32xf32>
    %217 = vector.broadcast %216 : vector<1x32xf32> to vector<8x32xf32>
    %218 = arith.select %215, %217, %187 : vector<8x32xi1>, vector<8x32xf32>
    %c3_i32_37 = arith.constant 3 : i32
    %219 = vector.broadcast %c3_i32_37 : i32 to vector<8x32xi32>
    %220 = arith.cmpi eq, %0, %219 : vector<8x32xi32>
    %221 = vector.shape_cast %213 : vector<1x32xf32> to vector<1x32xf32>
    %222 = vector.broadcast %221 : vector<1x32xf32> to vector<8x32xf32>
    %223 = arith.select %220, %222, %192 : vector<8x32xi1>, vector<8x32xf32>
    %224 = vector.extract_strided_slice %62 {offsets = [5, 0], sizes = [1, 512], strides = [1, 1]} : vector<8x512xf32> to vector<1x512xf32>
    %225 = vector.extract_strided_slice %212 {offsets = [0, 0], sizes = [1, 32], strides = [1, 1]} : vector<1x128xf32> to vector<1x32xf32>
    %cst_38 = arith.constant dense<0.000000e+00> : vector<1x512xf32>
    %226 = tpu.matmul %225, %64, %cst_38 {dimension_numbers = #tpu.dot_dimension_numbers<[1], [0], [0], [1], [0, 0, 1, 1], [], []>} : vector<1x32xf32>, vector<32x512xf32>, vector<1x512xf32> -> vector<1x512xf32>
    %227 = arith.addf %224, %226 : vector<1x512xf32>
    %228 = vector.extract_strided_slice %227 {offsets = [0, 0], sizes = [1, 384], strides = [1, 1]} : vector<1x512xf32> to vector<1x384xf32>
    %229 = arith.negf %228 : vector<1x384xf32>
    %230 = math.exp %229 : vector<1x384xf32>
    %cst_39 = arith.constant 1.000000e+00 : f32
    %231 = vector.broadcast %cst_39 : f32 to vector<1x384xf32>
    %232 = arith.addf %231, %230 : vector<1x384xf32>
    %233 = arith.divf %231, %232 : vector<1x384xf32>
    %234 = vector.extract_strided_slice %233 {offsets = [0, 0], sizes = [1, 128], strides = [1, 1]} : vector<1x384xf32> to vector<1x128xf32>
    %235 = vector.extract_strided_slice %233 {offsets = [0, 128], sizes = [1, 128], strides = [1, 1]} : vector<1x384xf32> to vector<1x128xf32>
    %236 = vector.extract_strided_slice %233 {offsets = [0, 256], sizes = [1, 128], strides = [1, 1]} : vector<1x384xf32> to vector<1x128xf32>
    %237 = vector.extract_strided_slice %227 {offsets = [0, 384], sizes = [1, 128], strides = [1, 1]} : vector<1x512xf32> to vector<1x128xf32>
    %238 = math.tanh %237 : vector<1x128xf32>
    %239 = arith.mulf %235, %210 : vector<1x128xf32>
    %240 = arith.mulf %234, %238 : vector<1x128xf32>
    %241 = arith.addf %239, %240 : vector<1x128xf32>
    %242 = math.tanh %241 : vector<1x128xf32>
    %243 = arith.mulf %236, %242 : vector<1x128xf32>
    %244 = vector.extract_strided_slice %243 {offsets = [0, 0], sizes = [1, 32], strides = [1, 1]} : vector<1x128xf32> to vector<1x32xf32>
    %c5_i32_40 = arith.constant 5 : i32
    %245 = vector.broadcast %c5_i32_40 : i32 to vector<8x32xi32>
    %246 = arith.cmpi eq, %0, %245 : vector<8x32xi32>
    %247 = vector.shape_cast %244 : vector<1x32xf32> to vector<1x32xf32>
    %248 = vector.broadcast %247 : vector<1x32xf32> to vector<8x32xf32>
    %249 = arith.select %246, %248, %218 : vector<8x32xi1>, vector<8x32xf32>
    %c2_i32_41 = arith.constant 2 : i32
    %250 = vector.broadcast %c2_i32_41 : i32 to vector<8x32xi32>
    %251 = arith.cmpi eq, %0, %250 : vector<8x32xi32>
    %252 = vector.shape_cast %244 : vector<1x32xf32> to vector<1x32xf32>
    %253 = vector.broadcast %252 : vector<1x32xf32> to vector<8x32xf32>
    %254 = arith.select %251, %253, %223 : vector<8x32xi1>, vector<8x32xf32>
    %255 = vector.extract_strided_slice %62 {offsets = [6, 0], sizes = [1, 512], strides = [1, 1]} : vector<8x512xf32> to vector<1x512xf32>
    %256 = vector.extract_strided_slice %243 {offsets = [0, 0], sizes = [1, 32], strides = [1, 1]} : vector<1x128xf32> to vector<1x32xf32>
    %cst_42 = arith.constant dense<0.000000e+00> : vector<1x512xf32>
    %257 = tpu.matmul %256, %64, %cst_42 {dimension_numbers = #tpu.dot_dimension_numbers<[1], [0], [0], [1], [0, 0, 1, 1], [], []>} : vector<1x32xf32>, vector<32x512xf32>, vector<1x512xf32> -> vector<1x512xf32>
    %258 = arith.addf %255, %257 : vector<1x512xf32>
    %259 = vector.extract_strided_slice %258 {offsets = [0, 0], sizes = [1, 384], strides = [1, 1]} : vector<1x512xf32> to vector<1x384xf32>
    %260 = arith.negf %259 : vector<1x384xf32>
    %261 = math.exp %260 : vector<1x384xf32>
    %cst_43 = arith.constant 1.000000e+00 : f32
    %262 = vector.broadcast %cst_43 : f32 to vector<1x384xf32>
    %263 = arith.addf %262, %261 : vector<1x384xf32>
    %264 = arith.divf %262, %263 : vector<1x384xf32>
    %265 = vector.extract_strided_slice %264 {offsets = [0, 0], sizes = [1, 128], strides = [1, 1]} : vector<1x384xf32> to vector<1x128xf32>
    %266 = vector.extract_strided_slice %264 {offsets = [0, 128], sizes = [1, 128], strides = [1, 1]} : vector<1x384xf32> to vector<1x128xf32>
    %267 = vector.extract_strided_slice %264 {offsets = [0, 256], sizes = [1, 128], strides = [1, 1]} : vector<1x384xf32> to vector<1x128xf32>
    %268 = vector.extract_strided_slice %258 {offsets = [0, 384], sizes = [1, 128], strides = [1, 1]} : vector<1x512xf32> to vector<1x128xf32>
    %269 = math.tanh %268 : vector<1x128xf32>
    %270 = arith.mulf %266, %241 : vector<1x128xf32>
    %271 = arith.mulf %265, %269 : vector<1x128xf32>
    %272 = arith.addf %270, %271 : vector<1x128xf32>
    %273 = math.tanh %272 : vector<1x128xf32>
    %274 = arith.mulf %267, %273 : vector<1x128xf32>
    %275 = vector.extract_strided_slice %274 {offsets = [0, 0], sizes = [1, 32], strides = [1, 1]} : vector<1x128xf32> to vector<1x32xf32>
    %c6_i32_44 = arith.constant 6 : i32
    %276 = vector.broadcast %c6_i32_44 : i32 to vector<8x32xi32>
    %277 = arith.cmpi eq, %0, %276 : vector<8x32xi32>
    %278 = vector.shape_cast %275 : vector<1x32xf32> to vector<1x32xf32>
    %279 = vector.broadcast %278 : vector<1x32xf32> to vector<8x32xf32>
    %280 = arith.select %277, %279, %249 : vector<8x32xi1>, vector<8x32xf32>
    %c1_i32_45 = arith.constant 1 : i32
    %281 = vector.broadcast %c1_i32_45 : i32 to vector<8x32xi32>
    %282 = arith.cmpi eq, %0, %281 : vector<8x32xi32>
    %283 = vector.shape_cast %275 : vector<1x32xf32> to vector<1x32xf32>
    %284 = vector.broadcast %283 : vector<1x32xf32> to vector<8x32xf32>
    %285 = arith.select %282, %284, %254 : vector<8x32xi1>, vector<8x32xf32>
    %286 = vector.extract_strided_slice %62 {offsets = [7, 0], sizes = [1, 512], strides = [1, 1]} : vector<8x512xf32> to vector<1x512xf32>
    %287 = vector.extract_strided_slice %274 {offsets = [0, 0], sizes = [1, 32], strides = [1, 1]} : vector<1x128xf32> to vector<1x32xf32>
    %cst_46 = arith.constant dense<0.000000e+00> : vector<1x512xf32>
    %288 = tpu.matmul %287, %64, %cst_46 {dimension_numbers = #tpu.dot_dimension_numbers<[1], [0], [0], [1], [0, 0, 1, 1], [], []>} : vector<1x32xf32>, vector<32x512xf32>, vector<1x512xf32> -> vector<1x512xf32>
    %289 = arith.addf %286, %288 : vector<1x512xf32>
    %290 = vector.extract_strided_slice %289 {offsets = [0, 0], sizes = [1, 384], strides = [1, 1]} : vector<1x512xf32> to vector<1x384xf32>
    %291 = arith.negf %290 : vector<1x384xf32>
    %292 = math.exp %291 : vector<1x384xf32>
    %cst_47 = arith.constant 1.000000e+00 : f32
    %293 = vector.broadcast %cst_47 : f32 to vector<1x384xf32>
    %294 = arith.addf %293, %292 : vector<1x384xf32>
    %295 = arith.divf %293, %294 : vector<1x384xf32>
    %296 = vector.extract_strided_slice %295 {offsets = [0, 0], sizes = [1, 128], strides = [1, 1]} : vector<1x384xf32> to vector<1x128xf32>
    %297 = vector.extract_strided_slice %295 {offsets = [0, 128], sizes = [1, 128], strides = [1, 1]} : vector<1x384xf32> to vector<1x128xf32>
    %298 = vector.extract_strided_slice %295 {offsets = [0, 256], sizes = [1, 128], strides = [1, 1]} : vector<1x384xf32> to vector<1x128xf32>
    %299 = vector.extract_strided_slice %289 {offsets = [0, 384], sizes = [1, 128], strides = [1, 1]} : vector<1x512xf32> to vector<1x128xf32>
    %300 = math.tanh %299 : vector<1x128xf32>
    %301 = arith.mulf %297, %272 : vector<1x128xf32>
    %302 = arith.mulf %296, %300 : vector<1x128xf32>
    %303 = arith.addf %301, %302 : vector<1x128xf32>
    %304 = math.tanh %303 : vector<1x128xf32>
    %305 = arith.mulf %298, %304 : vector<1x128xf32>
    %306 = vector.extract_strided_slice %305 {offsets = [0, 0], sizes = [1, 32], strides = [1, 1]} : vector<1x128xf32> to vector<1x32xf32>
    %c7_i32_48 = arith.constant 7 : i32
    %307 = vector.broadcast %c7_i32_48 : i32 to vector<8x32xi32>
    %308 = arith.cmpi eq, %0, %307 : vector<8x32xi32>
    %309 = vector.shape_cast %306 : vector<1x32xf32> to vector<1x32xf32>
    %310 = vector.broadcast %309 : vector<1x32xf32> to vector<8x32xf32>
    %311 = arith.select %308, %310, %280 : vector<8x32xi1>, vector<8x32xf32>
    %c0_i32_49 = arith.constant 0 : i32
    %312 = vector.broadcast %c0_i32_49 : i32 to vector<8x32xi32>
    %313 = arith.cmpi eq, %0, %312 : vector<8x32xi32>
    %314 = vector.shape_cast %306 : vector<1x32xf32> to vector<1x32xf32>
    %315 = vector.broadcast %314 : vector<1x32xf32> to vector<8x32xf32>
    %316 = arith.select %313, %315, %285 : vector<8x32xi1>, vector<8x32xf32>
    %c0_50 = arith.constant 0 : index
    %c0_51 = arith.constant 0 : index
    %c0_52 = arith.constant 0 : index
    %317 = vector.load %arg2[%c0_50, %c0_51, %c0_52] : memref<8x32x512xf32, #tpu.memory_space<vmem>>, vector<1x32x512xf32>
    %318 = vector.shape_cast %317 : vector<1x32x512xf32> to vector<32x512xf32>
    %cst_53 = arith.constant dense<0.000000e+00> : vector<8x512xf32>
    %319 = tpu.matmul %311, %318, %cst_53 {dimension_numbers = #tpu.dot_dimension_numbers<[1], [0], [0], [1], [0, 0, 1, 1], [], []>} : vector<8x32xf32>, vector<32x512xf32>, vector<8x512xf32> -> vector<8x512xf32>
    %c1_54 = arith.constant 1 : index
    %c0_55 = arith.constant 0 : index
    %c0_56 = arith.constant 0 : index
    %320 = vector.load %arg2[%c1_54, %c0_55, %c0_56] : memref<8x32x512xf32, #tpu.memory_space<vmem>>, vector<1x32x512xf32>
    %321 = vector.shape_cast %320 : vector<1x32x512xf32> to vector<32x512xf32>
    %cst_57 = arith.constant dense<0.000000e+00> : vector<8x512xf32>
    %322 = tpu.matmul %316, %321, %cst_57 {dimension_numbers = #tpu.dot_dimension_numbers<[1], [0], [0], [1], [0, 0, 1, 1], [], []>} : vector<8x32xf32>, vector<32x512xf32>, vector<8x512xf32> -> vector<8x512xf32>
    %323 = arith.addf %319, %322 : vector<8x512xf32>
    %c1_58 = arith.constant 1 : index
    %c0_59 = arith.constant 0 : index
    %c0_60 = arith.constant 0 : index
    %324 = vector.load %arg4[%c1_58, %c0_59, %c0_60] : memref<5x1x512xf32, #tpu.memory_space<vmem>>, vector<1x1x512xf32>
    %325 = vector.shape_cast %324 : vector<1x1x512xf32> to vector<1x512xf32>
    %326 = vector.broadcast %325 : vector<1x512xf32> to vector<8x512xf32>
    %327 = arith.addf %323, %326 : vector<8x512xf32>
    %c1_61 = arith.constant 1 : index
    %c0_62 = arith.constant 0 : index
    %c0_63 = arith.constant 0 : index
    %328 = vector.load %arg3[%c1_61, %c0_62, %c0_63] : memref<5x32x512xf32, #tpu.memory_space<vmem>>, vector<1x32x512xf32>
    %329 = vector.shape_cast %328 : vector<1x32x512xf32> to vector<32x512xf32>
    %cst_64 = arith.constant 0.000000e+00 : f32
    %330 = vector.broadcast %cst_64 : f32 to vector<1x128xf32>
    %cst_65 = arith.constant 0.000000e+00 : f32
    %331 = vector.broadcast %cst_65 : f32 to vector<1x128xf32>
    %cst_66 = arith.constant 0.000000e+00 : f32
    %332 = vector.broadcast %cst_66 : f32 to vector<8x32xf32>
    %cst_67 = arith.constant 0.000000e+00 : f32
    %333 = vector.broadcast %cst_67 : f32 to vector<8x32xf32>
    %334 = vector.extract_strided_slice %327 {offsets = [0, 0], sizes = [1, 512], strides = [1, 1]} : vector<8x512xf32> to vector<1x512xf32>
    %335 = vector.extract_strided_slice %330 {offsets = [0, 0], sizes = [1, 32], strides = [1, 1]} : vector<1x128xf32> to vector<1x32xf32>
    %cst_68 = arith.constant dense<0.000000e+00> : vector<1x512xf32>
    %336 = tpu.matmul %335, %329, %cst_68 {dimension_numbers = #tpu.dot_dimension_numbers<[1], [0], [0], [1], [0, 0, 1, 1], [], []>} : vector<1x32xf32>, vector<32x512xf32>, vector<1x512xf32> -> vector<1x512xf32>
    %337 = arith.addf %334, %336 : vector<1x512xf32>
    %338 = vector.extract_strided_slice %337 {offsets = [0, 0], sizes = [1, 384], strides = [1, 1]} : vector<1x512xf32> to vector<1x384xf32>
    %339 = arith.negf %338 : vector<1x384xf32>
    %340 = math.exp %339 : vector<1x384xf32>
    %cst_69 = arith.constant 1.000000e+00 : f32
    %341 = vector.broadcast %cst_69 : f32 to vector<1x384xf32>
    %342 = arith.addf %341, %340 : vector<1x384xf32>
    %343 = arith.divf %341, %342 : vector<1x384xf32>
    %344 = vector.extract_strided_slice %343 {offsets = [0, 0], sizes = [1, 128], strides = [1, 1]} : vector<1x384xf32> to vector<1x128xf32>
    %345 = vector.extract_strided_slice %343 {offsets = [0, 128], sizes = [1, 128], strides = [1, 1]} : vector<1x384xf32> to vector<1x128xf32>
    %346 = vector.extract_strided_slice %343 {offsets = [0, 256], sizes = [1, 128], strides = [1, 1]} : vector<1x384xf32> to vector<1x128xf32>
    %347 = vector.extract_strided_slice %337 {offsets = [0, 384], sizes = [1, 128], strides = [1, 1]} : vector<1x512xf32> to vector<1x128xf32>
    %348 = math.tanh %347 : vector<1x128xf32>
    %349 = arith.mulf %345, %331 : vector<1x128xf32>
    %350 = arith.mulf %344, %348 : vector<1x128xf32>
    %351 = arith.addf %349, %350 : vector<1x128xf32>
    %352 = math.tanh %351 : vector<1x128xf32>
    %353 = arith.mulf %346, %352 : vector<1x128xf32>
    %354 = vector.extract_strided_slice %353 {offsets = [0, 0], sizes = [1, 32], strides = [1, 1]} : vector<1x128xf32> to vector<1x32xf32>
    %c0_i32_70 = arith.constant 0 : i32
    %355 = vector.broadcast %c0_i32_70 : i32 to vector<8x32xi32>
    %356 = arith.cmpi eq, %0, %355 : vector<8x32xi32>
    %357 = vector.shape_cast %354 : vector<1x32xf32> to vector<1x32xf32>
    %358 = vector.broadcast %357 : vector<1x32xf32> to vector<8x32xf32>
    %359 = arith.select %356, %358, %332 : vector<8x32xi1>, vector<8x32xf32>
    %c7_i32_71 = arith.constant 7 : i32
    %360 = vector.broadcast %c7_i32_71 : i32 to vector<8x32xi32>
    %361 = arith.cmpi eq, %0, %360 : vector<8x32xi32>
    %362 = vector.shape_cast %354 : vector<1x32xf32> to vector<1x32xf32>
    %363 = vector.broadcast %362 : vector<1x32xf32> to vector<8x32xf32>
    %364 = arith.select %361, %363, %333 : vector<8x32xi1>, vector<8x32xf32>
    %365 = vector.extract_strided_slice %327 {offsets = [1, 0], sizes = [1, 512], strides = [1, 1]} : vector<8x512xf32> to vector<1x512xf32>
    %366 = vector.extract_strided_slice %353 {offsets = [0, 0], sizes = [1, 32], strides = [1, 1]} : vector<1x128xf32> to vector<1x32xf32>
    %cst_72 = arith.constant dense<0.000000e+00> : vector<1x512xf32>
    %367 = tpu.matmul %366, %329, %cst_72 {dimension_numbers = #tpu.dot_dimension_numbers<[1], [0], [0], [1], [0, 0, 1, 1], [], []>} : vector<1x32xf32>, vector<32x512xf32>, vector<1x512xf32> -> vector<1x512xf32>
    %368 = arith.addf %365, %367 : vector<1x512xf32>
    %369 = vector.extract_strided_slice %368 {offsets = [0, 0], sizes = [1, 384], strides = [1, 1]} : vector<1x512xf32> to vector<1x384xf32>
    %370 = arith.negf %369 : vector<1x384xf32>
    %371 = math.exp %370 : vector<1x384xf32>
    %cst_73 = arith.constant 1.000000e+00 : f32
    %372 = vector.broadcast %cst_73 : f32 to vector<1x384xf32>
    %373 = arith.addf %372, %371 : vector<1x384xf32>
    %374 = arith.divf %372, %373 : vector<1x384xf32>
    %375 = vector.extract_strided_slice %374 {offsets = [0, 0], sizes = [1, 128], strides = [1, 1]} : vector<1x384xf32> to vector<1x128xf32>
    %376 = vector.extract_strided_slice %374 {offsets = [0, 128], sizes = [1, 128], strides = [1, 1]} : vector<1x384xf32> to vector<1x128xf32>
    %377 = vector.extract_strided_slice %374 {offsets = [0, 256], sizes = [1, 128], strides = [1, 1]} : vector<1x384xf32> to vector<1x128xf32>
    %378 = vector.extract_strided_slice %368 {offsets = [0, 384], sizes = [1, 128], strides = [1, 1]} : vector<1x512xf32> to vector<1x128xf32>
    %379 = math.tanh %378 : vector<1x128xf32>
    %380 = arith.mulf %376, %351 : vector<1x128xf32>
    %381 = arith.mulf %375, %379 : vector<1x128xf32>
    %382 = arith.addf %380, %381 : vector<1x128xf32>
    %383 = math.tanh %382 : vector<1x128xf32>
    %384 = arith.mulf %377, %383 : vector<1x128xf32>
    %385 = vector.extract_strided_slice %384 {offsets = [0, 0], sizes = [1, 32], strides = [1, 1]} : vector<1x128xf32> to vector<1x32xf32>
    %c1_i32_74 = arith.constant 1 : i32
    %386 = vector.broadcast %c1_i32_74 : i32 to vector<8x32xi32>
    %387 = arith.cmpi eq, %0, %386 : vector<8x32xi32>
    %388 = vector.shape_cast %385 : vector<1x32xf32> to vector<1x32xf32>
    %389 = vector.broadcast %388 : vector<1x32xf32> to vector<8x32xf32>
    %390 = arith.select %387, %389, %359 : vector<8x32xi1>, vector<8x32xf32>
    %c6_i32_75 = arith.constant 6 : i32
    %391 = vector.broadcast %c6_i32_75 : i32 to vector<8x32xi32>
    %392 = arith.cmpi eq, %0, %391 : vector<8x32xi32>
    %393 = vector.shape_cast %385 : vector<1x32xf32> to vector<1x32xf32>
    %394 = vector.broadcast %393 : vector<1x32xf32> to vector<8x32xf32>
    %395 = arith.select %392, %394, %364 : vector<8x32xi1>, vector<8x32xf32>
    %396 = vector.extract_strided_slice %327 {offsets = [2, 0], sizes = [1, 512], strides = [1, 1]} : vector<8x512xf32> to vector<1x512xf32>
    %397 = vector.extract_strided_slice %384 {offsets = [0, 0], sizes = [1, 32], strides = [1, 1]} : vector<1x128xf32> to vector<1x32xf32>
    %cst_76 = arith.constant dense<0.000000e+00> : vector<1x512xf32>
    %398 = tpu.matmul %397, %329, %cst_76 {dimension_numbers = #tpu.dot_dimension_numbers<[1], [0], [0], [1], [0, 0, 1, 1], [], []>} : vector<1x32xf32>, vector<32x512xf32>, vector<1x512xf32> -> vector<1x512xf32>
    %399 = arith.addf %396, %398 : vector<1x512xf32>
    %400 = vector.extract_strided_slice %399 {offsets = [0, 0], sizes = [1, 384], strides = [1, 1]} : vector<1x512xf32> to vector<1x384xf32>
    %401 = arith.negf %400 : vector<1x384xf32>
    %402 = math.exp %401 : vector<1x384xf32>
    %cst_77 = arith.constant 1.000000e+00 : f32
    %403 = vector.broadcast %cst_77 : f32 to vector<1x384xf32>
    %404 = arith.addf %403, %402 : vector<1x384xf32>
    %405 = arith.divf %403, %404 : vector<1x384xf32>
    %406 = vector.extract_strided_slice %405 {offsets = [0, 0], sizes = [1, 128], strides = [1, 1]} : vector<1x384xf32> to vector<1x128xf32>
    %407 = vector.extract_strided_slice %405 {offsets = [0, 128], sizes = [1, 128], strides = [1, 1]} : vector<1x384xf32> to vector<1x128xf32>
    %408 = vector.extract_strided_slice %405 {offsets = [0, 256], sizes = [1, 128], strides = [1, 1]} : vector<1x384xf32> to vector<1x128xf32>
    %409 = vector.extract_strided_slice %399 {offsets = [0, 384], sizes = [1, 128], strides = [1, 1]} : vector<1x512xf32> to vector<1x128xf32>
    %410 = math.tanh %409 : vector<1x128xf32>
    %411 = arith.mulf %407, %382 : vector<1x128xf32>
    %412 = arith.mulf %406, %410 : vector<1x128xf32>
    %413 = arith.addf %411, %412 : vector<1x128xf32>
    %414 = math.tanh %413 : vector<1x128xf32>
    %415 = arith.mulf %408, %414 : vector<1x128xf32>
    %416 = vector.extract_strided_slice %415 {offsets = [0, 0], sizes = [1, 32], strides = [1, 1]} : vector<1x128xf32> to vector<1x32xf32>
    %c2_i32_78 = arith.constant 2 : i32
    %417 = vector.broadcast %c2_i32_78 : i32 to vector<8x32xi32>
    %418 = arith.cmpi eq, %0, %417 : vector<8x32xi32>
    %419 = vector.shape_cast %416 : vector<1x32xf32> to vector<1x32xf32>
    %420 = vector.broadcast %419 : vector<1x32xf32> to vector<8x32xf32>
    %421 = arith.select %418, %420, %390 : vector<8x32xi1>, vector<8x32xf32>
    %c5_i32_79 = arith.constant 5 : i32
    %422 = vector.broadcast %c5_i32_79 : i32 to vector<8x32xi32>
    %423 = arith.cmpi eq, %0, %422 : vector<8x32xi32>
    %424 = vector.shape_cast %416 : vector<1x32xf32> to vector<1x32xf32>
    %425 = vector.broadcast %424 : vector<1x32xf32> to vector<8x32xf32>
    %426 = arith.select %423, %425, %395 : vector<8x32xi1>, vector<8x32xf32>
    %427 = vector.extract_strided_slice %327 {offsets = [3, 0], sizes = [1, 512], strides = [1, 1]} : vector<8x512xf32> to vector<1x512xf32>
    %428 = vector.extract_strided_slice %415 {offsets = [0, 0], sizes = [1, 32], strides = [1, 1]} : vector<1x128xf32> to vector<1x32xf32>
    %cst_80 = arith.constant dense<0.000000e+00> : vector<1x512xf32>
    %429 = tpu.matmul %428, %329, %cst_80 {dimension_numbers = #tpu.dot_dimension_numbers<[1], [0], [0], [1], [0, 0, 1, 1], [], []>} : vector<1x32xf32>, vector<32x512xf32>, vector<1x512xf32> -> vector<1x512xf32>
    %430 = arith.addf %427, %429 : vector<1x512xf32>
    %431 = vector.extract_strided_slice %430 {offsets = [0, 0], sizes = [1, 384], strides = [1, 1]} : vector<1x512xf32> to vector<1x384xf32>
    %432 = arith.negf %431 : vector<1x384xf32>
    %433 = math.exp %432 : vector<1x384xf32>
    %cst_81 = arith.constant 1.000000e+00 : f32
    %434 = vector.broadcast %cst_81 : f32 to vector<1x384xf32>
    %435 = arith.addf %434, %433 : vector<1x384xf32>
    %436 = arith.divf %434, %435 : vector<1x384xf32>
    %437 = vector.extract_strided_slice %436 {offsets = [0, 0], sizes = [1, 128], strides = [1, 1]} : vector<1x384xf32> to vector<1x128xf32>
    %438 = vector.extract_strided_slice %436 {offsets = [0, 128], sizes = [1, 128], strides = [1, 1]} : vector<1x384xf32> to vector<1x128xf32>
    %439 = vector.extract_strided_slice %436 {offsets = [0, 256], sizes = [1, 128], strides = [1, 1]} : vector<1x384xf32> to vector<1x128xf32>
    %440 = vector.extract_strided_slice %430 {offsets = [0, 384], sizes = [1, 128], strides = [1, 1]} : vector<1x512xf32> to vector<1x128xf32>
    %441 = math.tanh %440 : vector<1x128xf32>
    %442 = arith.mulf %438, %413 : vector<1x128xf32>
    %443 = arith.mulf %437, %441 : vector<1x128xf32>
    %444 = arith.addf %442, %443 : vector<1x128xf32>
    %445 = math.tanh %444 : vector<1x128xf32>
    %446 = arith.mulf %439, %445 : vector<1x128xf32>
    %447 = vector.extract_strided_slice %446 {offsets = [0, 0], sizes = [1, 32], strides = [1, 1]} : vector<1x128xf32> to vector<1x32xf32>
    %c3_i32_82 = arith.constant 3 : i32
    %448 = vector.broadcast %c3_i32_82 : i32 to vector<8x32xi32>
    %449 = arith.cmpi eq, %0, %448 : vector<8x32xi32>
    %450 = vector.shape_cast %447 : vector<1x32xf32> to vector<1x32xf32>
    %451 = vector.broadcast %450 : vector<1x32xf32> to vector<8x32xf32>
    %452 = arith.select %449, %451, %421 : vector<8x32xi1>, vector<8x32xf32>
    %c4_i32_83 = arith.constant 4 : i32
    %453 = vector.broadcast %c4_i32_83 : i32 to vector<8x32xi32>
    %454 = arith.cmpi eq, %0, %453 : vector<8x32xi32>
    %455 = vector.shape_cast %447 : vector<1x32xf32> to vector<1x32xf32>
    %456 = vector.broadcast %455 : vector<1x32xf32> to vector<8x32xf32>
    %457 = arith.select %454, %456, %426 : vector<8x32xi1>, vector<8x32xf32>
    %458 = vector.extract_strided_slice %327 {offsets = [4, 0], sizes = [1, 512], strides = [1, 1]} : vector<8x512xf32> to vector<1x512xf32>
    %459 = vector.extract_strided_slice %446 {offsets = [0, 0], sizes = [1, 32], strides = [1, 1]} : vector<1x128xf32> to vector<1x32xf32>
    %cst_84 = arith.constant dense<0.000000e+00> : vector<1x512xf32>
    %460 = tpu.matmul %459, %329, %cst_84 {dimension_numbers = #tpu.dot_dimension_numbers<[1], [0], [0], [1], [0, 0, 1, 1], [], []>} : vector<1x32xf32>, vector<32x512xf32>, vector<1x512xf32> -> vector<1x512xf32>
    %461 = arith.addf %458, %460 : vector<1x512xf32>
    %462 = vector.extract_strided_slice %461 {offsets = [0, 0], sizes = [1, 384], strides = [1, 1]} : vector<1x512xf32> to vector<1x384xf32>
    %463 = arith.negf %462 : vector<1x384xf32>
    %464 = math.exp %463 : vector<1x384xf32>
    %cst_85 = arith.constant 1.000000e+00 : f32
    %465 = vector.broadcast %cst_85 : f32 to vector<1x384xf32>
    %466 = arith.addf %465, %464 : vector<1x384xf32>
    %467 = arith.divf %465, %466 : vector<1x384xf32>
    %468 = vector.extract_strided_slice %467 {offsets = [0, 0], sizes = [1, 128], strides = [1, 1]} : vector<1x384xf32> to vector<1x128xf32>
    %469 = vector.extract_strided_slice %467 {offsets = [0, 128], sizes = [1, 128], strides = [1, 1]} : vector<1x384xf32> to vector<1x128xf32>
    %470 = vector.extract_strided_slice %467 {offsets = [0, 256], sizes = [1, 128], strides = [1, 1]} : vector<1x384xf32> to vector<1x128xf32>
    %471 = vector.extract_strided_slice %461 {offsets = [0, 384], sizes = [1, 128], strides = [1, 1]} : vector<1x512xf32> to vector<1x128xf32>
    %472 = math.tanh %471 : vector<1x128xf32>
    %473 = arith.mulf %469, %444 : vector<1x128xf32>
    %474 = arith.mulf %468, %472 : vector<1x128xf32>
    %475 = arith.addf %473, %474 : vector<1x128xf32>
    %476 = math.tanh %475 : vector<1x128xf32>
    %477 = arith.mulf %470, %476 : vector<1x128xf32>
    %478 = vector.extract_strided_slice %477 {offsets = [0, 0], sizes = [1, 32], strides = [1, 1]} : vector<1x128xf32> to vector<1x32xf32>
    %c4_i32_86 = arith.constant 4 : i32
    %479 = vector.broadcast %c4_i32_86 : i32 to vector<8x32xi32>
    %480 = arith.cmpi eq, %0, %479 : vector<8x32xi32>
    %481 = vector.shape_cast %478 : vector<1x32xf32> to vector<1x32xf32>
    %482 = vector.broadcast %481 : vector<1x32xf32> to vector<8x32xf32>
    %483 = arith.select %480, %482, %452 : vector<8x32xi1>, vector<8x32xf32>
    %c3_i32_87 = arith.constant 3 : i32
    %484 = vector.broadcast %c3_i32_87 : i32 to vector<8x32xi32>
    %485 = arith.cmpi eq, %0, %484 : vector<8x32xi32>
    %486 = vector.shape_cast %478 : vector<1x32xf32> to vector<1x32xf32>
    %487 = vector.broadcast %486 : vector<1x32xf32> to vector<8x32xf32>
    %488 = arith.select %485, %487, %457 : vector<8x32xi1>, vector<8x32xf32>
    %489 = vector.extract_strided_slice %327 {offsets = [5, 0], sizes = [1, 512], strides = [1, 1]} : vector<8x512xf32> to vector<1x512xf32>
    %490 = vector.extract_strided_slice %477 {offsets = [0, 0], sizes = [1, 32], strides = [1, 1]} : vector<1x128xf32> to vector<1x32xf32>
    %cst_88 = arith.constant dense<0.000000e+00> : vector<1x512xf32>
    %491 = tpu.matmul %490, %329, %cst_88 {dimension_numbers = #tpu.dot_dimension_numbers<[1], [0], [0], [1], [0, 0, 1, 1], [], []>} : vector<1x32xf32>, vector<32x512xf32>, vector<1x512xf32> -> vector<1x512xf32>
    %492 = arith.addf %489, %491 : vector<1x512xf32>
    %493 = vector.extract_strided_slice %492 {offsets = [0, 0], sizes = [1, 384], strides = [1, 1]} : vector<1x512xf32> to vector<1x384xf32>
    %494 = arith.negf %493 : vector<1x384xf32>
    %495 = math.exp %494 : vector<1x384xf32>
    %cst_89 = arith.constant 1.000000e+00 : f32
    %496 = vector.broadcast %cst_89 : f32 to vector<1x384xf32>
    %497 = arith.addf %496, %495 : vector<1x384xf32>
    %498 = arith.divf %496, %497 : vector<1x384xf32>
    %499 = vector.extract_strided_slice %498 {offsets = [0, 0], sizes = [1, 128], strides = [1, 1]} : vector<1x384xf32> to vector<1x128xf32>
    %500 = vector.extract_strided_slice %498 {offsets = [0, 128], sizes = [1, 128], strides = [1, 1]} : vector<1x384xf32> to vector<1x128xf32>
    %501 = vector.extract_strided_slice %498 {offsets = [0, 256], sizes = [1, 128], strides = [1, 1]} : vector<1x384xf32> to vector<1x128xf32>
    %502 = vector.extract_strided_slice %492 {offsets = [0, 384], sizes = [1, 128], strides = [1, 1]} : vector<1x512xf32> to vector<1x128xf32>
    %503 = math.tanh %502 : vector<1x128xf32>
    %504 = arith.mulf %500, %475 : vector<1x128xf32>
    %505 = arith.mulf %499, %503 : vector<1x128xf32>
    %506 = arith.addf %504, %505 : vector<1x128xf32>
    %507 = math.tanh %506 : vector<1x128xf32>
    %508 = arith.mulf %501, %507 : vector<1x128xf32>
    %509 = vector.extract_strided_slice %508 {offsets = [0, 0], sizes = [1, 32], strides = [1, 1]} : vector<1x128xf32> to vector<1x32xf32>
    %c5_i32_90 = arith.constant 5 : i32
    %510 = vector.broadcast %c5_i32_90 : i32 to vector<8x32xi32>
    %511 = arith.cmpi eq, %0, %510 : vector<8x32xi32>
    %512 = vector.shape_cast %509 : vector<1x32xf32> to vector<1x32xf32>
    %513 = vector.broadcast %512 : vector<1x32xf32> to vector<8x32xf32>
    %514 = arith.select %511, %513, %483 : vector<8x32xi1>, vector<8x32xf32>
    %c2_i32_91 = arith.constant 2 : i32
    %515 = vector.broadcast %c2_i32_91 : i32 to vector<8x32xi32>
    %516 = arith.cmpi eq, %0, %515 : vector<8x32xi32>
    %517 = vector.shape_cast %509 : vector<1x32xf32> to vector<1x32xf32>
    %518 = vector.broadcast %517 : vector<1x32xf32> to vector<8x32xf32>
    %519 = arith.select %516, %518, %488 : vector<8x32xi1>, vector<8x32xf32>
    %520 = vector.extract_strided_slice %327 {offsets = [6, 0], sizes = [1, 512], strides = [1, 1]} : vector<8x512xf32> to vector<1x512xf32>
    %521 = vector.extract_strided_slice %508 {offsets = [0, 0], sizes = [1, 32], strides = [1, 1]} : vector<1x128xf32> to vector<1x32xf32>
    %cst_92 = arith.constant dense<0.000000e+00> : vector<1x512xf32>
    %522 = tpu.matmul %521, %329, %cst_92 {dimension_numbers = #tpu.dot_dimension_numbers<[1], [0], [0], [1], [0, 0, 1, 1], [], []>} : vector<1x32xf32>, vector<32x512xf32>, vector<1x512xf32> -> vector<1x512xf32>
    %523 = arith.addf %520, %522 : vector<1x512xf32>
    %524 = vector.extract_strided_slice %523 {offsets = [0, 0], sizes = [1, 384], strides = [1, 1]} : vector<1x512xf32> to vector<1x384xf32>
    %525 = arith.negf %524 : vector<1x384xf32>
    %526 = math.exp %525 : vector<1x384xf32>
    %cst_93 = arith.constant 1.000000e+00 : f32
    %527 = vector.broadcast %cst_93 : f32 to vector<1x384xf32>
    %528 = arith.addf %527, %526 : vector<1x384xf32>
    %529 = arith.divf %527, %528 : vector<1x384xf32>
    %530 = vector.extract_strided_slice %529 {offsets = [0, 0], sizes = [1, 128], strides = [1, 1]} : vector<1x384xf32> to vector<1x128xf32>
    %531 = vector.extract_strided_slice %529 {offsets = [0, 128], sizes = [1, 128], strides = [1, 1]} : vector<1x384xf32> to vector<1x128xf32>
    %532 = vector.extract_strided_slice %529 {offsets = [0, 256], sizes = [1, 128], strides = [1, 1]} : vector<1x384xf32> to vector<1x128xf32>
    %533 = vector.extract_strided_slice %523 {offsets = [0, 384], sizes = [1, 128], strides = [1, 1]} : vector<1x512xf32> to vector<1x128xf32>
    %534 = math.tanh %533 : vector<1x128xf32>
    %535 = arith.mulf %531, %506 : vector<1x128xf32>
    %536 = arith.mulf %530, %534 : vector<1x128xf32>
    %537 = arith.addf %535, %536 : vector<1x128xf32>
    %538 = math.tanh %537 : vector<1x128xf32>
    %539 = arith.mulf %532, %538 : vector<1x128xf32>
    %540 = vector.extract_strided_slice %539 {offsets = [0, 0], sizes = [1, 32], strides = [1, 1]} : vector<1x128xf32> to vector<1x32xf32>
    %c6_i32_94 = arith.constant 6 : i32
    %541 = vector.broadcast %c6_i32_94 : i32 to vector<8x32xi32>
    %542 = arith.cmpi eq, %0, %541 : vector<8x32xi32>
    %543 = vector.shape_cast %540 : vector<1x32xf32> to vector<1x32xf32>
    %544 = vector.broadcast %543 : vector<1x32xf32> to vector<8x32xf32>
    %545 = arith.select %542, %544, %514 : vector<8x32xi1>, vector<8x32xf32>
    %c1_i32_95 = arith.constant 1 : i32
    %546 = vector.broadcast %c1_i32_95 : i32 to vector<8x32xi32>
    %547 = arith.cmpi eq, %0, %546 : vector<8x32xi32>
    %548 = vector.shape_cast %540 : vector<1x32xf32> to vector<1x32xf32>
    %549 = vector.broadcast %548 : vector<1x32xf32> to vector<8x32xf32>
    %550 = arith.select %547, %549, %519 : vector<8x32xi1>, vector<8x32xf32>
    %551 = vector.extract_strided_slice %327 {offsets = [7, 0], sizes = [1, 512], strides = [1, 1]} : vector<8x512xf32> to vector<1x512xf32>
    %552 = vector.extract_strided_slice %539 {offsets = [0, 0], sizes = [1, 32], strides = [1, 1]} : vector<1x128xf32> to vector<1x32xf32>
    %cst_96 = arith.constant dense<0.000000e+00> : vector<1x512xf32>
    %553 = tpu.matmul %552, %329, %cst_96 {dimension_numbers = #tpu.dot_dimension_numbers<[1], [0], [0], [1], [0, 0, 1, 1], [], []>} : vector<1x32xf32>, vector<32x512xf32>, vector<1x512xf32> -> vector<1x512xf32>
    %554 = arith.addf %551, %553 : vector<1x512xf32>
    %555 = vector.extract_strided_slice %554 {offsets = [0, 0], sizes = [1, 384], strides = [1, 1]} : vector<1x512xf32> to vector<1x384xf32>
    %556 = arith.negf %555 : vector<1x384xf32>
    %557 = math.exp %556 : vector<1x384xf32>
    %cst_97 = arith.constant 1.000000e+00 : f32
    %558 = vector.broadcast %cst_97 : f32 to vector<1x384xf32>
    %559 = arith.addf %558, %557 : vector<1x384xf32>
    %560 = arith.divf %558, %559 : vector<1x384xf32>
    %561 = vector.extract_strided_slice %560 {offsets = [0, 0], sizes = [1, 128], strides = [1, 1]} : vector<1x384xf32> to vector<1x128xf32>
    %562 = vector.extract_strided_slice %560 {offsets = [0, 128], sizes = [1, 128], strides = [1, 1]} : vector<1x384xf32> to vector<1x128xf32>
    %563 = vector.extract_strided_slice %560 {offsets = [0, 256], sizes = [1, 128], strides = [1, 1]} : vector<1x384xf32> to vector<1x128xf32>
    %564 = vector.extract_strided_slice %554 {offsets = [0, 384], sizes = [1, 128], strides = [1, 1]} : vector<1x512xf32> to vector<1x128xf32>
    %565 = math.tanh %564 : vector<1x128xf32>
    %566 = arith.mulf %562, %537 : vector<1x128xf32>
    %567 = arith.mulf %561, %565 : vector<1x128xf32>
    %568 = arith.addf %566, %567 : vector<1x128xf32>
    %569 = math.tanh %568 : vector<1x128xf32>
    %570 = arith.mulf %563, %569 : vector<1x128xf32>
    %571 = vector.extract_strided_slice %570 {offsets = [0, 0], sizes = [1, 32], strides = [1, 1]} : vector<1x128xf32> to vector<1x32xf32>
    %c7_i32_98 = arith.constant 7 : i32
    %572 = vector.broadcast %c7_i32_98 : i32 to vector<8x32xi32>
    %573 = arith.cmpi eq, %0, %572 : vector<8x32xi32>
    %574 = vector.shape_cast %571 : vector<1x32xf32> to vector<1x32xf32>
    %575 = vector.broadcast %574 : vector<1x32xf32> to vector<8x32xf32>
    %576 = arith.select %573, %575, %545 : vector<8x32xi1>, vector<8x32xf32>
    %c0_i32_99 = arith.constant 0 : i32
    %577 = vector.broadcast %c0_i32_99 : i32 to vector<8x32xi32>
    %578 = arith.cmpi eq, %0, %577 : vector<8x32xi32>
    %579 = vector.shape_cast %571 : vector<1x32xf32> to vector<1x32xf32>
    %580 = vector.broadcast %579 : vector<1x32xf32> to vector<8x32xf32>
    %581 = arith.select %578, %580, %550 : vector<8x32xi1>, vector<8x32xf32>
    %c2 = arith.constant 2 : index
    %c0_100 = arith.constant 0 : index
    %c0_101 = arith.constant 0 : index
    %582 = vector.load %arg2[%c2, %c0_100, %c0_101] : memref<8x32x512xf32, #tpu.memory_space<vmem>>, vector<1x32x512xf32>
    %583 = vector.shape_cast %582 : vector<1x32x512xf32> to vector<32x512xf32>
    %cst_102 = arith.constant dense<0.000000e+00> : vector<8x512xf32>
    %584 = tpu.matmul %576, %583, %cst_102 {dimension_numbers = #tpu.dot_dimension_numbers<[1], [0], [0], [1], [0, 0, 1, 1], [], []>} : vector<8x32xf32>, vector<32x512xf32>, vector<8x512xf32> -> vector<8x512xf32>
    %c3 = arith.constant 3 : index
    %c0_103 = arith.constant 0 : index
    %c0_104 = arith.constant 0 : index
    %585 = vector.load %arg2[%c3, %c0_103, %c0_104] : memref<8x32x512xf32, #tpu.memory_space<vmem>>, vector<1x32x512xf32>
    %586 = vector.shape_cast %585 : vector<1x32x512xf32> to vector<32x512xf32>
    %cst_105 = arith.constant dense<0.000000e+00> : vector<8x512xf32>
    %587 = tpu.matmul %581, %586, %cst_105 {dimension_numbers = #tpu.dot_dimension_numbers<[1], [0], [0], [1], [0, 0, 1, 1], [], []>} : vector<8x32xf32>, vector<32x512xf32>, vector<8x512xf32> -> vector<8x512xf32>
    %588 = arith.addf %584, %587 : vector<8x512xf32>
    %c2_106 = arith.constant 2 : index
    %c0_107 = arith.constant 0 : index
    %c0_108 = arith.constant 0 : index
    %589 = vector.load %arg4[%c2_106, %c0_107, %c0_108] : memref<5x1x512xf32, #tpu.memory_space<vmem>>, vector<1x1x512xf32>
    %590 = vector.shape_cast %589 : vector<1x1x512xf32> to vector<1x512xf32>
    %591 = vector.broadcast %590 : vector<1x512xf32> to vector<8x512xf32>
    %592 = arith.addf %588, %591 : vector<8x512xf32>
    %c2_109 = arith.constant 2 : index
    %c0_110 = arith.constant 0 : index
    %c0_111 = arith.constant 0 : index
    %593 = vector.load %arg3[%c2_109, %c0_110, %c0_111] : memref<5x32x512xf32, #tpu.memory_space<vmem>>, vector<1x32x512xf32>
    %594 = vector.shape_cast %593 : vector<1x32x512xf32> to vector<32x512xf32>
    %cst_112 = arith.constant 0.000000e+00 : f32
    %595 = vector.broadcast %cst_112 : f32 to vector<1x128xf32>
    %cst_113 = arith.constant 0.000000e+00 : f32
    %596 = vector.broadcast %cst_113 : f32 to vector<1x128xf32>
    %cst_114 = arith.constant 0.000000e+00 : f32
    %597 = vector.broadcast %cst_114 : f32 to vector<8x32xf32>
    %cst_115 = arith.constant 0.000000e+00 : f32
    %598 = vector.broadcast %cst_115 : f32 to vector<8x32xf32>
    %599 = vector.extract_strided_slice %592 {offsets = [0, 0], sizes = [1, 512], strides = [1, 1]} : vector<8x512xf32> to vector<1x512xf32>
    %600 = vector.extract_strided_slice %595 {offsets = [0, 0], sizes = [1, 32], strides = [1, 1]} : vector<1x128xf32> to vector<1x32xf32>
    %cst_116 = arith.constant dense<0.000000e+00> : vector<1x512xf32>
    %601 = tpu.matmul %600, %594, %cst_116 {dimension_numbers = #tpu.dot_dimension_numbers<[1], [0], [0], [1], [0, 0, 1, 1], [], []>} : vector<1x32xf32>, vector<32x512xf32>, vector<1x512xf32> -> vector<1x512xf32>
    %602 = arith.addf %599, %601 : vector<1x512xf32>
    %603 = vector.extract_strided_slice %602 {offsets = [0, 0], sizes = [1, 384], strides = [1, 1]} : vector<1x512xf32> to vector<1x384xf32>
    %604 = arith.negf %603 : vector<1x384xf32>
    %605 = math.exp %604 : vector<1x384xf32>
    %cst_117 = arith.constant 1.000000e+00 : f32
    %606 = vector.broadcast %cst_117 : f32 to vector<1x384xf32>
    %607 = arith.addf %606, %605 : vector<1x384xf32>
    %608 = arith.divf %606, %607 : vector<1x384xf32>
    %609 = vector.extract_strided_slice %608 {offsets = [0, 0], sizes = [1, 128], strides = [1, 1]} : vector<1x384xf32> to vector<1x128xf32>
    %610 = vector.extract_strided_slice %608 {offsets = [0, 128], sizes = [1, 128], strides = [1, 1]} : vector<1x384xf32> to vector<1x128xf32>
    %611 = vector.extract_strided_slice %608 {offsets = [0, 256], sizes = [1, 128], strides = [1, 1]} : vector<1x384xf32> to vector<1x128xf32>
    %612 = vector.extract_strided_slice %602 {offsets = [0, 384], sizes = [1, 128], strides = [1, 1]} : vector<1x512xf32> to vector<1x128xf32>
    %613 = math.tanh %612 : vector<1x128xf32>
    %614 = arith.mulf %610, %596 : vector<1x128xf32>
    %615 = arith.mulf %609, %613 : vector<1x128xf32>
    %616 = arith.addf %614, %615 : vector<1x128xf32>
    %617 = math.tanh %616 : vector<1x128xf32>
    %618 = arith.mulf %611, %617 : vector<1x128xf32>
    %619 = vector.extract_strided_slice %618 {offsets = [0, 0], sizes = [1, 32], strides = [1, 1]} : vector<1x128xf32> to vector<1x32xf32>
    %c0_i32_118 = arith.constant 0 : i32
    %620 = vector.broadcast %c0_i32_118 : i32 to vector<8x32xi32>
    %621 = arith.cmpi eq, %0, %620 : vector<8x32xi32>
    %622 = vector.shape_cast %619 : vector<1x32xf32> to vector<1x32xf32>
    %623 = vector.broadcast %622 : vector<1x32xf32> to vector<8x32xf32>
    %624 = arith.select %621, %623, %597 : vector<8x32xi1>, vector<8x32xf32>
    %c7_i32_119 = arith.constant 7 : i32
    %625 = vector.broadcast %c7_i32_119 : i32 to vector<8x32xi32>
    %626 = arith.cmpi eq, %0, %625 : vector<8x32xi32>
    %627 = vector.shape_cast %619 : vector<1x32xf32> to vector<1x32xf32>
    %628 = vector.broadcast %627 : vector<1x32xf32> to vector<8x32xf32>
    %629 = arith.select %626, %628, %598 : vector<8x32xi1>, vector<8x32xf32>
    %630 = vector.extract_strided_slice %592 {offsets = [1, 0], sizes = [1, 512], strides = [1, 1]} : vector<8x512xf32> to vector<1x512xf32>
    %631 = vector.extract_strided_slice %618 {offsets = [0, 0], sizes = [1, 32], strides = [1, 1]} : vector<1x128xf32> to vector<1x32xf32>
    %cst_120 = arith.constant dense<0.000000e+00> : vector<1x512xf32>
    %632 = tpu.matmul %631, %594, %cst_120 {dimension_numbers = #tpu.dot_dimension_numbers<[1], [0], [0], [1], [0, 0, 1, 1], [], []>} : vector<1x32xf32>, vector<32x512xf32>, vector<1x512xf32> -> vector<1x512xf32>
    %633 = arith.addf %630, %632 : vector<1x512xf32>
    %634 = vector.extract_strided_slice %633 {offsets = [0, 0], sizes = [1, 384], strides = [1, 1]} : vector<1x512xf32> to vector<1x384xf32>
    %635 = arith.negf %634 : vector<1x384xf32>
    %636 = math.exp %635 : vector<1x384xf32>
    %cst_121 = arith.constant 1.000000e+00 : f32
    %637 = vector.broadcast %cst_121 : f32 to vector<1x384xf32>
    %638 = arith.addf %637, %636 : vector<1x384xf32>
    %639 = arith.divf %637, %638 : vector<1x384xf32>
    %640 = vector.extract_strided_slice %639 {offsets = [0, 0], sizes = [1, 128], strides = [1, 1]} : vector<1x384xf32> to vector<1x128xf32>
    %641 = vector.extract_strided_slice %639 {offsets = [0, 128], sizes = [1, 128], strides = [1, 1]} : vector<1x384xf32> to vector<1x128xf32>
    %642 = vector.extract_strided_slice %639 {offsets = [0, 256], sizes = [1, 128], strides = [1, 1]} : vector<1x384xf32> to vector<1x128xf32>
    %643 = vector.extract_strided_slice %633 {offsets = [0, 384], sizes = [1, 128], strides = [1, 1]} : vector<1x512xf32> to vector<1x128xf32>
    %644 = math.tanh %643 : vector<1x128xf32>
    %645 = arith.mulf %641, %616 : vector<1x128xf32>
    %646 = arith.mulf %640, %644 : vector<1x128xf32>
    %647 = arith.addf %645, %646 : vector<1x128xf32>
    %648 = math.tanh %647 : vector<1x128xf32>
    %649 = arith.mulf %642, %648 : vector<1x128xf32>
    %650 = vector.extract_strided_slice %649 {offsets = [0, 0], sizes = [1, 32], strides = [1, 1]} : vector<1x128xf32> to vector<1x32xf32>
    %c1_i32_122 = arith.constant 1 : i32
    %651 = vector.broadcast %c1_i32_122 : i32 to vector<8x32xi32>
    %652 = arith.cmpi eq, %0, %651 : vector<8x32xi32>
    %653 = vector.shape_cast %650 : vector<1x32xf32> to vector<1x32xf32>
    %654 = vector.broadcast %653 : vector<1x32xf32> to vector<8x32xf32>
    %655 = arith.select %652, %654, %624 : vector<8x32xi1>, vector<8x32xf32>
    %c6_i32_123 = arith.constant 6 : i32
    %656 = vector.broadcast %c6_i32_123 : i32 to vector<8x32xi32>
    %657 = arith.cmpi eq, %0, %656 : vector<8x32xi32>
    %658 = vector.shape_cast %650 : vector<1x32xf32> to vector<1x32xf32>
    %659 = vector.broadcast %658 : vector<1x32xf32> to vector<8x32xf32>
    %660 = arith.select %657, %659, %629 : vector<8x32xi1>, vector<8x32xf32>
    %661 = vector.extract_strided_slice %592 {offsets = [2, 0], sizes = [1, 512], strides = [1, 1]} : vector<8x512xf32> to vector<1x512xf32>
    %662 = vector.extract_strided_slice %649 {offsets = [0, 0], sizes = [1, 32], strides = [1, 1]} : vector<1x128xf32> to vector<1x32xf32>
    %cst_124 = arith.constant dense<0.000000e+00> : vector<1x512xf32>
    %663 = tpu.matmul %662, %594, %cst_124 {dimension_numbers = #tpu.dot_dimension_numbers<[1], [0], [0], [1], [0, 0, 1, 1], [], []>} : vector<1x32xf32>, vector<32x512xf32>, vector<1x512xf32> -> vector<1x512xf32>
    %664 = arith.addf %661, %663 : vector<1x512xf32>
    %665 = vector.extract_strided_slice %664 {offsets = [0, 0], sizes = [1, 384], strides = [1, 1]} : vector<1x512xf32> to vector<1x384xf32>
    %666 = arith.negf %665 : vector<1x384xf32>
    %667 = math.exp %666 : vector<1x384xf32>
    %cst_125 = arith.constant 1.000000e+00 : f32
    %668 = vector.broadcast %cst_125 : f32 to vector<1x384xf32>
    %669 = arith.addf %668, %667 : vector<1x384xf32>
    %670 = arith.divf %668, %669 : vector<1x384xf32>
    %671 = vector.extract_strided_slice %670 {offsets = [0, 0], sizes = [1, 128], strides = [1, 1]} : vector<1x384xf32> to vector<1x128xf32>
    %672 = vector.extract_strided_slice %670 {offsets = [0, 128], sizes = [1, 128], strides = [1, 1]} : vector<1x384xf32> to vector<1x128xf32>
    %673 = vector.extract_strided_slice %670 {offsets = [0, 256], sizes = [1, 128], strides = [1, 1]} : vector<1x384xf32> to vector<1x128xf32>
    %674 = vector.extract_strided_slice %664 {offsets = [0, 384], sizes = [1, 128], strides = [1, 1]} : vector<1x512xf32> to vector<1x128xf32>
    %675 = math.tanh %674 : vector<1x128xf32>
    %676 = arith.mulf %672, %647 : vector<1x128xf32>
    %677 = arith.mulf %671, %675 : vector<1x128xf32>
    %678 = arith.addf %676, %677 : vector<1x128xf32>
    %679 = math.tanh %678 : vector<1x128xf32>
    %680 = arith.mulf %673, %679 : vector<1x128xf32>
    %681 = vector.extract_strided_slice %680 {offsets = [0, 0], sizes = [1, 32], strides = [1, 1]} : vector<1x128xf32> to vector<1x32xf32>
    %c2_i32_126 = arith.constant 2 : i32
    %682 = vector.broadcast %c2_i32_126 : i32 to vector<8x32xi32>
    %683 = arith.cmpi eq, %0, %682 : vector<8x32xi32>
    %684 = vector.shape_cast %681 : vector<1x32xf32> to vector<1x32xf32>
    %685 = vector.broadcast %684 : vector<1x32xf32> to vector<8x32xf32>
    %686 = arith.select %683, %685, %655 : vector<8x32xi1>, vector<8x32xf32>
    %c5_i32_127 = arith.constant 5 : i32
    %687 = vector.broadcast %c5_i32_127 : i32 to vector<8x32xi32>
    %688 = arith.cmpi eq, %0, %687 : vector<8x32xi32>
    %689 = vector.shape_cast %681 : vector<1x32xf32> to vector<1x32xf32>
    %690 = vector.broadcast %689 : vector<1x32xf32> to vector<8x32xf32>
    %691 = arith.select %688, %690, %660 : vector<8x32xi1>, vector<8x32xf32>
    %692 = vector.extract_strided_slice %592 {offsets = [3, 0], sizes = [1, 512], strides = [1, 1]} : vector<8x512xf32> to vector<1x512xf32>
    %693 = vector.extract_strided_slice %680 {offsets = [0, 0], sizes = [1, 32], strides = [1, 1]} : vector<1x128xf32> to vector<1x32xf32>
    %cst_128 = arith.constant dense<0.000000e+00> : vector<1x512xf32>
    %694 = tpu.matmul %693, %594, %cst_128 {dimension_numbers = #tpu.dot_dimension_numbers<[1], [0], [0], [1], [0, 0, 1, 1], [], []>} : vector<1x32xf32>, vector<32x512xf32>, vector<1x512xf32> -> vector<1x512xf32>
    %695 = arith.addf %692, %694 : vector<1x512xf32>
    %696 = vector.extract_strided_slice %695 {offsets = [0, 0], sizes = [1, 384], strides = [1, 1]} : vector<1x512xf32> to vector<1x384xf32>
    %697 = arith.negf %696 : vector<1x384xf32>
    %698 = math.exp %697 : vector<1x384xf32>
    %cst_129 = arith.constant 1.000000e+00 : f32
    %699 = vector.broadcast %cst_129 : f32 to vector<1x384xf32>
    %700 = arith.addf %699, %698 : vector<1x384xf32>
    %701 = arith.divf %699, %700 : vector<1x384xf32>
    %702 = vector.extract_strided_slice %701 {offsets = [0, 0], sizes = [1, 128], strides = [1, 1]} : vector<1x384xf32> to vector<1x128xf32>
    %703 = vector.extract_strided_slice %701 {offsets = [0, 128], sizes = [1, 128], strides = [1, 1]} : vector<1x384xf32> to vector<1x128xf32>
    %704 = vector.extract_strided_slice %701 {offsets = [0, 256], sizes = [1, 128], strides = [1, 1]} : vector<1x384xf32> to vector<1x128xf32>
    %705 = vector.extract_strided_slice %695 {offsets = [0, 384], sizes = [1, 128], strides = [1, 1]} : vector<1x512xf32> to vector<1x128xf32>
    %706 = math.tanh %705 : vector<1x128xf32>
    %707 = arith.mulf %703, %678 : vector<1x128xf32>
    %708 = arith.mulf %702, %706 : vector<1x128xf32>
    %709 = arith.addf %707, %708 : vector<1x128xf32>
    %710 = math.tanh %709 : vector<1x128xf32>
    %711 = arith.mulf %704, %710 : vector<1x128xf32>
    %712 = vector.extract_strided_slice %711 {offsets = [0, 0], sizes = [1, 32], strides = [1, 1]} : vector<1x128xf32> to vector<1x32xf32>
    %c3_i32_130 = arith.constant 3 : i32
    %713 = vector.broadcast %c3_i32_130 : i32 to vector<8x32xi32>
    %714 = arith.cmpi eq, %0, %713 : vector<8x32xi32>
    %715 = vector.shape_cast %712 : vector<1x32xf32> to vector<1x32xf32>
    %716 = vector.broadcast %715 : vector<1x32xf32> to vector<8x32xf32>
    %717 = arith.select %714, %716, %686 : vector<8x32xi1>, vector<8x32xf32>
    %c4_i32_131 = arith.constant 4 : i32
    %718 = vector.broadcast %c4_i32_131 : i32 to vector<8x32xi32>
    %719 = arith.cmpi eq, %0, %718 : vector<8x32xi32>
    %720 = vector.shape_cast %712 : vector<1x32xf32> to vector<1x32xf32>
    %721 = vector.broadcast %720 : vector<1x32xf32> to vector<8x32xf32>
    %722 = arith.select %719, %721, %691 : vector<8x32xi1>, vector<8x32xf32>
    %723 = vector.extract_strided_slice %592 {offsets = [4, 0], sizes = [1, 512], strides = [1, 1]} : vector<8x512xf32> to vector<1x512xf32>
    %724 = vector.extract_strided_slice %711 {offsets = [0, 0], sizes = [1, 32], strides = [1, 1]} : vector<1x128xf32> to vector<1x32xf32>
    %cst_132 = arith.constant dense<0.000000e+00> : vector<1x512xf32>
    %725 = tpu.matmul %724, %594, %cst_132 {dimension_numbers = #tpu.dot_dimension_numbers<[1], [0], [0], [1], [0, 0, 1, 1], [], []>} : vector<1x32xf32>, vector<32x512xf32>, vector<1x512xf32> -> vector<1x512xf32>
    %726 = arith.addf %723, %725 : vector<1x512xf32>
    %727 = vector.extract_strided_slice %726 {offsets = [0, 0], sizes = [1, 384], strides = [1, 1]} : vector<1x512xf32> to vector<1x384xf32>
    %728 = arith.negf %727 : vector<1x384xf32>
    %729 = math.exp %728 : vector<1x384xf32>
    %cst_133 = arith.constant 1.000000e+00 : f32
    %730 = vector.broadcast %cst_133 : f32 to vector<1x384xf32>
    %731 = arith.addf %730, %729 : vector<1x384xf32>
    %732 = arith.divf %730, %731 : vector<1x384xf32>
    %733 = vector.extract_strided_slice %732 {offsets = [0, 0], sizes = [1, 128], strides = [1, 1]} : vector<1x384xf32> to vector<1x128xf32>
    %734 = vector.extract_strided_slice %732 {offsets = [0, 128], sizes = [1, 128], strides = [1, 1]} : vector<1x384xf32> to vector<1x128xf32>
    %735 = vector.extract_strided_slice %732 {offsets = [0, 256], sizes = [1, 128], strides = [1, 1]} : vector<1x384xf32> to vector<1x128xf32>
    %736 = vector.extract_strided_slice %726 {offsets = [0, 384], sizes = [1, 128], strides = [1, 1]} : vector<1x512xf32> to vector<1x128xf32>
    %737 = math.tanh %736 : vector<1x128xf32>
    %738 = arith.mulf %734, %709 : vector<1x128xf32>
    %739 = arith.mulf %733, %737 : vector<1x128xf32>
    %740 = arith.addf %738, %739 : vector<1x128xf32>
    %741 = math.tanh %740 : vector<1x128xf32>
    %742 = arith.mulf %735, %741 : vector<1x128xf32>
    %743 = vector.extract_strided_slice %742 {offsets = [0, 0], sizes = [1, 32], strides = [1, 1]} : vector<1x128xf32> to vector<1x32xf32>
    %c4_i32_134 = arith.constant 4 : i32
    %744 = vector.broadcast %c4_i32_134 : i32 to vector<8x32xi32>
    %745 = arith.cmpi eq, %0, %744 : vector<8x32xi32>
    %746 = vector.shape_cast %743 : vector<1x32xf32> to vector<1x32xf32>
    %747 = vector.broadcast %746 : vector<1x32xf32> to vector<8x32xf32>
    %748 = arith.select %745, %747, %717 : vector<8x32xi1>, vector<8x32xf32>
    %c3_i32_135 = arith.constant 3 : i32
    %749 = vector.broadcast %c3_i32_135 : i32 to vector<8x32xi32>
    %750 = arith.cmpi eq, %0, %749 : vector<8x32xi32>
    %751 = vector.shape_cast %743 : vector<1x32xf32> to vector<1x32xf32>
    %752 = vector.broadcast %751 : vector<1x32xf32> to vector<8x32xf32>
    %753 = arith.select %750, %752, %722 : vector<8x32xi1>, vector<8x32xf32>
    %754 = vector.extract_strided_slice %592 {offsets = [5, 0], sizes = [1, 512], strides = [1, 1]} : vector<8x512xf32> to vector<1x512xf32>
    %755 = vector.extract_strided_slice %742 {offsets = [0, 0], sizes = [1, 32], strides = [1, 1]} : vector<1x128xf32> to vector<1x32xf32>
    %cst_136 = arith.constant dense<0.000000e+00> : vector<1x512xf32>
    %756 = tpu.matmul %755, %594, %cst_136 {dimension_numbers = #tpu.dot_dimension_numbers<[1], [0], [0], [1], [0, 0, 1, 1], [], []>} : vector<1x32xf32>, vector<32x512xf32>, vector<1x512xf32> -> vector<1x512xf32>
    %757 = arith.addf %754, %756 : vector<1x512xf32>
    %758 = vector.extract_strided_slice %757 {offsets = [0, 0], sizes = [1, 384], strides = [1, 1]} : vector<1x512xf32> to vector<1x384xf32>
    %759 = arith.negf %758 : vector<1x384xf32>
    %760 = math.exp %759 : vector<1x384xf32>
    %cst_137 = arith.constant 1.000000e+00 : f32
    %761 = vector.broadcast %cst_137 : f32 to vector<1x384xf32>
    %762 = arith.addf %761, %760 : vector<1x384xf32>
    %763 = arith.divf %761, %762 : vector<1x384xf32>
    %764 = vector.extract_strided_slice %763 {offsets = [0, 0], sizes = [1, 128], strides = [1, 1]} : vector<1x384xf32> to vector<1x128xf32>
    %765 = vector.extract_strided_slice %763 {offsets = [0, 128], sizes = [1, 128], strides = [1, 1]} : vector<1x384xf32> to vector<1x128xf32>
    %766 = vector.extract_strided_slice %763 {offsets = [0, 256], sizes = [1, 128], strides = [1, 1]} : vector<1x384xf32> to vector<1x128xf32>
    %767 = vector.extract_strided_slice %757 {offsets = [0, 384], sizes = [1, 128], strides = [1, 1]} : vector<1x512xf32> to vector<1x128xf32>
    %768 = math.tanh %767 : vector<1x128xf32>
    %769 = arith.mulf %765, %740 : vector<1x128xf32>
    %770 = arith.mulf %764, %768 : vector<1x128xf32>
    %771 = arith.addf %769, %770 : vector<1x128xf32>
    %772 = math.tanh %771 : vector<1x128xf32>
    %773 = arith.mulf %766, %772 : vector<1x128xf32>
    %774 = vector.extract_strided_slice %773 {offsets = [0, 0], sizes = [1, 32], strides = [1, 1]} : vector<1x128xf32> to vector<1x32xf32>
    %c5_i32_138 = arith.constant 5 : i32
    %775 = vector.broadcast %c5_i32_138 : i32 to vector<8x32xi32>
    %776 = arith.cmpi eq, %0, %775 : vector<8x32xi32>
    %777 = vector.shape_cast %774 : vector<1x32xf32> to vector<1x32xf32>
    %778 = vector.broadcast %777 : vector<1x32xf32> to vector<8x32xf32>
    %779 = arith.select %776, %778, %748 : vector<8x32xi1>, vector<8x32xf32>
    %c2_i32_139 = arith.constant 2 : i32
    %780 = vector.broadcast %c2_i32_139 : i32 to vector<8x32xi32>
    %781 = arith.cmpi eq, %0, %780 : vector<8x32xi32>
    %782 = vector.shape_cast %774 : vector<1x32xf32> to vector<1x32xf32>
    %783 = vector.broadcast %782 : vector<1x32xf32> to vector<8x32xf32>
    %784 = arith.select %781, %783, %753 : vector<8x32xi1>, vector<8x32xf32>
    %785 = vector.extract_strided_slice %592 {offsets = [6, 0], sizes = [1, 512], strides = [1, 1]} : vector<8x512xf32> to vector<1x512xf32>
    %786 = vector.extract_strided_slice %773 {offsets = [0, 0], sizes = [1, 32], strides = [1, 1]} : vector<1x128xf32> to vector<1x32xf32>
    %cst_140 = arith.constant dense<0.000000e+00> : vector<1x512xf32>
    %787 = tpu.matmul %786, %594, %cst_140 {dimension_numbers = #tpu.dot_dimension_numbers<[1], [0], [0], [1], [0, 0, 1, 1], [], []>} : vector<1x32xf32>, vector<32x512xf32>, vector<1x512xf32> -> vector<1x512xf32>
    %788 = arith.addf %785, %787 : vector<1x512xf32>
    %789 = vector.extract_strided_slice %788 {offsets = [0, 0], sizes = [1, 384], strides = [1, 1]} : vector<1x512xf32> to vector<1x384xf32>
    %790 = arith.negf %789 : vector<1x384xf32>
    %791 = math.exp %790 : vector<1x384xf32>
    %cst_141 = arith.constant 1.000000e+00 : f32
    %792 = vector.broadcast %cst_141 : f32 to vector<1x384xf32>
    %793 = arith.addf %792, %791 : vector<1x384xf32>
    %794 = arith.divf %792, %793 : vector<1x384xf32>
    %795 = vector.extract_strided_slice %794 {offsets = [0, 0], sizes = [1, 128], strides = [1, 1]} : vector<1x384xf32> to vector<1x128xf32>
    %796 = vector.extract_strided_slice %794 {offsets = [0, 128], sizes = [1, 128], strides = [1, 1]} : vector<1x384xf32> to vector<1x128xf32>
    %797 = vector.extract_strided_slice %794 {offsets = [0, 256], sizes = [1, 128], strides = [1, 1]} : vector<1x384xf32> to vector<1x128xf32>
    %798 = vector.extract_strided_slice %788 {offsets = [0, 384], sizes = [1, 128], strides = [1, 1]} : vector<1x512xf32> to vector<1x128xf32>
    %799 = math.tanh %798 : vector<1x128xf32>
    %800 = arith.mulf %796, %771 : vector<1x128xf32>
    %801 = arith.mulf %795, %799 : vector<1x128xf32>
    %802 = arith.addf %800, %801 : vector<1x128xf32>
    %803 = math.tanh %802 : vector<1x128xf32>
    %804 = arith.mulf %797, %803 : vector<1x128xf32>
    %805 = vector.extract_strided_slice %804 {offsets = [0, 0], sizes = [1, 32], strides = [1, 1]} : vector<1x128xf32> to vector<1x32xf32>
    %c6_i32_142 = arith.constant 6 : i32
    %806 = vector.broadcast %c6_i32_142 : i32 to vector<8x32xi32>
    %807 = arith.cmpi eq, %0, %806 : vector<8x32xi32>
    %808 = vector.shape_cast %805 : vector<1x32xf32> to vector<1x32xf32>
    %809 = vector.broadcast %808 : vector<1x32xf32> to vector<8x32xf32>
    %810 = arith.select %807, %809, %779 : vector<8x32xi1>, vector<8x32xf32>
    %c1_i32_143 = arith.constant 1 : i32
    %811 = vector.broadcast %c1_i32_143 : i32 to vector<8x32xi32>
    %812 = arith.cmpi eq, %0, %811 : vector<8x32xi32>
    %813 = vector.shape_cast %805 : vector<1x32xf32> to vector<1x32xf32>
    %814 = vector.broadcast %813 : vector<1x32xf32> to vector<8x32xf32>
    %815 = arith.select %812, %814, %784 : vector<8x32xi1>, vector<8x32xf32>
    %816 = vector.extract_strided_slice %592 {offsets = [7, 0], sizes = [1, 512], strides = [1, 1]} : vector<8x512xf32> to vector<1x512xf32>
    %817 = vector.extract_strided_slice %804 {offsets = [0, 0], sizes = [1, 32], strides = [1, 1]} : vector<1x128xf32> to vector<1x32xf32>
    %cst_144 = arith.constant dense<0.000000e+00> : vector<1x512xf32>
    %818 = tpu.matmul %817, %594, %cst_144 {dimension_numbers = #tpu.dot_dimension_numbers<[1], [0], [0], [1], [0, 0, 1, 1], [], []>} : vector<1x32xf32>, vector<32x512xf32>, vector<1x512xf32> -> vector<1x512xf32>
    %819 = arith.addf %816, %818 : vector<1x512xf32>
    %820 = vector.extract_strided_slice %819 {offsets = [0, 0], sizes = [1, 384], strides = [1, 1]} : vector<1x512xf32> to vector<1x384xf32>
    %821 = arith.negf %820 : vector<1x384xf32>
    %822 = math.exp %821 : vector<1x384xf32>
    %cst_145 = arith.constant 1.000000e+00 : f32
    %823 = vector.broadcast %cst_145 : f32 to vector<1x384xf32>
    %824 = arith.addf %823, %822 : vector<1x384xf32>
    %825 = arith.divf %823, %824 : vector<1x384xf32>
    %826 = vector.extract_strided_slice %825 {offsets = [0, 0], sizes = [1, 128], strides = [1, 1]} : vector<1x384xf32> to vector<1x128xf32>
    %827 = vector.extract_strided_slice %825 {offsets = [0, 128], sizes = [1, 128], strides = [1, 1]} : vector<1x384xf32> to vector<1x128xf32>
    %828 = vector.extract_strided_slice %825 {offsets = [0, 256], sizes = [1, 128], strides = [1, 1]} : vector<1x384xf32> to vector<1x128xf32>
    %829 = vector.extract_strided_slice %819 {offsets = [0, 384], sizes = [1, 128], strides = [1, 1]} : vector<1x512xf32> to vector<1x128xf32>
    %830 = math.tanh %829 : vector<1x128xf32>
    %831 = arith.mulf %827, %802 : vector<1x128xf32>
    %832 = arith.mulf %826, %830 : vector<1x128xf32>
    %833 = arith.addf %831, %832 : vector<1x128xf32>
    %834 = math.tanh %833 : vector<1x128xf32>
    %835 = arith.mulf %828, %834 : vector<1x128xf32>
    %836 = vector.extract_strided_slice %835 {offsets = [0, 0], sizes = [1, 32], strides = [1, 1]} : vector<1x128xf32> to vector<1x32xf32>
    %c7_i32_146 = arith.constant 7 : i32
    %837 = vector.broadcast %c7_i32_146 : i32 to vector<8x32xi32>
    %838 = arith.cmpi eq, %0, %837 : vector<8x32xi32>
    %839 = vector.shape_cast %836 : vector<1x32xf32> to vector<1x32xf32>
    %840 = vector.broadcast %839 : vector<1x32xf32> to vector<8x32xf32>
    %841 = arith.select %838, %840, %810 : vector<8x32xi1>, vector<8x32xf32>
    %c0_i32_147 = arith.constant 0 : i32
    %842 = vector.broadcast %c0_i32_147 : i32 to vector<8x32xi32>
    %843 = arith.cmpi eq, %0, %842 : vector<8x32xi32>
    %844 = vector.shape_cast %836 : vector<1x32xf32> to vector<1x32xf32>
    %845 = vector.broadcast %844 : vector<1x32xf32> to vector<8x32xf32>
    %846 = arith.select %843, %845, %815 : vector<8x32xi1>, vector<8x32xf32>
    %c4 = arith.constant 4 : index
    %c0_148 = arith.constant 0 : index
    %c0_149 = arith.constant 0 : index
    %847 = vector.load %arg2[%c4, %c0_148, %c0_149] : memref<8x32x512xf32, #tpu.memory_space<vmem>>, vector<1x32x512xf32>
    %848 = vector.shape_cast %847 : vector<1x32x512xf32> to vector<32x512xf32>
    %cst_150 = arith.constant dense<0.000000e+00> : vector<8x512xf32>
    %849 = tpu.matmul %841, %848, %cst_150 {dimension_numbers = #tpu.dot_dimension_numbers<[1], [0], [0], [1], [0, 0, 1, 1], [], []>} : vector<8x32xf32>, vector<32x512xf32>, vector<8x512xf32> -> vector<8x512xf32>
    %c5 = arith.constant 5 : index
    %c0_151 = arith.constant 0 : index
    %c0_152 = arith.constant 0 : index
    %850 = vector.load %arg2[%c5, %c0_151, %c0_152] : memref<8x32x512xf32, #tpu.memory_space<vmem>>, vector<1x32x512xf32>
    %851 = vector.shape_cast %850 : vector<1x32x512xf32> to vector<32x512xf32>
    %cst_153 = arith.constant dense<0.000000e+00> : vector<8x512xf32>
    %852 = tpu.matmul %846, %851, %cst_153 {dimension_numbers = #tpu.dot_dimension_numbers<[1], [0], [0], [1], [0, 0, 1, 1], [], []>} : vector<8x32xf32>, vector<32x512xf32>, vector<8x512xf32> -> vector<8x512xf32>
    %853 = arith.addf %849, %852 : vector<8x512xf32>
    %c3_154 = arith.constant 3 : index
    %c0_155 = arith.constant 0 : index
    %c0_156 = arith.constant 0 : index
    %854 = vector.load %arg4[%c3_154, %c0_155, %c0_156] : memref<5x1x512xf32, #tpu.memory_space<vmem>>, vector<1x1x512xf32>
    %855 = vector.shape_cast %854 : vector<1x1x512xf32> to vector<1x512xf32>
    %856 = vector.broadcast %855 : vector<1x512xf32> to vector<8x512xf32>
    %857 = arith.addf %853, %856 : vector<8x512xf32>
    %c3_157 = arith.constant 3 : index
    %c0_158 = arith.constant 0 : index
    %c0_159 = arith.constant 0 : index
    %858 = vector.load %arg3[%c3_157, %c0_158, %c0_159] : memref<5x32x512xf32, #tpu.memory_space<vmem>>, vector<1x32x512xf32>
    %859 = vector.shape_cast %858 : vector<1x32x512xf32> to vector<32x512xf32>
    %cst_160 = arith.constant 0.000000e+00 : f32
    %860 = vector.broadcast %cst_160 : f32 to vector<1x128xf32>
    %cst_161 = arith.constant 0.000000e+00 : f32
    %861 = vector.broadcast %cst_161 : f32 to vector<1x128xf32>
    %cst_162 = arith.constant 0.000000e+00 : f32
    %862 = vector.broadcast %cst_162 : f32 to vector<8x32xf32>
    %cst_163 = arith.constant 0.000000e+00 : f32
    %863 = vector.broadcast %cst_163 : f32 to vector<8x32xf32>
    %864 = vector.extract_strided_slice %857 {offsets = [0, 0], sizes = [1, 512], strides = [1, 1]} : vector<8x512xf32> to vector<1x512xf32>
    %865 = vector.extract_strided_slice %860 {offsets = [0, 0], sizes = [1, 32], strides = [1, 1]} : vector<1x128xf32> to vector<1x32xf32>
    %cst_164 = arith.constant dense<0.000000e+00> : vector<1x512xf32>
    %866 = tpu.matmul %865, %859, %cst_164 {dimension_numbers = #tpu.dot_dimension_numbers<[1], [0], [0], [1], [0, 0, 1, 1], [], []>} : vector<1x32xf32>, vector<32x512xf32>, vector<1x512xf32> -> vector<1x512xf32>
    %867 = arith.addf %864, %866 : vector<1x512xf32>
    %868 = vector.extract_strided_slice %867 {offsets = [0, 0], sizes = [1, 384], strides = [1, 1]} : vector<1x512xf32> to vector<1x384xf32>
    %869 = arith.negf %868 : vector<1x384xf32>
    %870 = math.exp %869 : vector<1x384xf32>
    %cst_165 = arith.constant 1.000000e+00 : f32
    %871 = vector.broadcast %cst_165 : f32 to vector<1x384xf32>
    %872 = arith.addf %871, %870 : vector<1x384xf32>
    %873 = arith.divf %871, %872 : vector<1x384xf32>
    %874 = vector.extract_strided_slice %873 {offsets = [0, 0], sizes = [1, 128], strides = [1, 1]} : vector<1x384xf32> to vector<1x128xf32>
    %875 = vector.extract_strided_slice %873 {offsets = [0, 128], sizes = [1, 128], strides = [1, 1]} : vector<1x384xf32> to vector<1x128xf32>
    %876 = vector.extract_strided_slice %873 {offsets = [0, 256], sizes = [1, 128], strides = [1, 1]} : vector<1x384xf32> to vector<1x128xf32>
    %877 = vector.extract_strided_slice %867 {offsets = [0, 384], sizes = [1, 128], strides = [1, 1]} : vector<1x512xf32> to vector<1x128xf32>
    %878 = math.tanh %877 : vector<1x128xf32>
    %879 = arith.mulf %875, %861 : vector<1x128xf32>
    %880 = arith.mulf %874, %878 : vector<1x128xf32>
    %881 = arith.addf %879, %880 : vector<1x128xf32>
    %882 = math.tanh %881 : vector<1x128xf32>
    %883 = arith.mulf %876, %882 : vector<1x128xf32>
    %884 = vector.extract_strided_slice %883 {offsets = [0, 0], sizes = [1, 32], strides = [1, 1]} : vector<1x128xf32> to vector<1x32xf32>
    %c0_i32_166 = arith.constant 0 : i32
    %885 = vector.broadcast %c0_i32_166 : i32 to vector<8x32xi32>
    %886 = arith.cmpi eq, %0, %885 : vector<8x32xi32>
    %887 = vector.shape_cast %884 : vector<1x32xf32> to vector<1x32xf32>
    %888 = vector.broadcast %887 : vector<1x32xf32> to vector<8x32xf32>
    %889 = arith.select %886, %888, %862 : vector<8x32xi1>, vector<8x32xf32>
    %c7_i32_167 = arith.constant 7 : i32
    %890 = vector.broadcast %c7_i32_167 : i32 to vector<8x32xi32>
    %891 = arith.cmpi eq, %0, %890 : vector<8x32xi32>
    %892 = vector.shape_cast %884 : vector<1x32xf32> to vector<1x32xf32>
    %893 = vector.broadcast %892 : vector<1x32xf32> to vector<8x32xf32>
    %894 = arith.select %891, %893, %863 : vector<8x32xi1>, vector<8x32xf32>
    %895 = vector.extract_strided_slice %857 {offsets = [1, 0], sizes = [1, 512], strides = [1, 1]} : vector<8x512xf32> to vector<1x512xf32>
    %896 = vector.extract_strided_slice %883 {offsets = [0, 0], sizes = [1, 32], strides = [1, 1]} : vector<1x128xf32> to vector<1x32xf32>
    %cst_168 = arith.constant dense<0.000000e+00> : vector<1x512xf32>
    %897 = tpu.matmul %896, %859, %cst_168 {dimension_numbers = #tpu.dot_dimension_numbers<[1], [0], [0], [1], [0, 0, 1, 1], [], []>} : vector<1x32xf32>, vector<32x512xf32>, vector<1x512xf32> -> vector<1x512xf32>
    %898 = arith.addf %895, %897 : vector<1x512xf32>
    %899 = vector.extract_strided_slice %898 {offsets = [0, 0], sizes = [1, 384], strides = [1, 1]} : vector<1x512xf32> to vector<1x384xf32>
    %900 = arith.negf %899 : vector<1x384xf32>
    %901 = math.exp %900 : vector<1x384xf32>
    %cst_169 = arith.constant 1.000000e+00 : f32
    %902 = vector.broadcast %cst_169 : f32 to vector<1x384xf32>
    %903 = arith.addf %902, %901 : vector<1x384xf32>
    %904 = arith.divf %902, %903 : vector<1x384xf32>
    %905 = vector.extract_strided_slice %904 {offsets = [0, 0], sizes = [1, 128], strides = [1, 1]} : vector<1x384xf32> to vector<1x128xf32>
    %906 = vector.extract_strided_slice %904 {offsets = [0, 128], sizes = [1, 128], strides = [1, 1]} : vector<1x384xf32> to vector<1x128xf32>
    %907 = vector.extract_strided_slice %904 {offsets = [0, 256], sizes = [1, 128], strides = [1, 1]} : vector<1x384xf32> to vector<1x128xf32>
    %908 = vector.extract_strided_slice %898 {offsets = [0, 384], sizes = [1, 128], strides = [1, 1]} : vector<1x512xf32> to vector<1x128xf32>
    %909 = math.tanh %908 : vector<1x128xf32>
    %910 = arith.mulf %906, %881 : vector<1x128xf32>
    %911 = arith.mulf %905, %909 : vector<1x128xf32>
    %912 = arith.addf %910, %911 : vector<1x128xf32>
    %913 = math.tanh %912 : vector<1x128xf32>
    %914 = arith.mulf %907, %913 : vector<1x128xf32>
    %915 = vector.extract_strided_slice %914 {offsets = [0, 0], sizes = [1, 32], strides = [1, 1]} : vector<1x128xf32> to vector<1x32xf32>
    %c1_i32_170 = arith.constant 1 : i32
    %916 = vector.broadcast %c1_i32_170 : i32 to vector<8x32xi32>
    %917 = arith.cmpi eq, %0, %916 : vector<8x32xi32>
    %918 = vector.shape_cast %915 : vector<1x32xf32> to vector<1x32xf32>
    %919 = vector.broadcast %918 : vector<1x32xf32> to vector<8x32xf32>
    %920 = arith.select %917, %919, %889 : vector<8x32xi1>, vector<8x32xf32>
    %c6_i32_171 = arith.constant 6 : i32
    %921 = vector.broadcast %c6_i32_171 : i32 to vector<8x32xi32>
    %922 = arith.cmpi eq, %0, %921 : vector<8x32xi32>
    %923 = vector.shape_cast %915 : vector<1x32xf32> to vector<1x32xf32>
    %924 = vector.broadcast %923 : vector<1x32xf32> to vector<8x32xf32>
    %925 = arith.select %922, %924, %894 : vector<8x32xi1>, vector<8x32xf32>
    %926 = vector.extract_strided_slice %857 {offsets = [2, 0], sizes = [1, 512], strides = [1, 1]} : vector<8x512xf32> to vector<1x512xf32>
    %927 = vector.extract_strided_slice %914 {offsets = [0, 0], sizes = [1, 32], strides = [1, 1]} : vector<1x128xf32> to vector<1x32xf32>
    %cst_172 = arith.constant dense<0.000000e+00> : vector<1x512xf32>
    %928 = tpu.matmul %927, %859, %cst_172 {dimension_numbers = #tpu.dot_dimension_numbers<[1], [0], [0], [1], [0, 0, 1, 1], [], []>} : vector<1x32xf32>, vector<32x512xf32>, vector<1x512xf32> -> vector<1x512xf32>
    %929 = arith.addf %926, %928 : vector<1x512xf32>
    %930 = vector.extract_strided_slice %929 {offsets = [0, 0], sizes = [1, 384], strides = [1, 1]} : vector<1x512xf32> to vector<1x384xf32>
    %931 = arith.negf %930 : vector<1x384xf32>
    %932 = math.exp %931 : vector<1x384xf32>
    %cst_173 = arith.constant 1.000000e+00 : f32
    %933 = vector.broadcast %cst_173 : f32 to vector<1x384xf32>
    %934 = arith.addf %933, %932 : vector<1x384xf32>
    %935 = arith.divf %933, %934 : vector<1x384xf32>
    %936 = vector.extract_strided_slice %935 {offsets = [0, 0], sizes = [1, 128], strides = [1, 1]} : vector<1x384xf32> to vector<1x128xf32>
    %937 = vector.extract_strided_slice %935 {offsets = [0, 128], sizes = [1, 128], strides = [1, 1]} : vector<1x384xf32> to vector<1x128xf32>
    %938 = vector.extract_strided_slice %935 {offsets = [0, 256], sizes = [1, 128], strides = [1, 1]} : vector<1x384xf32> to vector<1x128xf32>
    %939 = vector.extract_strided_slice %929 {offsets = [0, 384], sizes = [1, 128], strides = [1, 1]} : vector<1x512xf32> to vector<1x128xf32>
    %940 = math.tanh %939 : vector<1x128xf32>
    %941 = arith.mulf %937, %912 : vector<1x128xf32>
    %942 = arith.mulf %936, %940 : vector<1x128xf32>
    %943 = arith.addf %941, %942 : vector<1x128xf32>
    %944 = math.tanh %943 : vector<1x128xf32>
    %945 = arith.mulf %938, %944 : vector<1x128xf32>
    %946 = vector.extract_strided_slice %945 {offsets = [0, 0], sizes = [1, 32], strides = [1, 1]} : vector<1x128xf32> to vector<1x32xf32>
    %c2_i32_174 = arith.constant 2 : i32
    %947 = vector.broadcast %c2_i32_174 : i32 to vector<8x32xi32>
    %948 = arith.cmpi eq, %0, %947 : vector<8x32xi32>
    %949 = vector.shape_cast %946 : vector<1x32xf32> to vector<1x32xf32>
    %950 = vector.broadcast %949 : vector<1x32xf32> to vector<8x32xf32>
    %951 = arith.select %948, %950, %920 : vector<8x32xi1>, vector<8x32xf32>
    %c5_i32_175 = arith.constant 5 : i32
    %952 = vector.broadcast %c5_i32_175 : i32 to vector<8x32xi32>
    %953 = arith.cmpi eq, %0, %952 : vector<8x32xi32>
    %954 = vector.shape_cast %946 : vector<1x32xf32> to vector<1x32xf32>
    %955 = vector.broadcast %954 : vector<1x32xf32> to vector<8x32xf32>
    %956 = arith.select %953, %955, %925 : vector<8x32xi1>, vector<8x32xf32>
    %957 = vector.extract_strided_slice %857 {offsets = [3, 0], sizes = [1, 512], strides = [1, 1]} : vector<8x512xf32> to vector<1x512xf32>
    %958 = vector.extract_strided_slice %945 {offsets = [0, 0], sizes = [1, 32], strides = [1, 1]} : vector<1x128xf32> to vector<1x32xf32>
    %cst_176 = arith.constant dense<0.000000e+00> : vector<1x512xf32>
    %959 = tpu.matmul %958, %859, %cst_176 {dimension_numbers = #tpu.dot_dimension_numbers<[1], [0], [0], [1], [0, 0, 1, 1], [], []>} : vector<1x32xf32>, vector<32x512xf32>, vector<1x512xf32> -> vector<1x512xf32>
    %960 = arith.addf %957, %959 : vector<1x512xf32>
    %961 = vector.extract_strided_slice %960 {offsets = [0, 0], sizes = [1, 384], strides = [1, 1]} : vector<1x512xf32> to vector<1x384xf32>
    %962 = arith.negf %961 : vector<1x384xf32>
    %963 = math.exp %962 : vector<1x384xf32>
    %cst_177 = arith.constant 1.000000e+00 : f32
    %964 = vector.broadcast %cst_177 : f32 to vector<1x384xf32>
    %965 = arith.addf %964, %963 : vector<1x384xf32>
    %966 = arith.divf %964, %965 : vector<1x384xf32>
    %967 = vector.extract_strided_slice %966 {offsets = [0, 0], sizes = [1, 128], strides = [1, 1]} : vector<1x384xf32> to vector<1x128xf32>
    %968 = vector.extract_strided_slice %966 {offsets = [0, 128], sizes = [1, 128], strides = [1, 1]} : vector<1x384xf32> to vector<1x128xf32>
    %969 = vector.extract_strided_slice %966 {offsets = [0, 256], sizes = [1, 128], strides = [1, 1]} : vector<1x384xf32> to vector<1x128xf32>
    %970 = vector.extract_strided_slice %960 {offsets = [0, 384], sizes = [1, 128], strides = [1, 1]} : vector<1x512xf32> to vector<1x128xf32>
    %971 = math.tanh %970 : vector<1x128xf32>
    %972 = arith.mulf %968, %943 : vector<1x128xf32>
    %973 = arith.mulf %967, %971 : vector<1x128xf32>
    %974 = arith.addf %972, %973 : vector<1x128xf32>
    %975 = math.tanh %974 : vector<1x128xf32>
    %976 = arith.mulf %969, %975 : vector<1x128xf32>
    %977 = vector.extract_strided_slice %976 {offsets = [0, 0], sizes = [1, 32], strides = [1, 1]} : vector<1x128xf32> to vector<1x32xf32>
    %c3_i32_178 = arith.constant 3 : i32
    %978 = vector.broadcast %c3_i32_178 : i32 to vector<8x32xi32>
    %979 = arith.cmpi eq, %0, %978 : vector<8x32xi32>
    %980 = vector.shape_cast %977 : vector<1x32xf32> to vector<1x32xf32>
    %981 = vector.broadcast %980 : vector<1x32xf32> to vector<8x32xf32>
    %982 = arith.select %979, %981, %951 : vector<8x32xi1>, vector<8x32xf32>
    %c4_i32_179 = arith.constant 4 : i32
    %983 = vector.broadcast %c4_i32_179 : i32 to vector<8x32xi32>
    %984 = arith.cmpi eq, %0, %983 : vector<8x32xi32>
    %985 = vector.shape_cast %977 : vector<1x32xf32> to vector<1x32xf32>
    %986 = vector.broadcast %985 : vector<1x32xf32> to vector<8x32xf32>
    %987 = arith.select %984, %986, %956 : vector<8x32xi1>, vector<8x32xf32>
    %988 = vector.extract_strided_slice %857 {offsets = [4, 0], sizes = [1, 512], strides = [1, 1]} : vector<8x512xf32> to vector<1x512xf32>
    %989 = vector.extract_strided_slice %976 {offsets = [0, 0], sizes = [1, 32], strides = [1, 1]} : vector<1x128xf32> to vector<1x32xf32>
    %cst_180 = arith.constant dense<0.000000e+00> : vector<1x512xf32>
    %990 = tpu.matmul %989, %859, %cst_180 {dimension_numbers = #tpu.dot_dimension_numbers<[1], [0], [0], [1], [0, 0, 1, 1], [], []>} : vector<1x32xf32>, vector<32x512xf32>, vector<1x512xf32> -> vector<1x512xf32>
    %991 = arith.addf %988, %990 : vector<1x512xf32>
    %992 = vector.extract_strided_slice %991 {offsets = [0, 0], sizes = [1, 384], strides = [1, 1]} : vector<1x512xf32> to vector<1x384xf32>
    %993 = arith.negf %992 : vector<1x384xf32>
    %994 = math.exp %993 : vector<1x384xf32>
    %cst_181 = arith.constant 1.000000e+00 : f32
    %995 = vector.broadcast %cst_181 : f32 to vector<1x384xf32>
    %996 = arith.addf %995, %994 : vector<1x384xf32>
    %997 = arith.divf %995, %996 : vector<1x384xf32>
    %998 = vector.extract_strided_slice %997 {offsets = [0, 0], sizes = [1, 128], strides = [1, 1]} : vector<1x384xf32> to vector<1x128xf32>
    %999 = vector.extract_strided_slice %997 {offsets = [0, 128], sizes = [1, 128], strides = [1, 1]} : vector<1x384xf32> to vector<1x128xf32>
    %1000 = vector.extract_strided_slice %997 {offsets = [0, 256], sizes = [1, 128], strides = [1, 1]} : vector<1x384xf32> to vector<1x128xf32>
    %1001 = vector.extract_strided_slice %991 {offsets = [0, 384], sizes = [1, 128], strides = [1, 1]} : vector<1x512xf32> to vector<1x128xf32>
    %1002 = math.tanh %1001 : vector<1x128xf32>
    %1003 = arith.mulf %999, %974 : vector<1x128xf32>
    %1004 = arith.mulf %998, %1002 : vector<1x128xf32>
    %1005 = arith.addf %1003, %1004 : vector<1x128xf32>
    %1006 = math.tanh %1005 : vector<1x128xf32>
    %1007 = arith.mulf %1000, %1006 : vector<1x128xf32>
    %1008 = vector.extract_strided_slice %1007 {offsets = [0, 0], sizes = [1, 32], strides = [1, 1]} : vector<1x128xf32> to vector<1x32xf32>
    %c4_i32_182 = arith.constant 4 : i32
    %1009 = vector.broadcast %c4_i32_182 : i32 to vector<8x32xi32>
    %1010 = arith.cmpi eq, %0, %1009 : vector<8x32xi32>
    %1011 = vector.shape_cast %1008 : vector<1x32xf32> to vector<1x32xf32>
    %1012 = vector.broadcast %1011 : vector<1x32xf32> to vector<8x32xf32>
    %1013 = arith.select %1010, %1012, %982 : vector<8x32xi1>, vector<8x32xf32>
    %c3_i32_183 = arith.constant 3 : i32
    %1014 = vector.broadcast %c3_i32_183 : i32 to vector<8x32xi32>
    %1015 = arith.cmpi eq, %0, %1014 : vector<8x32xi32>
    %1016 = vector.shape_cast %1008 : vector<1x32xf32> to vector<1x32xf32>
    %1017 = vector.broadcast %1016 : vector<1x32xf32> to vector<8x32xf32>
    %1018 = arith.select %1015, %1017, %987 : vector<8x32xi1>, vector<8x32xf32>
    %1019 = vector.extract_strided_slice %857 {offsets = [5, 0], sizes = [1, 512], strides = [1, 1]} : vector<8x512xf32> to vector<1x512xf32>
    %1020 = vector.extract_strided_slice %1007 {offsets = [0, 0], sizes = [1, 32], strides = [1, 1]} : vector<1x128xf32> to vector<1x32xf32>
    %cst_184 = arith.constant dense<0.000000e+00> : vector<1x512xf32>
    %1021 = tpu.matmul %1020, %859, %cst_184 {dimension_numbers = #tpu.dot_dimension_numbers<[1], [0], [0], [1], [0, 0, 1, 1], [], []>} : vector<1x32xf32>, vector<32x512xf32>, vector<1x512xf32> -> vector<1x512xf32>
    %1022 = arith.addf %1019, %1021 : vector<1x512xf32>
    %1023 = vector.extract_strided_slice %1022 {offsets = [0, 0], sizes = [1, 384], strides = [1, 1]} : vector<1x512xf32> to vector<1x384xf32>
    %1024 = arith.negf %1023 : vector<1x384xf32>
    %1025 = math.exp %1024 : vector<1x384xf32>
    %cst_185 = arith.constant 1.000000e+00 : f32
    %1026 = vector.broadcast %cst_185 : f32 to vector<1x384xf32>
    %1027 = arith.addf %1026, %1025 : vector<1x384xf32>
    %1028 = arith.divf %1026, %1027 : vector<1x384xf32>
    %1029 = vector.extract_strided_slice %1028 {offsets = [0, 0], sizes = [1, 128], strides = [1, 1]} : vector<1x384xf32> to vector<1x128xf32>
    %1030 = vector.extract_strided_slice %1028 {offsets = [0, 128], sizes = [1, 128], strides = [1, 1]} : vector<1x384xf32> to vector<1x128xf32>
    %1031 = vector.extract_strided_slice %1028 {offsets = [0, 256], sizes = [1, 128], strides = [1, 1]} : vector<1x384xf32> to vector<1x128xf32>
    %1032 = vector.extract_strided_slice %1022 {offsets = [0, 384], sizes = [1, 128], strides = [1, 1]} : vector<1x512xf32> to vector<1x128xf32>
    %1033 = math.tanh %1032 : vector<1x128xf32>
    %1034 = arith.mulf %1030, %1005 : vector<1x128xf32>
    %1035 = arith.mulf %1029, %1033 : vector<1x128xf32>
    %1036 = arith.addf %1034, %1035 : vector<1x128xf32>
    %1037 = math.tanh %1036 : vector<1x128xf32>
    %1038 = arith.mulf %1031, %1037 : vector<1x128xf32>
    %1039 = vector.extract_strided_slice %1038 {offsets = [0, 0], sizes = [1, 32], strides = [1, 1]} : vector<1x128xf32> to vector<1x32xf32>
    %c5_i32_186 = arith.constant 5 : i32
    %1040 = vector.broadcast %c5_i32_186 : i32 to vector<8x32xi32>
    %1041 = arith.cmpi eq, %0, %1040 : vector<8x32xi32>
    %1042 = vector.shape_cast %1039 : vector<1x32xf32> to vector<1x32xf32>
    %1043 = vector.broadcast %1042 : vector<1x32xf32> to vector<8x32xf32>
    %1044 = arith.select %1041, %1043, %1013 : vector<8x32xi1>, vector<8x32xf32>
    %c2_i32_187 = arith.constant 2 : i32
    %1045 = vector.broadcast %c2_i32_187 : i32 to vector<8x32xi32>
    %1046 = arith.cmpi eq, %0, %1045 : vector<8x32xi32>
    %1047 = vector.shape_cast %1039 : vector<1x32xf32> to vector<1x32xf32>
    %1048 = vector.broadcast %1047 : vector<1x32xf32> to vector<8x32xf32>
    %1049 = arith.select %1046, %1048, %1018 : vector<8x32xi1>, vector<8x32xf32>
    %1050 = vector.extract_strided_slice %857 {offsets = [6, 0], sizes = [1, 512], strides = [1, 1]} : vector<8x512xf32> to vector<1x512xf32>
    %1051 = vector.extract_strided_slice %1038 {offsets = [0, 0], sizes = [1, 32], strides = [1, 1]} : vector<1x128xf32> to vector<1x32xf32>
    %cst_188 = arith.constant dense<0.000000e+00> : vector<1x512xf32>
    %1052 = tpu.matmul %1051, %859, %cst_188 {dimension_numbers = #tpu.dot_dimension_numbers<[1], [0], [0], [1], [0, 0, 1, 1], [], []>} : vector<1x32xf32>, vector<32x512xf32>, vector<1x512xf32> -> vector<1x512xf32>
    %1053 = arith.addf %1050, %1052 : vector<1x512xf32>
    %1054 = vector.extract_strided_slice %1053 {offsets = [0, 0], sizes = [1, 384], strides = [1, 1]} : vector<1x512xf32> to vector<1x384xf32>
    %1055 = arith.negf %1054 : vector<1x384xf32>
    %1056 = math.exp %1055 : vector<1x384xf32>
    %cst_189 = arith.constant 1.000000e+00 : f32
    %1057 = vector.broadcast %cst_189 : f32 to vector<1x384xf32>
    %1058 = arith.addf %1057, %1056 : vector<1x384xf32>
    %1059 = arith.divf %1057, %1058 : vector<1x384xf32>
    %1060 = vector.extract_strided_slice %1059 {offsets = [0, 0], sizes = [1, 128], strides = [1, 1]} : vector<1x384xf32> to vector<1x128xf32>
    %1061 = vector.extract_strided_slice %1059 {offsets = [0, 128], sizes = [1, 128], strides = [1, 1]} : vector<1x384xf32> to vector<1x128xf32>
    %1062 = vector.extract_strided_slice %1059 {offsets = [0, 256], sizes = [1, 128], strides = [1, 1]} : vector<1x384xf32> to vector<1x128xf32>
    %1063 = vector.extract_strided_slice %1053 {offsets = [0, 384], sizes = [1, 128], strides = [1, 1]} : vector<1x512xf32> to vector<1x128xf32>
    %1064 = math.tanh %1063 : vector<1x128xf32>
    %1065 = arith.mulf %1061, %1036 : vector<1x128xf32>
    %1066 = arith.mulf %1060, %1064 : vector<1x128xf32>
    %1067 = arith.addf %1065, %1066 : vector<1x128xf32>
    %1068 = math.tanh %1067 : vector<1x128xf32>
    %1069 = arith.mulf %1062, %1068 : vector<1x128xf32>
    %1070 = vector.extract_strided_slice %1069 {offsets = [0, 0], sizes = [1, 32], strides = [1, 1]} : vector<1x128xf32> to vector<1x32xf32>
    %c6_i32_190 = arith.constant 6 : i32
    %1071 = vector.broadcast %c6_i32_190 : i32 to vector<8x32xi32>
    %1072 = arith.cmpi eq, %0, %1071 : vector<8x32xi32>
    %1073 = vector.shape_cast %1070 : vector<1x32xf32> to vector<1x32xf32>
    %1074 = vector.broadcast %1073 : vector<1x32xf32> to vector<8x32xf32>
    %1075 = arith.select %1072, %1074, %1044 : vector<8x32xi1>, vector<8x32xf32>
    %c1_i32_191 = arith.constant 1 : i32
    %1076 = vector.broadcast %c1_i32_191 : i32 to vector<8x32xi32>
    %1077 = arith.cmpi eq, %0, %1076 : vector<8x32xi32>
    %1078 = vector.shape_cast %1070 : vector<1x32xf32> to vector<1x32xf32>
    %1079 = vector.broadcast %1078 : vector<1x32xf32> to vector<8x32xf32>
    %1080 = arith.select %1077, %1079, %1049 : vector<8x32xi1>, vector<8x32xf32>
    %1081 = vector.extract_strided_slice %857 {offsets = [7, 0], sizes = [1, 512], strides = [1, 1]} : vector<8x512xf32> to vector<1x512xf32>
    %1082 = vector.extract_strided_slice %1069 {offsets = [0, 0], sizes = [1, 32], strides = [1, 1]} : vector<1x128xf32> to vector<1x32xf32>
    %cst_192 = arith.constant dense<0.000000e+00> : vector<1x512xf32>
    %1083 = tpu.matmul %1082, %859, %cst_192 {dimension_numbers = #tpu.dot_dimension_numbers<[1], [0], [0], [1], [0, 0, 1, 1], [], []>} : vector<1x32xf32>, vector<32x512xf32>, vector<1x512xf32> -> vector<1x512xf32>
    %1084 = arith.addf %1081, %1083 : vector<1x512xf32>
    %1085 = vector.extract_strided_slice %1084 {offsets = [0, 0], sizes = [1, 384], strides = [1, 1]} : vector<1x512xf32> to vector<1x384xf32>
    %1086 = arith.negf %1085 : vector<1x384xf32>
    %1087 = math.exp %1086 : vector<1x384xf32>
    %cst_193 = arith.constant 1.000000e+00 : f32
    %1088 = vector.broadcast %cst_193 : f32 to vector<1x384xf32>
    %1089 = arith.addf %1088, %1087 : vector<1x384xf32>
    %1090 = arith.divf %1088, %1089 : vector<1x384xf32>
    %1091 = vector.extract_strided_slice %1090 {offsets = [0, 0], sizes = [1, 128], strides = [1, 1]} : vector<1x384xf32> to vector<1x128xf32>
    %1092 = vector.extract_strided_slice %1090 {offsets = [0, 128], sizes = [1, 128], strides = [1, 1]} : vector<1x384xf32> to vector<1x128xf32>
    %1093 = vector.extract_strided_slice %1090 {offsets = [0, 256], sizes = [1, 128], strides = [1, 1]} : vector<1x384xf32> to vector<1x128xf32>
    %1094 = vector.extract_strided_slice %1084 {offsets = [0, 384], sizes = [1, 128], strides = [1, 1]} : vector<1x512xf32> to vector<1x128xf32>
    %1095 = math.tanh %1094 : vector<1x128xf32>
    %1096 = arith.mulf %1092, %1067 : vector<1x128xf32>
    %1097 = arith.mulf %1091, %1095 : vector<1x128xf32>
    %1098 = arith.addf %1096, %1097 : vector<1x128xf32>
    %1099 = math.tanh %1098 : vector<1x128xf32>
    %1100 = arith.mulf %1093, %1099 : vector<1x128xf32>
    %1101 = vector.extract_strided_slice %1100 {offsets = [0, 0], sizes = [1, 32], strides = [1, 1]} : vector<1x128xf32> to vector<1x32xf32>
    %c7_i32_194 = arith.constant 7 : i32
    %1102 = vector.broadcast %c7_i32_194 : i32 to vector<8x32xi32>
    %1103 = arith.cmpi eq, %0, %1102 : vector<8x32xi32>
    %1104 = vector.shape_cast %1101 : vector<1x32xf32> to vector<1x32xf32>
    %1105 = vector.broadcast %1104 : vector<1x32xf32> to vector<8x32xf32>
    %1106 = arith.select %1103, %1105, %1075 : vector<8x32xi1>, vector<8x32xf32>
    %c0_i32_195 = arith.constant 0 : i32
    %1107 = vector.broadcast %c0_i32_195 : i32 to vector<8x32xi32>
    %1108 = arith.cmpi eq, %0, %1107 : vector<8x32xi32>
    %1109 = vector.shape_cast %1101 : vector<1x32xf32> to vector<1x32xf32>
    %1110 = vector.broadcast %1109 : vector<1x32xf32> to vector<8x32xf32>
    %1111 = arith.select %1108, %1110, %1080 : vector<8x32xi1>, vector<8x32xf32>
    %c6 = arith.constant 6 : index
    %c0_196 = arith.constant 0 : index
    %c0_197 = arith.constant 0 : index
    %1112 = vector.load %arg2[%c6, %c0_196, %c0_197] : memref<8x32x512xf32, #tpu.memory_space<vmem>>, vector<1x32x512xf32>
    %1113 = vector.shape_cast %1112 : vector<1x32x512xf32> to vector<32x512xf32>
    %cst_198 = arith.constant dense<0.000000e+00> : vector<8x512xf32>
    %1114 = tpu.matmul %1106, %1113, %cst_198 {dimension_numbers = #tpu.dot_dimension_numbers<[1], [0], [0], [1], [0, 0, 1, 1], [], []>} : vector<8x32xf32>, vector<32x512xf32>, vector<8x512xf32> -> vector<8x512xf32>
    %c7 = arith.constant 7 : index
    %c0_199 = arith.constant 0 : index
    %c0_200 = arith.constant 0 : index
    %1115 = vector.load %arg2[%c7, %c0_199, %c0_200] : memref<8x32x512xf32, #tpu.memory_space<vmem>>, vector<1x32x512xf32>
    %1116 = vector.shape_cast %1115 : vector<1x32x512xf32> to vector<32x512xf32>
    %cst_201 = arith.constant dense<0.000000e+00> : vector<8x512xf32>
    %1117 = tpu.matmul %1111, %1116, %cst_201 {dimension_numbers = #tpu.dot_dimension_numbers<[1], [0], [0], [1], [0, 0, 1, 1], [], []>} : vector<8x32xf32>, vector<32x512xf32>, vector<8x512xf32> -> vector<8x512xf32>
    %1118 = arith.addf %1114, %1117 : vector<8x512xf32>
    %c4_202 = arith.constant 4 : index
    %c0_203 = arith.constant 0 : index
    %c0_204 = arith.constant 0 : index
    %1119 = vector.load %arg4[%c4_202, %c0_203, %c0_204] : memref<5x1x512xf32, #tpu.memory_space<vmem>>, vector<1x1x512xf32>
    %1120 = vector.shape_cast %1119 : vector<1x1x512xf32> to vector<1x512xf32>
    %1121 = vector.broadcast %1120 : vector<1x512xf32> to vector<8x512xf32>
    %1122 = arith.addf %1118, %1121 : vector<8x512xf32>
    %c4_205 = arith.constant 4 : index
    %c0_206 = arith.constant 0 : index
    %c0_207 = arith.constant 0 : index
    %1123 = vector.load %arg3[%c4_205, %c0_206, %c0_207] : memref<5x32x512xf32, #tpu.memory_space<vmem>>, vector<1x32x512xf32>
    %1124 = vector.shape_cast %1123 : vector<1x32x512xf32> to vector<32x512xf32>
    %cst_208 = arith.constant 0.000000e+00 : f32
    %1125 = vector.broadcast %cst_208 : f32 to vector<1x128xf32>
    %cst_209 = arith.constant 0.000000e+00 : f32
    %1126 = vector.broadcast %cst_209 : f32 to vector<1x128xf32>
    %cst_210 = arith.constant 0.000000e+00 : f32
    %1127 = vector.broadcast %cst_210 : f32 to vector<8x32xf32>
    %cst_211 = arith.constant 0.000000e+00 : f32
    %1128 = vector.broadcast %cst_211 : f32 to vector<8x32xf32>
    %1129 = vector.extract_strided_slice %1122 {offsets = [0, 0], sizes = [1, 512], strides = [1, 1]} : vector<8x512xf32> to vector<1x512xf32>
    %1130 = vector.extract_strided_slice %1125 {offsets = [0, 0], sizes = [1, 32], strides = [1, 1]} : vector<1x128xf32> to vector<1x32xf32>
    %cst_212 = arith.constant dense<0.000000e+00> : vector<1x512xf32>
    %1131 = tpu.matmul %1130, %1124, %cst_212 {dimension_numbers = #tpu.dot_dimension_numbers<[1], [0], [0], [1], [0, 0, 1, 1], [], []>} : vector<1x32xf32>, vector<32x512xf32>, vector<1x512xf32> -> vector<1x512xf32>
    %1132 = arith.addf %1129, %1131 : vector<1x512xf32>
    %1133 = vector.extract_strided_slice %1132 {offsets = [0, 0], sizes = [1, 384], strides = [1, 1]} : vector<1x512xf32> to vector<1x384xf32>
    %1134 = arith.negf %1133 : vector<1x384xf32>
    %1135 = math.exp %1134 : vector<1x384xf32>
    %cst_213 = arith.constant 1.000000e+00 : f32
    %1136 = vector.broadcast %cst_213 : f32 to vector<1x384xf32>
    %1137 = arith.addf %1136, %1135 : vector<1x384xf32>
    %1138 = arith.divf %1136, %1137 : vector<1x384xf32>
    %1139 = vector.extract_strided_slice %1138 {offsets = [0, 0], sizes = [1, 128], strides = [1, 1]} : vector<1x384xf32> to vector<1x128xf32>
    %1140 = vector.extract_strided_slice %1138 {offsets = [0, 128], sizes = [1, 128], strides = [1, 1]} : vector<1x384xf32> to vector<1x128xf32>
    %1141 = vector.extract_strided_slice %1138 {offsets = [0, 256], sizes = [1, 128], strides = [1, 1]} : vector<1x384xf32> to vector<1x128xf32>
    %1142 = vector.extract_strided_slice %1132 {offsets = [0, 384], sizes = [1, 128], strides = [1, 1]} : vector<1x512xf32> to vector<1x128xf32>
    %1143 = math.tanh %1142 : vector<1x128xf32>
    %1144 = arith.mulf %1140, %1126 : vector<1x128xf32>
    %1145 = arith.mulf %1139, %1143 : vector<1x128xf32>
    %1146 = arith.addf %1144, %1145 : vector<1x128xf32>
    %1147 = math.tanh %1146 : vector<1x128xf32>
    %1148 = arith.mulf %1141, %1147 : vector<1x128xf32>
    %1149 = vector.extract_strided_slice %1148 {offsets = [0, 0], sizes = [1, 32], strides = [1, 1]} : vector<1x128xf32> to vector<1x32xf32>
    %c0_i32_214 = arith.constant 0 : i32
    %1150 = vector.broadcast %c0_i32_214 : i32 to vector<8x32xi32>
    %1151 = arith.cmpi eq, %0, %1150 : vector<8x32xi32>
    %1152 = vector.shape_cast %1149 : vector<1x32xf32> to vector<1x32xf32>
    %1153 = vector.broadcast %1152 : vector<1x32xf32> to vector<8x32xf32>
    %1154 = arith.select %1151, %1153, %1127 : vector<8x32xi1>, vector<8x32xf32>
    %c7_i32_215 = arith.constant 7 : i32
    %1155 = vector.broadcast %c7_i32_215 : i32 to vector<8x32xi32>
    %1156 = arith.cmpi eq, %0, %1155 : vector<8x32xi32>
    %1157 = vector.shape_cast %1149 : vector<1x32xf32> to vector<1x32xf32>
    %1158 = vector.broadcast %1157 : vector<1x32xf32> to vector<8x32xf32>
    %1159 = arith.select %1156, %1158, %1128 : vector<8x32xi1>, vector<8x32xf32>
    %1160 = vector.extract_strided_slice %1122 {offsets = [1, 0], sizes = [1, 512], strides = [1, 1]} : vector<8x512xf32> to vector<1x512xf32>
    %1161 = vector.extract_strided_slice %1148 {offsets = [0, 0], sizes = [1, 32], strides = [1, 1]} : vector<1x128xf32> to vector<1x32xf32>
    %cst_216 = arith.constant dense<0.000000e+00> : vector<1x512xf32>
    %1162 = tpu.matmul %1161, %1124, %cst_216 {dimension_numbers = #tpu.dot_dimension_numbers<[1], [0], [0], [1], [0, 0, 1, 1], [], []>} : vector<1x32xf32>, vector<32x512xf32>, vector<1x512xf32> -> vector<1x512xf32>
    %1163 = arith.addf %1160, %1162 : vector<1x512xf32>
    %1164 = vector.extract_strided_slice %1163 {offsets = [0, 0], sizes = [1, 384], strides = [1, 1]} : vector<1x512xf32> to vector<1x384xf32>
    %1165 = arith.negf %1164 : vector<1x384xf32>
    %1166 = math.exp %1165 : vector<1x384xf32>
    %cst_217 = arith.constant 1.000000e+00 : f32
    %1167 = vector.broadcast %cst_217 : f32 to vector<1x384xf32>
    %1168 = arith.addf %1167, %1166 : vector<1x384xf32>
    %1169 = arith.divf %1167, %1168 : vector<1x384xf32>
    %1170 = vector.extract_strided_slice %1169 {offsets = [0, 0], sizes = [1, 128], strides = [1, 1]} : vector<1x384xf32> to vector<1x128xf32>
    %1171 = vector.extract_strided_slice %1169 {offsets = [0, 128], sizes = [1, 128], strides = [1, 1]} : vector<1x384xf32> to vector<1x128xf32>
    %1172 = vector.extract_strided_slice %1169 {offsets = [0, 256], sizes = [1, 128], strides = [1, 1]} : vector<1x384xf32> to vector<1x128xf32>
    %1173 = vector.extract_strided_slice %1163 {offsets = [0, 384], sizes = [1, 128], strides = [1, 1]} : vector<1x512xf32> to vector<1x128xf32>
    %1174 = math.tanh %1173 : vector<1x128xf32>
    %1175 = arith.mulf %1171, %1146 : vector<1x128xf32>
    %1176 = arith.mulf %1170, %1174 : vector<1x128xf32>
    %1177 = arith.addf %1175, %1176 : vector<1x128xf32>
    %1178 = math.tanh %1177 : vector<1x128xf32>
    %1179 = arith.mulf %1172, %1178 : vector<1x128xf32>
    %1180 = vector.extract_strided_slice %1179 {offsets = [0, 0], sizes = [1, 32], strides = [1, 1]} : vector<1x128xf32> to vector<1x32xf32>
    %c1_i32_218 = arith.constant 1 : i32
    %1181 = vector.broadcast %c1_i32_218 : i32 to vector<8x32xi32>
    %1182 = arith.cmpi eq, %0, %1181 : vector<8x32xi32>
    %1183 = vector.shape_cast %1180 : vector<1x32xf32> to vector<1x32xf32>
    %1184 = vector.broadcast %1183 : vector<1x32xf32> to vector<8x32xf32>
    %1185 = arith.select %1182, %1184, %1154 : vector<8x32xi1>, vector<8x32xf32>
    %c6_i32_219 = arith.constant 6 : i32
    %1186 = vector.broadcast %c6_i32_219 : i32 to vector<8x32xi32>
    %1187 = arith.cmpi eq, %0, %1186 : vector<8x32xi32>
    %1188 = vector.shape_cast %1180 : vector<1x32xf32> to vector<1x32xf32>
    %1189 = vector.broadcast %1188 : vector<1x32xf32> to vector<8x32xf32>
    %1190 = arith.select %1187, %1189, %1159 : vector<8x32xi1>, vector<8x32xf32>
    %1191 = vector.extract_strided_slice %1122 {offsets = [2, 0], sizes = [1, 512], strides = [1, 1]} : vector<8x512xf32> to vector<1x512xf32>
    %1192 = vector.extract_strided_slice %1179 {offsets = [0, 0], sizes = [1, 32], strides = [1, 1]} : vector<1x128xf32> to vector<1x32xf32>
    %cst_220 = arith.constant dense<0.000000e+00> : vector<1x512xf32>
    %1193 = tpu.matmul %1192, %1124, %cst_220 {dimension_numbers = #tpu.dot_dimension_numbers<[1], [0], [0], [1], [0, 0, 1, 1], [], []>} : vector<1x32xf32>, vector<32x512xf32>, vector<1x512xf32> -> vector<1x512xf32>
    %1194 = arith.addf %1191, %1193 : vector<1x512xf32>
    %1195 = vector.extract_strided_slice %1194 {offsets = [0, 0], sizes = [1, 384], strides = [1, 1]} : vector<1x512xf32> to vector<1x384xf32>
    %1196 = arith.negf %1195 : vector<1x384xf32>
    %1197 = math.exp %1196 : vector<1x384xf32>
    %cst_221 = arith.constant 1.000000e+00 : f32
    %1198 = vector.broadcast %cst_221 : f32 to vector<1x384xf32>
    %1199 = arith.addf %1198, %1197 : vector<1x384xf32>
    %1200 = arith.divf %1198, %1199 : vector<1x384xf32>
    %1201 = vector.extract_strided_slice %1200 {offsets = [0, 0], sizes = [1, 128], strides = [1, 1]} : vector<1x384xf32> to vector<1x128xf32>
    %1202 = vector.extract_strided_slice %1200 {offsets = [0, 128], sizes = [1, 128], strides = [1, 1]} : vector<1x384xf32> to vector<1x128xf32>
    %1203 = vector.extract_strided_slice %1200 {offsets = [0, 256], sizes = [1, 128], strides = [1, 1]} : vector<1x384xf32> to vector<1x128xf32>
    %1204 = vector.extract_strided_slice %1194 {offsets = [0, 384], sizes = [1, 128], strides = [1, 1]} : vector<1x512xf32> to vector<1x128xf32>
    %1205 = math.tanh %1204 : vector<1x128xf32>
    %1206 = arith.mulf %1202, %1177 : vector<1x128xf32>
    %1207 = arith.mulf %1201, %1205 : vector<1x128xf32>
    %1208 = arith.addf %1206, %1207 : vector<1x128xf32>
    %1209 = math.tanh %1208 : vector<1x128xf32>
    %1210 = arith.mulf %1203, %1209 : vector<1x128xf32>
    %1211 = vector.extract_strided_slice %1210 {offsets = [0, 0], sizes = [1, 32], strides = [1, 1]} : vector<1x128xf32> to vector<1x32xf32>
    %c2_i32_222 = arith.constant 2 : i32
    %1212 = vector.broadcast %c2_i32_222 : i32 to vector<8x32xi32>
    %1213 = arith.cmpi eq, %0, %1212 : vector<8x32xi32>
    %1214 = vector.shape_cast %1211 : vector<1x32xf32> to vector<1x32xf32>
    %1215 = vector.broadcast %1214 : vector<1x32xf32> to vector<8x32xf32>
    %1216 = arith.select %1213, %1215, %1185 : vector<8x32xi1>, vector<8x32xf32>
    %c5_i32_223 = arith.constant 5 : i32
    %1217 = vector.broadcast %c5_i32_223 : i32 to vector<8x32xi32>
    %1218 = arith.cmpi eq, %0, %1217 : vector<8x32xi32>
    %1219 = vector.shape_cast %1211 : vector<1x32xf32> to vector<1x32xf32>
    %1220 = vector.broadcast %1219 : vector<1x32xf32> to vector<8x32xf32>
    %1221 = arith.select %1218, %1220, %1190 : vector<8x32xi1>, vector<8x32xf32>
    %1222 = vector.extract_strided_slice %1122 {offsets = [3, 0], sizes = [1, 512], strides = [1, 1]} : vector<8x512xf32> to vector<1x512xf32>
    %1223 = vector.extract_strided_slice %1210 {offsets = [0, 0], sizes = [1, 32], strides = [1, 1]} : vector<1x128xf32> to vector<1x32xf32>
    %cst_224 = arith.constant dense<0.000000e+00> : vector<1x512xf32>
    %1224 = tpu.matmul %1223, %1124, %cst_224 {dimension_numbers = #tpu.dot_dimension_numbers<[1], [0], [0], [1], [0, 0, 1, 1], [], []>} : vector<1x32xf32>, vector<32x512xf32>, vector<1x512xf32> -> vector<1x512xf32>
    %1225 = arith.addf %1222, %1224 : vector<1x512xf32>
    %1226 = vector.extract_strided_slice %1225 {offsets = [0, 0], sizes = [1, 384], strides = [1, 1]} : vector<1x512xf32> to vector<1x384xf32>
    %1227 = arith.negf %1226 : vector<1x384xf32>
    %1228 = math.exp %1227 : vector<1x384xf32>
    %cst_225 = arith.constant 1.000000e+00 : f32
    %1229 = vector.broadcast %cst_225 : f32 to vector<1x384xf32>
    %1230 = arith.addf %1229, %1228 : vector<1x384xf32>
    %1231 = arith.divf %1229, %1230 : vector<1x384xf32>
    %1232 = vector.extract_strided_slice %1231 {offsets = [0, 0], sizes = [1, 128], strides = [1, 1]} : vector<1x384xf32> to vector<1x128xf32>
    %1233 = vector.extract_strided_slice %1231 {offsets = [0, 128], sizes = [1, 128], strides = [1, 1]} : vector<1x384xf32> to vector<1x128xf32>
    %1234 = vector.extract_strided_slice %1231 {offsets = [0, 256], sizes = [1, 128], strides = [1, 1]} : vector<1x384xf32> to vector<1x128xf32>
    %1235 = vector.extract_strided_slice %1225 {offsets = [0, 384], sizes = [1, 128], strides = [1, 1]} : vector<1x512xf32> to vector<1x128xf32>
    %1236 = math.tanh %1235 : vector<1x128xf32>
    %1237 = arith.mulf %1233, %1208 : vector<1x128xf32>
    %1238 = arith.mulf %1232, %1236 : vector<1x128xf32>
    %1239 = arith.addf %1237, %1238 : vector<1x128xf32>
    %1240 = math.tanh %1239 : vector<1x128xf32>
    %1241 = arith.mulf %1234, %1240 : vector<1x128xf32>
    %1242 = vector.extract_strided_slice %1241 {offsets = [0, 0], sizes = [1, 32], strides = [1, 1]} : vector<1x128xf32> to vector<1x32xf32>
    %c3_i32_226 = arith.constant 3 : i32
    %1243 = vector.broadcast %c3_i32_226 : i32 to vector<8x32xi32>
    %1244 = arith.cmpi eq, %0, %1243 : vector<8x32xi32>
    %1245 = vector.shape_cast %1242 : vector<1x32xf32> to vector<1x32xf32>
    %1246 = vector.broadcast %1245 : vector<1x32xf32> to vector<8x32xf32>
    %1247 = arith.select %1244, %1246, %1216 : vector<8x32xi1>, vector<8x32xf32>
    %c4_i32_227 = arith.constant 4 : i32
    %1248 = vector.broadcast %c4_i32_227 : i32 to vector<8x32xi32>
    %1249 = arith.cmpi eq, %0, %1248 : vector<8x32xi32>
    %1250 = vector.shape_cast %1242 : vector<1x32xf32> to vector<1x32xf32>
    %1251 = vector.broadcast %1250 : vector<1x32xf32> to vector<8x32xf32>
    %1252 = arith.select %1249, %1251, %1221 : vector<8x32xi1>, vector<8x32xf32>
    %1253 = vector.extract_strided_slice %1122 {offsets = [4, 0], sizes = [1, 512], strides = [1, 1]} : vector<8x512xf32> to vector<1x512xf32>
    %1254 = vector.extract_strided_slice %1241 {offsets = [0, 0], sizes = [1, 32], strides = [1, 1]} : vector<1x128xf32> to vector<1x32xf32>
    %cst_228 = arith.constant dense<0.000000e+00> : vector<1x512xf32>
    %1255 = tpu.matmul %1254, %1124, %cst_228 {dimension_numbers = #tpu.dot_dimension_numbers<[1], [0], [0], [1], [0, 0, 1, 1], [], []>} : vector<1x32xf32>, vector<32x512xf32>, vector<1x512xf32> -> vector<1x512xf32>
    %1256 = arith.addf %1253, %1255 : vector<1x512xf32>
    %1257 = vector.extract_strided_slice %1256 {offsets = [0, 0], sizes = [1, 384], strides = [1, 1]} : vector<1x512xf32> to vector<1x384xf32>
    %1258 = arith.negf %1257 : vector<1x384xf32>
    %1259 = math.exp %1258 : vector<1x384xf32>
    %cst_229 = arith.constant 1.000000e+00 : f32
    %1260 = vector.broadcast %cst_229 : f32 to vector<1x384xf32>
    %1261 = arith.addf %1260, %1259 : vector<1x384xf32>
    %1262 = arith.divf %1260, %1261 : vector<1x384xf32>
    %1263 = vector.extract_strided_slice %1262 {offsets = [0, 0], sizes = [1, 128], strides = [1, 1]} : vector<1x384xf32> to vector<1x128xf32>
    %1264 = vector.extract_strided_slice %1262 {offsets = [0, 128], sizes = [1, 128], strides = [1, 1]} : vector<1x384xf32> to vector<1x128xf32>
    %1265 = vector.extract_strided_slice %1262 {offsets = [0, 256], sizes = [1, 128], strides = [1, 1]} : vector<1x384xf32> to vector<1x128xf32>
    %1266 = vector.extract_strided_slice %1256 {offsets = [0, 384], sizes = [1, 128], strides = [1, 1]} : vector<1x512xf32> to vector<1x128xf32>
    %1267 = math.tanh %1266 : vector<1x128xf32>
    %1268 = arith.mulf %1264, %1239 : vector<1x128xf32>
    %1269 = arith.mulf %1263, %1267 : vector<1x128xf32>
    %1270 = arith.addf %1268, %1269 : vector<1x128xf32>
    %1271 = math.tanh %1270 : vector<1x128xf32>
    %1272 = arith.mulf %1265, %1271 : vector<1x128xf32>
    %1273 = vector.extract_strided_slice %1272 {offsets = [0, 0], sizes = [1, 32], strides = [1, 1]} : vector<1x128xf32> to vector<1x32xf32>
    %c4_i32_230 = arith.constant 4 : i32
    %1274 = vector.broadcast %c4_i32_230 : i32 to vector<8x32xi32>
    %1275 = arith.cmpi eq, %0, %1274 : vector<8x32xi32>
    %1276 = vector.shape_cast %1273 : vector<1x32xf32> to vector<1x32xf32>
    %1277 = vector.broadcast %1276 : vector<1x32xf32> to vector<8x32xf32>
    %1278 = arith.select %1275, %1277, %1247 : vector<8x32xi1>, vector<8x32xf32>
    %c3_i32_231 = arith.constant 3 : i32
    %1279 = vector.broadcast %c3_i32_231 : i32 to vector<8x32xi32>
    %1280 = arith.cmpi eq, %0, %1279 : vector<8x32xi32>
    %1281 = vector.shape_cast %1273 : vector<1x32xf32> to vector<1x32xf32>
    %1282 = vector.broadcast %1281 : vector<1x32xf32> to vector<8x32xf32>
    %1283 = arith.select %1280, %1282, %1252 : vector<8x32xi1>, vector<8x32xf32>
    %1284 = vector.extract_strided_slice %1122 {offsets = [5, 0], sizes = [1, 512], strides = [1, 1]} : vector<8x512xf32> to vector<1x512xf32>
    %1285 = vector.extract_strided_slice %1272 {offsets = [0, 0], sizes = [1, 32], strides = [1, 1]} : vector<1x128xf32> to vector<1x32xf32>
    %cst_232 = arith.constant dense<0.000000e+00> : vector<1x512xf32>
    %1286 = tpu.matmul %1285, %1124, %cst_232 {dimension_numbers = #tpu.dot_dimension_numbers<[1], [0], [0], [1], [0, 0, 1, 1], [], []>} : vector<1x32xf32>, vector<32x512xf32>, vector<1x512xf32> -> vector<1x512xf32>
    %1287 = arith.addf %1284, %1286 : vector<1x512xf32>
    %1288 = vector.extract_strided_slice %1287 {offsets = [0, 0], sizes = [1, 384], strides = [1, 1]} : vector<1x512xf32> to vector<1x384xf32>
    %1289 = arith.negf %1288 : vector<1x384xf32>
    %1290 = math.exp %1289 : vector<1x384xf32>
    %cst_233 = arith.constant 1.000000e+00 : f32
    %1291 = vector.broadcast %cst_233 : f32 to vector<1x384xf32>
    %1292 = arith.addf %1291, %1290 : vector<1x384xf32>
    %1293 = arith.divf %1291, %1292 : vector<1x384xf32>
    %1294 = vector.extract_strided_slice %1293 {offsets = [0, 0], sizes = [1, 128], strides = [1, 1]} : vector<1x384xf32> to vector<1x128xf32>
    %1295 = vector.extract_strided_slice %1293 {offsets = [0, 128], sizes = [1, 128], strides = [1, 1]} : vector<1x384xf32> to vector<1x128xf32>
    %1296 = vector.extract_strided_slice %1293 {offsets = [0, 256], sizes = [1, 128], strides = [1, 1]} : vector<1x384xf32> to vector<1x128xf32>
    %1297 = vector.extract_strided_slice %1287 {offsets = [0, 384], sizes = [1, 128], strides = [1, 1]} : vector<1x512xf32> to vector<1x128xf32>
    %1298 = math.tanh %1297 : vector<1x128xf32>
    %1299 = arith.mulf %1295, %1270 : vector<1x128xf32>
    %1300 = arith.mulf %1294, %1298 : vector<1x128xf32>
    %1301 = arith.addf %1299, %1300 : vector<1x128xf32>
    %1302 = math.tanh %1301 : vector<1x128xf32>
    %1303 = arith.mulf %1296, %1302 : vector<1x128xf32>
    %1304 = vector.extract_strided_slice %1303 {offsets = [0, 0], sizes = [1, 32], strides = [1, 1]} : vector<1x128xf32> to vector<1x32xf32>
    %c5_i32_234 = arith.constant 5 : i32
    %1305 = vector.broadcast %c5_i32_234 : i32 to vector<8x32xi32>
    %1306 = arith.cmpi eq, %0, %1305 : vector<8x32xi32>
    %1307 = vector.shape_cast %1304 : vector<1x32xf32> to vector<1x32xf32>
    %1308 = vector.broadcast %1307 : vector<1x32xf32> to vector<8x32xf32>
    %1309 = arith.select %1306, %1308, %1278 : vector<8x32xi1>, vector<8x32xf32>
    %c2_i32_235 = arith.constant 2 : i32
    %1310 = vector.broadcast %c2_i32_235 : i32 to vector<8x32xi32>
    %1311 = arith.cmpi eq, %0, %1310 : vector<8x32xi32>
    %1312 = vector.shape_cast %1304 : vector<1x32xf32> to vector<1x32xf32>
    %1313 = vector.broadcast %1312 : vector<1x32xf32> to vector<8x32xf32>
    %1314 = arith.select %1311, %1313, %1283 : vector<8x32xi1>, vector<8x32xf32>
    %1315 = vector.extract_strided_slice %1122 {offsets = [6, 0], sizes = [1, 512], strides = [1, 1]} : vector<8x512xf32> to vector<1x512xf32>
    %1316 = vector.extract_strided_slice %1303 {offsets = [0, 0], sizes = [1, 32], strides = [1, 1]} : vector<1x128xf32> to vector<1x32xf32>
    %cst_236 = arith.constant dense<0.000000e+00> : vector<1x512xf32>
    %1317 = tpu.matmul %1316, %1124, %cst_236 {dimension_numbers = #tpu.dot_dimension_numbers<[1], [0], [0], [1], [0, 0, 1, 1], [], []>} : vector<1x32xf32>, vector<32x512xf32>, vector<1x512xf32> -> vector<1x512xf32>
    %1318 = arith.addf %1315, %1317 : vector<1x512xf32>
    %1319 = vector.extract_strided_slice %1318 {offsets = [0, 0], sizes = [1, 384], strides = [1, 1]} : vector<1x512xf32> to vector<1x384xf32>
    %1320 = arith.negf %1319 : vector<1x384xf32>
    %1321 = math.exp %1320 : vector<1x384xf32>
    %cst_237 = arith.constant 1.000000e+00 : f32
    %1322 = vector.broadcast %cst_237 : f32 to vector<1x384xf32>
    %1323 = arith.addf %1322, %1321 : vector<1x384xf32>
    %1324 = arith.divf %1322, %1323 : vector<1x384xf32>
    %1325 = vector.extract_strided_slice %1324 {offsets = [0, 0], sizes = [1, 128], strides = [1, 1]} : vector<1x384xf32> to vector<1x128xf32>
    %1326 = vector.extract_strided_slice %1324 {offsets = [0, 128], sizes = [1, 128], strides = [1, 1]} : vector<1x384xf32> to vector<1x128xf32>
    %1327 = vector.extract_strided_slice %1324 {offsets = [0, 256], sizes = [1, 128], strides = [1, 1]} : vector<1x384xf32> to vector<1x128xf32>
    %1328 = vector.extract_strided_slice %1318 {offsets = [0, 384], sizes = [1, 128], strides = [1, 1]} : vector<1x512xf32> to vector<1x128xf32>
    %1329 = math.tanh %1328 : vector<1x128xf32>
    %1330 = arith.mulf %1326, %1301 : vector<1x128xf32>
    %1331 = arith.mulf %1325, %1329 : vector<1x128xf32>
    %1332 = arith.addf %1330, %1331 : vector<1x128xf32>
    %1333 = math.tanh %1332 : vector<1x128xf32>
    %1334 = arith.mulf %1327, %1333 : vector<1x128xf32>
    %1335 = vector.extract_strided_slice %1334 {offsets = [0, 0], sizes = [1, 32], strides = [1, 1]} : vector<1x128xf32> to vector<1x32xf32>
    %c6_i32_238 = arith.constant 6 : i32
    %1336 = vector.broadcast %c6_i32_238 : i32 to vector<8x32xi32>
    %1337 = arith.cmpi eq, %0, %1336 : vector<8x32xi32>
    %1338 = vector.shape_cast %1335 : vector<1x32xf32> to vector<1x32xf32>
    %1339 = vector.broadcast %1338 : vector<1x32xf32> to vector<8x32xf32>
    %1340 = arith.select %1337, %1339, %1309 : vector<8x32xi1>, vector<8x32xf32>
    %c1_i32_239 = arith.constant 1 : i32
    %1341 = vector.broadcast %c1_i32_239 : i32 to vector<8x32xi32>
    %1342 = arith.cmpi eq, %0, %1341 : vector<8x32xi32>
    %1343 = vector.shape_cast %1335 : vector<1x32xf32> to vector<1x32xf32>
    %1344 = vector.broadcast %1343 : vector<1x32xf32> to vector<8x32xf32>
    %1345 = arith.select %1342, %1344, %1314 : vector<8x32xi1>, vector<8x32xf32>
    %1346 = vector.extract_strided_slice %1122 {offsets = [7, 0], sizes = [1, 512], strides = [1, 1]} : vector<8x512xf32> to vector<1x512xf32>
    %1347 = vector.extract_strided_slice %1334 {offsets = [0, 0], sizes = [1, 32], strides = [1, 1]} : vector<1x128xf32> to vector<1x32xf32>
    %cst_240 = arith.constant dense<0.000000e+00> : vector<1x512xf32>
    %1348 = tpu.matmul %1347, %1124, %cst_240 {dimension_numbers = #tpu.dot_dimension_numbers<[1], [0], [0], [1], [0, 0, 1, 1], [], []>} : vector<1x32xf32>, vector<32x512xf32>, vector<1x512xf32> -> vector<1x512xf32>
    %1349 = arith.addf %1346, %1348 : vector<1x512xf32>
    %1350 = vector.extract_strided_slice %1349 {offsets = [0, 0], sizes = [1, 384], strides = [1, 1]} : vector<1x512xf32> to vector<1x384xf32>
    %1351 = arith.negf %1350 : vector<1x384xf32>
    %1352 = math.exp %1351 : vector<1x384xf32>
    %cst_241 = arith.constant 1.000000e+00 : f32
    %1353 = vector.broadcast %cst_241 : f32 to vector<1x384xf32>
    %1354 = arith.addf %1353, %1352 : vector<1x384xf32>
    %1355 = arith.divf %1353, %1354 : vector<1x384xf32>
    %1356 = vector.extract_strided_slice %1355 {offsets = [0, 0], sizes = [1, 128], strides = [1, 1]} : vector<1x384xf32> to vector<1x128xf32>
    %1357 = vector.extract_strided_slice %1355 {offsets = [0, 128], sizes = [1, 128], strides = [1, 1]} : vector<1x384xf32> to vector<1x128xf32>
    %1358 = vector.extract_strided_slice %1355 {offsets = [0, 256], sizes = [1, 128], strides = [1, 1]} : vector<1x384xf32> to vector<1x128xf32>
    %1359 = vector.extract_strided_slice %1349 {offsets = [0, 384], sizes = [1, 128], strides = [1, 1]} : vector<1x512xf32> to vector<1x128xf32>
    %1360 = math.tanh %1359 : vector<1x128xf32>
    %1361 = arith.mulf %1357, %1332 : vector<1x128xf32>
    %1362 = arith.mulf %1356, %1360 : vector<1x128xf32>
    %1363 = arith.addf %1361, %1362 : vector<1x128xf32>
    %1364 = math.tanh %1363 : vector<1x128xf32>
    %1365 = arith.mulf %1358, %1364 : vector<1x128xf32>
    %1366 = vector.extract_strided_slice %1365 {offsets = [0, 0], sizes = [1, 32], strides = [1, 1]} : vector<1x128xf32> to vector<1x32xf32>
    %c7_i32_242 = arith.constant 7 : i32
    %1367 = vector.broadcast %c7_i32_242 : i32 to vector<8x32xi32>
    %1368 = arith.cmpi eq, %0, %1367 : vector<8x32xi32>
    %1369 = vector.shape_cast %1366 : vector<1x32xf32> to vector<1x32xf32>
    %1370 = vector.broadcast %1369 : vector<1x32xf32> to vector<8x32xf32>
    %1371 = arith.select %1368, %1370, %1340 : vector<8x32xi1>, vector<8x32xf32>
    %c0_i32_243 = arith.constant 0 : i32
    %1372 = vector.broadcast %c0_i32_243 : i32 to vector<8x32xi32>
    %1373 = arith.cmpi eq, %0, %1372 : vector<8x32xi32>
    %1374 = vector.shape_cast %1366 : vector<1x32xf32> to vector<1x32xf32>
    %1375 = vector.broadcast %1374 : vector<1x32xf32> to vector<8x32xf32>
    %1376 = arith.select %1373, %1375, %1345 : vector<8x32xi1>, vector<8x32xf32>
    %c0_244 = arith.constant 0 : index
    %c0_245 = arith.constant 0 : index
    %c0_246 = arith.constant 0 : index
    %1377 = vector.load %arg5[%c0_244, %c0_245, %c0_246] : memref<2x32x5xf32, #tpu.memory_space<vmem>>, vector<1x32x5xf32>
    %1378 = vector.shape_cast %1377 : vector<1x32x5xf32> to vector<32x5xf32>
    %cst_247 = arith.constant dense<0.000000e+00> : vector<8x5xf32>
    %1379 = tpu.matmul %1371, %1378, %cst_247 {dimension_numbers = #tpu.dot_dimension_numbers<[1], [0], [0], [1], [0, 0, 1, 1], [], []>} : vector<8x32xf32>, vector<32x5xf32>, vector<8x5xf32> -> vector<8x5xf32>
    %c1_248 = arith.constant 1 : index
    %c0_249 = arith.constant 0 : index
    %c0_250 = arith.constant 0 : index
    %1380 = vector.load %arg5[%c1_248, %c0_249, %c0_250] : memref<2x32x5xf32, #tpu.memory_space<vmem>>, vector<1x32x5xf32>
    %1381 = vector.shape_cast %1380 : vector<1x32x5xf32> to vector<32x5xf32>
    %cst_251 = arith.constant dense<0.000000e+00> : vector<8x5xf32>
    %1382 = tpu.matmul %1376, %1381, %cst_251 {dimension_numbers = #tpu.dot_dimension_numbers<[1], [0], [0], [1], [0, 0, 1, 1], [], []>} : vector<8x32xf32>, vector<32x5xf32>, vector<8x5xf32> -> vector<8x5xf32>
    %1383 = arith.addf %1379, %1382 : vector<8x5xf32>
    %c0_252 = arith.constant 0 : index
    %c0_253 = arith.constant 0 : index
    %1384 = vector.load %arg6[%c0_252, %c0_253] : memref<1x5xf32, #tpu.memory_space<vmem>>, vector<1x5xf32>
    %1385 = vector.broadcast %1384 : vector<1x5xf32> to vector<8x5xf32>
    %1386 = arith.addf %1383, %1385 : vector<8x5xf32>
    %c0_254 = arith.constant 0 : index
    %c0_255 = arith.constant 0 : index
    %1387 = vector.load %arg7[%c0_254, %c0_255] : memref<5x5xf32, #tpu.memory_space<vmem>>, vector<5x5xf32>
    %1388 = tpu.iota {dimensions = array<i32: 0>} : vector<5x5xi32>
    %1389 = tpu.iota {dimensions = array<i32: 1>} : vector<5x5xi32>
    %1390 = arith.cmpi eq, %1388, %1389 : vector<5x5xi32>
    %1391 = tpu.iota {dimensions = array<i32: 1>} : vector<1x5xi32>
    %c0_256 = arith.constant 0 : index
    %c0_257 = arith.constant 0 : index
    %1392 = vector.load %arg9[%c0_256, %c0_257] : memref<5x1xf32, #tpu.memory_space<vmem>>, vector<5x1xf32>
    %1393 = vector.broadcast %1392 : vector<5x1xf32> to vector<5x5xf32>
    %1394 = arith.addf %1393, %1387 : vector<5x5xf32>
    %cst_258 = arith.constant dense<0xFF800000> : vector<5xf32>
    %1395 = vector.multi_reduction <maximumf>, %1394, %cst_258 [0] : vector<5x5xf32> to vector<5xf32>
    %1396 = vector.shape_cast %1395 : vector<5xf32> to vector<1x5xf32>
    %1397 = vector.broadcast %1396 : vector<1x5xf32> to vector<5x5xf32>
    %1398 = arith.cmpf oeq, %1394, %1397 : vector<5x5xf32>
    %c5_i32_259 = arith.constant 5 : i32
    %1399 = vector.broadcast %c5_i32_259 : i32 to vector<5x5xi32>
    %1400 = arith.select %1398, %1388, %1399 : vector<5x5xi1>, vector<5x5xi32>
    %cst_260 = arith.constant dense<2147483647> : vector<5xi32>
    %1401 = vector.multi_reduction <minsi>, %1400, %cst_260 [0] : vector<5x5xi32> to vector<5xi32>
    %1402 = vector.shape_cast %1401 : vector<5xi32> to vector<1x5xi32>
    %c0_261 = arith.constant 0 : index
    %c0_262 = arith.constant 0 : index
    %1403 = vector.load %arg13[%c0_261, %c0_262] : memref<8x5xi32, #tpu.memory_space<vmem>>, vector<1x5xi32>
    tpu.vector_store %arg13[%c0_261, %c0_262], %1402 {strides = array<i32>} : memref<8x5xi32, #tpu.memory_space<vmem>>, vector<1x5xi32>,
    %1404 = vector.extract_strided_slice %1386 {offsets = [0, 0], sizes = [1, 5], strides = [1, 1]} : vector<8x5xf32> to vector<1x5xf32>
    %1405 = arith.addf %1396, %1404 : vector<1x5xf32>
    %cst_263 = arith.constant -1.000000e+30 : f32
    %1406 = vector.shape_cast %1405 : vector<1x5xf32> to vector<1x5xf32>
    %1407 = vector.broadcast %1406 : vector<1x5xf32> to vector<5x5xf32>
    %1408 = vector.broadcast %cst_263 : f32 to vector<5x5xf32>
    %1409 = arith.select %1390, %1407, %1408 : vector<5x5xi1>, vector<5x5xf32>
    %cst_264 = arith.constant dense<0xFF800000> : vector<5xf32>
    %1410 = vector.multi_reduction <maximumf>, %1409, %cst_264 [1] : vector<5x5xf32> to vector<5xf32>
    %1411 = vector.shape_cast %1410 : vector<5xf32> to vector<5x1xf32>
    %1412 = vector.broadcast %1411 : vector<5x1xf32> to vector<5x5xf32>
    %1413 = arith.addf %1412, %1387 : vector<5x5xf32>
    %cst_265 = arith.constant dense<0xFF800000> : vector<5xf32>
    %1414 = vector.multi_reduction <maximumf>, %1413, %cst_265 [0] : vector<5x5xf32> to vector<5xf32>
    %1415 = vector.shape_cast %1414 : vector<5xf32> to vector<1x5xf32>
    %1416 = vector.broadcast %1415 : vector<1x5xf32> to vector<5x5xf32>
    %1417 = arith.cmpf oeq, %1413, %1416 : vector<5x5xf32>
    %c5_i32_266 = arith.constant 5 : i32
    %1418 = vector.broadcast %c5_i32_266 : i32 to vector<5x5xi32>
    %1419 = arith.select %1417, %1388, %1418 : vector<5x5xi1>, vector<5x5xi32>
    %cst_267 = arith.constant dense<2147483647> : vector<5xi32>
    %1420 = vector.multi_reduction <minsi>, %1419, %cst_267 [0] : vector<5x5xi32> to vector<5xi32>
    %1421 = vector.shape_cast %1420 : vector<5xi32> to vector<1x5xi32>
    %c1_268 = arith.constant 1 : index
    %c0_269 = arith.constant 0 : index
    %1422 = vector.load %arg13[%c1_268, %c0_269] : memref<8x5xi32, #tpu.memory_space<vmem>>, vector<1x5xi32>
    tpu.vector_store %arg13[%c1_268, %c0_269], %1421 {strides = array<i32>} : memref<8x5xi32, #tpu.memory_space<vmem>>, vector<1x5xi32>,
    %1423 = vector.extract_strided_slice %1386 {offsets = [1, 0], sizes = [1, 5], strides = [1, 1]} : vector<8x5xf32> to vector<1x5xf32>
    %1424 = arith.addf %1415, %1423 : vector<1x5xf32>
    %cst_270 = arith.constant -1.000000e+30 : f32
    %1425 = vector.shape_cast %1424 : vector<1x5xf32> to vector<1x5xf32>
    %1426 = vector.broadcast %1425 : vector<1x5xf32> to vector<5x5xf32>
    %1427 = vector.broadcast %cst_270 : f32 to vector<5x5xf32>
    %1428 = arith.select %1390, %1426, %1427 : vector<5x5xi1>, vector<5x5xf32>
    %cst_271 = arith.constant dense<0xFF800000> : vector<5xf32>
    %1429 = vector.multi_reduction <maximumf>, %1428, %cst_271 [1] : vector<5x5xf32> to vector<5xf32>
    %1430 = vector.shape_cast %1429 : vector<5xf32> to vector<5x1xf32>
    %1431 = vector.broadcast %1430 : vector<5x1xf32> to vector<5x5xf32>
    %1432 = arith.addf %1431, %1387 : vector<5x5xf32>
    %cst_272 = arith.constant dense<0xFF800000> : vector<5xf32>
    %1433 = vector.multi_reduction <maximumf>, %1432, %cst_272 [0] : vector<5x5xf32> to vector<5xf32>
    %1434 = vector.shape_cast %1433 : vector<5xf32> to vector<1x5xf32>
    %1435 = vector.broadcast %1434 : vector<1x5xf32> to vector<5x5xf32>
    %1436 = arith.cmpf oeq, %1432, %1435 : vector<5x5xf32>
    %c5_i32_273 = arith.constant 5 : i32
    %1437 = vector.broadcast %c5_i32_273 : i32 to vector<5x5xi32>
    %1438 = arith.select %1436, %1388, %1437 : vector<5x5xi1>, vector<5x5xi32>
    %cst_274 = arith.constant dense<2147483647> : vector<5xi32>
    %1439 = vector.multi_reduction <minsi>, %1438, %cst_274 [0] : vector<5x5xi32> to vector<5xi32>
    %1440 = vector.shape_cast %1439 : vector<5xi32> to vector<1x5xi32>
    %c2_275 = arith.constant 2 : index
    %c0_276 = arith.constant 0 : index
    %1441 = vector.load %arg13[%c2_275, %c0_276] : memref<8x5xi32, #tpu.memory_space<vmem>>, vector<1x5xi32>
    tpu.vector_store %arg13[%c2_275, %c0_276], %1440 {strides = array<i32>} : memref<8x5xi32, #tpu.memory_space<vmem>>, vector<1x5xi32>,
    %1442 = vector.extract_strided_slice %1386 {offsets = [2, 0], sizes = [1, 5], strides = [1, 1]} : vector<8x5xf32> to vector<1x5xf32>
    %1443 = arith.addf %1434, %1442 : vector<1x5xf32>
    %cst_277 = arith.constant -1.000000e+30 : f32
    %1444 = vector.shape_cast %1443 : vector<1x5xf32> to vector<1x5xf32>
    %1445 = vector.broadcast %1444 : vector<1x5xf32> to vector<5x5xf32>
    %1446 = vector.broadcast %cst_277 : f32 to vector<5x5xf32>
    %1447 = arith.select %1390, %1445, %1446 : vector<5x5xi1>, vector<5x5xf32>
    %cst_278 = arith.constant dense<0xFF800000> : vector<5xf32>
    %1448 = vector.multi_reduction <maximumf>, %1447, %cst_278 [1] : vector<5x5xf32> to vector<5xf32>
    %1449 = vector.shape_cast %1448 : vector<5xf32> to vector<5x1xf32>
    %1450 = vector.broadcast %1449 : vector<5x1xf32> to vector<5x5xf32>
    %1451 = arith.addf %1450, %1387 : vector<5x5xf32>
    %cst_279 = arith.constant dense<0xFF800000> : vector<5xf32>
    %1452 = vector.multi_reduction <maximumf>, %1451, %cst_279 [0] : vector<5x5xf32> to vector<5xf32>
    %1453 = vector.shape_cast %1452 : vector<5xf32> to vector<1x5xf32>
    %1454 = vector.broadcast %1453 : vector<1x5xf32> to vector<5x5xf32>
    %1455 = arith.cmpf oeq, %1451, %1454 : vector<5x5xf32>
    %c5_i32_280 = arith.constant 5 : i32
    %1456 = vector.broadcast %c5_i32_280 : i32 to vector<5x5xi32>
    %1457 = arith.select %1455, %1388, %1456 : vector<5x5xi1>, vector<5x5xi32>
    %cst_281 = arith.constant dense<2147483647> : vector<5xi32>
    %1458 = vector.multi_reduction <minsi>, %1457, %cst_281 [0] : vector<5x5xi32> to vector<5xi32>
    %1459 = vector.shape_cast %1458 : vector<5xi32> to vector<1x5xi32>
    %c3_282 = arith.constant 3 : index
    %c0_283 = arith.constant 0 : index
    %1460 = vector.load %arg13[%c3_282, %c0_283] : memref<8x5xi32, #tpu.memory_space<vmem>>, vector<1x5xi32>
    tpu.vector_store %arg13[%c3_282, %c0_283], %1459 {strides = array<i32>} : memref<8x5xi32, #tpu.memory_space<vmem>>, vector<1x5xi32>,
    %1461 = vector.extract_strided_slice %1386 {offsets = [3, 0], sizes = [1, 5], strides = [1, 1]} : vector<8x5xf32> to vector<1x5xf32>
    %1462 = arith.addf %1453, %1461 : vector<1x5xf32>
    %cst_284 = arith.constant -1.000000e+30 : f32
    %1463 = vector.shape_cast %1462 : vector<1x5xf32> to vector<1x5xf32>
    %1464 = vector.broadcast %1463 : vector<1x5xf32> to vector<5x5xf32>
    %1465 = vector.broadcast %cst_284 : f32 to vector<5x5xf32>
    %1466 = arith.select %1390, %1464, %1465 : vector<5x5xi1>, vector<5x5xf32>
    %cst_285 = arith.constant dense<0xFF800000> : vector<5xf32>
    %1467 = vector.multi_reduction <maximumf>, %1466, %cst_285 [1] : vector<5x5xf32> to vector<5xf32>
    %1468 = vector.shape_cast %1467 : vector<5xf32> to vector<5x1xf32>
    %1469 = vector.broadcast %1468 : vector<5x1xf32> to vector<5x5xf32>
    %1470 = arith.addf %1469, %1387 : vector<5x5xf32>
    %cst_286 = arith.constant dense<0xFF800000> : vector<5xf32>
    %1471 = vector.multi_reduction <maximumf>, %1470, %cst_286 [0] : vector<5x5xf32> to vector<5xf32>
    %1472 = vector.shape_cast %1471 : vector<5xf32> to vector<1x5xf32>
    %1473 = vector.broadcast %1472 : vector<1x5xf32> to vector<5x5xf32>
    %1474 = arith.cmpf oeq, %1470, %1473 : vector<5x5xf32>
    %c5_i32_287 = arith.constant 5 : i32
    %1475 = vector.broadcast %c5_i32_287 : i32 to vector<5x5xi32>
    %1476 = arith.select %1474, %1388, %1475 : vector<5x5xi1>, vector<5x5xi32>
    %cst_288 = arith.constant dense<2147483647> : vector<5xi32>
    %1477 = vector.multi_reduction <minsi>, %1476, %cst_288 [0] : vector<5x5xi32> to vector<5xi32>
    %1478 = vector.shape_cast %1477 : vector<5xi32> to vector<1x5xi32>
    %c4_289 = arith.constant 4 : index
    %c0_290 = arith.constant 0 : index
    %1479 = vector.load %arg13[%c4_289, %c0_290] : memref<8x5xi32, #tpu.memory_space<vmem>>, vector<1x5xi32>
    tpu.vector_store %arg13[%c4_289, %c0_290], %1478 {strides = array<i32>} : memref<8x5xi32, #tpu.memory_space<vmem>>, vector<1x5xi32>,
    %1480 = vector.extract_strided_slice %1386 {offsets = [4, 0], sizes = [1, 5], strides = [1, 1]} : vector<8x5xf32> to vector<1x5xf32>
    %1481 = arith.addf %1472, %1480 : vector<1x5xf32>
    %cst_291 = arith.constant -1.000000e+30 : f32
    %1482 = vector.shape_cast %1481 : vector<1x5xf32> to vector<1x5xf32>
    %1483 = vector.broadcast %1482 : vector<1x5xf32> to vector<5x5xf32>
    %1484 = vector.broadcast %cst_291 : f32 to vector<5x5xf32>
    %1485 = arith.select %1390, %1483, %1484 : vector<5x5xi1>, vector<5x5xf32>
    %cst_292 = arith.constant dense<0xFF800000> : vector<5xf32>
    %1486 = vector.multi_reduction <maximumf>, %1485, %cst_292 [1] : vector<5x5xf32> to vector<5xf32>
    %1487 = vector.shape_cast %1486 : vector<5xf32> to vector<5x1xf32>
    %1488 = vector.broadcast %1487 : vector<5x1xf32> to vector<5x5xf32>
    %1489 = arith.addf %1488, %1387 : vector<5x5xf32>
    %cst_293 = arith.constant dense<0xFF800000> : vector<5xf32>
    %1490 = vector.multi_reduction <maximumf>, %1489, %cst_293 [0] : vector<5x5xf32> to vector<5xf32>
    %1491 = vector.shape_cast %1490 : vector<5xf32> to vector<1x5xf32>
    %1492 = vector.broadcast %1491 : vector<1x5xf32> to vector<5x5xf32>
    %1493 = arith.cmpf oeq, %1489, %1492 : vector<5x5xf32>
    %c5_i32_294 = arith.constant 5 : i32
    %1494 = vector.broadcast %c5_i32_294 : i32 to vector<5x5xi32>
    %1495 = arith.select %1493, %1388, %1494 : vector<5x5xi1>, vector<5x5xi32>
    %cst_295 = arith.constant dense<2147483647> : vector<5xi32>
    %1496 = vector.multi_reduction <minsi>, %1495, %cst_295 [0] : vector<5x5xi32> to vector<5xi32>
    %1497 = vector.shape_cast %1496 : vector<5xi32> to vector<1x5xi32>
    %c5_296 = arith.constant 5 : index
    %c0_297 = arith.constant 0 : index
    %1498 = vector.load %arg13[%c5_296, %c0_297] : memref<8x5xi32, #tpu.memory_space<vmem>>, vector<1x5xi32>
    tpu.vector_store %arg13[%c5_296, %c0_297], %1497 {strides = array<i32>} : memref<8x5xi32, #tpu.memory_space<vmem>>, vector<1x5xi32>,
    %1499 = vector.extract_strided_slice %1386 {offsets = [5, 0], sizes = [1, 5], strides = [1, 1]} : vector<8x5xf32> to vector<1x5xf32>
    %1500 = arith.addf %1491, %1499 : vector<1x5xf32>
    %cst_298 = arith.constant -1.000000e+30 : f32
    %1501 = vector.shape_cast %1500 : vector<1x5xf32> to vector<1x5xf32>
    %1502 = vector.broadcast %1501 : vector<1x5xf32> to vector<5x5xf32>
    %1503 = vector.broadcast %cst_298 : f32 to vector<5x5xf32>
    %1504 = arith.select %1390, %1502, %1503 : vector<5x5xi1>, vector<5x5xf32>
    %cst_299 = arith.constant dense<0xFF800000> : vector<5xf32>
    %1505 = vector.multi_reduction <maximumf>, %1504, %cst_299 [1] : vector<5x5xf32> to vector<5xf32>
    %1506 = vector.shape_cast %1505 : vector<5xf32> to vector<5x1xf32>
    %1507 = vector.broadcast %1506 : vector<5x1xf32> to vector<5x5xf32>
    %1508 = arith.addf %1507, %1387 : vector<5x5xf32>
    %cst_300 = arith.constant dense<0xFF800000> : vector<5xf32>
    %1509 = vector.multi_reduction <maximumf>, %1508, %cst_300 [0] : vector<5x5xf32> to vector<5xf32>
    %1510 = vector.shape_cast %1509 : vector<5xf32> to vector<1x5xf32>
    %1511 = vector.broadcast %1510 : vector<1x5xf32> to vector<5x5xf32>
    %1512 = arith.cmpf oeq, %1508, %1511 : vector<5x5xf32>
    %c5_i32_301 = arith.constant 5 : i32
    %1513 = vector.broadcast %c5_i32_301 : i32 to vector<5x5xi32>
    %1514 = arith.select %1512, %1388, %1513 : vector<5x5xi1>, vector<5x5xi32>
    %cst_302 = arith.constant dense<2147483647> : vector<5xi32>
    %1515 = vector.multi_reduction <minsi>, %1514, %cst_302 [0] : vector<5x5xi32> to vector<5xi32>
    %1516 = vector.shape_cast %1515 : vector<5xi32> to vector<1x5xi32>
    %c6_303 = arith.constant 6 : index
    %c0_304 = arith.constant 0 : index
    %1517 = vector.load %arg13[%c6_303, %c0_304] : memref<8x5xi32, #tpu.memory_space<vmem>>, vector<1x5xi32>
    tpu.vector_store %arg13[%c6_303, %c0_304], %1516 {strides = array<i32>} : memref<8x5xi32, #tpu.memory_space<vmem>>, vector<1x5xi32>,
    %1518 = vector.extract_strided_slice %1386 {offsets = [6, 0], sizes = [1, 5], strides = [1, 1]} : vector<8x5xf32> to vector<1x5xf32>
    %1519 = arith.addf %1510, %1518 : vector<1x5xf32>
    %cst_305 = arith.constant -1.000000e+30 : f32
    %1520 = vector.shape_cast %1519 : vector<1x5xf32> to vector<1x5xf32>
    %1521 = vector.broadcast %1520 : vector<1x5xf32> to vector<5x5xf32>
    %1522 = vector.broadcast %cst_305 : f32 to vector<5x5xf32>
    %1523 = arith.select %1390, %1521, %1522 : vector<5x5xi1>, vector<5x5xf32>
    %cst_306 = arith.constant dense<0xFF800000> : vector<5xf32>
    %1524 = vector.multi_reduction <maximumf>, %1523, %cst_306 [1] : vector<5x5xf32> to vector<5xf32>
    %1525 = vector.shape_cast %1524 : vector<5xf32> to vector<5x1xf32>
    %1526 = vector.broadcast %1525 : vector<5x1xf32> to vector<5x5xf32>
    %1527 = arith.addf %1526, %1387 : vector<5x5xf32>
    %cst_307 = arith.constant dense<0xFF800000> : vector<5xf32>
    %1528 = vector.multi_reduction <maximumf>, %1527, %cst_307 [0] : vector<5x5xf32> to vector<5xf32>
    %1529 = vector.shape_cast %1528 : vector<5xf32> to vector<1x5xf32>
    %1530 = vector.broadcast %1529 : vector<1x5xf32> to vector<5x5xf32>
    %1531 = arith.cmpf oeq, %1527, %1530 : vector<5x5xf32>
    %c5_i32_308 = arith.constant 5 : i32
    %1532 = vector.broadcast %c5_i32_308 : i32 to vector<5x5xi32>
    %1533 = arith.select %1531, %1388, %1532 : vector<5x5xi1>, vector<5x5xi32>
    %cst_309 = arith.constant dense<2147483647> : vector<5xi32>
    %1534 = vector.multi_reduction <minsi>, %1533, %cst_309 [0] : vector<5x5xi32> to vector<5xi32>
    %1535 = vector.shape_cast %1534 : vector<5xi32> to vector<1x5xi32>
    %c7_310 = arith.constant 7 : index
    %c0_311 = arith.constant 0 : index
    %1536 = vector.load %arg13[%c7_310, %c0_311] : memref<8x5xi32, #tpu.memory_space<vmem>>, vector<1x5xi32>
    tpu.vector_store %arg13[%c7_310, %c0_311], %1535 {strides = array<i32>} : memref<8x5xi32, #tpu.memory_space<vmem>>, vector<1x5xi32>,
    %1537 = vector.extract_strided_slice %1386 {offsets = [7, 0], sizes = [1, 5], strides = [1, 1]} : vector<8x5xf32> to vector<1x5xf32>
    %1538 = arith.addf %1529, %1537 : vector<1x5xf32>
    %cst_312 = arith.constant -1.000000e+30 : f32
    %1539 = vector.shape_cast %1538 : vector<1x5xf32> to vector<1x5xf32>
    %1540 = vector.broadcast %1539 : vector<1x5xf32> to vector<5x5xf32>
    %1541 = vector.broadcast %cst_312 : f32 to vector<5x5xf32>
    %1542 = arith.select %1390, %1540, %1541 : vector<5x5xi1>, vector<5x5xf32>
    %cst_313 = arith.constant dense<0xFF800000> : vector<5xf32>
    %1543 = vector.multi_reduction <maximumf>, %1542, %cst_313 [1] : vector<5x5xf32> to vector<5xf32>
    %1544 = vector.shape_cast %1543 : vector<5xf32> to vector<5x1xf32>
    %c0_314 = arith.constant 0 : index
    %c0_315 = arith.constant 0 : index
    %1545 = vector.load %arg8[%c0_314, %c0_315] : memref<5x1xf32, #tpu.memory_space<vmem>>, vector<5x1xf32>
    %1546 = arith.addf %1544, %1545 : vector<5x1xf32>
    %cst_316 = arith.constant dense<0xFF800000> : vector<1xf32>
    %1547 = vector.multi_reduction <maximumf>, %1546, %cst_316 [0] : vector<5x1xf32> to vector<1xf32>
    %1548 = vector.shape_cast %1547 : vector<1xf32> to vector<1x1xf32>
    %1549 = tpu.iota {dimensions = array<i32: 0>} : vector<5x1xi32>
    %1550 = vector.broadcast %1548 : vector<1x1xf32> to vector<5x1xf32>
    %1551 = arith.cmpf oeq, %1546, %1550 : vector<5x1xf32>
    %c5_i32_317 = arith.constant 5 : i32
    %1552 = vector.broadcast %c5_i32_317 : i32 to vector<5x1xi32>
    %1553 = arith.select %1551, %1549, %1552 : vector<5x1xi1>, vector<5x1xi32>
    %cst_318 = arith.constant dense<2147483647> : vector<1xi32>
    %1554 = vector.multi_reduction <minsi>, %1553, %cst_318 [0] : vector<5x1xi32> to vector<1xi32>
    %1555 = vector.shape_cast %1554 : vector<1xi32> to vector<1x1xi32>
    %c0_319 = arith.constant 0 : index
    %c0_320 = arith.constant 0 : index
    %1556 = vector.load %arg10[%c0_319, %c0_320] : memref<1x1xf32, #tpu.memory_space<vmem>>, vector<1x1xf32>
    tpu.vector_store %arg10[%c0_319, %c0_320], %1548 {strides = array<i32>} : memref<1x1xf32, #tpu.memory_space<vmem>>, vector<1x1xf32>,
    %1557 = tpu.iota {dimensions = array<i32: 1>} : vector<1x8xi32>
    %c7_i32_321 = arith.constant 7 : i32
    %1558 = vector.broadcast %c7_i32_321 : i32 to vector<1x8xi32>
    %1559 = arith.cmpi eq, %1557, %1558 : vector<1x8xi32>
    %c0_i32_322 = arith.constant 0 : i32
    %1560 = vector.shape_cast %1555 : vector<1x1xi32> to vector<1x1xi32>
    %1561 = vector.broadcast %1560 : vector<1x1xi32> to vector<1x8xi32>
    %1562 = vector.broadcast %c0_i32_322 : i32 to vector<1x8xi32>
    %1563 = arith.select %1559, %1561, %1562 : vector<1x8xi1>, vector<1x8xi32>
    %c7_323 = arith.constant 7 : index
    %c0_324 = arith.constant 0 : index
    %1564 = vector.load %arg13[%c7_323, %c0_324] : memref<8x5xi32, #tpu.memory_space<vmem>>, vector<1x5xi32>
    %1565 = vector.broadcast %1555 : vector<1x1xi32> to vector<1x5xi32>
    %1566 = arith.cmpi eq, %1391, %1565 : vector<1x5xi32>
    %c5_i32_325 = arith.constant 5 : i32
    %1567 = vector.broadcast %c5_i32_325 : i32 to vector<1x5xi32>
    %1568 = arith.select %1566, %1564, %1567 : vector<1x5xi1>, vector<1x5xi32>
    %cst_326 = arith.constant dense<2147483647> : vector<1xi32>
    %1569 = vector.multi_reduction <minsi>, %1568, %cst_326 [1] : vector<1x5xi32> to vector<1xi32>
    %1570 = vector.shape_cast %1569 : vector<1xi32> to vector<1x1xi32>
    %c6_i32_327 = arith.constant 6 : i32
    %1571 = vector.broadcast %c6_i32_327 : i32 to vector<1x8xi32>
    %1572 = arith.cmpi eq, %1557, %1571 : vector<1x8xi32>
    %1573 = vector.shape_cast %1570 : vector<1x1xi32> to vector<1x1xi32>
    %1574 = vector.broadcast %1573 : vector<1x1xi32> to vector<1x8xi32>
    %1575 = arith.select %1572, %1574, %1563 : vector<1x8xi1>, vector<1x8xi32>
    %c6_328 = arith.constant 6 : index
    %c0_329 = arith.constant 0 : index
    %1576 = vector.load %arg13[%c6_328, %c0_329] : memref<8x5xi32, #tpu.memory_space<vmem>>, vector<1x5xi32>
    %1577 = vector.broadcast %1570 : vector<1x1xi32> to vector<1x5xi32>
    %1578 = arith.cmpi eq, %1391, %1577 : vector<1x5xi32>
    %c5_i32_330 = arith.constant 5 : i32
    %1579 = vector.broadcast %c5_i32_330 : i32 to vector<1x5xi32>
    %1580 = arith.select %1578, %1576, %1579 : vector<1x5xi1>, vector<1x5xi32>
    %cst_331 = arith.constant dense<2147483647> : vector<1xi32>
    %1581 = vector.multi_reduction <minsi>, %1580, %cst_331 [1] : vector<1x5xi32> to vector<1xi32>
    %1582 = vector.shape_cast %1581 : vector<1xi32> to vector<1x1xi32>
    %c5_i32_332 = arith.constant 5 : i32
    %1583 = vector.broadcast %c5_i32_332 : i32 to vector<1x8xi32>
    %1584 = arith.cmpi eq, %1557, %1583 : vector<1x8xi32>
    %1585 = vector.shape_cast %1582 : vector<1x1xi32> to vector<1x1xi32>
    %1586 = vector.broadcast %1585 : vector<1x1xi32> to vector<1x8xi32>
    %1587 = arith.select %1584, %1586, %1575 : vector<1x8xi1>, vector<1x8xi32>
    %c5_333 = arith.constant 5 : index
    %c0_334 = arith.constant 0 : index
    %1588 = vector.load %arg13[%c5_333, %c0_334] : memref<8x5xi32, #tpu.memory_space<vmem>>, vector<1x5xi32>
    %1589 = vector.broadcast %1582 : vector<1x1xi32> to vector<1x5xi32>
    %1590 = arith.cmpi eq, %1391, %1589 : vector<1x5xi32>
    %c5_i32_335 = arith.constant 5 : i32
    %1591 = vector.broadcast %c5_i32_335 : i32 to vector<1x5xi32>
    %1592 = arith.select %1590, %1588, %1591 : vector<1x5xi1>, vector<1x5xi32>
    %cst_336 = arith.constant dense<2147483647> : vector<1xi32>
    %1593 = vector.multi_reduction <minsi>, %1592, %cst_336 [1] : vector<1x5xi32> to vector<1xi32>
    %1594 = vector.shape_cast %1593 : vector<1xi32> to vector<1x1xi32>
    %c4_i32_337 = arith.constant 4 : i32
    %1595 = vector.broadcast %c4_i32_337 : i32 to vector<1x8xi32>
    %1596 = arith.cmpi eq, %1557, %1595 : vector<1x8xi32>
    %1597 = vector.shape_cast %1594 : vector<1x1xi32> to vector<1x1xi32>
    %1598 = vector.broadcast %1597 : vector<1x1xi32> to vector<1x8xi32>
    %1599 = arith.select %1596, %1598, %1587 : vector<1x8xi1>, vector<1x8xi32>
    %c4_338 = arith.constant 4 : index
    %c0_339 = arith.constant 0 : index
    %1600 = vector.load %arg13[%c4_338, %c0_339] : memref<8x5xi32, #tpu.memory_space<vmem>>, vector<1x5xi32>
    %1601 = vector.broadcast %1594 : vector<1x1xi32> to vector<1x5xi32>
    %1602 = arith.cmpi eq, %1391, %1601 : vector<1x5xi32>
    %c5_i32_340 = arith.constant 5 : i32
    %1603 = vector.broadcast %c5_i32_340 : i32 to vector<1x5xi32>
    %1604 = arith.select %1602, %1600, %1603 : vector<1x5xi1>, vector<1x5xi32>
    %cst_341 = arith.constant dense<2147483647> : vector<1xi32>
    %1605 = vector.multi_reduction <minsi>, %1604, %cst_341 [1] : vector<1x5xi32> to vector<1xi32>
    %1606 = vector.shape_cast %1605 : vector<1xi32> to vector<1x1xi32>
    %c3_i32_342 = arith.constant 3 : i32
    %1607 = vector.broadcast %c3_i32_342 : i32 to vector<1x8xi32>
    %1608 = arith.cmpi eq, %1557, %1607 : vector<1x8xi32>
    %1609 = vector.shape_cast %1606 : vector<1x1xi32> to vector<1x1xi32>
    %1610 = vector.broadcast %1609 : vector<1x1xi32> to vector<1x8xi32>
    %1611 = arith.select %1608, %1610, %1599 : vector<1x8xi1>, vector<1x8xi32>
    %c3_343 = arith.constant 3 : index
    %c0_344 = arith.constant 0 : index
    %1612 = vector.load %arg13[%c3_343, %c0_344] : memref<8x5xi32, #tpu.memory_space<vmem>>, vector<1x5xi32>
    %1613 = vector.broadcast %1606 : vector<1x1xi32> to vector<1x5xi32>
    %1614 = arith.cmpi eq, %1391, %1613 : vector<1x5xi32>
    %c5_i32_345 = arith.constant 5 : i32
    %1615 = vector.broadcast %c5_i32_345 : i32 to vector<1x5xi32>
    %1616 = arith.select %1614, %1612, %1615 : vector<1x5xi1>, vector<1x5xi32>
    %cst_346 = arith.constant dense<2147483647> : vector<1xi32>
    %1617 = vector.multi_reduction <minsi>, %1616, %cst_346 [1] : vector<1x5xi32> to vector<1xi32>
    %1618 = vector.shape_cast %1617 : vector<1xi32> to vector<1x1xi32>
    %c2_i32_347 = arith.constant 2 : i32
    %1619 = vector.broadcast %c2_i32_347 : i32 to vector<1x8xi32>
    %1620 = arith.cmpi eq, %1557, %1619 : vector<1x8xi32>
    %1621 = vector.shape_cast %1618 : vector<1x1xi32> to vector<1x1xi32>
    %1622 = vector.broadcast %1621 : vector<1x1xi32> to vector<1x8xi32>
    %1623 = arith.select %1620, %1622, %1611 : vector<1x8xi1>, vector<1x8xi32>
    %c2_348 = arith.constant 2 : index
    %c0_349 = arith.constant 0 : index
    %1624 = vector.load %arg13[%c2_348, %c0_349] : memref<8x5xi32, #tpu.memory_space<vmem>>, vector<1x5xi32>
    %1625 = vector.broadcast %1618 : vector<1x1xi32> to vector<1x5xi32>
    %1626 = arith.cmpi eq, %1391, %1625 : vector<1x5xi32>
    %c5_i32_350 = arith.constant 5 : i32
    %1627 = vector.broadcast %c5_i32_350 : i32 to vector<1x5xi32>
    %1628 = arith.select %1626, %1624, %1627 : vector<1x5xi1>, vector<1x5xi32>
    %cst_351 = arith.constant dense<2147483647> : vector<1xi32>
    %1629 = vector.multi_reduction <minsi>, %1628, %cst_351 [1] : vector<1x5xi32> to vector<1xi32>
    %1630 = vector.shape_cast %1629 : vector<1xi32> to vector<1x1xi32>
    %c1_i32_352 = arith.constant 1 : i32
    %1631 = vector.broadcast %c1_i32_352 : i32 to vector<1x8xi32>
    %1632 = arith.cmpi eq, %1557, %1631 : vector<1x8xi32>
    %1633 = vector.shape_cast %1630 : vector<1x1xi32> to vector<1x1xi32>
    %1634 = vector.broadcast %1633 : vector<1x1xi32> to vector<1x8xi32>
    %1635 = arith.select %1632, %1634, %1623 : vector<1x8xi1>, vector<1x8xi32>
    %c1_353 = arith.constant 1 : index
    %c0_354 = arith.constant 0 : index
    %1636 = vector.load %arg13[%c1_353, %c0_354] : memref<8x5xi32, #tpu.memory_space<vmem>>, vector<1x5xi32>
    %1637 = vector.broadcast %1630 : vector<1x1xi32> to vector<1x5xi32>
    %1638 = arith.cmpi eq, %1391, %1637 : vector<1x5xi32>
    %c5_i32_355 = arith.constant 5 : i32
    %1639 = vector.broadcast %c5_i32_355 : i32 to vector<1x5xi32>
    %1640 = arith.select %1638, %1636, %1639 : vector<1x5xi1>, vector<1x5xi32>
    %cst_356 = arith.constant dense<2147483647> : vector<1xi32>
    %1641 = vector.multi_reduction <minsi>, %1640, %cst_356 [1] : vector<1x5xi32> to vector<1xi32>
    %1642 = vector.shape_cast %1641 : vector<1xi32> to vector<1x1xi32>
    %c0_i32_357 = arith.constant 0 : i32
    %1643 = vector.broadcast %c0_i32_357 : i32 to vector<1x8xi32>
    %1644 = arith.cmpi eq, %1557, %1643 : vector<1x8xi32>
    %1645 = vector.shape_cast %1642 : vector<1x1xi32> to vector<1x1xi32>
    %1646 = vector.broadcast %1645 : vector<1x1xi32> to vector<1x8xi32>
    %1647 = arith.select %1644, %1646, %1635 : vector<1x8xi1>, vector<1x8xi32>
    %c0_358 = arith.constant 0 : index
    %c0_359 = arith.constant 0 : index
    %1648 = vector.load %arg11[%c0_358, %c0_359] : memref<1x8xi32, #tpu.memory_space<vmem>>, vector<1x8xi32>
    tpu.vector_store %arg11[%c0_358, %c0_359], %1647 {strides = array<i32>} : memref<1x8xi32, #tpu.memory_space<vmem>>, vector<1x8xi32>,
    %1649 = vector.broadcast %1642 : vector<1x1xi32> to vector<1x5xi32>
    %1650 = arith.cmpi eq, %1391, %1649 : vector<1x5xi32>
    %c0_360 = arith.constant 0 : index
    %c0_361 = arith.constant 0 : index
    %1651 = vector.load %arg13[%c0_360, %c0_361] : memref<8x5xi32, #tpu.memory_space<vmem>>, vector<1x5xi32>
    %c5_i32_362 = arith.constant 5 : i32
    %1652 = vector.broadcast %c5_i32_362 : i32 to vector<1x5xi32>
    %1653 = arith.select %1650, %1651, %1652 : vector<1x5xi1>, vector<1x5xi32>
    %cst_363 = arith.constant dense<2147483647> : vector<1xi32>
    %1654 = vector.multi_reduction <minsi>, %1653, %cst_363 [1] : vector<1x5xi32> to vector<1xi32>
    %1655 = vector.shape_cast %1654 : vector<1xi32> to vector<1x1xi32>
    %c0_364 = arith.constant 0 : index
    %c0_365 = arith.constant 0 : index
    %1656 = vector.load %arg12[%c0_364, %c0_365] : memref<1x1xi32, #tpu.memory_space<vmem>>, vector<1x1xi32>
    tpu.vector_store %arg12[%c0_364, %c0_365], %1655 {strides = array<i32>} : memref<1x1xi32, #tpu.memory_space<vmem>>, vector<1x1xi32>,
    return
  }
}

</mosaic_0001>

<bundles_post_ra>
// kernel: _forward_impl.1
= control target key start
LH: loop header
LB: loop body
LE: loop exit
PB: predicated region body
PF: predicated region fallthrough
CT: control target
= control target key end

     0   :  { %18 = vsyncpa [#allocation4], 0  ;;  %s13306_s0 = inlined_call_operand.vmem [shape: f32[8,16], index: 0, kind: input, shape index: {}]   ;;  %s13307_s1 = inlined_call_operand.hbm [shape: f32[2,16,512], index: 1, kind: input, shape index: {}]   ;;  %s13308_s2 = inlined_call_operand.hbm [shape: f32[8,32,512], index: 2, kind: input, shape index: {}]   ;;  %s13309_s3 = inlined_call_operand.hbm [shape: f32[5,32,512], index: 3, kind: input, shape index: {}]   ;;  %s13310_s4 = inlined_call_operand.vmem [shape: f32[5,1,512], index: 4, kind: input, shape index: {}]   ;;  %s13311_s5 = inlined_call_operand.vmem [shape: f32[2,32,5], index: 5, kind: input, shape index: {}]   ;;  %s13312_s6 = inlined_call_operand.vmem [shape: f32[1,5], index: 6, kind: input, shape index: {}]   ;;  %s13313_s7 = inlined_call_operand.vmem [shape: f32[5,5], index: 7, kind: input, shape index: {}]   ;;  %s13314_s8 = inlined_call_operand.vmem [shape: f32[5,1], index: 8, kind: input, shape index: {}]   ;;  %s13315_s9 = inlined_call_operand.vmem [shape: f32[5,1], index: 9, kind: input, shape index: {}]   ;;  %s13316_s10 = inlined_call_operand.hbm [shape: f32[1,1], index: 10, kind: output, shape index: {0}]   ;;  %s13317_s11 = inlined_call_operand.hbm [shape: s32[1,8], index: 11, kind: output, shape index: {1}]   ;;  %s13318_s12 = inlined_call_operand.hbm [shape: s32[1,1], index: 12, kind: output, shape index: {2}]  }
   0x1   :  { %19 = vsyncpa [#allocation7], 0 }
   0x2   :  { %20 = vsyncpa [#allocation5], 0 }
   0x3   :  { %21 = vsyncpa [#allocation11], 0  ;;  %s11339_s21 = smov [#allocation6]   ;;  %s11340_s23 = smov [#allocation3]  }
   0x4   :  { %s41_s22 = sshll.u32 %s11339_s21, 4  ;;  %s29_s24 = sshll.u32 %s11340_s23, 4  ;;  %s42_s22 = int_to_ptr.vmem [resolvable:$true] %s41_s22  ;;  %s30_s24 = int_to_ptr.vmem [resolvable:$true] %s29_s24 }
   0x5   :  { %s11219_s25 = scalar_lea.vmem %s42_s22, 16384  ;;  %p11224_p1 = scmp.lt.s32.totalorder %s42_s22, %s42_s22 }
   0x6   :  { %p11220_p0 = scmp.ne.s32.totalorder %s42_s22, %s11219_s25  ;;  %p11225_p2 = scmp.lt.s32.totalorder %s11219_s25, %s11219_s25 }
   0x8   :  { %p11226_p3 = por %p11225_p2, %p11224_p1 }
   0xa   :  { %p11227_p4 = pnand %p11226_p3, %p11220_p0 }
   0xc   :  { %11230 = shalt.err (!%p11227_p4)
}
   0xd   :  { %s11341_s26 = smov 512   ;;  %s11342_s27 = smov 32  }
   0xe   :  { %47 = dma.hbm_to_vmem [thread:$0]  %s13308_s2, 16384, %s42_s22, [#allocation7], %s11341_s26, %s11341_s26, %s11342_s27  }
   0xf   :  { %s11239_s30 = scalar_lea.vmem %s30_s24, 2048  ;;  %p11244_p6 = scmp.lt.s32.totalorder %s30_s24, %s30_s24 }
  0x10   :  { %p11240_p5 = scmp.ne.s32.totalorder %s30_s24, %s11239_s30  ;;  %p11245_p7 = scmp.lt.s32.totalorder %s11239_s30, %s11239_s30 }
  0x12   :  { %p11246_p8 = por %p11245_p7, %p11244_p6 }
  0x14   :  { %p11247_p9 = pnand %p11246_p8, %p11240_p5 }
  0x16   :  { %11250 = shalt.err (!%p11247_p9)
}
  0x17   :  { %35 = dma.hbm_to_vmem [thread:$0]  %s13307_s1, 2048, %s30_s24, [#allocation4], %s11341_s26, %s11341_s26, %s11342_s27  }
  0x18   :  { %s11343_s15 = smov [#allocation8]  }
  0x19   :  { %s53_s16 = sshll.u32 %s11343_s15, 4  ;;  %s54_s16 = int_to_ptr.vmem [resolvable:$true] %s53_s16 }
  0x1a   :  { %s11259_s17 = scalar_lea.vmem %s54_s16, 10240  ;;  %p11264_p11 = scmp.lt.s32.totalorder %s54_s16, %s54_s16 }
  0x1b   :  { %p11260_p10 = scmp.ne.s32.totalorder %s54_s16, %s11259_s17  ;;  %p11265_p12 = scmp.lt.s32.totalorder %s11259_s17, %s11259_s17 }
  0x1d   :  { %p11266_p13 = por %p11265_p12, %p11264_p11 }
  0x1f   :  { %p11267_p0 = pnand %p11266_p13, %p11260_p10 }
  0x21   :  { %11270 = shalt.err (!%p11267_p0)
}
  0x22   :  { %59 = dma.hbm_to_vmem [thread:$0]  %s13309_s3, 10240, %s54_s16, [#allocation7], %s11341_s26, %s11341_s26, %s11342_s27  }
  0x23   :  { %11331 = dma.done.wait [#allocation4], 2048  }
  0x24   :  { %11332 = vsyncadd [#allocation4], 4294965248 }
  0x25   :  { %11333 = dma.done.wait [#allocation7], 26624  }
  0x26   :  { %11334 = vsyncadd [#allocation7], 4294940672  ;;  %v81_v0 = vlaneseq  ;;  %v11344_v1 = vmov 0.0   ;;  %v146_v7 = vld [vmem:[#allocation3 + $0x68] sm:$0xff]  ;;  %v145_v8 = vld [vmem:[#allocation3 + $0x60] sm:$0xff]  ;;  %vm149_vm8 = vcmask 130048  }
  0x27   :  { %217 = vmatprep.mubr.f32.mxu0 %v11344_v1  ;;  %288 = vmatprep.mubr.f32.mxu1 %v11344_v1  ;;  %v142_v9 = vld [vmem:[#allocation3 + $0x48] sm:$0xff]  ;;  %v141_v11 = vld [vmem:[#allocation3 + $0x40] sm:$0xff]  ;;  %v11447_v12 = vld [vmem:[%s13306_s0] sm:$0xff]  ;;  %vm482_vm9 = vcmask 261120   ;;  %vm11345_vm10 = vmmov 0   ;;  %vm9831_vm11 = vcmask 36864  }
  0x28   :  { %v11427_v2 = vshrl.u32 %v81_v0, 7  ;;  %181 = vmatprep.subr.mxu0 %v146_v7  ;;  %v137_v14 = vld [vmem:[#allocation3 + $0x28] sm:$0xff]  ;;  %v148_v21 = vld [vmem:[#allocation3 + $0x78] sm:$0xff]  ;;  %v147_v24 = vld [vmem:[#allocation3 + $0x70] sm:$0xff]  ;;  %vm9851_vm15 = vcmask 32768   ;;  %s11348_s26 = smov [#allocation9]  }
  0x29   :  { %182 = vmatpush1.msra.mxu0 %v145_v8  ;;  %252 = vmatprep.subr.mxu1 %v148_v21  ;;  %v144_v25 = vld [vmem:[#allocation3 + $0x58] sm:$0xff]  ;;  %v143_v28 = vld [vmem:[#allocation3 + $0x50] sm:$0xff]  ;;  %v136_v37 = vld [vmem:[#allocation3 + $0x20] sm:$0xff]  ;;  %s10268_s27 = sshll.u32 %s11348_s26, 4  ;;  %s10269_s27 = int_to_ptr.vmem [resolvable:$true] %s10268_s27 }
  0x2a   :  { %v11430_v3 = vsub.s32 7, %v11427_v2  ;;  %v11433_v4 = vsub.s32 6, %v11427_v2  ;;  %v11436_v5 = vsub.s32 5, %v11427_v2  ;;  %v11439_v6 = vsub.s32 4, %v11427_v2  ;;  %183 = vmatprep.subr.mxu0 %v142_v9  ;;  %253 = vmatpush1.msra.mxu1 %v147_v24  ;;  %v139_v31 = vld [vmem:[#allocation3 + $0x38] sm:$0xff]  ;;  %v133_v39 = vld [vmem:[#allocation3 + $0x8] sm:$0xff] }
  0x2b   :  { %v11442_v10 = vsub.s32 3, %v11427_v2  ;;  %vm84_vm0 = vcmp.eq.s32.totalorder %v11427_v2, 0  ;;  %vm90_vm1 = vcmp.eq.s32.totalorder %v11427_v2, 1  ;;  %v11452_v13 = vsub.s32 2, %v11427_v2  ;;  %184 = vmatpush1.msra.mxu0 %v141_v11  ;;  %254 = vmatprep.subr.mxu1 %v144_v25  ;;  %v138_v40 = vld [vmem:[#allocation3 + $0x30] sm:$0xff]  ;;  %v132_v41 = vld [vmem:[#allocation3] sm:$0xff] }
  0x2c   :  { %v88_v15 = vrot.slane %v11447_v12, %v11430_v3  ;;  %v94_v16 = vrot.slane %v11447_v12, %v11433_v4  ;;  %v100_v17 = vrot.slane %v11447_v12, %v11436_v5  ;;  %v11461_v18 = vsub.s32 1, %v11427_v2  ;;  %326 = vmatprep.subr.mxu0 %v137_v14  ;;  %255 = vmatpush1.msra.mxu1 %v143_v28  ;;  %v135_v42 = vld [vmem:[#allocation3 + $0x18] sm:$0xff]  ;;  %v11501_v43 = vld [vmem:[#allocation8 + $0x68] sm:$0xff]  ;;  %v11503_v44 = vld [vmem:[#allocation8 + $0x60] sm:$0xff] }
  0x2d   :  { %vm96_vm2 = vcmp.eq.s32.totalorder %v11427_v2, 2  ;;  %v106_v19 = vrot.slane %v11447_v12, %v11439_v6  ;;  %v11467_v20 = vsub.s32 0, %v11427_v2  ;;  %vm102_vm3 = vcmp.eq.s32.totalorder %v11427_v2, 3  ;;  %397 = vmatprep.subr.mxu1 %v139_v31  ;;  %v11505_v45 = vld [vmem:[#allocation8 + $0x48] sm:$0xff]  ;;  %v134_v46 = vld [vmem:[#allocation3 + $0x10] sm:$0xff]  ;;  %v11510_v47 = vld [vmem:[#allocation8 + $0x40] sm:$0xff] }
  0x2e   :  { %v89_v22 = vsel %vm84_vm0, %v88_v15, 0.0  ;;  %v112_v23 = vrot.slane %v11447_v12, %v11442_v10  ;;  %vm108_vm4 = vcmp.eq.s32.totalorder %v11427_v2, 4  ;;  %v118_v27 = vrot.slane %v11447_v12, %v11452_v13  ;;  %v11513_v48 = vld [vmem:[#allocation8 + $0x28] sm:$0xff]  ;;  %v11516_v49 = vld [vmem:[#allocation8 + $0x78] sm:$0xff]  ;;  %v11519_v50 = vld [vmem:[#allocation8 + $0x20] sm:$0xff] }
  0x2f   :  { %v95_v26 = vsel %vm90_vm1, %v94_v16, %v89_v22  ;;  %vm114_vm5 = vcmp.eq.s32.totalorder %v11427_v2, 5  ;;  %v124_v30 = vrot.slane %v11447_v12, %v11461_v18  ;;  %vm120_vm6 = vcmp.eq.s32.totalorder %v11427_v2, 6  ;;  %v11522_v51 = vld [vmem:[#allocation8 + $0x8] sm:$0xff]  ;;  %v11525_v52 = vld [vmem:[#allocation8 + $0x70] sm:$0xff]  ;;  %v11528_v53 = vld [vmem:[#allocation8] sm:$0xff] }
  0x30   :  { %v101_v29 = vsel %vm96_vm2, %v100_v17, %v95_v26  ;;  %v130_v33 = vrot.slane %v11447_v12, %v11467_v20  ;;  %vm126_vm7 = vcmp.eq.s32.totalorder %v11427_v2, 7  ;;  %v11531_v54 = vld [vmem:[#allocation8 + $0x58] sm:$0xff]  ;;  %v11536_v55 = vld [vmem:[#allocation8 + $0x50] sm:$0xff] }
  0x31   :  { %v107_v32 = vsel %vm102_vm3, %v106_v19, %v101_v29  ;;  %v11540_v56 = vld [vmem:[#allocation8 + $0x38] sm:$0xff]  ;;  %v11544_v57 = vld [vmem:[#allocation8 + $0x30] sm:$0xff] }
  0x32   :  { %v113_v34 = vsel %vm108_vm4, %v112_v23, %v107_v32  ;;  %v11548_v58 = vld [vmem:[#allocation8 + $0x18] sm:$0xff]  ;;  %v11551_v59 = vld [vmem:[#allocation8 + $0x10] sm:$0xff] }
  0x33   :  { %v119_v35 = vsel %vm114_vm5, %v118_v27, %v113_v34  ;;  %v440_v63 = vld [vmem:[%s13310_s4] sm:$0xf] }
  0x34   :  { %v125_v36 = vsel %vm120_vm6, %v124_v30, %v119_v35  ;;  %v445_v9 = vrot.slane %v440_v63, %v11467_v20  ;;  %v449_v14 = vrot.slane %v440_v63, %v11461_v18  ;;  %v453_v27 = vrot.slane %v440_v63, %v11452_v13 }
  0x35   :  { %v131_v38 = vsel %vm126_vm7, %v130_v33, %v125_v36  ;;  %v457_v32 = vrot.slane %v440_v63, %v11442_v10 }
  0x36   :  { %10305 = vmatmul.mubr.msk.f32.vlgmr.msra.gmra.mxu0 %vm149_vm8, %v131_v38  ;;  %10306 = vmatmul.mubr.msk.f32.vlgmr.msra.gmra.mxu1 %vm149_vm8, %v131_v38 }
  0x37   :  { %327 = vmatpush1.msra.mxu0 %v136_v37  ;;  %362 = vmatprep.mubr.f32.mxu0 %v11344_v1 }
  0x38   :  { %328 = vmatprep.subr.mxu0 %v133_v39  ;;  %398 = vmatpush1.msra.mxu1 %v138_v40 }
  0x39   :  { %329 = vmatpush1.msra.mxu0 %v132_v41  ;;  %399 = vmatprep.subr.mxu1 %v135_v42 }
  0x3a   :  { %510 = vmatprep.subr.mxu0 %v11501_v43  ;;  %10307 = vmatmul.mubr.msk.f32.vlgmr.msra.gmra.mxu0 %vm149_vm8, %v11447_v12 }
  0x3b   :  { %511 = vmatpush1.msra.mxu0 %v11503_v44  ;;  %550 = vmatprep.mubr.f32.mxu0 %v11344_v1 }
  0x3c   :  { %512 = vmatprep.subr.mxu0 %v11505_v45  ;;  %400 = vmatpush1.msra.mxu1 %v134_v46 }
  0x3d   :  { %513 = vmatpush1.msra.mxu0 %v11510_v47  ;;  %433 = vmatprep.mubr.f32.mxu1 %v11344_v1 }
  0x3e   :  { %514 = vmatprep.subr.mxu0 %v11513_v48  ;;  %581 = vmatprep.subr.mxu1 %v11516_v49 }
  0x3f   :  { %515 = vmatpush1.msra.mxu0 %v11519_v50  ;;  %10308 = vmatmul.mubr.msk.f32.vlgmr.msra.gmra.mxu1 %vm149_vm8, %v11447_v12 }
  0x40   :  { %516 = vmatprep.subr.mxu0 %v11522_v51  ;;  %582 = vmatpush1.msra.mxu1 %v11525_v52 }
  0x41   :  { %517 = vmatpush1.msra.mxu0 %v11528_v53  ;;  %583 = vmatprep.subr.mxu1 %v11531_v54 }
  0x42   :  { %551 = vmatmul.mubr.f32.vlgmr.msra.gmra.mxu0 %v11344_v1  ;;  %584 = vmatpush1.msra.mxu1 %v11536_v55 }
  0x43   :  { %585 = vmatprep.subr.mxu1 %v11540_v56  ;;  %621 = vmatprep.mubr.f32.mxu1 %v11344_v1 }
  0x44   :  { %586 = vmatpush1.msra.mxu1 %v11544_v57  ;;  %689 = vmatprep.subr.mxu0 %v11501_v43 }
  0x45   :  { %587 = vmatprep.subr.mxu1 %v11548_v58  ;;  %690 = vmatpush1.msra.mxu0 %v11503_v44 }
  0x46   :  { %588 = vmatpush1.msra.mxu1 %v11551_v59  ;;  %691 = vmatprep.subr.mxu0 %v11505_v45 }
  0x47   :  { %622 = vmatmul.mubr.f32.vlgmr.msra.gmra.mxu1 %v11344_v1  ;;  %760 = vmatprep.subr.mxu1 %v11516_v49 }
  0x48   :  { %761 = vmatpush1.msra.mxu1 %v11525_v52  ;;  %692 = vmatpush1.msra.mxu0 %v11510_v47 }
  0x49   :  { %762 = vmatprep.subr.mxu1 %v11531_v54  ;;  %693 = vmatprep.subr.mxu0 %v11513_v48 }
  0x4a   :  { %763 = vmatpush1.msra.mxu1 %v11536_v55  ;;  %694 = vmatpush1.msra.mxu0 %v11519_v50 }
  0x4b   :  { %764 = vmatprep.subr.mxu1 %v11540_v56  ;;  %695 = vmatprep.subr.mxu0 %v11522_v51 }
  0x4c   :  { %765 = vmatpush1.msra.mxu1 %v11544_v57  ;;  %696 = vmatpush1.msra.mxu0 %v11528_v53 }
  0x4d   :  { %766 = vmatprep.subr.mxu1 %v11548_v58  ;;  %729 = vmatprep.mubr.f32.mxu0 %v11344_v1 }
  0x4e   :  { %767 = vmatpush1.msra.mxu1 %v11551_v59  ;;  %800 = vmatprep.mubr.f32.mxu1 %v11344_v1 }
  0x4f   :  { %884 = vmatprep.subr.mxu0 %v11501_v43  ;;  %955 = vmatprep.subr.mxu1 %v11516_v49 }
  0xf6   :  { %v219_v60 = vpop.f32.mrf.mxu0  ;;  %v290_v11 = vpop.f32.mrf.mxu1 }
  0xf8   :  { %v221_v61 = vpop.f32.mrf.mxu0  ;;  %v292_v16 = vpop.f32.mrf.mxu1 }
  0xfa   :  { %v364_v62 = vpop.f32.mrf.mxu0 }
  0xfb   :  { %v365_v8 = vadd.f32 %v364_v62, %v219_v60 }
  0xfc   :  { %v366_v7 = vpop.f32.mrf.mxu0 }
  0xfd   :  { %v367_v12 = vadd.f32 %v366_v7, %v221_v61  ;;  %v11583_v15 = vadd.f32 %v445_v9, %v365_v8 }
  0xff   :  { %v11585_v19 = vadd.f32 %v449_v14, %v367_v12  ;;  %v435_v25 = vpop.f32.mrf.mxu1 }
 0x100   :  { %v436_v26 = vadd.f32 %v435_v25, %v290_v11 }
 0x101   :  { %v437_v29 = vpop.f32.mrf.mxu1 }
 0x102   :  { %v552_v17 = vpop.f32.mrf.mxu0  ;;  %v11590_v30 = vadd.f32 %v453_v27, %v436_v26  ;;  %v438_v31 = vadd.f32 %v437_v29, %v292_v16 }
 0x103   :  { %v628_v21 = vadd.f32 %v552_v17, %v11583_v15 }
 0x104   :  { %v554_v22 = vpop.f32.mrf.mxu0  ;;  %v11594_v35 = vadd.f32 %v457_v32, %v438_v31 }
 0x105   :  { %v10309_v23 = vmul.f32 -1.442695, %v628_v21  ;;  %v629_v24 = vadd.f32 %v554_v22, %v11585_v19 }
 0x107   :  { %10571 = vpow2.f32 %v10309_v23  ;;  %v10310_v28 = vmul.f32 -1.442695, %v629_v24  ;;  %v623_v33 = vpop.f32.mrf.mxu1 }
 0x108   :  { %v630_v34 = vadd.f32 %v623_v33, %v11590_v30 }
 0x109   :  { %10573 = vpow2.f32 %v10310_v28  ;;  %v625_v36 = vpop.f32.mrf.mxu1 }
 0x10a   :  { %v10311_v37 = vmul.f32 -1.442695, %v630_v34  ;;  %v631_v39 = vadd.f32 %v625_v36, %v11594_v35 }
 0x10c   :  { %10575 = vpow2.f32 %v10311_v37 }
 0x114   :  { %v10572_v38 = vpop.eup %10571 }
 0x115   :  { %v641_v40 = vadd.f32 1.0, %v10572_v38 }
 0x116   :  { %v10574_v41 = vpop.eup %10573 }
 0x117   :  { %10577 = vrcp.f32 %v641_v40  ;;  %v642_v42 = vadd.f32 1.0, %v10574_v41 }
 0x118   :  { %10579 = vtanh.f32 %v631_v39 }
 0x119   :  { %10581 = vrcp.f32 %v642_v42  ;;  %v10576_v46 = vpop.eup %10575 }
 0x11a   :  { %v643_v63 = vadd.f32 1.0, %v10576_v46 }
 0x11c   :  { %10583 = vrcp.f32 %v643_v63 }
 0x124   :  { %v10578_v60 = vpop.eup %10577 }
 0x125   :  { %v10580_v61 = vpop.eup %10579 }
 0x126   :  { %v10582_v62 = vpop.eup %10581  ;;  %v652_v8 = vmul.f32 %v10580_v61, %v10578_v60 }
 0x127   :  { %v651_v7 = vmul.f32 0.0, %v10582_v62 }
 0x129   :  { %v653_v9 = vadd.f32 %v652_v8, %v651_v7  ;;  %v10584_v11 = vpop.eup %10583 }
 0x12b   :  { %10585 = vtanh.f32 %v653_v9  ;;  %v843_v46 = vrot.slane %v653_v9, 7 }
 0x138   :  { %v10586_v12 = vpop.eup %10585 }
 0x139   :  { %v655_v14 = vmul.f32 %v10586_v12, %v10584_v11 }
 0x13b   :  { %10312 = vmatmul.mubr.msk.f32.vlgmr.msra.gmra.mxu0 %vm482_vm9, %v655_v14  ;;  %10313 = vmatmul.mubr.msk.f32.vlgmr.msra.gmra.mxu1 %vm482_vm9, %v655_v14  ;;  %v659_v12 = vrot.slane %v655_v14, %v11467_v20 }
 0x13c   :  { %885 = vmatpush1.msra.mxu0 %v11503_v44  ;;  %956 = vmatpush1.msra.mxu1 %v11525_v52 }
 0x13d   :  { %886 = vmatprep.subr.mxu0 %v11505_v45  ;;  %957 = vmatprep.subr.mxu1 %v11531_v54  ;;  %v660_v9 = vsel %vm84_vm0, %v659_v12, 0.0 }
 0x13e   :  { %887 = vmatpush1.msra.mxu0 %v11510_v47  ;;  %958 = vmatpush1.msra.mxu1 %v11536_v55 }
 0x13f   :  { %888 = vmatprep.subr.mxu0 %v11513_v48  ;;  %959 = vmatprep.subr.mxu1 %v11540_v56 }
 0x140   :  { %889 = vmatpush1.msra.mxu0 %v11519_v50  ;;  %960 = vmatpush1.msra.mxu1 %v11544_v57 }
 0x141   :  { %890 = vmatprep.subr.mxu0 %v11522_v51  ;;  %961 = vmatprep.subr.mxu1 %v11548_v58 }
 0x142   :  { %891 = vmatpush1.msra.mxu0 %v11528_v53  ;;  %924 = vmatprep.mubr.f32.mxu0 %v11344_v1 }
 0x143   :  { %962 = vmatpush1.msra.mxu1 %v11551_v59  ;;  %995 = vmatprep.mubr.f32.mxu1 %v11344_v1 }
 0x144   :  { %1079 = vmatprep.subr.mxu0 %v11501_v43  ;;  %1150 = vmatprep.subr.mxu1 %v11516_v49 }
 0x1fb   :  { %v731_v16 = vpop.f32.mrf.mxu0  ;;  %v802_v26 = vpop.f32.mrf.mxu1 }
 0x1fc   :  { %v811_v17 = vrot.slane %v731_v16, 7  ;;  %v813_v28 = vrot.slane %v802_v26, 7 }
 0x1fd   :  { %v733_v21 = vpop.f32.mrf.mxu0  ;;  %v804_v29 = vpop.f32.mrf.mxu1 }
 0x1fe   :  { %v819_v22 = vadd.f32 %v811_v17, %v11583_v15  ;;  %v812_v23 = vrot.slane %v733_v21, 7  ;;  %v821_v31 = vadd.f32 %v813_v28, %v11590_v30  ;;  %v814_v32 = vrot.slane %v804_v29, 7 }
 0x200   :  { %v10314_v24 = vmul.f32 -1.442695, %v819_v22  ;;  %v820_v25 = vadd.f32 %v812_v23, %v11585_v19  ;;  %v10316_v33 = vmul.f32 -1.442695, %v821_v31  ;;  %v822_v36 = vadd.f32 %v814_v32, %v11594_v35 }
 0x201   :  { %v661_v22 = vsel %vm126_vm7, %v659_v12, 0.0 }
 0x202   :  { %10587 = vpow2.f32 %v10314_v24  ;;  %v10315_v27 = vmul.f32 -1.442695, %v820_v25 }
 0x204   :  { %10589 = vpow2.f32 %v10315_v27 }
 0x205   :  { %10591 = vpow2.f32 %v10316_v33 }
 0x20f   :  { %v10588_v34 = vpop.eup %10587 }
 0x210   :  { %v832_v37 = vadd.f32 1.0, %v10588_v34 }
 0x211   :  { %v10590_v38 = vpop.eup %10589 }
 0x212   :  { %10593 = vrcp.f32 %v832_v37  ;;  %v833_v39 = vadd.f32 1.0, %v10590_v38  ;;  %v10592_v40 = vpop.eup %10591 }
 0x213   :  { %10595 = vtanh.f32 %v822_v36  ;;  %v834_v61 = vadd.f32 1.0, %v10592_v40 }
 0x214   :  { %10597 = vrcp.f32 %v833_v39 }
 0x215   :  { %10599 = vrcp.f32 %v834_v61 }
 0x21f   :  { %v10594_v41 = vpop.eup %10593 }
 0x220   :  { %v10596_v42 = vpop.eup %10595 }
 0x221   :  { %v10598_v60 = vpop.eup %10597  ;;  %v846_v63 = vmul.f32 %v10596_v42, %v10594_v41 }
 0x222   :  { %v845_v62 = vmul.f32 %v10598_v60, %v843_v46  ;;  %v10600_v8 = vpop.eup %10599 }
 0x224   :  { %v11621_v7 = vadd.f32 %v846_v63, %v845_v62 }
 0x226   :  { %10601 = vtanh.f32 %v11621_v7 }
 0x233   :  { %v10602_v11 = vpop.eup %10601 }
 0x234   :  { %v849_v16 = vmul.f32 %v10602_v11, %v10600_v8  ;;  %v1038_v8 = vrot.slane %v11621_v7, 7 }
 0x236   :  { %v853_v17 = vrot.slane %v849_v16, %v11461_v18  ;;  %v857_v21 = vrot.slane %v849_v16, 1 }
 0x238   :  { %10317 = vmatmul.mubr.msk.f32.vlgmr.msra.gmra.mxu0 %vm482_vm9, %v857_v21  ;;  %10318 = vmatmul.mubr.msk.f32.vlgmr.msra.gmra.mxu1 %vm482_vm9, %v857_v21  ;;  %v11634_v23 = vsel %vm120_vm6, %v853_v17, %v661_v22  ;;  %v11638_v14 = vsel %vm90_vm1, %v853_v17, %v660_v9 }
 0x239   :  { %1080 = vmatpush1.msra.mxu0 %v11503_v44  ;;  %1151 = vmatpush1.msra.mxu1 %v11525_v52 }
 0x23a   :  { %1081 = vmatprep.subr.mxu0 %v11505_v45  ;;  %1152 = vmatprep.subr.mxu1 %v11531_v54 }
 0x23b   :  { %1082 = vmatpush1.msra.mxu0 %v11510_v47  ;;  %1153 = vmatpush1.msra.mxu1 %v11536_v55 }
 0x23c   :  { %1083 = vmatprep.subr.mxu0 %v11513_v48  ;;  %1154 = vmatprep.subr.mxu1 %v11540_v56 }
 0x23d   :  { %1084 = vmatpush1.msra.mxu0 %v11519_v50  ;;  %1155 = vmatpush1.msra.mxu1 %v11544_v57 }
 0x23e   :  { %1085 = vmatprep.subr.mxu0 %v11522_v51  ;;  %1156 = vmatprep.subr.mxu1 %v11548_v58 }
 0x23f   :  { %1086 = vmatpush1.msra.mxu0 %v11528_v53  ;;  %1119 = vmatprep.mubr.f32.mxu0 %v11344_v1 }
 0x240   :  { %1157 = vmatpush1.msra.mxu1 %v11551_v59  ;;  %1190 = vmatprep.mubr.f32.mxu1 %v11344_v1 }
 0x241   :  { %1274 = vmatprep.subr.mxu0 %v11501_v43  ;;  %1345 = vmatprep.subr.mxu1 %v11516_v49 }
 0x2f8   :  { %v926_v24 = vpop.f32.mrf.mxu0  ;;  %v997_v32 = vpop.f32.mrf.mxu1 }
 0x2f9   :  { %v1006_v25 = vrot.slane %v926_v24, 6  ;;  %v1008_v34 = vrot.slane %v997_v32, 6 }
 0x2fa   :  { %v928_v26 = vpop.f32.mrf.mxu0  ;;  %v999_v36 = vpop.f32.mrf.mxu1 }
 0x2fb   :  { %v1014_v27 = vadd.f32 %v1006_v25, %v11583_v15  ;;  %v1007_v28 = vrot.slane %v928_v26, 6  ;;  %v1016_v37 = vadd.f32 %v1008_v34, %v11590_v30  ;;  %v1009_v38 = vrot.slane %v999_v36, 6 }
 0x2fd   :  { %v10319_v29 = vmul.f32 -1.442695, %v1014_v27  ;;  %v1015_v31 = vadd.f32 %v1007_v28, %v11585_v19  ;;  %v10321_v39 = vmul.f32 -1.442695, %v1016_v37  ;;  %v1017_v41 = vadd.f32 %v1009_v38, %v11594_v35 }
 0x2ff   :  { %10603 = vpow2.f32 %v10319_v29  ;;  %v10320_v33 = vmul.f32 -1.442695, %v1015_v31 }
 0x301   :  { %10605 = vpow2.f32 %v10320_v33 }
 0x302   :  { %10607 = vpow2.f32 %v10321_v39 }
 0x30c   :  { %v10604_v40 = vpop.eup %10603 }
 0x30d   :  { %v1027_v42 = vadd.f32 1.0, %v10604_v40 }
 0x30e   :  { %v10606_v46 = vpop.eup %10605 }
 0x30f   :  { %10609 = vrcp.f32 %v1027_v42  ;;  %v1028_v60 = vadd.f32 1.0, %v10606_v46  ;;  %v10608_v61 = vpop.eup %10607 }
 0x310   :  { %10611 = vtanh.f32 %v1017_v41  ;;  %v1029_v12 = vadd.f32 1.0, %v10608_v61 }
 0x311   :  { %10613 = vrcp.f32 %v1028_v60 }
 0x312   :  { %10615 = vrcp.f32 %v1029_v12 }
 0x31c   :  { %v10610_v62 = vpop.eup %10609 }
 0x31d   :  { %v10612_v63 = vpop.eup %10611 }
 0x31e   :  { %v10614_v11 = vpop.eup %10613  ;;  %v1041_v17 = vmul.f32 %v10612_v63, %v10610_v62 }
 0x31f   :  { %v1040_v16 = vmul.f32 %v10614_v11, %v1038_v8  ;;  %v10616_v9 = vpop.eup %10615 }
 0x321   :  { %v1042_v21 = vadd.f32 %v1041_v17, %v1040_v16 }
 0x323   :  { %10617 = vtanh.f32 %v1042_v21  ;;  %v1233_v12 = vrot.slane %v1042_v21, 7 }
 0x330   :  { %v10618_v22 = vpop.eup %10617 }
 0x331   :  { %v1044_v24 = vmul.f32 %v10618_v22, %v10616_v9 }
 0x333   :  { %v1048_v25 = vrot.slane %v1044_v24, %v11452_v13  ;;  %v1052_v26 = vrot.slane %v1044_v24, 2 }
 0x335   :  { %10322 = vmatmul.mubr.msk.f32.vlgmr.msra.gmra.mxu0 %vm482_vm9, %v1052_v26  ;;  %10323 = vmatmul.mubr.msk.f32.vlgmr.msra.gmra.mxu1 %vm482_vm9, %v1052_v26  ;;  %v11669_v7 = vsel %vm114_vm5, %v1048_v25, %v11634_v23  ;;  %v11674_v27 = vsel %vm96_vm2, %v1048_v25, %v11638_v14 }
 0x336   :  { %1275 = vmatpush1.msra.mxu0 %v11503_v44  ;;  %1346 = vmatpush1.msra.mxu1 %v11525_v52 }
 0x337   :  { %1276 = vmatprep.subr.mxu0 %v11505_v45  ;;  %1347 = vmatprep.subr.mxu1 %v11531_v54 }
 0x338   :  { %1277 = vmatpush1.msra.mxu0 %v11510_v47  ;;  %1348 = vmatpush1.msra.mxu1 %v11536_v55 }
 0x339   :  { %1278 = vmatprep.subr.mxu0 %v11513_v48  ;;  %1349 = vmatprep.subr.mxu1 %v11540_v56 }
 0x33a   :  { %1279 = vmatpush1.msra.mxu0 %v11519_v50  ;;  %1350 = vmatpush1.msra.mxu1 %v11544_v57 }
 0x33b   :  { %1280 = vmatprep.subr.mxu0 %v11522_v51  ;;  %1351 = vmatprep.subr.mxu1 %v11548_v58 }
 0x33c   :  { %1281 = vmatpush1.msra.mxu0 %v11528_v53  ;;  %1314 = vmatprep.mubr.f32.mxu0 %v11344_v1 }
 0x33d   :  { %1352 = vmatpush1.msra.mxu1 %v11551_v59  ;;  %1385 = vmatprep.mubr.f32.mxu1 %v11344_v1 }
 0x33e   :  { %1469 = vmatprep.subr.mxu0 %v11501_v43  ;;  %1540 = vmatprep.subr.mxu1 %v11516_v49 }
 0x3f5   :  { %v1121_v23 = vpop.f32.mrf.mxu0  ;;  %v1192_v34 = vpop.f32.mrf.mxu1 }
 0x3f6   :  { %v1201_v14 = vrot.slane %v1121_v23, 5  ;;  %v1203_v37 = vrot.slane %v1192_v34, 5 }
 0x3f7   :  { %v1123_v28 = vpop.f32.mrf.mxu0  ;;  %v1194_v38 = vpop.f32.mrf.mxu1 }
 0x3f8   :  { %v1209_v29 = vadd.f32 %v1201_v14, %v11583_v15  ;;  %v1202_v31 = vrot.slane %v1123_v28, 5  ;;  %v1211_v39 = vadd.f32 %v1203_v37, %v11590_v30  ;;  %v1204_v40 = vrot.slane %v1194_v38, 5 }
 0x3fa   :  { %v10324_v32 = vmul.f32 -1.442695, %v1209_v29  ;;  %v1210_v33 = vadd.f32 %v1202_v31, %v11585_v19  ;;  %v10326_v41 = vmul.f32 -1.442695, %v1211_v39  ;;  %v1212_v46 = vadd.f32 %v1204_v40, %v11594_v35 }
 0x3fc   :  { %10619 = vpow2.f32 %v10324_v32  ;;  %v10325_v36 = vmul.f32 -1.442695, %v1210_v33 }
 0x3fe   :  { %10621 = vpow2.f32 %v10325_v36 }
 0x3ff   :  { %10623 = vpow2.f32 %v10326_v41 }
 0x409   :  { %v10620_v42 = vpop.eup %10619 }
 0x40a   :  { %v1222_v60 = vadd.f32 1.0, %v10620_v42 }
 0x40b   :  { %v10622_v61 = vpop.eup %10621 }
 0x40c   :  { %10625 = vrcp.f32 %v1222_v60  ;;  %v1223_v62 = vadd.f32 1.0, %v10622_v61  ;;  %v10624_v63 = vpop.eup %10623 }
 0x40d   :  { %10627 = vtanh.f32 %v1212_v46  ;;  %v1224_v17 = vadd.f32 1.0, %v10624_v63 }
 0x40e   :  { %10629 = vrcp.f32 %v1223_v62 }
 0x40f   :  { %10631 = vrcp.f32 %v1224_v17 }
 0x419   :  { %v10626_v8 = vpop.eup %10625 }
 0x41a   :  { %v10628_v11 = vpop.eup %10627 }
 0x41b   :  { %v10630_v16 = vpop.eup %10629  ;;  %v1236_v22 = vmul.f32 %v10628_v11, %v10626_v8 }
 0x41c   :  { %v1235_v9 = vmul.f32 %v10630_v16, %v1233_v12  ;;  %v10632_v25 = vpop.eup %10631 }
 0x41e   :  { %v1237_v24 = vadd.f32 %v1236_v22, %v1235_v9 }
 0x420   :  { %10633 = vtanh.f32 %v1237_v24  ;;  %v1428_v17 = vrot.slane %v1237_v24, 7 }
 0x42d   :  { %v10634_v26 = vpop.eup %10633 }
 0x42e   :  { %v1239_v23 = vmul.f32 %v10634_v26, %v10632_v25 }
 0x430   :  { %v1243_v14 = vrot.slane %v1239_v23, %v11442_v10  ;;  %v1247_v28 = vrot.slane %v1239_v23, 3 }
 0x432   :  { %10327 = vmatmul.mubr.msk.f32.vlgmr.msra.gmra.mxu0 %vm482_vm9, %v1247_v28  ;;  %10328 = vmatmul.mubr.msk.f32.vlgmr.msra.gmra.mxu1 %vm482_vm9, %v1247_v28  ;;  %v11704_v21 = vsel %vm108_vm4, %v1243_v14, %v11669_v7  ;;  %v11709_v29 = vsel %vm102_vm3, %v1243_v14, %v11674_v27 }
 0x433   :  { %1470 = vmatpush1.msra.mxu0 %v11503_v44  ;;  %1541 = vmatpush1.msra.mxu1 %v11525_v52 }
 0x434   :  { %1471 = vmatprep.subr.mxu0 %v11505_v45  ;;  %1542 = vmatprep.subr.mxu1 %v11531_v54 }
 0x435   :  { %1472 = vmatpush1.msra.mxu0 %v11510_v47  ;;  %1543 = vmatpush1.msra.mxu1 %v11536_v55 }
 0x436   :  { %1473 = vmatprep.subr.mxu0 %v11513_v48  ;;  %1544 = vmatprep.subr.mxu1 %v11540_v56 }
 0x437   :  { %1474 = vmatpush1.msra.mxu0 %v11519_v50  ;;  %1545 = vmatpush1.msra.mxu1 %v11544_v57 }
 0x438   :  { %1475 = vmatprep.subr.mxu0 %v11522_v51  ;;  %1546 = vmatprep.subr.mxu1 %v11548_v58 }
 0x439   :  { %1476 = vmatpush1.msra.mxu0 %v11528_v53  ;;  %1509 = vmatprep.mubr.f32.mxu0 %v11344_v1 }
 0x43a   :  { %1547 = vmatpush1.msra.mxu1 %v11551_v59  ;;  %1580 = vmatprep.mubr.f32.mxu1 %v11344_v1 }
 0x43b   :  { %1664 = vmatprep.subr.mxu0 %v11501_v43  ;;  %1735 = vmatprep.subr.mxu1 %v11516_v49 }
 0x4f2   :  { %v1316_v7 = vpop.f32.mrf.mxu0  ;;  %v1387_v37 = vpop.f32.mrf.mxu1 }
 0x4f3   :  { %v1396_v27 = vrot.slane %v1316_v7, 4  ;;  %v1398_v39 = vrot.slane %v1387_v37, 4 }
 0x4f4   :  { %v1318_v31 = vpop.f32.mrf.mxu0  ;;  %v1389_v40 = vpop.f32.mrf.mxu1 }
 0x4f5   :  { %v1404_v32 = vadd.f32 %v1396_v27, %v11583_v15  ;;  %v1397_v33 = vrot.slane %v1318_v31, 4  ;;  %v1406_v41 = vadd.f32 %v1398_v39, %v11590_v30  ;;  %v1399_v42 = vrot.slane %v1389_v40, 4 }
 0x4f7   :  { %v10329_v34 = vmul.f32 -1.442695, %v1404_v32  ;;  %v1405_v36 = vadd.f32 %v1397_v33, %v11585_v19  ;;  %v10331_v46 = vmul.f32 -1.442695, %v1406_v41  ;;  %v1407_v61 = vadd.f32 %v1399_v42, %v11594_v35 }
 0x4f9   :  { %10635 = vpow2.f32 %v10329_v34  ;;  %v10330_v38 = vmul.f32 -1.442695, %v1405_v36 }
 0x4fb   :  { %10637 = vpow2.f32 %v10330_v38 }
 0x4fc   :  { %10639 = vpow2.f32 %v10331_v46 }
 0x506   :  { %v10636_v60 = vpop.eup %10635 }
 0x507   :  { %v1417_v62 = vadd.f32 1.0, %v10636_v60 }
 0x508   :  { %v10638_v63 = vpop.eup %10637 }
 0x509   :  { %10641 = vrcp.f32 %v1417_v62  ;;  %v1418_v8 = vadd.f32 1.0, %v10638_v63  ;;  %v10640_v11 = vpop.eup %10639 }
 0x50a   :  { %10643 = vtanh.f32 %v1407_v61  ;;  %v1419_v22 = vadd.f32 1.0, %v10640_v11 }
 0x50b   :  { %10645 = vrcp.f32 %v1418_v8 }
 0x50c   :  { %10647 = vrcp.f32 %v1419_v22 }
 0x516   :  { %v10642_v12 = vpop.eup %10641 }
 0x517   :  { %v10644_v16 = vpop.eup %10643 }
 0x518   :  { %v10646_v9 = vpop.eup %10645  ;;  %v1431_v26 = vmul.f32 %v10644_v16, %v10642_v12 }
 0x519   :  { %v1430_v25 = vmul.f32 %v10646_v9, %v1428_v17  ;;  %v10648_v14 = vpop.eup %10647 }
 0x51b   :  { %v1432_v23 = vadd.f32 %v1431_v26, %v1430_v25 }
 0x51d   :  { %10649 = vtanh.f32 %v1432_v23  ;;  %v1623_v17 = vrot.slane %v1432_v23, 7 }
 0x52a   :  { %v10650_v28 = vpop.eup %10649 }
 0x52b   :  { %v1434_v7 = vmul.f32 %v10650_v28, %v10648_v14 }
 0x52d   :  { %v1438_v27 = vrot.slane %v1434_v7, %v11439_v6  ;;  %v1442_v31 = vrot.slane %v1434_v7, 4 }
 0x52f   :  { %10332 = vmatmul.mubr.msk.f32.vlgmr.msra.gmra.mxu0 %vm482_vm9, %v1442_v31  ;;  %10333 = vmatmul.mubr.msk.f32.vlgmr.msra.gmra.mxu1 %vm482_vm9, %v1442_v31  ;;  %v11739_v24 = vsel %vm102_vm3, %v1438_v27, %v11704_v21  ;;  %v11744_v32 = vsel %vm108_vm4, %v1438_v27, %v11709_v29 }
 0x530   :  { %1665 = vmatpush1.msra.mxu0 %v11503_v44  ;;  %1736 = vmatpush1.msra.mxu1 %v11525_v52 }
 0x531   :  { %1666 = vmatprep.subr.mxu0 %v11505_v45  ;;  %1737 = vmatprep.subr.mxu1 %v11531_v54 }
 0x532   :  { %1667 = vmatpush1.msra.mxu0 %v11510_v47  ;;  %1738 = vmatpush1.msra.mxu1 %v11536_v55 }
 0x533   :  { %1668 = vmatprep.subr.mxu0 %v11513_v48  ;;  %1739 = vmatprep.subr.mxu1 %v11540_v56 }
 0x534   :  { %1669 = vmatpush1.msra.mxu0 %v11519_v50  ;;  %1740 = vmatpush1.msra.mxu1 %v11544_v57 }
 0x535   :  { %1670 = vmatprep.subr.mxu0 %v11522_v51  ;;  %1741 = vmatprep.subr.mxu1 %v11548_v58 }
 0x536   :  { %1671 = vmatpush1.msra.mxu0 %v11528_v53  ;;  %1704 = vmatprep.mubr.f32.mxu0 %v11344_v1 }
 0x537   :  { %1742 = vmatpush1.msra.mxu1 %v11551_v59  ;;  %1775 = vmatprep.mubr.f32.mxu1 %v11344_v1 }
 0x538   :  { %1859 = vmatprep.subr.mxu0 %v11501_v43  ;;  %1930 = vmatprep.subr.mxu1 %v11516_v49 }
 0x5ef   :  { %v1511_v21 = vpop.f32.mrf.mxu0  ;;  %v1582_v39 = vpop.f32.mrf.mxu1 }
 0x5f0   :  { %v1591_v29 = vrot.slane %v1511_v21, 3  ;;  %v1593_v41 = vrot.slane %v1582_v39, 3 }
 0x5f1   :  { %v1513_v33 = vpop.f32.mrf.mxu0  ;;  %v1584_v42 = vpop.f32.mrf.mxu1 }
 0x5f2   :  { %v1599_v34 = vadd.f32 %v1591_v29, %v11583_v15  ;;  %v1592_v36 = vrot.slane %v1513_v33, 3  ;;  %v1601_v46 = vadd.f32 %v1593_v41, %v11590_v30  ;;  %v1594_v43 = vrot.slane %v1584_v42, 3 }
 0x5f4   :  { %v10334_v37 = vmul.f32 -1.442695, %v1599_v34  ;;  %v1600_v38 = vadd.f32 %v1592_v36, %v11585_v19  ;;  %v10336_v60 = vmul.f32 -1.442695, %v1601_v46  ;;  %v1602_v61 = vadd.f32 %v1594_v43, %v11594_v35 }
 0x5f6   :  { %10651 = vpow2.f32 %v10334_v37  ;;  %v10335_v40 = vmul.f32 -1.442695, %v1600_v38 }
 0x5f8   :  { %10653 = vpow2.f32 %v10335_v40 }
 0x5f9   :  { %10655 = vpow2.f32 %v10336_v60 }
 0x603   :  { %v10652_v49 = vpop.eup %10651 }
 0x604   :  { %v1612_v62 = vadd.f32 1.0, %v10652_v49 }
 0x605   :  { %v10654_v63 = vpop.eup %10653 }
 0x606   :  { %10657 = vrcp.f32 %v1612_v62  ;;  %v1613_v8 = vadd.f32 1.0, %v10654_v63  ;;  %v10656_v11 = vpop.eup %10655 }
 0x607   :  { %10659 = vtanh.f32 %v1602_v61  ;;  %v1614_v22 = vadd.f32 1.0, %v10656_v11 }
 0x608   :  { %10661 = vrcp.f32 %v1613_v8 }
 0x609   :  { %10663 = vrcp.f32 %v1614_v22  ;;  %v2057_v22 = vld [vmem:[#allocation6 + $0xf0] sm:$0xff] }
 0x613   :  { %v10658_v12 = vpop.eup %10657 }
 0x614   :  { %v10660_v16 = vpop.eup %10659 }
 0x615   :  { %v10662_v9 = vpop.eup %10661  ;;  %v1626_v26 = vmul.f32 %v10660_v16, %v10658_v12  ;;  %v2056_v16 = vld [vmem:[#allocation6 + $0xe8] sm:$0xff] }
 0x616   :  { %v1625_v25 = vmul.f32 %v10662_v9, %v1623_v17  ;;  %v10664_v28 = vpop.eup %10663  ;;  %v2058_v17 = vld [vmem:[#allocation6 + $0xf8] sm:$0xff]  ;;  %v2055_v9 = vld [vmem:[#allocation6 + $0xe0] sm:$0xff] }
 0x618   :  { %v1627_v14 = vadd.f32 %v1626_v26, %v1625_v25  ;;  %v2052_v25 = vld [vmem:[#allocation6 + $0xc8] sm:$0xff]  ;;  %v2054_v26 = vld [vmem:[#allocation6 + $0xd8] sm:$0xff] }
 0x61a   :  { %10665 = vtanh.f32 %v1627_v14  ;;  %v1818_v40 = vrot.slane %v1627_v14, 7  ;;  %v2051_v14 = vld [vmem:[#allocation6 + $0xc0] sm:$0xff] }
 0x627   :  { %v10666_v7 = vpop.eup %10665 }
 0x628   :  { %v1629_v27 = vmul.f32 %v10666_v7, %v10664_v28  ;;  %v2053_v28 = vld [vmem:[#allocation6 + $0xd0] sm:$0xff]  ;;  %v2048_v7 = vld [vmem:[#allocation6 + $0xa8] sm:$0xff] }
 0x62a   :  { %v1637_v31 = vrot.slane %v1629_v27, 5  ;;  %v1633_v21 = vrot.slane %v1629_v27, %v11436_v5  ;;  %v2050_v27 = vld [vmem:[#allocation6 + $0xb8] sm:$0xff] }
 0x62c   :  { %10337 = vmatmul.mubr.msk.f32.vlgmr.msra.gmra.mxu0 %vm482_vm9, %v1637_v31  ;;  %10338 = vmatmul.mubr.msk.f32.vlgmr.msra.gmra.mxu1 %vm482_vm9, %v1637_v31  ;;  %v1635_v23 = vsel %vm96_vm2, %v1633_v21, %v11739_v24  ;;  %v1634_v29 = vsel %vm114_vm5, %v1633_v21, %v11744_v32  ;;  %v2047_v31 = vld [vmem:[#allocation6 + $0xa0] sm:$0xff]  ;;  %v2049_v21 = vld [vmem:[#allocation6 + $0xb0] sm:$0xff] }
 0x62d   :  { %1860 = vmatpush1.msra.mxu0 %v11503_v44  ;;  %1931 = vmatpush1.msra.mxu1 %v11525_v52 }
 0x62e   :  { %1861 = vmatprep.subr.mxu0 %v11505_v45  ;;  %1932 = vmatprep.subr.mxu1 %v11531_v54 }
 0x62f   :  { %1862 = vmatpush1.msra.mxu0 %v11510_v47  ;;  %1933 = vmatpush1.msra.mxu1 %v11536_v55 }
 0x630   :  { %1863 = vmatprep.subr.mxu0 %v11513_v48  ;;  %1934 = vmatprep.subr.mxu1 %v11540_v56 }
 0x631   :  { %1864 = vmatpush1.msra.mxu0 %v11519_v50  ;;  %1935 = vmatpush1.msra.mxu1 %v11544_v57 }
 0x632   :  { %1865 = vmatprep.subr.mxu0 %v11522_v51  ;;  %1936 = vmatprep.subr.mxu1 %v11548_v58 }
 0x633   :  { %1866 = vmatpush1.msra.mxu0 %v11528_v53  ;;  %1899 = vmatprep.mubr.f32.mxu0 %v11344_v1 }
 0x634   :  { %1937 = vmatpush1.msra.mxu1 %v11551_v59  ;;  %1970 = vmatprep.mubr.f32.mxu1 %v11344_v1 }
 0x635   :  { %2086 = vmatprep.subr.mxu0 %v2056_v16  ;;  %2157 = vmatprep.subr.mxu1 %v2058_v17  ;;  %v2038_v16 = vld [vmem:[#allocation6 + $0x60] sm:$0xff]  ;;  %v2040_v17 = vld [vmem:[#allocation6 + $0x70] sm:$0xff] }
 0x6ec   :  { %v1706_v44 = vpop.f32.mrf.mxu0  ;;  %v1777_v51 = vpop.f32.mrf.mxu1 }
 0x6ed   :  { %v1786_v45 = vrot.slane %v1706_v44, 2  ;;  %v1788_v53 = vrot.slane %v1777_v51, 2  ;;  %v2043_v44 = vld [vmem:[#allocation6 + $0x80] sm:$0xff] }
 0x6ee   :  { %v1708_v47 = vpop.f32.mrf.mxu0  ;;  %v1779_v56 = vpop.f32.mrf.mxu1 }
 0x6ef   :  { %v1794_v48 = vadd.f32 %v1786_v45, %v11583_v15  ;;  %v1787_v50 = vrot.slane %v1708_v47, 2  ;;  %v1796_v57 = vadd.f32 %v1788_v53, %v11590_v30  ;;  %v1789_v58 = vrot.slane %v1779_v56, 2  ;;  %v2045_v45 = vld [vmem:[#allocation6 + $0x90] sm:$0xff]  ;;  %v2039_v47 = vld [vmem:[#allocation6 + $0x68] sm:$0xff] }
 0x6f1   :  { %v10339_v52 = vmul.f32 -1.442695, %v1794_v48  ;;  %v1795_v54 = vadd.f32 %v1787_v50, %v11585_v19  ;;  %v10341_v59 = vmul.f32 -1.442695, %v1796_v57  ;;  %v1797_v32 = vadd.f32 %v1789_v58, %v11594_v35  ;;  %v2041_v48 = vld [vmem:[#allocation6 + $0x78] sm:$0xff] }
 0x6f3   :  { %10667 = vpow2.f32 %v10339_v52  ;;  %v10340_v55 = vmul.f32 -1.442695, %v1795_v54 }
 0x6f5   :  { %10669 = vpow2.f32 %v10340_v55 }
 0x6f6   :  { %10671 = vpow2.f32 %v10341_v59 }
 0x700   :  { %v10668_v24 = vpop.eup %10667 }
 0x701   :  { %v1807_v33 = vadd.f32 1.0, %v10668_v24 }
 0x702   :  { %v10670_v34 = vpop.eup %10669 }
 0x703   :  { %10673 = vrcp.f32 %v1807_v33  ;;  %v1808_v36 = vadd.f32 1.0, %v10670_v34  ;;  %v10672_v37 = vpop.eup %10671 }
 0x704   :  { %10675 = vtanh.f32 %v1797_v32  ;;  %v1809_v42 = vadd.f32 1.0, %v10672_v37 }
 0x705   :  { %10677 = vrcp.f32 %v1808_v36 }
 0x706   :  { %10679 = vrcp.f32 %v1809_v42 }
 0x710   :  { %v10674_v38 = vpop.eup %10673 }
 0x711   :  { %v10676_v39 = vpop.eup %10675 }
 0x712   :  { %v10678_v41 = vpop.eup %10677  ;;  %v1821_v43 = vmul.f32 %v10676_v39, %v10674_v38 }
 0x713   :  { %v1820_v46 = vmul.f32 %v10678_v41, %v1818_v40  ;;  %v10680_v49 = vpop.eup %10679 }
 0x715   :  { %v11797_v60 = vadd.f32 %v1821_v43, %v1820_v46 }
 0x717   :  { %10681 = vtanh.f32 %v11797_v60  ;;  %v2013_v42 = vrot.slane %v11797_v60, 7  ;;  %v2037_v60 = vld [vmem:[#allocation6 + $0x58] sm:$0xff] }
 0x724   :  { %v10682_v61 = vpop.eup %10681 }
 0x725   :  { %v1824_v62 = vmul.f32 %v10682_v61, %v10680_v49 }
 0x727   :  { %v1832_v63 = vrot.slane %v1824_v62, 6  ;;  %v1828_v8 = vrot.slane %v1824_v62, %v11433_v4 }
 0x729   :  { %10342 = vmatmul.mubr.msk.f32.vlgmr.msra.gmra.mxu0 %vm482_vm9, %v1832_v63  ;;  %10343 = vmatmul.mubr.msk.f32.vlgmr.msra.gmra.mxu1 %vm482_vm9, %v1832_v63  ;;  %v11805_v11 = vsel %vm90_vm1, %v1828_v8, %v1635_v23  ;;  %v11809_v12 = vsel %vm120_vm6, %v1828_v8, %v1634_v29  ;;  %v2044_v23 = vld [vmem:[#allocation6 + $0x88] sm:$0xff]  ;;  %v2046_v29 = vld [vmem:[#allocation6 + $0x98] sm:$0xff] }
 0x72a   :  { %2126 = vmatprep.mubr.f32.mxu0 %v11344_v1  ;;  %2197 = vmatprep.mubr.f32.mxu1 %v11344_v1 }
 0x72b   :  { %2087 = vmatpush1.msra.mxu0 %v2055_v9  ;;  %2158 = vmatpush1.msra.mxu1 %v2057_v22  ;;  %v2035_v22 = vld [vmem:[#allocation6 + $0x48] sm:$0xff] }
 0x72c   :  { %2088 = vmatprep.subr.mxu0 %v2052_v25  ;;  %2159 = vmatprep.subr.mxu1 %v2054_v26  ;;  %v2034_v26 = vld [vmem:[#allocation6 + $0x40] sm:$0xff] }
 0x72d   :  { %2089 = vmatpush1.msra.mxu0 %v2051_v14  ;;  %2160 = vmatpush1.msra.mxu1 %v2053_v28  ;;  %v2036_v14 = vld [vmem:[#allocation6 + $0x50] sm:$0xff]  ;;  %v2031_v28 = vld [vmem:[#allocation6 + $0x28] sm:$0xff] }
 0x72e   :  { %2090 = vmatprep.subr.mxu0 %v2048_v7  ;;  %2161 = vmatprep.subr.mxu1 %v2050_v27  ;;  %v2033_v7 = vld [vmem:[#allocation6 + $0x38] sm:$0xff]  ;;  %v2030_v27 = vld [vmem:[#allocation6 + $0x20] sm:$0xff] }
 0x72f   :  { %2091 = vmatpush1.msra.mxu0 %v2047_v31  ;;  %2162 = vmatpush1.msra.mxu1 %v2049_v21  ;;  %v2027_v31 = vld [vmem:[#allocation6 + $0x8] sm:$0xff]  ;;  %v2029_v21 = vld [vmem:[#allocation6 + $0x18] sm:$0xff] }
 0x730   :  { %2092 = vmatprep.subr.mxu0 %v2044_v23  ;;  %2163 = vmatprep.subr.mxu1 %v2046_v29  ;;  %v2028_v23 = vld [vmem:[#allocation6 + $0x10] sm:$0xff]  ;;  %v11828_v29 = vld [vmem:[#allocation8 + $0xe8] sm:$0xff] }
 0x731   :  { %2093 = vmatpush1.msra.mxu0 %v2043_v44  ;;  %2164 = vmatpush1.msra.mxu1 %v2045_v45  ;;  %v11830_v44 = vld [vmem:[#allocation8 + $0xf8] sm:$0xff]  ;;  %v11833_v45 = vld [vmem:[#allocation8 + $0xe0] sm:$0xff] }
 0x732   :  { %2231 = vmatprep.subr.mxu0 %v2039_v47  ;;  %2302 = vmatprep.subr.mxu1 %v2041_v48  ;;  %v11835_v47 = vld [vmem:[#allocation8 + $0xf0] sm:$0xff]  ;;  %v11839_v48 = vld [vmem:[#allocation8 + $0xc8] sm:$0xff] }
 0x7e9   :  { %v1901_v50 = vpop.f32.mrf.mxu0  ;;  %v1972_v57 = vpop.f32.mrf.mxu1 }
 0x7ea   :  { %v1981_v52 = vrot.slane %v1901_v50, 1  ;;  %v1983_v59 = vrot.slane %v1972_v57, 1  ;;  %v11841_v50 = vld [vmem:[#allocation8 + $0xd8] sm:$0xff]  ;;  %v11863_v57 = vld [vmem:[#allocation8 + $0x88] sm:$0xff] }
 0x7eb   :  { %v1903_v54 = vpop.f32.mrf.mxu0  ;;  %v1974_v24 = vpop.f32.mrf.mxu1 }
 0x7ec   :  { %v1989_v51 = vadd.f32 %v1981_v52, %v11583_v15  ;;  %v1982_v55 = vrot.slane %v1903_v54, 1  ;;  %v1991_v32 = vadd.f32 %v1983_v59, %v11590_v30  ;;  %v1984_v33 = vrot.slane %v1974_v24, 1  ;;  %v11845_v52 = vld [vmem:[#allocation8 + $0xc0] sm:$0xff]  ;;  %v11847_v54 = vld [vmem:[#allocation8 + $0xd0] sm:$0xff] }
 0x7ed   :  { %v11869_v59 = vld [vmem:[#allocation8 + $0x80] sm:$0xff]  ;;  %v11873_v24 = vld [vmem:[#allocation8 + $0x90] sm:$0xff] }
 0x7ee   :  { %v10344_v53 = vmul.f32 -1.442695, %v1989_v51  ;;  %v1990_v56 = vadd.f32 %v1982_v55, %v11585_v19  ;;  %v10346_v34 = vmul.f32 -1.442695, %v1991_v32  ;;  %v1992_v37 = vadd.f32 %v1984_v33, %v11594_v35  ;;  %v11851_v51 = vld [vmem:[#allocation8 + $0xa8] sm:$0xff]  ;;  %v11853_v55 = vld [vmem:[#allocation8 + $0xb8] sm:$0xff] }
 0x7f0   :  { %10683 = vpow2.f32 %v10344_v53  ;;  %v10345_v58 = vmul.f32 -1.442695, %v1990_v56  ;;  %v11857_v53 = vld [vmem:[#allocation8 + $0xa0] sm:$0xff]  ;;  %v11859_v56 = vld [vmem:[#allocation8 + $0xb0] sm:$0xff] }
 0x7f2   :  { %10685 = vpow2.f32 %v10345_v58  ;;  %v11865_v58 = vld [vmem:[#allocation8 + $0x98] sm:$0xff] }
 0x7f3   :  { %10687 = vpow2.f32 %v10346_v34 }
 0x7fd   :  { %v10684_v36 = vpop.eup %10683 }
 0x7fe   :  { %v2002_v38 = vadd.f32 1.0, %v10684_v36  ;;  %v10351_v36 = vld [vmem:[%s13310_s4 + $0x4] sm:$0xf] }
 0x7ff   :  { %v10686_v39 = vpop.eup %10685 }
 0x800   :  { %10689 = vrcp.f32 %v2002_v38  ;;  %v2003_v15 = vadd.f32 1.0, %v10686_v39  ;;  %v10688_v19 = vpop.eup %10687  ;;  %v2355_v39 = vrot.slane %v10351_v36, %v11467_v20 }
 0x801   :  { %10691 = vtanh.f32 %v1992_v37  ;;  %v2004_v43 = vadd.f32 1.0, %v10688_v19 }
 0x802   :  { %10693 = vrcp.f32 %v2003_v15 }
 0x803   :  { %10695 = vrcp.f32 %v2004_v43 }
 0x80d   :  { %v10690_v40 = vpop.eup %10689 }
 0x80e   :  { %v10692_v41 = vpop.eup %10691 }
 0x80f   :  { %v10694_v46 = vpop.eup %10693  ;;  %v2016_v49 = vmul.f32 %v10692_v41, %v10690_v40  ;;  %v2359_v40 = vrot.slane %v10351_v36, %v11461_v18 }
 0x810   :  { %v2015_v30 = vmul.f32 %v10694_v46, %v2013_v42  ;;  %v10696_v35 = vpop.eup %10695 }
 0x812   :  { %v2017_v61 = vadd.f32 %v2016_v49, %v2015_v30 }
 0x814   :  { %10697 = vtanh.f32 %v2017_v61 }
 0x821   :  { %v10698_v62 = vpop.eup %10697 }
 0x822   :  { %v2019_v63 = vmul.f32 %v10698_v62, %v10696_v35 }
 0x824   :  { %v2023_v8 = vrot.slane %v2019_v63, %v11430_v3 }
 0x826   :  { %v2025_v9 = vsel %vm84_vm0, %v2023_v8, %v11805_v11  ;;  %v2024_v25 = vsel %vm126_vm7, %v2023_v8, %v11809_v12  ;;  %v2032_v11 = vld [vmem:[#allocation6 + $0x30] sm:$0xff]  ;;  %v2026_v12 = vld [vmem:[#allocation6] sm:$0xff] }
 0x827   :  { %10347 = vmatmul.mubr.msk.f32.vlgmr.msra.gmra.mxu0 %vm482_vm9, %v2025_v9  ;;  %10348 = vmatmul.mubr.msk.f32.vlgmr.msra.gmra.mxu1 %vm482_vm9, %v2025_v9 }
 0x828   :  { %2232 = vmatpush1.msra.mxu0 %v2038_v16  ;;  %2303 = vmatpush1.msra.mxu1 %v2040_v17  ;;  %v2363_v16 = vrot.slane %v10351_v36, %v11452_v13 }
 0x829   :  { %2233 = vmatprep.subr.mxu0 %v2035_v22  ;;  %2304 = vmatprep.subr.mxu1 %v2037_v60 }
 0x82a   :  { %2234 = vmatpush1.msra.mxu0 %v2034_v26  ;;  %2305 = vmatpush1.msra.mxu1 %v2036_v14 }
 0x82b   :  { %2235 = vmatprep.subr.mxu0 %v2031_v28  ;;  %2306 = vmatprep.subr.mxu1 %v2033_v7 }
 0x82c   :  { %2236 = vmatpush1.msra.mxu0 %v2030_v27  ;;  %2307 = vmatpush1.msra.mxu1 %v2032_v11 }
 0x82d   :  { %2237 = vmatprep.subr.mxu0 %v2027_v31  ;;  %2308 = vmatprep.subr.mxu1 %v2029_v21 }
 0x82e   :  { %2238 = vmatpush1.msra.mxu0 %v2026_v12  ;;  %2271 = vmatprep.mubr.f32.mxu0 %v11344_v1 }
 0x82f   :  { %2309 = vmatpush1.msra.mxu1 %v2028_v23  ;;  %2342 = vmatprep.mubr.f32.mxu1 %v11344_v1 }
 0x830   :  { %10349 = vmatmul.mubr.msk.f32.vlgmr.msra.gmra.mxu0 %vm482_vm9, %v2024_v25  ;;  %10350 = vmatmul.mubr.msk.f32.vlgmr.msra.gmra.mxu1 %vm482_vm9, %v2024_v25  ;;  %v2367_v25 = vrot.slane %v10351_v36, %v11442_v10 }
 0x831   :  { %2417 = vmatprep.subr.mxu0 %v11828_v29  ;;  %2488 = vmatprep.subr.mxu1 %v11830_v44 }
 0x832   :  { %2418 = vmatpush1.msra.mxu0 %v11833_v45  ;;  %2489 = vmatpush1.msra.mxu1 %v11835_v47 }
 0x833   :  { %2419 = vmatprep.subr.mxu0 %v11839_v48  ;;  %2490 = vmatprep.subr.mxu1 %v11841_v50 }
 0x834   :  { %2420 = vmatpush1.msra.mxu0 %v11845_v52  ;;  %2491 = vmatpush1.msra.mxu1 %v11847_v54 }
 0x835   :  { %2421 = vmatprep.subr.mxu0 %v11851_v51  ;;  %2492 = vmatprep.subr.mxu1 %v11853_v55 }
 0x836   :  { %2422 = vmatpush1.msra.mxu0 %v11857_v53  ;;  %2493 = vmatpush1.msra.mxu1 %v11859_v56 }
 0x837   :  { %2423 = vmatprep.subr.mxu0 %v11863_v57  ;;  %2494 = vmatprep.subr.mxu1 %v11865_v58 }
 0x838   :  { %2424 = vmatpush1.msra.mxu0 %v11869_v59  ;;  %2457 = vmatprep.mubr.f32.mxu0 %v11344_v1 }
 0x839   :  { %2495 = vmatpush1.msra.mxu1 %v11873_v24  ;;  %2528 = vmatprep.mubr.f32.mxu1 %v11344_v1 }
 0x83a   :  { %2458 = vmatmul.mubr.f32.vlgmr.msra.gmra.mxu0 %v11344_v1  ;;  %2529 = vmatmul.mubr.f32.vlgmr.msra.gmra.mxu1 %v11344_v1 }
 0x83b   :  { %2596 = vmatprep.subr.mxu0 %v11828_v29  ;;  %2667 = vmatprep.subr.mxu1 %v11830_v44 }
 0x83c   :  { %2597 = vmatpush1.msra.mxu0 %v11833_v45  ;;  %2668 = vmatpush1.msra.mxu1 %v11835_v47 }
 0x83d   :  { %2598 = vmatprep.subr.mxu0 %v11839_v48  ;;  %2669 = vmatprep.subr.mxu1 %v11841_v50 }
 0x83e   :  { %2599 = vmatpush1.msra.mxu0 %v11845_v52  ;;  %2670 = vmatpush1.msra.mxu1 %v11847_v54 }
 0x83f   :  { %2600 = vmatprep.subr.mxu0 %v11851_v51  ;;  %2671 = vmatprep.subr.mxu1 %v11853_v55 }
 0x840   :  { %2601 = vmatpush1.msra.mxu0 %v11857_v53  ;;  %2672 = vmatpush1.msra.mxu1 %v11859_v56 }
 0x841   :  { %2602 = vmatprep.subr.mxu0 %v11863_v57  ;;  %2673 = vmatprep.subr.mxu1 %v11865_v58 }
 0x842   :  { %2603 = vmatpush1.msra.mxu0 %v11869_v59  ;;  %2636 = vmatprep.mubr.f32.mxu0 %v11344_v1 }
 0x843   :  { %2674 = vmatpush1.msra.mxu1 %v11873_v24  ;;  %2707 = vmatprep.mubr.f32.mxu1 %v11344_v1 }
 0x844   :  { %2791 = vmatprep.subr.mxu0 %v11828_v29  ;;  %2862 = vmatprep.subr.mxu1 %v11830_v44 }
 0x8e7   :  { %v2128_v32 = vpop.f32.mrf.mxu0  ;;  %v2199_v15 = vpop.f32.mrf.mxu1 }
 0x8e9   :  { %v2130_v33 = vpop.f32.mrf.mxu0  ;;  %v2201_v46 = vpop.f32.mrf.mxu1 }
 0x8f0   :  { %v2273_v34 = vpop.f32.mrf.mxu0  ;;  %v2344_v61 = vpop.f32.mrf.mxu1 }
 0x8f1   :  { %v2274_v38 = vadd.f32 %v2273_v34, %v2128_v32  ;;  %v2345_v8 = vadd.f32 %v2344_v61, %v2199_v15 }
 0x8f2   :  { %v2275_v37 = vpop.f32.mrf.mxu0  ;;  %v2346_v17 = vpop.f32.mrf.mxu1 }
 0x8f3   :  { %v2276_v19 = vadd.f32 %v2275_v37, %v2130_v33  ;;  %v11908_v41 = vadd.f32 %v2355_v39, %v2274_v38  ;;  %v11915_v22 = vadd.f32 %v2363_v16, %v2345_v8  ;;  %v2347_v60 = vadd.f32 %v2346_v17, %v2201_v46 }
 0x8f5   :  { %v11910_v43 = vadd.f32 %v2359_v40, %v2276_v19  ;;  %v11919_v28 = vadd.f32 %v2367_v25, %v2347_v60 }
 0x8fa   :  { %v2459_v42 = vpop.f32.mrf.mxu0  ;;  %v2530_v9 = vpop.f32.mrf.mxu1 }
 0x8fb   :  { %v2535_v30 = vadd.f32 %v2459_v42, %v11908_v41  ;;  %v2537_v26 = vadd.f32 %v2530_v9, %v11915_v22 }
 0x8fc   :  { %v2461_v49 = vpop.f32.mrf.mxu0  ;;  %v2532_v14 = vpop.f32.mrf.mxu1 }
 0x8fd   :  { %v10352_v35 = vmul.f32 -1.442695, %v2535_v30  ;;  %v2536_v62 = vadd.f32 %v2461_v49, %v11910_v43  ;;  %v10354_v7 = vmul.f32 -1.442695, %v2537_v26  ;;  %v2538_v11 = vadd.f32 %v2532_v14, %v11919_v28 }
 0x8ff   :  { %10699 = vpow2.f32 %v10352_v35  ;;  %v10353_v63 = vmul.f32 -1.442695, %v2536_v62 }
 0x901   :  { %10701 = vpow2.f32 %v10353_v63 }
 0x902   :  { %10703 = vpow2.f32 %v10354_v7 }
 0x90c   :  { %v10700_v27 = vpop.eup %10699 }
 0x90d   :  { %v2548_v31 = vadd.f32 1.0, %v10700_v27 }
 0x90e   :  { %v10702_v21 = vpop.eup %10701 }
 0x90f   :  { %10705 = vrcp.f32 %v2548_v31  ;;  %v2549_v12 = vadd.f32 1.0, %v10702_v21  ;;  %v10704_v23 = vpop.eup %10703 }
 0x910   :  { %10707 = vtanh.f32 %v2538_v11  ;;  %v2550_v36 = vadd.f32 1.0, %v10704_v23 }
 0x911   :  { %10709 = vrcp.f32 %v2549_v12 }
 0x912   :  { %10711 = vrcp.f32 %v2550_v36 }
 0x91c   :  { %v10706_v32 = vpop.eup %10705 }
 0x91d   :  { %v10708_v33 = vpop.eup %10707 }
 0x91e   :  { %v10710_v34 = vpop.eup %10709  ;;  %v2559_v38 = vmul.f32 %v10708_v33, %v10706_v32 }
 0x91f   :  { %v2558_v37 = vmul.f32 0.0, %v10710_v34  ;;  %v10712_v15 = vpop.eup %10711 }
 0x921   :  { %v2560_v39 = vadd.f32 %v2559_v38, %v2558_v37 }
 0x923   :  { %10713 = vtanh.f32 %v2560_v39  ;;  %v2750_v23 = vrot.slane %v2560_v39, 7 }
 0x930   :  { %v10714_v19 = vpop.eup %10713 }
 0x931   :  { %v2562_v40 = vmul.f32 %v10714_v19, %v10712_v15 }
 0x933   :  { %10355 = vmatmul.mubr.msk.f32.vlgmr.msra.gmra.mxu0 %vm482_vm9, %v2562_v40  ;;  %10356 = vmatmul.mubr.msk.f32.vlgmr.msra.gmra.mxu1 %vm482_vm9, %v2562_v40  ;;  %v2566_v19 = vrot.slane %v2562_v40, %v11467_v20 }
 0x934   :  { %2792 = vmatpush1.msra.mxu0 %v11833_v45  ;;  %2863 = vmatpush1.msra.mxu1 %v11835_v47 }
 0x935   :  { %2793 = vmatprep.subr.mxu0 %v11839_v48  ;;  %2864 = vmatprep.subr.mxu1 %v11841_v50  ;;  %v2567_v39 = vsel %vm84_vm0, %v2566_v19, 0.0 }
 0x936   :  { %2794 = vmatpush1.msra.mxu0 %v11845_v52  ;;  %2865 = vmatpush1.msra.mxu1 %v11847_v54 }
 0x937   :  { %2795 = vmatprep.subr.mxu0 %v11851_v51  ;;  %2866 = vmatprep.subr.mxu1 %v11853_v55 }
 0x938   :  { %2796 = vmatpush1.msra.mxu0 %v11857_v53  ;;  %2867 = vmatpush1.msra.mxu1 %v11859_v56 }
 0x939   :  { %2797 = vmatprep.subr.mxu0 %v11863_v57  ;;  %2868 = vmatprep.subr.mxu1 %v11865_v58 }
 0x93a   :  { %2798 = vmatpush1.msra.mxu0 %v11869_v59  ;;  %2831 = vmatprep.mubr.f32.mxu0 %v11344_v1 }
 0x93b   :  { %2869 = vmatpush1.msra.mxu1 %v11873_v24  ;;  %2902 = vmatprep.mubr.f32.mxu1 %v11344_v1 }
 0x93c   :  { %2986 = vmatprep.subr.mxu0 %v11828_v29  ;;  %3057 = vmatprep.subr.mxu1 %v11830_v44 }
 0x9f3   :  { %v2638_v42 = vpop.f32.mrf.mxu0  ;;  %v2709_v63 = vpop.f32.mrf.mxu1 }
 0x9f4   :  { %v2718_v46 = vrot.slane %v2638_v42, 7  ;;  %v2720_v16 = vrot.slane %v2709_v63, 7 }
 0x9f5   :  { %v2640_v30 = vpop.f32.mrf.mxu0  ;;  %v2711_v17 = vpop.f32.mrf.mxu1 }
 0x9f6   :  { %v2726_v49 = vadd.f32 %v2718_v46, %v11908_v41  ;;  %v2719_v61 = vrot.slane %v2640_v30, 7  ;;  %v2728_v9 = vadd.f32 %v2720_v16, %v11915_v22  ;;  %v2721_v60 = vrot.slane %v2711_v17, 7 }
 0x9f8   :  { %v10357_v35 = vmul.f32 -1.442695, %v2726_v49  ;;  %v2727_v62 = vadd.f32 %v2719_v61, %v11910_v43  ;;  %v10359_v25 = vmul.f32 -1.442695, %v2728_v9  ;;  %v2729_v14 = vadd.f32 %v2721_v60, %v11919_v28 }
 0x9f9   :  { %v2568_v49 = vsel %vm126_vm7, %v2566_v19, 0.0 }
 0x9fa   :  { %10715 = vpow2.f32 %v10357_v35  ;;  %v10358_v8 = vmul.f32 -1.442695, %v2727_v62 }
 0x9fc   :  { %10717 = vpow2.f32 %v10358_v8 }
 0x9fd   :  { %10719 = vpow2.f32 %v10359_v25 }
 0xa07   :  { %v10716_v26 = vpop.eup %10715 }
 0xa08   :  { %v2739_v7 = vadd.f32 1.0, %v10716_v26 }
 0xa09   :  { %v10718_v27 = vpop.eup %10717 }
 0xa0a   :  { %10721 = vrcp.f32 %v2739_v7  ;;  %v2740_v11 = vadd.f32 1.0, %v10718_v27  ;;  %v10720_v31 = vpop.eup %10719 }
 0xa0b   :  { %10723 = vtanh.f32 %v2729_v14  ;;  %v2741_v33 = vadd.f32 1.0, %v10720_v31 }
 0xa0c   :  { %10725 = vrcp.f32 %v2740_v11 }
 0xa0d   :  { %10727 = vrcp.f32 %v2741_v33 }
 0xa17   :  { %v10722_v21 = vpop.eup %10721 }
 0xa18   :  { %v10724_v12 = vpop.eup %10723 }
 0xa19   :  { %v10726_v32 = vpop.eup %10725  ;;  %v2753_v36 = vmul.f32 %v10724_v12, %v10722_v21 }
 0xa1a   :  { %v2752_v34 = vmul.f32 %v10726_v32, %v2750_v23  ;;  %v10728_v38 = vpop.eup %10727 }
 0xa1c   :  { %v11946_v37 = vadd.f32 %v2753_v36, %v2752_v34 }
 0xa1e   :  { %10729 = vtanh.f32 %v11946_v37 }
 0xa2b   :  { %v10730_v15 = vpop.eup %10729 }
 0xa2c   :  { %v2756_v42 = vmul.f32 %v10730_v15, %v10728_v38  ;;  %v2945_v38 = vrot.slane %v11946_v37, 7 }
 0xa2e   :  { %v2760_v46 = vrot.slane %v2756_v42, %v11461_v18  ;;  %v2764_v30 = vrot.slane %v2756_v42, 1 }
 0xa30   :  { %10360 = vmatmul.mubr.msk.f32.vlgmr.msra.gmra.mxu0 %vm482_vm9, %v2764_v30  ;;  %10361 = vmatmul.mubr.msk.f32.vlgmr.msra.gmra.mxu1 %vm482_vm9, %v2764_v30  ;;  %v11959_v61 = vsel %vm120_vm6, %v2760_v46, %v2568_v49  ;;  %v11963_v40 = vsel %vm90_vm1, %v2760_v46, %v2567_v39 }
 0xa31   :  { %2987 = vmatpush1.msra.mxu0 %v11833_v45  ;;  %3058 = vmatpush1.msra.mxu1 %v11835_v47 }
 0xa32   :  { %2988 = vmatprep.subr.mxu0 %v11839_v48  ;;  %3059 = vmatprep.subr.mxu1 %v11841_v50 }
 0xa33   :  { %2989 = vmatpush1.msra.mxu0 %v11845_v52  ;;  %3060 = vmatpush1.msra.mxu1 %v11847_v54 }
 0xa34   :  { %2990 = vmatprep.subr.mxu0 %v11851_v51  ;;  %3061 = vmatprep.subr.mxu1 %v11853_v55 }
 0xa35   :  { %2991 = vmatpush1.msra.mxu0 %v11857_v53  ;;  %3062 = vmatpush1.msra.mxu1 %v11859_v56 }
 0xa36   :  { %2992 = vmatprep.subr.mxu0 %v11863_v57  ;;  %3063 = vmatprep.subr.mxu1 %v11865_v58 }
 0xa37   :  { %2993 = vmatpush1.msra.mxu0 %v11869_v59  ;;  %3026 = vmatprep.mubr.f32.mxu0 %v11344_v1 }
 0xa38   :  { %3064 = vmatpush1.msra.mxu1 %v11873_v24  ;;  %3097 = vmatprep.mubr.f32.mxu1 %v11344_v1 }
 0xa39   :  { %3181 = vmatprep.subr.mxu0 %v11828_v29  ;;  %3252 = vmatprep.subr.mxu1 %v11830_v44 }
 0xaf0   :  { %v2833_v35 = vpop.f32.mrf.mxu0  ;;  %v2904_v60 = vpop.f32.mrf.mxu1 }
 0xaf1   :  { %v2913_v62 = vrot.slane %v2833_v35, 6  ;;  %v2915_v26 = vrot.slane %v2904_v60, 6 }
 0xaf2   :  { %v2835_v63 = vpop.f32.mrf.mxu0  ;;  %v2906_v14 = vpop.f32.mrf.mxu1 }
 0xaf3   :  { %v2921_v8 = vadd.f32 %v2913_v62, %v11908_v41  ;;  %v2914_v16 = vrot.slane %v2835_v63, 6  ;;  %v2923_v7 = vadd.f32 %v2915_v26, %v11915_v22  ;;  %v2916_v27 = vrot.slane %v2906_v14, 6 }
 0xaf5   :  { %v10362_v17 = vmul.f32 -1.442695, %v2921_v8  ;;  %v2922_v9 = vadd.f32 %v2914_v16, %v11910_v43  ;;  %v10364_v11 = vmul.f32 -1.442695, %v2923_v7  ;;  %v2924_v21 = vadd.f32 %v2916_v27, %v11919_v28 }
 0xaf7   :  { %10731 = vpow2.f32 %v10362_v17  ;;  %v10363_v25 = vmul.f32 -1.442695, %v2922_v9 }
 0xaf9   :  { %10733 = vpow2.f32 %v10363_v25 }
 0xafa   :  { %10735 = vpow2.f32 %v10364_v11 }
 0xb04   :  { %v10732_v31 = vpop.eup %10731 }
 0xb05   :  { %v2934_v12 = vadd.f32 1.0, %v10732_v31 }
 0xb06   :  { %v10734_v23 = vpop.eup %10733 }
 0xb07   :  { %10737 = vrcp.f32 %v2934_v12  ;;  %v2935_v32 = vadd.f32 1.0, %v10734_v23  ;;  %v10736_v33 = vpop.eup %10735 }
 0xb08   :  { %10739 = vtanh.f32 %v2924_v21  ;;  %v2936_v19 = vadd.f32 1.0, %v10736_v33 }
 0xb09   :  { %10741 = vrcp.f32 %v2935_v32 }
 0xb0a   :  { %10743 = vrcp.f32 %v2936_v19 }
 0xb14   :  { %v10738_v34 = vpop.eup %10737 }
 0xb15   :  { %v10740_v36 = vpop.eup %10739 }
 0xb16   :  { %v10742_v15 = vpop.eup %10741  ;;  %v2948_v46 = vmul.f32 %v10740_v36, %v10738_v34 }
 0xb17   :  { %v2947_v42 = vmul.f32 %v10742_v15, %v2945_v38  ;;  %v10744_v39 = vpop.eup %10743 }
 0xb19   :  { %v2949_v30 = vadd.f32 %v2948_v46, %v2947_v42 }
 0xb1b   :  { %10745 = vtanh.f32 %v2949_v30  ;;  %v3140_v19 = vrot.slane %v2949_v30, 7 }
 0xb28   :  { %v10746_v49 = vpop.eup %10745 }
 0xb29   :  { %v2951_v35 = vmul.f32 %v10746_v49, %v10744_v39 }
 0xb2b   :  { %v2955_v62 = vrot.slane %v2951_v35, %v11452_v13  ;;  %v2959_v63 = vrot.slane %v2951_v35, 2 }
 0xb2d   :  { %10365 = vmatmul.mubr.msk.f32.vlgmr.msra.gmra.mxu0 %vm482_vm9, %v2959_v63  ;;  %10366 = vmatmul.mubr.msk.f32.vlgmr.msra.gmra.mxu1 %vm482_vm9, %v2959_v63  ;;  %v11994_v37 = vsel %vm114_vm5, %v2955_v62, %v11959_v61  ;;  %v11999_v8 = vsel %vm96_vm2, %v2955_v62, %v11963_v40 }
 0xb2e   :  { %3182 = vmatpush1.msra.mxu0 %v11833_v45  ;;  %3253 = vmatpush1.msra.mxu1 %v11835_v47 }
 0xb2f   :  { %3183 = vmatprep.subr.mxu0 %v11839_v48  ;;  %3254 = vmatprep.subr.mxu1 %v11841_v50 }
 0xb30   :  { %3184 = vmatpush1.msra.mxu0 %v11845_v52  ;;  %3255 = vmatpush1.msra.mxu1 %v11847_v54 }
 0xb31   :  { %3185 = vmatprep.subr.mxu0 %v11851_v51  ;;  %3256 = vmatprep.subr.mxu1 %v11853_v55 }
 0xb32   :  { %3186 = vmatpush1.msra.mxu0 %v11857_v53  ;;  %3257 = vmatpush1.msra.mxu1 %v11859_v56 }
 0xb33   :  { %3187 = vmatprep.subr.mxu0 %v11863_v57  ;;  %3258 = vmatprep.subr.mxu1 %v11865_v58 }
 0xb34   :  { %3188 = vmatpush1.msra.mxu0 %v11869_v59  ;;  %3221 = vmatprep.mubr.f32.mxu0 %v11344_v1 }
 0xb35   :  { %3259 = vmatpush1.msra.mxu1 %v11873_v24  ;;  %3292 = vmatprep.mubr.f32.mxu1 %v11344_v1 }
 0xb36   :  { %3376 = vmatprep.subr.mxu0 %v11828_v29  ;;  %3447 = vmatprep.subr.mxu1 %v11830_v44 }
 0xbed   :  { %v3028_v61 = vpop.f32.mrf.mxu0  ;;  %v3099_v26 = vpop.f32.mrf.mxu1 }
 0xbee   :  { %v3108_v40 = vrot.slane %v3028_v61, 5  ;;  %v3110_v7 = vrot.slane %v3099_v26, 5 }
 0xbef   :  { %v3030_v16 = vpop.f32.mrf.mxu0  ;;  %v3101_v27 = vpop.f32.mrf.mxu1 }
 0xbf0   :  { %v3116_v17 = vadd.f32 %v3108_v40, %v11908_v41  ;;  %v3109_v9 = vrot.slane %v3030_v16, 5  ;;  %v3118_v11 = vadd.f32 %v3110_v7, %v11915_v22  ;;  %v3111_v31 = vrot.slane %v3101_v27, 5 }
 0xbf2   :  { %v10367_v60 = vmul.f32 -1.442695, %v3116_v17  ;;  %v3117_v25 = vadd.f32 %v3109_v9, %v11910_v43  ;;  %v10369_v21 = vmul.f32 -1.442695, %v3118_v11  ;;  %v3119_v23 = vadd.f32 %v3111_v31, %v11919_v28 }
 0xbf4   :  { %10747 = vpow2.f32 %v10367_v60  ;;  %v10368_v14 = vmul.f32 -1.442695, %v3117_v25 }
 0xbf6   :  { %10749 = vpow2.f32 %v10368_v14 }
 0xbf7   :  { %10751 = vpow2.f32 %v10369_v21 }
 0xc01   :  { %v10748_v12 = vpop.eup %10747 }
 0xc02   :  { %v3129_v32 = vadd.f32 1.0, %v10748_v12 }
 0xc03   :  { %v10750_v33 = vpop.eup %10749 }
 0xc04   :  { %10753 = vrcp.f32 %v3129_v32  ;;  %v3130_v34 = vadd.f32 1.0, %v10750_v33  ;;  %v10752_v36 = vpop.eup %10751 }
 0xc05   :  { %10755 = vtanh.f32 %v3119_v23  ;;  %v3131_v46 = vadd.f32 1.0, %v10752_v36 }
 0xc06   :  { %10757 = vrcp.f32 %v3130_v34 }
 0xc07   :  { %10759 = vrcp.f32 %v3131_v46 }
 0xc11   :  { %v10754_v38 = vpop.eup %10753 }
 0xc12   :  { %v10756_v15 = vpop.eup %10755 }
 0xc13   :  { %v10758_v42 = vpop.eup %10757  ;;  %v3143_v49 = vmul.f32 %v10756_v15, %v10754_v38 }
 0xc14   :  { %v3142_v39 = vmul.f32 %v10758_v42, %v3140_v19  ;;  %v10760_v62 = vpop.eup %10759 }
 0xc16   :  { %v3144_v35 = vadd.f32 %v3143_v49, %v3142_v39 }
 0xc18   :  { %10761 = vtanh.f32 %v3144_v35  ;;  %v3335_v46 = vrot.slane %v3144_v35, 7 }
 0xc25   :  { %v10762_v63 = vpop.eup %10761 }
 0xc26   :  { %v3146_v61 = vmul.f32 %v10762_v63, %v10760_v62 }
 0xc28   :  { %v3150_v40 = vrot.slane %v3146_v61, %v11442_v10  ;;  %v3154_v16 = vrot.slane %v3146_v61, 3 }
 0xc2a   :  { %10370 = vmatmul.mubr.msk.f32.vlgmr.msra.gmra.mxu0 %vm482_vm9, %v3154_v16  ;;  %10371 = vmatmul.mubr.msk.f32.vlgmr.msra.gmra.mxu1 %vm482_vm9, %v3154_v16  ;;  %v12029_v30 = vsel %vm108_vm4, %v3150_v40, %v11994_v37  ;;  %v12034_v17 = vsel %vm102_vm3, %v3150_v40, %v11999_v8 }
 0xc2b   :  { %3377 = vmatpush1.msra.mxu0 %v11833_v45  ;;  %3448 = vmatpush1.msra.mxu1 %v11835_v47 }
 0xc2c   :  { %3378 = vmatprep.subr.mxu0 %v11839_v48  ;;  %3449 = vmatprep.subr.mxu1 %v11841_v50 }
 0xc2d   :  { %3379 = vmatpush1.msra.mxu0 %v11845_v52  ;;  %3450 = vmatpush1.msra.mxu1 %v11847_v54 }
 0xc2e   :  { %3380 = vmatprep.subr.mxu0 %v11851_v51  ;;  %3451 = vmatprep.subr.mxu1 %v11853_v55 }
 0xc2f   :  { %3381 = vmatpush1.msra.mxu0 %v11857_v53  ;;  %3452 = vmatpush1.msra.mxu1 %v11859_v56 }
 0xc30   :  { %3382 = vmatprep.subr.mxu0 %v11863_v57  ;;  %3453 = vmatprep.subr.mxu1 %v11865_v58 }
 0xc31   :  { %3383 = vmatpush1.msra.mxu0 %v11869_v59  ;;  %3416 = vmatprep.mubr.f32.mxu0 %v11344_v1 }
 0xc32   :  { %3454 = vmatpush1.msra.mxu1 %v11873_v24  ;;  %3487 = vmatprep.mubr.f32.mxu1 %v11344_v1 }
 0xc33   :  { %3571 = vmatprep.subr.mxu0 %v11828_v29  ;;  %3642 = vmatprep.subr.mxu1 %v11830_v44 }
 0xcea   :  { %v3223_v37 = vpop.f32.mrf.mxu0  ;;  %v3294_v7 = vpop.f32.mrf.mxu1 }
 0xceb   :  { %v3303_v8 = vrot.slane %v3223_v37, 4  ;;  %v3305_v11 = vrot.slane %v3294_v7, 4 }
 0xcec   :  { %v3225_v9 = vpop.f32.mrf.mxu0  ;;  %v3296_v31 = vpop.f32.mrf.mxu1 }
 0xced   :  { %v3311_v60 = vadd.f32 %v3303_v8, %v11908_v41  ;;  %v3304_v25 = vrot.slane %v3225_v9, 4  ;;  %v3313_v21 = vadd.f32 %v3305_v11, %v11915_v22  ;;  %v3306_v12 = vrot.slane %v3296_v31, 4 }
 0xcef   :  { %v10372_v26 = vmul.f32 -1.442695, %v3311_v60  ;;  %v3312_v14 = vadd.f32 %v3304_v25, %v11910_v43  ;;  %v10374_v23 = vmul.f32 -1.442695, %v3313_v21  ;;  %v3314_v33 = vadd.f32 %v3306_v12, %v11919_v28 }
 0xcf1   :  { %10763 = vpow2.f32 %v10372_v26  ;;  %v10373_v27 = vmul.f32 -1.442695, %v3312_v14 }
 0xcf3   :  { %10765 = vpow2.f32 %v10373_v27 }
 0xcf4   :  { %10767 = vpow2.f32 %v10374_v23 }
 0xcfe   :  { %v10764_v32 = vpop.eup %10763 }
 0xcff   :  { %v3324_v34 = vadd.f32 1.0, %v10764_v32 }
 0xd00   :  { %v10766_v36 = vpop.eup %10765 }
 0xd01   :  { %10769 = vrcp.f32 %v3324_v34  ;;  %v3325_v38 = vadd.f32 1.0, %v10766_v36  ;;  %v10768_v15 = vpop.eup %10767 }
 0xd02   :  { %10771 = vtanh.f32 %v3314_v33  ;;  %v3326_v49 = vadd.f32 1.0, %v10768_v15 }
 0xd03   :  { %10773 = vrcp.f32 %v3325_v38 }
 0xd04   :  { %10775 = vrcp.f32 %v3326_v49 }
 0xd0e   :  { %v10770_v19 = vpop.eup %10769 }
 0xd0f   :  { %v10772_v42 = vpop.eup %10771 }
 0xd10   :  { %v10774_v39 = vpop.eup %10773  ;;  %v3338_v63 = vmul.f32 %v10772_v42, %v10770_v19 }
 0xd11   :  { %v3337_v62 = vmul.f32 %v10774_v39, %v3335_v46  ;;  %v10776_v40 = vpop.eup %10775 }
 0xd13   :  { %v3339_v61 = vadd.f32 %v3338_v63, %v3337_v62 }
 0xd15   :  { %10777 = vtanh.f32 %v3339_v61  ;;  %v3530_v46 = vrot.slane %v3339_v61, 7 }
 0xd22   :  { %v10778_v16 = vpop.eup %10777 }
 0xd23   :  { %v3341_v37 = vmul.f32 %v10778_v16, %v10776_v40 }
 0xd25   :  { %v3345_v8 = vrot.slane %v3341_v37, %v11439_v6  ;;  %v3349_v9 = vrot.slane %v3341_v37, 4 }
 0xd27   :  { %10375 = vmatmul.mubr.msk.f32.vlgmr.msra.gmra.mxu0 %vm482_vm9, %v3349_v9  ;;  %10376 = vmatmul.mubr.msk.f32.vlgmr.msra.gmra.mxu1 %vm482_vm9, %v3349_v9  ;;  %v12064_v35 = vsel %vm102_vm3, %v3345_v8, %v12029_v30  ;;  %v12069_v60 = vsel %vm108_vm4, %v3345_v8, %v12034_v17 }
 0xd28   :  { %3572 = vmatpush1.msra.mxu0 %v11833_v45  ;;  %3643 = vmatpush1.msra.mxu1 %v11835_v47 }
 0xd29   :  { %3573 = vmatprep.subr.mxu0 %v11839_v48  ;;  %3644 = vmatprep.subr.mxu1 %v11841_v50 }
 0xd2a   :  { %3574 = vmatpush1.msra.mxu0 %v11845_v52  ;;  %3645 = vmatpush1.msra.mxu1 %v11847_v54 }
 0xd2b   :  { %3575 = vmatprep.subr.mxu0 %v11851_v51  ;;  %3646 = vmatprep.subr.mxu1 %v11853_v55 }
 0xd2c   :  { %3576 = vmatpush1.msra.mxu0 %v11857_v53  ;;  %3647 = vmatpush1.msra.mxu1 %v11859_v56 }
 0xd2d   :  { %3577 = vmatprep.subr.mxu0 %v11863_v57  ;;  %3648 = vmatprep.subr.mxu1 %v11865_v58 }
 0xd2e   :  { %3578 = vmatpush1.msra.mxu0 %v11869_v59  ;;  %3611 = vmatprep.mubr.f32.mxu0 %v11344_v1 }
 0xd2f   :  { %3649 = vmatpush1.msra.mxu1 %v11873_v24  ;;  %3682 = vmatprep.mubr.f32.mxu1 %v11344_v1 }
 0xd30   :  { %3766 = vmatprep.subr.mxu0 %v11828_v29  ;;  %3837 = vmatprep.subr.mxu1 %v11830_v44 }
 0xde7   :  { %v3418_v30 = vpop.f32.mrf.mxu0  ;;  %v3489_v11 = vpop.f32.mrf.mxu1 }
 0xde8   :  { %v3498_v17 = vrot.slane %v3418_v30, 3  ;;  %v3500_v21 = vrot.slane %v3489_v11, 3 }
 0xde9   :  { %v3420_v25 = vpop.f32.mrf.mxu0  ;;  %v3491_v12 = vpop.f32.mrf.mxu1 }
 0xdea   :  { %v3506_v26 = vadd.f32 %v3498_v17, %v11908_v41  ;;  %v3499_v14 = vrot.slane %v3420_v25, 3  ;;  %v3508_v23 = vadd.f32 %v3500_v21, %v11915_v22  ;;  %v3501_v29 = vrot.slane %v3491_v12, 3 }
 0xdec   :  { %v10377_v7 = vmul.f32 -1.442695, %v3506_v26  ;;  %v3507_v27 = vadd.f32 %v3499_v14, %v11910_v43  ;;  %v10379_v32 = vmul.f32 -1.442695, %v3508_v23  ;;  %v3509_v33 = vadd.f32 %v3501_v29, %v11919_v28 }
 0xdee   :  { %10779 = vpow2.f32 %v10377_v7  ;;  %v10378_v31 = vmul.f32 -1.442695, %v3507_v27 }
 0xdf0   :  { %10781 = vpow2.f32 %v10378_v31 }
 0xdf1   :  { %10783 = vpow2.f32 %v10379_v32 }
 0xdfb   :  { %v10780_v44 = vpop.eup %10779 }
 0xdfc   :  { %v3519_v34 = vadd.f32 1.0, %v10780_v44 }
 0xdfd   :  { %v10782_v36 = vpop.eup %10781 }
 0xdfe   :  { %10785 = vrcp.f32 %v3519_v34  ;;  %v3520_v38 = vadd.f32 1.0, %v10782_v36  ;;  %v10784_v15 = vpop.eup %10783 }
 0xdff   :  { %10787 = vtanh.f32 %v3509_v33  ;;  %v3521_v49 = vadd.f32 1.0, %v10784_v15 }
 0xe00   :  { %10789 = vrcp.f32 %v3520_v38 }
 0xe01   :  { %10791 = vrcp.f32 %v3521_v49  ;;  %v3965_v49 = vld [vmem:[#allocation6 + $0x1f0] sm:$0xff] }
 0xe0b   :  { %v10786_v19 = vpop.eup %10785 }
 0xe0c   :  { %v10788_v42 = vpop.eup %10787 }
 0xe0d   :  { %v10790_v39 = vpop.eup %10789  ;;  %v3533_v63 = vmul.f32 %v10788_v42, %v10786_v19  ;;  %v3964_v42 = vld [vmem:[#allocation6 + $0x1e8] sm:$0xff] }
 0xe0e   :  { %v3532_v62 = vmul.f32 %v10790_v39, %v3530_v46  ;;  %v10792_v16 = vpop.eup %10791  ;;  %v3966_v46 = vld [vmem:[#allocation6 + $0x1f8] sm:$0xff]  ;;  %v3963_v39 = vld [vmem:[#allocation6 + $0x1e0] sm:$0xff] }
 0xe10   :  { %v3534_v40 = vadd.f32 %v3533_v63, %v3532_v62  ;;  %v3960_v62 = vld [vmem:[#allocation6 + $0x1c8] sm:$0xff]  ;;  %v3962_v63 = vld [vmem:[#allocation6 + $0x1d8] sm:$0xff] }
 0xe12   :  { %10793 = vtanh.f32 %v3534_v40  ;;  %v3725_v31 = vrot.slane %v3534_v40, 7  ;;  %v3959_v40 = vld [vmem:[#allocation6 + $0x1c0] sm:$0xff] }
 0xe1f   :  { %v10794_v37 = vpop.eup %10793 }
 0xe20   :  { %v3536_v8 = vmul.f32 %v10794_v37, %v10792_v16  ;;  %v3961_v16 = vld [vmem:[#allocation6 + $0x1d0] sm:$0xff]  ;;  %v3956_v37 = vld [vmem:[#allocation6 + $0x1a8] sm:$0xff] }
 0xe22   :  { %v3544_v9 = vrot.slane %v3536_v8, 5  ;;  %v3540_v30 = vrot.slane %v3536_v8, %v11436_v5  ;;  %v3958_v8 = vld [vmem:[#allocation6 + $0x1b8] sm:$0xff] }
 0xe24   :  { %10380 = vmatmul.mubr.msk.f32.vlgmr.msra.gmra.mxu0 %vm482_vm9, %v3544_v9  ;;  %10381 = vmatmul.mubr.msk.f32.vlgmr.msra.gmra.mxu1 %vm482_vm9, %v3544_v9  ;;  %v3542_v61 = vsel %vm96_vm2, %v3540_v30, %v12064_v35  ;;  %v3541_v17 = vsel %vm114_vm5, %v3540_v30, %v12069_v60  ;;  %v3955_v9 = vld [vmem:[#allocation6 + $0x1a0] sm:$0xff]  ;;  %v3957_v30 = vld [vmem:[#allocation6 + $0x1b0] sm:$0xff] }
 0xe25   :  { %3767 = vmatpush1.msra.mxu0 %v11833_v45  ;;  %3838 = vmatpush1.msra.mxu1 %v11835_v47 }
 0xe26   :  { %3768 = vmatprep.subr.mxu0 %v11839_v48  ;;  %3839 = vmatprep.subr.mxu1 %v11841_v50 }
 0xe27   :  { %3769 = vmatpush1.msra.mxu0 %v11845_v52  ;;  %3840 = vmatpush1.msra.mxu1 %v11847_v54 }
 0xe28   :  { %3770 = vmatprep.subr.mxu0 %v11851_v51  ;;  %3841 = vmatprep.subr.mxu1 %v11853_v55 }
 0xe29   :  { %3771 = vmatpush1.msra.mxu0 %v11857_v53  ;;  %3842 = vmatpush1.msra.mxu1 %v11859_v56 }
 0xe2a   :  { %3772 = vmatprep.subr.mxu0 %v11863_v57  ;;  %3843 = vmatprep.subr.mxu1 %v11865_v58 }
 0xe2b   :  { %3773 = vmatpush1.msra.mxu0 %v11869_v59  ;;  %3806 = vmatprep.mubr.f32.mxu0 %v11344_v1 }
 0xe2c   :  { %3844 = vmatpush1.msra.mxu1 %v11873_v24  ;;  %3877 = vmatprep.mubr.f32.mxu1 %v11344_v1 }
 0xe2d   :  { %3994 = vmatprep.subr.mxu0 %v3964_v42  ;;  %4065 = vmatprep.subr.mxu1 %v3966_v46  ;;  %v3946_v42 = vld [vmem:[#allocation6 + $0x160] sm:$0xff]  ;;  %v3948_v46 = vld [vmem:[#allocation6 + $0x170] sm:$0xff] }
 0xee4   :  { %v3613_v45 = vpop.f32.mrf.mxu0  ;;  %v3684_v55 = vpop.f32.mrf.mxu1 }
 0xee5   :  { %v3693_v47 = vrot.slane %v3613_v45, 2  ;;  %v3695_v56 = vrot.slane %v3684_v55, 2  ;;  %v3951_v45 = vld [vmem:[#allocation6 + $0x180] sm:$0xff] }
 0xee6   :  { %v3615_v48 = vpop.f32.mrf.mxu0  ;;  %v3686_v57 = vpop.f32.mrf.mxu1 }
 0xee7   :  { %v3701_v50 = vadd.f32 %v3693_v47, %v11908_v41  ;;  %v3694_v52 = vrot.slane %v3615_v48, 2  ;;  %v3703_v58 = vadd.f32 %v3695_v56, %v11915_v22  ;;  %v3696_v59 = vrot.slane %v3686_v57, 2  ;;  %v3953_v47 = vld [vmem:[#allocation6 + $0x190] sm:$0xff]  ;;  %v3947_v48 = vld [vmem:[#allocation6 + $0x168] sm:$0xff] }
 0xee9   :  { %v10382_v54 = vmul.f32 -1.442695, %v3701_v50  ;;  %v3702_v51 = vadd.f32 %v3694_v52, %v11910_v43  ;;  %v10384_v24 = vmul.f32 -1.442695, %v3703_v58  ;;  %v3704_v60 = vadd.f32 %v3696_v59, %v11919_v28  ;;  %v3949_v50 = vld [vmem:[#allocation6 + $0x178] sm:$0xff] }
 0xeeb   :  { %10795 = vpow2.f32 %v10382_v54  ;;  %v10383_v53 = vmul.f32 -1.442695, %v3702_v51 }
 0xeed   :  { %10797 = vpow2.f32 %v10383_v53 }
 0xeee   :  { %10799 = vpow2.f32 %v10384_v24 }
 0xef8   :  { %v10796_v35 = vpop.eup %10795 }
 0xef9   :  { %v3714_v25 = vadd.f32 1.0, %v10796_v35 }
 0xefa   :  { %v10798_v26 = vpop.eup %10797 }
 0xefb   :  { %10801 = vrcp.f32 %v3714_v25  ;;  %v3715_v14 = vadd.f32 1.0, %v10798_v26  ;;  %v10800_v7 = vpop.eup %10799 }
 0xefc   :  { %10803 = vtanh.f32 %v3704_v60  ;;  %v3716_v12 = vadd.f32 1.0, %v10800_v7 }
 0xefd   :  { %10805 = vrcp.f32 %v3715_v14 }
 0xefe   :  { %10807 = vrcp.f32 %v3716_v12 }
 0xf08   :  { %v10802_v27 = vpop.eup %10801 }
 0xf09   :  { %v10804_v11 = vpop.eup %10803 }
 0xf0a   :  { %v10806_v21 = vpop.eup %10805  ;;  %v3728_v29 = vmul.f32 %v10804_v11, %v10802_v27 }
 0xf0b   :  { %v3727_v23 = vmul.f32 %v10806_v21, %v3725_v31  ;;  %v10808_v44 = vpop.eup %10807 }
 0xf0d   :  { %v12122_v32 = vadd.f32 %v3728_v29, %v3727_v23 }
 0xf0f   :  { %10809 = vtanh.f32 %v12122_v32  ;;  %v3920_v12 = vrot.slane %v12122_v32, 7  ;;  %v3945_v32 = vld [vmem:[#allocation6 + $0x158] sm:$0xff] }
 0xf1c   :  { %v10810_v33 = vpop.eup %10809 }
 0xf1d   :  { %v3731_v34 = vmul.f32 %v10810_v33, %v10808_v44 }
 0xf1f   :  { %v3739_v36 = vrot.slane %v3731_v34, 6  ;;  %v3735_v38 = vrot.slane %v3731_v34, %v11433_v4 }
 0xf21   :  { %10385 = vmatmul.mubr.msk.f32.vlgmr.msra.gmra.mxu0 %vm482_vm9, %v3739_v36  ;;  %10386 = vmatmul.mubr.msk.f32.vlgmr.msra.gmra.mxu1 %vm482_vm9, %v3739_v36  ;;  %v12130_v15 = vsel %vm90_vm1, %v3735_v38, %v3542_v61  ;;  %v12134_v19 = vsel %vm120_vm6, %v3735_v38, %v3541_v17  ;;  %v3952_v61 = vld [vmem:[#allocation6 + $0x188] sm:$0xff]  ;;  %v3954_v17 = vld [vmem:[#allocation6 + $0x198] sm:$0xff] }
 0xf22   :  { %4034 = vmatprep.mubr.f32.mxu0 %v11344_v1  ;;  %4105 = vmatprep.mubr.f32.mxu1 %v11344_v1 }
 0xf23   :  { %3995 = vmatpush1.msra.mxu0 %v3963_v39  ;;  %4066 = vmatpush1.msra.mxu1 %v3965_v49  ;;  %v3943_v49 = vld [vmem:[#allocation6 + $0x148] sm:$0xff] }
 0xf24   :  { %3996 = vmatprep.subr.mxu0 %v3960_v62  ;;  %4067 = vmatprep.subr.mxu1 %v3962_v63  ;;  %v3942_v63 = vld [vmem:[#allocation6 + $0x140] sm:$0xff] }
 0xf25   :  { %3997 = vmatpush1.msra.mxu0 %v3959_v40  ;;  %4068 = vmatpush1.msra.mxu1 %v3961_v16  ;;  %v3944_v40 = vld [vmem:[#allocation6 + $0x150] sm:$0xff]  ;;  %v3939_v16 = vld [vmem:[#allocation6 + $0x128] sm:$0xff] }
 0xf26   :  { %3998 = vmatprep.subr.mxu0 %v3956_v37  ;;  %4069 = vmatprep.subr.mxu1 %v3958_v8  ;;  %v3941_v37 = vld [vmem:[#allocation6 + $0x138] sm:$0xff]  ;;  %v3938_v8 = vld [vmem:[#allocation6 + $0x120] sm:$0xff] }
 0xf27   :  { %3999 = vmatpush1.msra.mxu0 %v3955_v9  ;;  %4070 = vmatpush1.msra.mxu1 %v3957_v30  ;;  %v3935_v9 = vld [vmem:[#allocation6 + $0x108] sm:$0xff]  ;;  %v3937_v30 = vld [vmem:[#allocation6 + $0x118] sm:$0xff] }
 0xf28   :  { %4000 = vmatprep.subr.mxu0 %v3952_v61  ;;  %4071 = vmatprep.subr.mxu1 %v3954_v17  ;;  %v3936_v61 = vld [vmem:[#allocation6 + $0x110] sm:$0xff]  ;;  %v12153_v17 = vld [vmem:[#allocation8 + $0x168] sm:$0xff] }
 0xf29   :  { %4001 = vmatpush1.msra.mxu0 %v3951_v45  ;;  %4072 = vmatpush1.msra.mxu1 %v3953_v47  ;;  %v12155_v45 = vld [vmem:[#allocation8 + $0x178] sm:$0xff]  ;;  %v12158_v47 = vld [vmem:[#allocation8 + $0x160] sm:$0xff] }
 0xf2a   :  { %4139 = vmatprep.subr.mxu0 %v3947_v48  ;;  %4210 = vmatprep.subr.mxu1 %v3949_v50  ;;  %v12160_v48 = vld [vmem:[#allocation8 + $0x170] sm:$0xff]  ;;  %v12164_v50 = vld [vmem:[#allocation8 + $0x148] sm:$0xff] }
 0xfe1   :  { %v3808_v52 = vpop.f32.mrf.mxu0  ;;  %v3879_v58 = vpop.f32.mrf.mxu1 }
 0xfe2   :  { %v3888_v54 = vrot.slane %v3808_v52, 1  ;;  %v3890_v24 = vrot.slane %v3879_v58, 1  ;;  %v12166_v52 = vld [vmem:[#allocation8 + $0x158] sm:$0xff]  ;;  %v12188_v58 = vld [vmem:[#allocation8 + $0x108] sm:$0xff] }
 0xfe3   :  { %v3810_v51 = vpop.f32.mrf.mxu0  ;;  %v3881_v35 = vpop.f32.mrf.mxu1 }
 0xfe4   :  { %v3896_v55 = vadd.f32 %v3888_v54, %v11908_v41  ;;  %v3889_v53 = vrot.slane %v3810_v51, 1  ;;  %v3898_v60 = vadd.f32 %v3890_v24, %v11915_v22  ;;  %v3891_v25 = vrot.slane %v3881_v35, 1  ;;  %v12170_v54 = vld [vmem:[#allocation8 + $0x140] sm:$0xff]  ;;  %v12172_v51 = vld [vmem:[#allocation8 + $0x150] sm:$0xff] }
 0xfe5   :  { %v12194_v24 = vld [vmem:[#allocation8 + $0x100] sm:$0xff]  ;;  %v12198_v35 = vld [vmem:[#allocation8 + $0x110] sm:$0xff] }
 0xfe6   :  { %v10387_v56 = vmul.f32 -1.442695, %v3896_v55  ;;  %v3897_v57 = vadd.f32 %v3889_v53, %v11910_v43  ;;  %v10389_v26 = vmul.f32 -1.442695, %v3898_v60  ;;  %v3899_v7 = vadd.f32 %v3891_v25, %v11919_v28  ;;  %v12176_v55 = vld [vmem:[#allocation8 + $0x128] sm:$0xff]  ;;  %v12178_v53 = vld [vmem:[#allocation8 + $0x138] sm:$0xff] }
 0xfe8   :  { %10811 = vpow2.f32 %v10387_v56  ;;  %v10388_v59 = vmul.f32 -1.442695, %v3897_v57  ;;  %v12182_v56 = vld [vmem:[#allocation8 + $0x120] sm:$0xff]  ;;  %v12184_v57 = vld [vmem:[#allocation8 + $0x130] sm:$0xff] }
 0xfea   :  { %10813 = vpow2.f32 %v10388_v59  ;;  %v12190_v59 = vld [vmem:[#allocation8 + $0x118] sm:$0xff] }
 0xfeb   :  { %10815 = vpow2.f32 %v10389_v26 }
 0xff5   :  { %v10812_v14 = vpop.eup %10811 }
 0xff6   :  { %v3909_v27 = vadd.f32 1.0, %v10812_v14  ;;  %v10394_v14 = vld [vmem:[%s13310_s4 + $0x8] sm:$0xf] }
 0xff7   :  { %v10814_v11 = vpop.eup %10813 }
 0xff8   :  { %10817 = vrcp.f32 %v3909_v27  ;;  %v3910_v41 = vadd.f32 1.0, %v10814_v11  ;;  %v10816_v43 = vpop.eup %10815  ;;  %v4263_v11 = vrot.slane %v10394_v14, %v11467_v20 }
 0xff9   :  { %10819 = vtanh.f32 %v3899_v7  ;;  %v3911_v29 = vadd.f32 1.0, %v10816_v43 }
 0xffa   :  { %10821 = vrcp.f32 %v3910_v41 }
 0xffb   :  { %10823 = vrcp.f32 %v3911_v29 }
0x1005   :  { %v10818_v31 = vpop.eup %10817 }
0x1006   :  { %v10820_v21 = vpop.eup %10819 }
0x1007   :  { %v10822_v23 = vpop.eup %10821  ;;  %v3923_v44 = vmul.f32 %v10820_v21, %v10818_v31  ;;  %v4267_v31 = vrot.slane %v10394_v14, %v11461_v18 }
0x1008   :  { %v3922_v22 = vmul.f32 %v10822_v23, %v3920_v12  ;;  %v10824_v28 = vpop.eup %10823 }
0x100a   :  { %v3924_v33 = vadd.f32 %v3923_v44, %v3922_v22 }
0x100c   :  { %10825 = vtanh.f32 %v3924_v33 }
0x1019   :  { %v10826_v34 = vpop.eup %10825 }
0x101a   :  { %v3926_v36 = vmul.f32 %v10826_v34, %v10824_v28 }
0x101c   :  { %v3930_v38 = vrot.slane %v3926_v36, %v11430_v3 }
0x101e   :  { %v3932_v39 = vsel %vm84_vm0, %v3930_v38, %v12130_v15  ;;  %v3931_v62 = vsel %vm126_vm7, %v3930_v38, %v12134_v19  ;;  %v3940_v15 = vld [vmem:[#allocation6 + $0x130] sm:$0xff]  ;;  %v3934_v19 = vld [vmem:[#allocation6 + $0x100] sm:$0xff] }
0x101f   :  { %10390 = vmatmul.mubr.msk.f32.vlgmr.msra.gmra.mxu0 %vm482_vm9, %v3932_v39  ;;  %10391 = vmatmul.mubr.msk.f32.vlgmr.msra.gmra.mxu1 %vm482_vm9, %v3932_v39 }
0x1020   :  { %4140 = vmatpush1.msra.mxu0 %v3946_v42  ;;  %4211 = vmatpush1.msra.mxu1 %v3948_v46  ;;  %v4271_v42 = vrot.slane %v10394_v14, %v11452_v13 }
0x1021   :  { %4141 = vmatprep.subr.mxu0 %v3943_v49  ;;  %4212 = vmatprep.subr.mxu1 %v3945_v32 }
0x1022   :  { %4142 = vmatpush1.msra.mxu0 %v3942_v63  ;;  %4213 = vmatpush1.msra.mxu1 %v3944_v40 }
0x1023   :  { %4143 = vmatprep.subr.mxu0 %v3939_v16  ;;  %4214 = vmatprep.subr.mxu1 %v3941_v37 }
0x1024   :  { %4144 = vmatpush1.msra.mxu0 %v3938_v8  ;;  %4215 = vmatpush1.msra.mxu1 %v3940_v15 }
0x1025   :  { %4145 = vmatprep.subr.mxu0 %v3935_v9  ;;  %4216 = vmatprep.subr.mxu1 %v3937_v30 }
0x1026   :  { %4146 = vmatpush1.msra.mxu0 %v3934_v19  ;;  %4179 = vmatprep.mubr.f32.mxu0 %v11344_v1 }
0x1027   :  { %4217 = vmatpush1.msra.mxu1 %v3936_v61  ;;  %4250 = vmatprep.mubr.f32.mxu1 %v11344_v1 }
0x1028   :  { %10392 = vmatmul.mubr.msk.f32.vlgmr.msra.gmra.mxu0 %vm482_vm9, %v3931_v62  ;;  %10393 = vmatmul.mubr.msk.f32.vlgmr.msra.gmra.mxu1 %vm482_vm9, %v3931_v62  ;;  %v4275_v62 = vrot.slane %v10394_v14, %v11442_v10 }
0x1029   :  { %4325 = vmatprep.subr.mxu0 %v12153_v17  ;;  %4396 = vmatprep.subr.mxu1 %v12155_v45 }
0x102a   :  { %4326 = vmatpush1.msra.mxu0 %v12158_v47  ;;  %4397 = vmatpush1.msra.mxu1 %v12160_v48 }
0x102b   :  { %4327 = vmatprep.subr.mxu0 %v12164_v50  ;;  %4398 = vmatprep.subr.mxu1 %v12166_v52 }
0x102c   :  { %4328 = vmatpush1.msra.mxu0 %v12170_v54  ;;  %4399 = vmatpush1.msra.mxu1 %v12172_v51 }
0x102d   :  { %4329 = vmatprep.subr.mxu0 %v12176_v55  ;;  %4400 = vmatprep.subr.mxu1 %v12178_v53 }
0x102e   :  { %4330 = vmatpush1.msra.mxu0 %v12182_v56  ;;  %4401 = vmatpush1.msra.mxu1 %v12184_v57 }
0x102f   :  { %4331 = vmatprep.subr.mxu0 %v12188_v58  ;;  %4402 = vmatprep.subr.mxu1 %v12190_v59 }
0x1030   :  { %4332 = vmatpush1.msra.mxu0 %v12194_v24  ;;  %4365 = vmatprep.mubr.f32.mxu0 %v11344_v1 }
0x1031   :  { %4403 = vmatpush1.msra.mxu1 %v12198_v35  ;;  %4436 = vmatprep.mubr.f32.mxu1 %v11344_v1 }
0x1032   :  { %4366 = vmatmul.mubr.f32.vlgmr.msra.gmra.mxu0 %v11344_v1  ;;  %4437 = vmatmul.mubr.f32.vlgmr.msra.gmra.mxu1 %v11344_v1 }
0x1033   :  { %4504 = vmatprep.subr.mxu0 %v12153_v17  ;;  %4575 = vmatprep.subr.mxu1 %v12155_v45 }
0x1034   :  { %4505 = vmatpush1.msra.mxu0 %v12158_v47  ;;  %4576 = vmatpush1.msra.mxu1 %v12160_v48 }
0x1035   :  { %4506 = vmatprep.subr.mxu0 %v12164_v50  ;;  %4577 = vmatprep.subr.mxu1 %v12166_v52 }
0x1036   :  { %4507 = vmatpush1.msra.mxu0 %v12170_v54  ;;  %4578 = vmatpush1.msra.mxu1 %v12172_v51 }
0x1037   :  { %4508 = vmatprep.subr.mxu0 %v12176_v55  ;;  %4579 = vmatprep.subr.mxu1 %v12178_v53 }
0x1038   :  { %4509 = vmatpush1.msra.mxu0 %v12182_v56  ;;  %4580 = vmatpush1.msra.mxu1 %v12184_v57 }
0x1039   :  { %4510 = vmatprep.subr.mxu0 %v12188_v58  ;;  %4581 = vmatprep.subr.mxu1 %v12190_v59 }
0x103a   :  { %4511 = vmatpush1.msra.mxu0 %v12194_v24  ;;  %4544 = vmatprep.mubr.f32.mxu0 %v11344_v1 }
0x103b   :  { %4582 = vmatpush1.msra.mxu1 %v12198_v35  ;;  %4615 = vmatprep.mubr.f32.mxu1 %v11344_v1 }
0x103c   :  { %4699 = vmatprep.subr.mxu0 %v12153_v17  ;;  %4770 = vmatprep.subr.mxu1 %v12155_v45 }
0x10df   :  { %v4036_v60 = vpop.f32.mrf.mxu0  ;;  %v4107_v41 = vpop.f32.mrf.mxu1 }
0x10e1   :  { %v4038_v25 = vpop.f32.mrf.mxu0  ;;  %v4109_v23 = vpop.f32.mrf.mxu1 }
0x10e8   :  { %v4181_v26 = vpop.f32.mrf.mxu0  ;;  %v4252_v33 = vpop.f32.mrf.mxu1 }
0x10e9   :  { %v4182_v27 = vadd.f32 %v4181_v26, %v4036_v60  ;;  %v4253_v38 = vadd.f32 %v4252_v33, %v4107_v41 }
0x10ea   :  { %v4183_v7 = vpop.f32.mrf.mxu0  ;;  %v4254_v46 = vpop.f32.mrf.mxu1 }
0x10eb   :  { %v4184_v43 = vadd.f32 %v4183_v7, %v4038_v25  ;;  %v12233_v21 = vadd.f32 %v4263_v11, %v4182_v27  ;;  %v12240_v49 = vadd.f32 %v4271_v42, %v4253_v38  ;;  %v4255_v32 = vadd.f32 %v4254_v46, %v4109_v23 }
0x10ed   :  { %v12235_v29 = vadd.f32 %v4267_v31, %v4184_v43  ;;  %v12244_v16 = vadd.f32 %v4275_v62, %v4255_v32 }
0x10f2   :  { %v4367_v12 = vpop.f32.mrf.mxu0  ;;  %v4438_v39 = vpop.f32.mrf.mxu1 }
0x10f3   :  { %v4443_v22 = vadd.f32 %v4367_v12, %v12233_v21  ;;  %v4445_v63 = vadd.f32 %v4438_v39, %v12240_v49 }
0x10f4   :  { %v4369_v44 = vpop.f32.mrf.mxu0  ;;  %v4440_v40 = vpop.f32.mrf.mxu1 }
0x10f5   :  { %v10395_v28 = vmul.f32 -1.442695, %v4443_v22  ;;  %v4444_v34 = vadd.f32 %v4369_v44, %v12235_v29  ;;  %v10397_v37 = vmul.f32 -1.442695, %v4445_v63  ;;  %v4446_v15 = vadd.f32 %v4440_v40, %v12244_v16 }
0x10f7   :  { %10827 = vpow2.f32 %v10395_v28  ;;  %v10396_v36 = vmul.f32 -1.442695, %v4444_v34 }
0x10f9   :  { %10829 = vpow2.f32 %v10396_v36 }
0x10fa   :  { %10831 = vpow2.f32 %v10397_v37 }
0x1104   :  { %v10828_v8 = vpop.eup %10827 }
0x1105   :  { %v4456_v9 = vadd.f32 1.0, %v10828_v8 }
0x1106   :  { %v10830_v30 = vpop.eup %10829 }
0x1107   :  { %10833 = vrcp.f32 %v4456_v9  ;;  %v4457_v19 = vadd.f32 1.0, %v10830_v30  ;;  %v10832_v61 = vpop.eup %10831 }
0x1108   :  { %10835 = vtanh.f32 %v4446_v15  ;;  %v4458_v14 = vadd.f32 1.0, %v10832_v61 }
0x1109   :  { %10837 = vrcp.f32 %v4457_v19 }
0x110a   :  { %10839 = vrcp.f32 %v4458_v14 }
0x1114   :  { %v10834_v60 = vpop.eup %10833 }
0x1115   :  { %v10836_v25 = vpop.eup %10835 }
0x1116   :  { %v10838_v26 = vpop.eup %10837  ;;  %v4467_v27 = vmul.f32 %v10836_v25, %v10834_v60 }
0x1117   :  { %v4466_v7 = vmul.f32 0.0, %v10838_v26  ;;  %v10840_v41 = vpop.eup %10839 }
0x1119   :  { %v4468_v11 = vadd.f32 %v4467_v27, %v4466_v7 }
0x111b   :  { %10841 = vtanh.f32 %v4468_v11  ;;  %v4658_v61 = vrot.slane %v4468_v11, 7 }
0x1128   :  { %v10842_v43 = vpop.eup %10841 }
0x1129   :  { %v4470_v31 = vmul.f32 %v10842_v43, %v10840_v41 }
0x112b   :  { %10398 = vmatmul.mubr.msk.f32.vlgmr.msra.gmra.mxu0 %vm482_vm9, %v4470_v31  ;;  %10399 = vmatmul.mubr.msk.f32.vlgmr.msra.gmra.mxu1 %vm482_vm9, %v4470_v31  ;;  %v4474_v43 = vrot.slane %v4470_v31, %v11467_v20 }
0x112c   :  { %4700 = vmatpush1.msra.mxu0 %v12158_v47  ;;  %4771 = vmatpush1.msra.mxu1 %v12160_v48 }
0x112d   :  { %4701 = vmatprep.subr.mxu0 %v12164_v50  ;;  %4772 = vmatprep.subr.mxu1 %v12166_v52  ;;  %v4475_v11 = vsel %vm84_vm0, %v4474_v43, 0.0 }
0x112e   :  { %4702 = vmatpush1.msra.mxu0 %v12170_v54  ;;  %4773 = vmatpush1.msra.mxu1 %v12172_v51 }
0x112f   :  { %4703 = vmatprep.subr.mxu0 %v12176_v55  ;;  %4774 = vmatprep.subr.mxu1 %v12178_v53 }
0x1130   :  { %4704 = vmatpush1.msra.mxu0 %v12182_v56  ;;  %4775 = vmatpush1.msra.mxu1 %v12184_v57 }
0x1131   :  { %4705 = vmatprep.subr.mxu0 %v12188_v58  ;;  %4776 = vmatprep.subr.mxu1 %v12190_v59 }
0x1132   :  { %4706 = vmatpush1.msra.mxu0 %v12194_v24  ;;  %4739 = vmatprep.mubr.f32.mxu0 %v11344_v1 }
0x1133   :  { %4777 = vmatpush1.msra.mxu1 %v12198_v35  ;;  %4810 = vmatprep.mubr.f32.mxu1 %v11344_v1 }
0x1134   :  { %4894 = vmatprep.subr.mxu0 %v12153_v17  ;;  %4965 = vmatprep.subr.mxu1 %v12155_v45 }
0x11eb   :  { %v4546_v12 = vpop.f32.mrf.mxu0  ;;  %v4617_v36 = vpop.f32.mrf.mxu1 }
0x11ec   :  { %v4626_v23 = vrot.slane %v4546_v12, 7  ;;  %v4628_v42 = vrot.slane %v4617_v36, 7 }
0x11ed   :  { %v4548_v22 = vpop.f32.mrf.mxu0  ;;  %v4619_v46 = vpop.f32.mrf.mxu1 }
0x11ee   :  { %v4634_v44 = vadd.f32 %v4626_v23, %v12233_v21  ;;  %v4627_v33 = vrot.slane %v4548_v22, 7  ;;  %v4636_v39 = vadd.f32 %v4628_v42, %v12240_v49  ;;  %v4629_v32 = vrot.slane %v4619_v46, 7 }
0x11f0   :  { %v10400_v28 = vmul.f32 -1.442695, %v4634_v44  ;;  %v4635_v34 = vadd.f32 %v4627_v33, %v12235_v29  ;;  %v10402_v62 = vmul.f32 -1.442695, %v4636_v39  ;;  %v4637_v40 = vadd.f32 %v4629_v32, %v12244_v16 }
0x11f1   :  { %v4476_v44 = vsel %vm126_vm7, %v4474_v43, 0.0 }
0x11f2   :  { %10843 = vpow2.f32 %v10400_v28  ;;  %v10401_v38 = vmul.f32 -1.442695, %v4635_v34 }
0x11f4   :  { %10845 = vpow2.f32 %v10401_v38 }
0x11f5   :  { %10847 = vpow2.f32 %v10402_v62 }
0x11ff   :  { %v10844_v63 = vpop.eup %10843 }
0x1200   :  { %v4647_v37 = vadd.f32 1.0, %v10844_v63 }
0x1201   :  { %v10846_v8 = vpop.eup %10845 }
0x1202   :  { %10849 = vrcp.f32 %v4647_v37  ;;  %v4648_v15 = vadd.f32 1.0, %v10846_v8  ;;  %v10848_v9 = vpop.eup %10847 }
0x1203   :  { %10851 = vtanh.f32 %v4637_v40  ;;  %v4649_v25 = vadd.f32 1.0, %v10848_v9 }
0x1204   :  { %10853 = vrcp.f32 %v4648_v15 }
0x1205   :  { %10855 = vrcp.f32 %v4649_v25 }
0x120f   :  { %v10850_v30 = vpop.eup %10849 }
0x1210   :  { %v10852_v19 = vpop.eup %10851 }
0x1211   :  { %v10854_v60 = vpop.eup %10853  ;;  %v4661_v14 = vmul.f32 %v10852_v19, %v10850_v30 }
0x1212   :  { %v4660_v26 = vmul.f32 %v10854_v60, %v4658_v61  ;;  %v10856_v27 = vpop.eup %10855 }
0x1214   :  { %v12271_v7 = vadd.f32 %v4661_v14, %v4660_v26 }
0x1216   :  { %10857 = vtanh.f32 %v12271_v7 }
0x1223   :  { %v10858_v41 = vpop.eup %10857 }
0x1224   :  { %v4664_v12 = vmul.f32 %v10858_v41, %v10856_v27  ;;  %v4853_v27 = vrot.slane %v12271_v7, 7 }
0x1226   :  { %v4668_v23 = vrot.slane %v4664_v12, %v11461_v18  ;;  %v4672_v22 = vrot.slane %v4664_v12, 1 }
0x1228   :  { %10403 = vmatmul.mubr.msk.f32.vlgmr.msra.gmra.mxu0 %vm482_vm9, %v4672_v22  ;;  %10404 = vmatmul.mubr.msk.f32.vlgmr.msra.gmra.mxu1 %vm482_vm9, %v4672_v22  ;;  %v12284_v33 = vsel %vm120_vm6, %v4668_v23, %v4476_v44  ;;  %v12288_v31 = vsel %vm90_vm1, %v4668_v23, %v4475_v11 }
0x1229   :  { %4895 = vmatpush1.msra.mxu0 %v12158_v47  ;;  %4966 = vmatpush1.msra.mxu1 %v12160_v48 }
0x122a   :  { %4896 = vmatprep.subr.mxu0 %v12164_v50  ;;  %4967 = vmatprep.subr.mxu1 %v12166_v52 }
0x122b   :  { %4897 = vmatpush1.msra.mxu0 %v12170_v54  ;;  %4968 = vmatpush1.msra.mxu1 %v12172_v51 }
0x122c   :  { %4898 = vmatprep.subr.mxu0 %v12176_v55  ;;  %4969 = vmatprep.subr.mxu1 %v12178_v53 }
0x122d   :  { %4899 = vmatpush1.msra.mxu0 %v12182_v56  ;;  %4970 = vmatpush1.msra.mxu1 %v12184_v57 }
0x122e   :  { %4900 = vmatprep.subr.mxu0 %v12188_v58  ;;  %4971 = vmatprep.subr.mxu1 %v12190_v59 }
0x122f   :  { %4901 = vmatpush1.msra.mxu0 %v12194_v24  ;;  %4934 = vmatprep.mubr.f32.mxu0 %v11344_v1 }
0x1230   :  { %4972 = vmatpush1.msra.mxu1 %v12198_v35  ;;  %5005 = vmatprep.mubr.f32.mxu1 %v11344_v1 }
0x1231   :  { %5089 = vmatprep.subr.mxu0 %v12153_v17  ;;  %5160 = vmatprep.subr.mxu1 %v12155_v45 }
0x12e8   :  { %v4741_v28 = vpop.f32.mrf.mxu0  ;;  %v4812_v32 = vpop.f32.mrf.mxu1 }
0x12e9   :  { %v4821_v34 = vrot.slane %v4741_v28, 6  ;;  %v4823_v63 = vrot.slane %v4812_v32, 6 }
0x12ea   :  { %v4743_v36 = vpop.f32.mrf.mxu0  ;;  %v4814_v40 = vpop.f32.mrf.mxu1 }
0x12eb   :  { %v4829_v38 = vadd.f32 %v4821_v34, %v12233_v21  ;;  %v4822_v42 = vrot.slane %v4743_v36, 6  ;;  %v4831_v37 = vadd.f32 %v4823_v63, %v12240_v49  ;;  %v4824_v8 = vrot.slane %v4814_v40, 6 }
0x12ed   :  { %v10405_v46 = vmul.f32 -1.442695, %v4829_v38  ;;  %v4830_v39 = vadd.f32 %v4822_v42, %v12235_v29  ;;  %v10407_v15 = vmul.f32 -1.442695, %v4831_v37  ;;  %v4832_v30 = vadd.f32 %v4824_v8, %v12244_v16 }
0x12ef   :  { %10859 = vpow2.f32 %v10405_v46  ;;  %v10406_v62 = vmul.f32 -1.442695, %v4830_v39 }
0x12f1   :  { %10861 = vpow2.f32 %v10406_v62 }
0x12f2   :  { %10863 = vpow2.f32 %v10407_v15 }
0x12fc   :  { %v10860_v9 = vpop.eup %10859 }
0x12fd   :  { %v4842_v19 = vadd.f32 1.0, %v10860_v9 }
0x12fe   :  { %v10862_v61 = vpop.eup %10861 }
0x12ff   :  { %10865 = vrcp.f32 %v4842_v19  ;;  %v4843_v60 = vadd.f32 1.0, %v10862_v61  ;;  %v10864_v25 = vpop.eup %10863 }
0x1300   :  { %10867 = vtanh.f32 %v4832_v30  ;;  %v4844_v43 = vadd.f32 1.0, %v10864_v25 }
0x1301   :  { %10869 = vrcp.f32 %v4843_v60 }
0x1302   :  { %10871 = vrcp.f32 %v4844_v43 }
0x130c   :  { %v10866_v26 = vpop.eup %10865 }
0x130d   :  { %v10868_v14 = vpop.eup %10867 }
0x130e   :  { %v10870_v41 = vpop.eup %10869  ;;  %v4856_v23 = vmul.f32 %v10868_v14, %v10866_v26 }
0x130f   :  { %v4855_v12 = vmul.f32 %v10870_v41, %v4853_v27  ;;  %v10872_v11 = vpop.eup %10871 }
0x1311   :  { %v4857_v22 = vadd.f32 %v4856_v23, %v4855_v12 }
0x1313   :  { %10873 = vtanh.f32 %v4857_v22  ;;  %v5048_v43 = vrot.slane %v4857_v22, 7 }
0x1320   :  { %v10874_v44 = vpop.eup %10873 }
0x1321   :  { %v4859_v28 = vmul.f32 %v10874_v44, %v10872_v11 }
0x1323   :  { %v4863_v34 = vrot.slane %v4859_v28, %v11452_v13  ;;  %v4867_v36 = vrot.slane %v4859_v28, 2 }
0x1325   :  { %10408 = vmatmul.mubr.msk.f32.vlgmr.msra.gmra.mxu0 %vm482_vm9, %v4867_v36  ;;  %10409 = vmatmul.mubr.msk.f32.vlgmr.msra.gmra.mxu1 %vm482_vm9, %v4867_v36  ;;  %v12319_v7 = vsel %vm114_vm5, %v4863_v34, %v12284_v33  ;;  %v12324_v38 = vsel %vm96_vm2, %v4863_v34, %v12288_v31 }
0x1326   :  { %5090 = vmatpush1.msra.mxu0 %v12158_v47  ;;  %5161 = vmatpush1.msra.mxu1 %v12160_v48 }
0x1327   :  { %5091 = vmatprep.subr.mxu0 %v12164_v50  ;;  %5162 = vmatprep.subr.mxu1 %v12166_v52 }
0x1328   :  { %5092 = vmatpush1.msra.mxu0 %v12170_v54  ;;  %5163 = vmatpush1.msra.mxu1 %v12172_v51 }
0x1329   :  { %5093 = vmatprep.subr.mxu0 %v12176_v55  ;;  %5164 = vmatprep.subr.mxu1 %v12178_v53 }
0x132a   :  { %5094 = vmatpush1.msra.mxu0 %v12182_v56  ;;  %5165 = vmatpush1.msra.mxu1 %v12184_v57 }
0x132b   :  { %5095 = vmatprep.subr.mxu0 %v12188_v58  ;;  %5166 = vmatprep.subr.mxu1 %v12190_v59 }
0x132c   :  { %5096 = vmatpush1.msra.mxu0 %v12194_v24  ;;  %5129 = vmatprep.mubr.f32.mxu0 %v11344_v1 }
0x132d   :  { %5167 = vmatpush1.msra.mxu1 %v12198_v35  ;;  %5200 = vmatprep.mubr.f32.mxu1 %v11344_v1 }
0x132e   :  { %5284 = vmatprep.subr.mxu0 %v12153_v17  ;;  %5355 = vmatprep.subr.mxu1 %v12155_v45 }
0x13e5   :  { %v4936_v33 = vpop.f32.mrf.mxu0  ;;  %v5007_v63 = vpop.f32.mrf.mxu1 }
0x13e6   :  { %v5016_v31 = vrot.slane %v4936_v33, 5  ;;  %v5018_v37 = vrot.slane %v5007_v63, 5 }
0x13e7   :  { %v4938_v42 = vpop.f32.mrf.mxu0  ;;  %v5009_v8 = vpop.f32.mrf.mxu1 }
0x13e8   :  { %v5024_v46 = vadd.f32 %v5016_v31, %v12233_v21  ;;  %v5017_v39 = vrot.slane %v4938_v42, 5  ;;  %v5026_v15 = vadd.f32 %v5018_v37, %v12240_v49  ;;  %v5019_v9 = vrot.slane %v5009_v8, 5 }
0x13ea   :  { %v10410_v32 = vmul.f32 -1.442695, %v5024_v46  ;;  %v5025_v62 = vadd.f32 %v5017_v39, %v12235_v29  ;;  %v10412_v30 = vmul.f32 -1.442695, %v5026_v15  ;;  %v5027_v61 = vadd.f32 %v5019_v9, %v12244_v16 }
0x13ec   :  { %10875 = vpow2.f32 %v10410_v32  ;;  %v10411_v40 = vmul.f32 -1.442695, %v5025_v62 }
0x13ee   :  { %10877 = vpow2.f32 %v10411_v40 }
0x13ef   :  { %10879 = vpow2.f32 %v10412_v30 }
0x13f9   :  { %v10876_v19 = vpop.eup %10875 }
0x13fa   :  { %v5037_v60 = vadd.f32 1.0, %v10876_v19 }
0x13fb   :  { %v10878_v25 = vpop.eup %10877 }
0x13fc   :  { %10881 = vrcp.f32 %v5037_v60  ;;  %v5038_v26 = vadd.f32 1.0, %v10878_v25  ;;  %v10880_v14 = vpop.eup %10879 }
0x13fd   :  { %10883 = vtanh.f32 %v5027_v61  ;;  %v5039_v23 = vadd.f32 1.0, %v10880_v14 }
0x13fe   :  { %10885 = vrcp.f32 %v5038_v26 }
0x13ff   :  { %10887 = vrcp.f32 %v5039_v23 }
0x1409   :  { %v10882_v27 = vpop.eup %10881 }
0x140a   :  { %v10884_v41 = vpop.eup %10883 }
0x140b   :  { %v10886_v12 = vpop.eup %10885  ;;  %v5051_v44 = vmul.f32 %v10884_v41, %v10882_v27 }
0x140c   :  { %v5050_v11 = vmul.f32 %v10886_v12, %v5048_v43  ;;  %v10888_v34 = vpop.eup %10887 }
0x140e   :  { %v5052_v28 = vadd.f32 %v5051_v44, %v5050_v11 }
0x1410   :  { %10889 = vtanh.f32 %v5052_v28  ;;  %v5243_v23 = vrot.slane %v5052_v28, 7 }
0x141d   :  { %v10890_v36 = vpop.eup %10889 }
0x141e   :  { %v5054_v33 = vmul.f32 %v10890_v36, %v10888_v34 }
0x1420   :  { %v5058_v31 = vrot.slane %v5054_v33, %v11442_v10  ;;  %v5062_v42 = vrot.slane %v5054_v33, 3 }
0x1422   :  { %10413 = vmatmul.mubr.msk.f32.vlgmr.msra.gmra.mxu0 %vm482_vm9, %v5062_v42  ;;  %10414 = vmatmul.mubr.msk.f32.vlgmr.msra.gmra.mxu1 %vm482_vm9, %v5062_v42  ;;  %v12354_v22 = vsel %vm108_vm4, %v5058_v31, %v12319_v7  ;;  %v12359_v46 = vsel %vm102_vm3, %v5058_v31, %v12324_v38 }
0x1423   :  { %5285 = vmatpush1.msra.mxu0 %v12158_v47  ;;  %5356 = vmatpush1.msra.mxu1 %v12160_v48 }
0x1424   :  { %5286 = vmatprep.subr.mxu0 %v12164_v50  ;;  %5357 = vmatprep.subr.mxu1 %v12166_v52 }
0x1425   :  { %5287 = vmatpush1.msra.mxu0 %v12170_v54  ;;  %5358 = vmatpush1.msra.mxu1 %v12172_v51 }
0x1426   :  { %5288 = vmatprep.subr.mxu0 %v12176_v55  ;;  %5359 = vmatprep.subr.mxu1 %v12178_v53 }
0x1427   :  { %5289 = vmatpush1.msra.mxu0 %v12182_v56  ;;  %5360 = vmatpush1.msra.mxu1 %v12184_v57 }
0x1428   :  { %5290 = vmatprep.subr.mxu0 %v12188_v58  ;;  %5361 = vmatprep.subr.mxu1 %v12190_v59 }
0x1429   :  { %5291 = vmatpush1.msra.mxu0 %v12194_v24  ;;  %5324 = vmatprep.mubr.f32.mxu0 %v11344_v1 }
0x142a   :  { %5362 = vmatpush1.msra.mxu1 %v12198_v35  ;;  %5395 = vmatprep.mubr.f32.mxu1 %v11344_v1 }
0x142b   :  { %5479 = vmatprep.subr.mxu0 %v12153_v17  ;;  %5550 = vmatprep.subr.mxu1 %v12155_v45 }
0x14e2   :  { %v5131_v7 = vpop.f32.mrf.mxu0  ;;  %v5202_v37 = vpop.f32.mrf.mxu1 }
0x14e3   :  { %v5211_v38 = vrot.slane %v5131_v7, 4  ;;  %v5213_v15 = vrot.slane %v5202_v37, 4 }
0x14e4   :  { %v5133_v39 = vpop.f32.mrf.mxu0  ;;  %v5204_v9 = vpop.f32.mrf.mxu1 }
0x14e5   :  { %v5219_v32 = vadd.f32 %v5211_v38, %v12233_v21  ;;  %v5212_v62 = vrot.slane %v5133_v39, 4  ;;  %v5221_v30 = vadd.f32 %v5213_v15, %v12240_v49  ;;  %v5214_v19 = vrot.slane %v5204_v9, 4 }
0x14e7   :  { %v10415_v63 = vmul.f32 -1.442695, %v5219_v32  ;;  %v5220_v40 = vadd.f32 %v5212_v62, %v12235_v29  ;;  %v10417_v61 = vmul.f32 -1.442695, %v5221_v30  ;;  %v5222_v25 = vadd.f32 %v5214_v19, %v12244_v16 }
0x14e9   :  { %10891 = vpow2.f32 %v10415_v63  ;;  %v10416_v8 = vmul.f32 -1.442695, %v5220_v40 }
0x14eb   :  { %10893 = vpow2.f32 %v10416_v8 }
0x14ec   :  { %10895 = vpow2.f32 %v10417_v61 }
0x14f6   :  { %v10892_v60 = vpop.eup %10891 }
0x14f7   :  { %v5232_v26 = vadd.f32 1.0, %v10892_v60 }
0x14f8   :  { %v10894_v14 = vpop.eup %10893 }
0x14f9   :  { %10897 = vrcp.f32 %v5232_v26  ;;  %v5233_v27 = vadd.f32 1.0, %v10894_v14  ;;  %v10896_v41 = vpop.eup %10895 }
0x14fa   :  { %10899 = vtanh.f32 %v5222_v25  ;;  %v5234_v44 = vadd.f32 1.0, %v10896_v41 }
0x14fb   :  { %10901 = vrcp.f32 %v5233_v27 }
0x14fc   :  { %10903 = vrcp.f32 %v5234_v44 }
0x1506   :  { %v10898_v43 = vpop.eup %10897 }
0x1507   :  { %v10900_v12 = vpop.eup %10899 }
0x1508   :  { %v10902_v11 = vpop.eup %10901  ;;  %v5246_v36 = vmul.f32 %v10900_v12, %v10898_v43 }
0x1509   :  { %v5245_v34 = vmul.f32 %v10902_v11, %v5243_v23  ;;  %v10904_v31 = vpop.eup %10903 }
0x150b   :  { %v5247_v33 = vadd.f32 %v5246_v36, %v5245_v34 }
0x150d   :  { %10905 = vtanh.f32 %v5247_v33  ;;  %v5438_v23 = vrot.slane %v5247_v33, 7 }
0x151a   :  { %v10906_v42 = vpop.eup %10905 }
0x151b   :  { %v5249_v7 = vmul.f32 %v10906_v42, %v10904_v31 }
0x151d   :  { %v5253_v38 = vrot.slane %v5249_v7, %v11439_v6  ;;  %v5257_v39 = vrot.slane %v5249_v7, 4 }
0x151f   :  { %10418 = vmatmul.mubr.msk.f32.vlgmr.msra.gmra.mxu0 %vm482_vm9, %v5257_v39  ;;  %10419 = vmatmul.mubr.msk.f32.vlgmr.msra.gmra.mxu1 %vm482_vm9, %v5257_v39  ;;  %v12389_v28 = vsel %vm102_vm3, %v5253_v38, %v12354_v22  ;;  %v12394_v32 = vsel %vm108_vm4, %v5253_v38, %v12359_v46 }
0x1520   :  { %5480 = vmatpush1.msra.mxu0 %v12158_v47  ;;  %5551 = vmatpush1.msra.mxu1 %v12160_v48 }
0x1521   :  { %5481 = vmatprep.subr.mxu0 %v12164_v50  ;;  %5552 = vmatprep.subr.mxu1 %v12166_v52 }
0x1522   :  { %5482 = vmatpush1.msra.mxu0 %v12170_v54  ;;  %5553 = vmatpush1.msra.mxu1 %v12172_v51 }
0x1523   :  { %5483 = vmatprep.subr.mxu0 %v12176_v55  ;;  %5554 = vmatprep.subr.mxu1 %v12178_v53 }
0x1524   :  { %5484 = vmatpush1.msra.mxu0 %v12182_v56  ;;  %5555 = vmatpush1.msra.mxu1 %v12184_v57 }
0x1525   :  { %5485 = vmatprep.subr.mxu0 %v12188_v58  ;;  %5556 = vmatprep.subr.mxu1 %v12190_v59 }
0x1526   :  { %5486 = vmatpush1.msra.mxu0 %v12194_v24  ;;  %5519 = vmatprep.mubr.f32.mxu0 %v11344_v1 }
0x1527   :  { %5557 = vmatpush1.msra.mxu1 %v12198_v35  ;;  %5590 = vmatprep.mubr.f32.mxu1 %v11344_v1 }
0x1528   :  { %5674 = vmatprep.subr.mxu0 %v12153_v17  ;;  %5745 = vmatprep.subr.mxu1 %v12155_v45 }
0x15df   :  { %v5326_v22 = vpop.f32.mrf.mxu0  ;;  %v5397_v15 = vpop.f32.mrf.mxu1 }
0x15e0   :  { %v5406_v46 = vrot.slane %v5326_v22, 3  ;;  %v5408_v30 = vrot.slane %v5397_v15, 3 }
0x15e1   :  { %v5328_v62 = vpop.f32.mrf.mxu0  ;;  %v5399_v19 = vpop.f32.mrf.mxu1 }
0x15e2   :  { %v5414_v63 = vadd.f32 %v5406_v46, %v12233_v21  ;;  %v5407_v40 = vrot.slane %v5328_v62, 3  ;;  %v5416_v61 = vadd.f32 %v5408_v30, %v12240_v49  ;;  %v5409_v17 = vrot.slane %v5399_v19, 3 }
0x15e4   :  { %v10420_v37 = vmul.f32 -1.442695, %v5414_v63  ;;  %v5415_v8 = vadd.f32 %v5407_v40, %v12235_v29  ;;  %v10422_v60 = vmul.f32 -1.442695, %v5416_v61  ;;  %v5417_v25 = vadd.f32 %v5409_v17, %v12244_v16 }
0x15e6   :  { %10907 = vpow2.f32 %v10420_v37  ;;  %v10421_v9 = vmul.f32 -1.442695, %v5415_v8 }
0x15e8   :  { %10909 = vpow2.f32 %v10421_v9 }
0x15e9   :  { %10911 = vpow2.f32 %v10422_v60 }
0x15f3   :  { %v10908_v45 = vpop.eup %10907 }
0x15f4   :  { %v5427_v26 = vadd.f32 1.0, %v10908_v45 }
0x15f5   :  { %v10910_v14 = vpop.eup %10909 }
0x15f6   :  { %10913 = vrcp.f32 %v5427_v26  ;;  %v5428_v27 = vadd.f32 1.0, %v10910_v14  ;;  %v10912_v41 = vpop.eup %10911 }
0x15f7   :  { %10915 = vtanh.f32 %v5417_v25  ;;  %v5429_v44 = vadd.f32 1.0, %v10912_v41 }
0x15f8   :  { %10917 = vrcp.f32 %v5428_v27 }
0x15f9   :  { %10919 = vrcp.f32 %v5429_v44  ;;  %v5873_v44 = vld [vmem:[#allocation6 + $0x2f0] sm:$0xff] }
0x1603   :  { %v10914_v43 = vpop.eup %10913 }
0x1604   :  { %v10916_v12 = vpop.eup %10915 }
0x1605   :  { %v10918_v11 = vpop.eup %10917  ;;  %v5441_v36 = vmul.f32 %v10916_v12, %v10914_v43  ;;  %v5872_v12 = vld [vmem:[#allocation6 + $0x2e8] sm:$0xff] }
0x1606   :  { %v5440_v34 = vmul.f32 %v10918_v11, %v5438_v23  ;;  %v10920_v42 = vpop.eup %10919  ;;  %v5874_v23 = vld [vmem:[#allocation6 + $0x2f8] sm:$0xff]  ;;  %v5871_v11 = vld [vmem:[#allocation6 + $0x2e0] sm:$0xff] }
0x1608   :  { %v5442_v31 = vadd.f32 %v5441_v36, %v5440_v34  ;;  %v5868_v34 = vld [vmem:[#allocation6 + $0x2c8] sm:$0xff]  ;;  %v5870_v36 = vld [vmem:[#allocation6 + $0x2d8] sm:$0xff] }
0x160a   :  { %10921 = vtanh.f32 %v5442_v31  ;;  %v5633_v9 = vrot.slane %v5442_v31, 7  ;;  %v5867_v31 = vld [vmem:[#allocation6 + $0x2c0] sm:$0xff] }
0x1617   :  { %v10922_v7 = vpop.eup %10921 }
0x1618   :  { %v5444_v38 = vmul.f32 %v10922_v7, %v10920_v42  ;;  %v5869_v42 = vld [vmem:[#allocation6 + $0x2d0] sm:$0xff]  ;;  %v5864_v7 = vld [vmem:[#allocation6 + $0x2a8] sm:$0xff] }
0x161a   :  { %v5452_v39 = vrot.slane %v5444_v38, 5  ;;  %v5448_v22 = vrot.slane %v5444_v38, %v11436_v5  ;;  %v5866_v38 = vld [vmem:[#allocation6 + $0x2b8] sm:$0xff] }
0x161c   :  { %10423 = vmatmul.mubr.msk.f32.vlgmr.msra.gmra.mxu0 %vm482_vm9, %v5452_v39  ;;  %10424 = vmatmul.mubr.msk.f32.vlgmr.msra.gmra.mxu1 %vm482_vm9, %v5452_v39  ;;  %v5450_v33 = vsel %vm96_vm2, %v5448_v22, %v12389_v28  ;;  %v5449_v46 = vsel %vm114_vm5, %v5448_v22, %v12394_v32  ;;  %v5863_v39 = vld [vmem:[#allocation6 + $0x2a0] sm:$0xff]  ;;  %v5865_v22 = vld [vmem:[#allocation6 + $0x2b0] sm:$0xff] }
0x161d   :  { %5675 = vmatpush1.msra.mxu0 %v12158_v47  ;;  %5746 = vmatpush1.msra.mxu1 %v12160_v48 }
0x161e   :  { %5676 = vmatprep.subr.mxu0 %v12164_v50  ;;  %5747 = vmatprep.subr.mxu1 %v12166_v52 }
0x161f   :  { %5677 = vmatpush1.msra.mxu0 %v12170_v54  ;;  %5748 = vmatpush1.msra.mxu1 %v12172_v51 }
0x1620   :  { %5678 = vmatprep.subr.mxu0 %v12176_v55  ;;  %5749 = vmatprep.subr.mxu1 %v12178_v53 }
0x1621   :  { %5679 = vmatpush1.msra.mxu0 %v12182_v56  ;;  %5750 = vmatpush1.msra.mxu1 %v12184_v57 }
0x1622   :  { %5680 = vmatprep.subr.mxu0 %v12188_v58  ;;  %5751 = vmatprep.subr.mxu1 %v12190_v59 }
0x1623   :  { %5681 = vmatpush1.msra.mxu0 %v12194_v24  ;;  %5714 = vmatprep.mubr.f32.mxu0 %v11344_v1 }
0x1624   :  { %5752 = vmatpush1.msra.mxu1 %v12198_v35  ;;  %5785 = vmatprep.mubr.f32.mxu1 %v11344_v1 }
0x1625   :  { %5902 = vmatprep.subr.mxu0 %v5872_v12  ;;  %5973 = vmatprep.subr.mxu1 %v5874_v23  ;;  %v5854_v12 = vld [vmem:[#allocation6 + $0x260] sm:$0xff]  ;;  %v5856_v23 = vld [vmem:[#allocation6 + $0x270] sm:$0xff] }
0x16dc   :  { %v5521_v47 = vpop.f32.mrf.mxu0  ;;  %v5592_v53 = vpop.f32.mrf.mxu1 }
0x16dd   :  { %v5601_v48 = vrot.slane %v5521_v47, 2  ;;  %v5603_v57 = vrot.slane %v5592_v53, 2  ;;  %v5859_v47 = vld [vmem:[#allocation6 + $0x280] sm:$0xff] }
0x16de   :  { %v5523_v50 = vpop.f32.mrf.mxu0  ;;  %v5594_v58 = vpop.f32.mrf.mxu1 }
0x16df   :  { %v5609_v52 = vadd.f32 %v5601_v48, %v12233_v21  ;;  %v5602_v54 = vrot.slane %v5523_v50, 2  ;;  %v5611_v59 = vadd.f32 %v5603_v57, %v12240_v49  ;;  %v5604_v24 = vrot.slane %v5594_v58, 2  ;;  %v5861_v48 = vld [vmem:[#allocation6 + $0x290] sm:$0xff]  ;;  %v5855_v50 = vld [vmem:[#allocation6 + $0x268] sm:$0xff] }
0x16e1   :  { %v10425_v51 = vmul.f32 -1.442695, %v5609_v52  ;;  %v5610_v55 = vadd.f32 %v5602_v54, %v12235_v29  ;;  %v10427_v35 = vmul.f32 -1.442695, %v5611_v59  ;;  %v5612_v32 = vadd.f32 %v5604_v24, %v12244_v16  ;;  %v5857_v52 = vld [vmem:[#allocation6 + $0x278] sm:$0xff] }
0x16e3   :  { %10923 = vpow2.f32 %v10425_v51  ;;  %v10426_v56 = vmul.f32 -1.442695, %v5610_v55 }
0x16e5   :  { %10925 = vpow2.f32 %v10426_v56 }
0x16e6   :  { %10927 = vpow2.f32 %v10427_v35 }
0x16f0   :  { %v10924_v28 = vpop.eup %10923 }
0x16f1   :  { %v5622_v62 = vadd.f32 1.0, %v10924_v28 }
0x16f2   :  { %v10926_v63 = vpop.eup %10925 }
0x16f3   :  { %10929 = vrcp.f32 %v5622_v62  ;;  %v5623_v40 = vadd.f32 1.0, %v10926_v63  ;;  %v10928_v37 = vpop.eup %10927 }
0x16f4   :  { %10931 = vtanh.f32 %v5612_v32  ;;  %v5624_v19 = vadd.f32 1.0, %v10928_v37 }
0x16f5   :  { %10933 = vrcp.f32 %v5623_v40 }
0x16f6   :  { %10935 = vrcp.f32 %v5624_v19 }
0x1700   :  { %v10930_v8 = vpop.eup %10929 }
0x1701   :  { %v10932_v15 = vpop.eup %10931 }
0x1702   :  { %v10934_v30 = vpop.eup %10933  ;;  %v5636_v17 = vmul.f32 %v10932_v15, %v10930_v8 }
0x1703   :  { %v5635_v61 = vmul.f32 %v10934_v30, %v5633_v9  ;;  %v10936_v45 = vpop.eup %10935 }
0x1705   :  { %v12447_v60 = vadd.f32 %v5636_v17, %v5635_v61 }
0x1707   :  { %10937 = vtanh.f32 %v12447_v60  ;;  %v5828_v19 = vrot.slane %v12447_v60, 7  ;;  %v5853_v60 = vld [vmem:[#allocation6 + $0x258] sm:$0xff] }
0x1714   :  { %v10938_v25 = vpop.eup %10937 }
0x1715   :  { %v5639_v26 = vmul.f32 %v10938_v25, %v10936_v45 }
0x1717   :  { %v5647_v14 = vrot.slane %v5639_v26, 6  ;;  %v5643_v27 = vrot.slane %v5639_v26, %v11433_v4 }
0x1719   :  { %10428 = vmatmul.mubr.msk.f32.vlgmr.msra.gmra.mxu0 %vm482_vm9, %v5647_v14  ;;  %10429 = vmatmul.mubr.msk.f32.vlgmr.msra.gmra.mxu1 %vm482_vm9, %v5647_v14  ;;  %v12455_v41 = vsel %vm90_vm1, %v5643_v27, %v5450_v33  ;;  %v12459_v43 = vsel %vm120_vm6, %v5643_v27, %v5449_v46  ;;  %v5860_v33 = vld [vmem:[#allocation6 + $0x288] sm:$0xff]  ;;  %v5862_v46 = vld [vmem:[#allocation6 + $0x298] sm:$0xff] }
0x171a   :  { %5942 = vmatprep.mubr.f32.mxu0 %v11344_v1  ;;  %6013 = vmatprep.mubr.f32.mxu1 %v11344_v1 }
0x171b   :  { %5903 = vmatpush1.msra.mxu0 %v5871_v11  ;;  %5974 = vmatpush1.msra.mxu1 %v5873_v44  ;;  %v5851_v44 = vld [vmem:[#allocation6 + $0x248] sm:$0xff] }
0x171c   :  { %5904 = vmatprep.subr.mxu0 %v5868_v34  ;;  %5975 = vmatprep.subr.mxu1 %v5870_v36  ;;  %v5850_v36 = vld [vmem:[#allocation6 + $0x240] sm:$0xff] }
0x171d   :  { %5905 = vmatpush1.msra.mxu0 %v5867_v31  ;;  %5976 = vmatpush1.msra.mxu1 %v5869_v42  ;;  %v5852_v31 = vld [vmem:[#allocation6 + $0x250] sm:$0xff]  ;;  %v5847_v42 = vld [vmem:[#allocation6 + $0x228] sm:$0xff] }
0x171e   :  { %5906 = vmatprep.subr.mxu0 %v5864_v7  ;;  %5977 = vmatprep.subr.mxu1 %v5866_v38  ;;  %v5849_v7 = vld [vmem:[#allocation6 + $0x238] sm:$0xff]  ;;  %v5846_v38 = vld [vmem:[#allocation6 + $0x220] sm:$0xff] }
0x171f   :  { %5907 = vmatpush1.msra.mxu0 %v5863_v39  ;;  %5978 = vmatpush1.msra.mxu1 %v5865_v22  ;;  %v5843_v39 = vld [vmem:[#allocation6 + $0x208] sm:$0xff]  ;;  %v5845_v22 = vld [vmem:[#allocation6 + $0x218] sm:$0xff] }
0x1720   :  { %5908 = vmatprep.subr.mxu0 %v5860_v33  ;;  %5979 = vmatprep.subr.mxu1 %v5862_v46  ;;  %v5844_v33 = vld [vmem:[#allocation6 + $0x210] sm:$0xff]  ;;  %v12478_v46 = vld [vmem:[#allocation8 + $0x1e8] sm:$0xff] }
0x1721   :  { %5909 = vmatpush1.msra.mxu0 %v5859_v47  ;;  %5980 = vmatpush1.msra.mxu1 %v5861_v48  ;;  %v12480_v47 = vld [vmem:[#allocation8 + $0x1f8] sm:$0xff]  ;;  %v12483_v48 = vld [vmem:[#allocation8 + $0x1e0] sm:$0xff] }
0x1722   :  { %6047 = vmatprep.subr.mxu0 %v5855_v50  ;;  %6118 = vmatprep.subr.mxu1 %v5857_v52  ;;  %v12485_v50 = vld [vmem:[#allocation8 + $0x1f0] sm:$0xff]  ;;  %v12489_v52 = vld [vmem:[#allocation8 + $0x1c8] sm:$0xff] }
0x17d9   :  { %v5716_v54 = vpop.f32.mrf.mxu0  ;;  %v5787_v59 = vpop.f32.mrf.mxu1 }
0x17da   :  { %v5796_v51 = vrot.slane %v5716_v54, 1  ;;  %v5798_v35 = vrot.slane %v5787_v59, 1  ;;  %v12491_v54 = vld [vmem:[#allocation8 + $0x1d8] sm:$0xff]  ;;  %v12513_v59 = vld [vmem:[#allocation8 + $0x188] sm:$0xff] }
0x17db   :  { %v5718_v55 = vpop.f32.mrf.mxu0  ;;  %v5789_v28 = vpop.f32.mrf.mxu1 }
0x17dc   :  { %v5804_v53 = vadd.f32 %v5796_v51, %v12233_v21  ;;  %v5797_v56 = vrot.slane %v5718_v55, 1  ;;  %v5806_v32 = vadd.f32 %v5798_v35, %v12240_v49  ;;  %v5799_v62 = vrot.slane %v5789_v28, 1  ;;  %v12495_v51 = vld [vmem:[#allocation8 + $0x1c0] sm:$0xff]  ;;  %v12497_v55 = vld [vmem:[#allocation8 + $0x1d0] sm:$0xff] }
0x17dd   :  { %v12519_v35 = vld [vmem:[#allocation8 + $0x180] sm:$0xff]  ;;  %v12523_v28 = vld [vmem:[#allocation8 + $0x190] sm:$0xff] }
0x17de   :  { %v10430_v57 = vmul.f32 -1.442695, %v5804_v53  ;;  %v5805_v58 = vadd.f32 %v5797_v56, %v12235_v29  ;;  %v10432_v63 = vmul.f32 -1.442695, %v5806_v32  ;;  %v5807_v37 = vadd.f32 %v5799_v62, %v12244_v16  ;;  %v12501_v53 = vld [vmem:[#allocation8 + $0x1a8] sm:$0xff]  ;;  %v12503_v56 = vld [vmem:[#allocation8 + $0x1b8] sm:$0xff] }
0x17e0   :  { %10939 = vpow2.f32 %v10430_v57  ;;  %v10431_v24 = vmul.f32 -1.442695, %v5805_v58  ;;  %v12507_v57 = vld [vmem:[#allocation8 + $0x1a0] sm:$0xff]  ;;  %v12509_v58 = vld [vmem:[#allocation8 + $0x1b0] sm:$0xff] }
0x17e2   :  { %10941 = vpow2.f32 %v10431_v24  ;;  %v12515_v24 = vld [vmem:[#allocation8 + $0x198] sm:$0xff] }
0x17e3   :  { %10943 = vpow2.f32 %v10432_v63 }
0x17ed   :  { %v10940_v40 = vpop.eup %10939 }
0x17ee   :  { %v5817_v8 = vadd.f32 1.0, %v10940_v40  ;;  %v10437_v40 = vld [vmem:[%s13310_s4 + $0xc] sm:$0xf] }
0x17ef   :  { %v10942_v15 = vpop.eup %10941 }
0x17f0   :  { %10945 = vrcp.f32 %v5817_v8  ;;  %v5818_v21 = vadd.f32 1.0, %v10942_v15  ;;  %v10944_v29 = vpop.eup %10943  ;;  %v6171_v15 = vrot.slane %v10437_v40, %v11467_v20 }
0x17f1   :  { %10947 = vtanh.f32 %v5807_v37  ;;  %v5819_v17 = vadd.f32 1.0, %v10944_v29 }
0x17f2   :  { %10949 = vrcp.f32 %v5818_v21 }
0x17f3   :  { %10951 = vrcp.f32 %v5819_v17 }
0x17fd   :  { %v10946_v9 = vpop.eup %10945 }
0x17fe   :  { %v10948_v30 = vpop.eup %10947 }
0x17ff   :  { %v10950_v61 = vpop.eup %10949  ;;  %v5831_v45 = vmul.f32 %v10948_v30, %v10946_v9  ;;  %v6175_v9 = vrot.slane %v10437_v40, %v11461_v18 }
0x1800   :  { %v5830_v49 = vmul.f32 %v10950_v61, %v5828_v19  ;;  %v10952_v16 = vpop.eup %10951 }
0x1802   :  { %v5832_v25 = vadd.f32 %v5831_v45, %v5830_v49 }
0x1804   :  { %10953 = vtanh.f32 %v5832_v25 }
0x1811   :  { %v10954_v26 = vpop.eup %10953 }
0x1812   :  { %v5834_v14 = vmul.f32 %v10954_v26, %v10952_v16 }
0x1814   :  { %v5838_v27 = vrot.slane %v5834_v14, %v11430_v3 }
0x1816   :  { %v5840_v11 = vsel %vm84_vm0, %v5838_v27, %v12455_v41  ;;  %v5839_v34 = vsel %vm126_vm7, %v5838_v27, %v12459_v43  ;;  %v5848_v41 = vld [vmem:[#allocation6 + $0x230] sm:$0xff]  ;;  %v5842_v43 = vld [vmem:[#allocation6 + $0x200] sm:$0xff] }
0x1817   :  { %10433 = vmatmul.mubr.msk.f32.vlgmr.msra.gmra.mxu0 %vm482_vm9, %v5840_v11  ;;  %10434 = vmatmul.mubr.msk.f32.vlgmr.msra.gmra.mxu1 %vm482_vm9, %v5840_v11 }
0x1818   :  { %6048 = vmatpush1.msra.mxu0 %v5854_v12  ;;  %6119 = vmatpush1.msra.mxu1 %v5856_v23  ;;  %v6179_v12 = vrot.slane %v10437_v40, %v11452_v13 }
0x1819   :  { %6049 = vmatprep.subr.mxu0 %v5851_v44  ;;  %6120 = vmatprep.subr.mxu1 %v5853_v60 }
0x181a   :  { %6050 = vmatpush1.msra.mxu0 %v5850_v36  ;;  %6121 = vmatpush1.msra.mxu1 %v5852_v31 }
0x181b   :  { %6051 = vmatprep.subr.mxu0 %v5847_v42  ;;  %6122 = vmatprep.subr.mxu1 %v5849_v7 }
0x181c   :  { %6052 = vmatpush1.msra.mxu0 %v5846_v38  ;;  %6123 = vmatpush1.msra.mxu1 %v5848_v41 }
0x181d   :  { %6053 = vmatprep.subr.mxu0 %v5843_v39  ;;  %6124 = vmatprep.subr.mxu1 %v5845_v22 }
0x181e   :  { %6054 = vmatpush1.msra.mxu0 %v5842_v43  ;;  %6087 = vmatprep.mubr.f32.mxu0 %v11344_v1 }
0x181f   :  { %6125 = vmatpush1.msra.mxu1 %v5844_v33  ;;  %6158 = vmatprep.mubr.f32.mxu1 %v11344_v1 }
0x1820   :  { %10435 = vmatmul.mubr.msk.f32.vlgmr.msra.gmra.mxu0 %vm482_vm9, %v5839_v34  ;;  %10436 = vmatmul.mubr.msk.f32.vlgmr.msra.gmra.mxu1 %vm482_vm9, %v5839_v34  ;;  %v6183_v34 = vrot.slane %v10437_v40, %v11442_v10 }
0x1821   :  { %6233 = vmatprep.subr.mxu0 %v12478_v46  ;;  %6304 = vmatprep.subr.mxu1 %v12480_v47 }
0x1822   :  { %6234 = vmatpush1.msra.mxu0 %v12483_v48  ;;  %6305 = vmatpush1.msra.mxu1 %v12485_v50 }
0x1823   :  { %6235 = vmatprep.subr.mxu0 %v12489_v52  ;;  %6306 = vmatprep.subr.mxu1 %v12491_v54 }
0x1824   :  { %6236 = vmatpush1.msra.mxu0 %v12495_v51  ;;  %6307 = vmatpush1.msra.mxu1 %v12497_v55 }
0x1825   :  { %6237 = vmatprep.subr.mxu0 %v12501_v53  ;;  %6308 = vmatprep.subr.mxu1 %v12503_v56 }
0x1826   :  { %6238 = vmatpush1.msra.mxu0 %v12507_v57  ;;  %6309 = vmatpush1.msra.mxu1 %v12509_v58 }
0x1827   :  { %6239 = vmatprep.subr.mxu0 %v12513_v59  ;;  %6310 = vmatprep.subr.mxu1 %v12515_v24 }
0x1828   :  { %6240 = vmatpush1.msra.mxu0 %v12519_v35  ;;  %6273 = vmatprep.mubr.f32.mxu0 %v11344_v1 }
0x1829   :  { %6311 = vmatpush1.msra.mxu1 %v12523_v28  ;;  %6344 = vmatprep.mubr.f32.mxu1 %v11344_v1 }
0x182a   :  { %6274 = vmatmul.mubr.f32.vlgmr.msra.gmra.mxu0 %v11344_v1  ;;  %6345 = vmatmul.mubr.f32.vlgmr.msra.gmra.mxu1 %v11344_v1 }
0x182b   :  { %6412 = vmatprep.subr.mxu0 %v12478_v46  ;;  %6483 = vmatprep.subr.mxu1 %v12480_v47 }
0x182c   :  { %6413 = vmatpush1.msra.mxu0 %v12483_v48  ;;  %6484 = vmatpush1.msra.mxu1 %v12485_v50 }
0x182d   :  { %6414 = vmatprep.subr.mxu0 %v12489_v52  ;;  %6485 = vmatprep.subr.mxu1 %v12491_v54 }
0x182e   :  { %6415 = vmatpush1.msra.mxu0 %v12495_v51  ;;  %6486 = vmatpush1.msra.mxu1 %v12497_v55 }
0x182f   :  { %6416 = vmatprep.subr.mxu0 %v12501_v53  ;;  %6487 = vmatprep.subr.mxu1 %v12503_v56 }
0x1830   :  { %6417 = vmatpush1.msra.mxu0 %v12507_v57  ;;  %6488 = vmatpush1.msra.mxu1 %v12509_v58 }
0x1831   :  { %6418 = vmatprep.subr.mxu0 %v12513_v59  ;;  %6489 = vmatprep.subr.mxu1 %v12515_v24 }
0x1832   :  { %6419 = vmatpush1.msra.mxu0 %v12519_v35  ;;  %6452 = vmatprep.mubr.f32.mxu0 %v11344_v1 }
0x1833   :  { %6490 = vmatpush1.msra.mxu1 %v12523_v28  ;;  %6523 = vmatprep.mubr.f32.mxu1 %v11344_v1 }
0x1834   :  { %6607 = vmatprep.subr.mxu0 %v12478_v46  ;;  %6678 = vmatprep.subr.mxu1 %v12480_v47 }
0x18d7   :  { %v5944_v32 = vpop.f32.mrf.mxu0  ;;  %v6015_v21 = vpop.f32.mrf.mxu1 }
0x18d9   :  { %v5946_v62 = vpop.f32.mrf.mxu0  ;;  %v6017_v61 = vpop.f32.mrf.mxu1 }
0x18e0   :  { %v6089_v63 = vpop.f32.mrf.mxu0  ;;  %v6160_v25 = vpop.f32.mrf.mxu1 }
0x18e1   :  { %v6090_v8 = vadd.f32 %v6089_v63, %v5944_v32  ;;  %v6161_v27 = vadd.f32 %v6160_v25, %v6015_v21 }
0x18e2   :  { %v6091_v37 = vpop.f32.mrf.mxu0  ;;  %v6162_v23 = vpop.f32.mrf.mxu1 }
0x18e3   :  { %v6092_v29 = vadd.f32 %v6091_v37, %v5946_v62  ;;  %v12558_v30 = vadd.f32 %v6171_v15, %v6090_v8  ;;  %v12565_v44 = vadd.f32 %v6179_v12, %v6161_v27  ;;  %v6163_v60 = vadd.f32 %v6162_v23, %v6017_v61 }
0x18e5   :  { %v12560_v17 = vadd.f32 %v6175_v9, %v6092_v29  ;;  %v12569_v42 = vadd.f32 %v6183_v34, %v6163_v60 }
0x18ea   :  { %v6275_v19 = vpop.f32.mrf.mxu0  ;;  %v6346_v11 = vpop.f32.mrf.mxu1 }
0x18eb   :  { %v6351_v49 = vadd.f32 %v6275_v19, %v12558_v30  ;;  %v6353_v36 = vadd.f32 %v6346_v11, %v12565_v44 }
0x18ec   :  { %v6277_v45 = vpop.f32.mrf.mxu0  ;;  %v6348_v31 = vpop.f32.mrf.mxu1 }
0x18ed   :  { %v10438_v16 = vmul.f32 -1.442695, %v6351_v49  ;;  %v6352_v26 = vadd.f32 %v6277_v45, %v12560_v17  ;;  %v10440_v7 = vmul.f32 -1.442695, %v6353_v36  ;;  %v6354_v41 = vadd.f32 %v6348_v31, %v12569_v42 }
0x18ef   :  { %10955 = vpow2.f32 %v10438_v16  ;;  %v10439_v14 = vmul.f32 -1.442695, %v6352_v26 }
0x18f1   :  { %10957 = vpow2.f32 %v10439_v14 }
0x18f2   :  { %10959 = vpow2.f32 %v10440_v7 }
0x18fc   :  { %v10956_v38 = vpop.eup %10955 }
0x18fd   :  { %v6364_v39 = vadd.f32 1.0, %v10956_v38 }
0x18fe   :  { %v10958_v22 = vpop.eup %10957 }
0x18ff   :  { %10961 = vrcp.f32 %v6364_v39  ;;  %v6365_v43 = vadd.f32 1.0, %v10958_v22  ;;  %v10960_v33 = vpop.eup %10959 }
0x1900   :  { %10963 = vtanh.f32 %v6354_v41  ;;  %v6366_v40 = vadd.f32 1.0, %v10960_v33 }
0x1901   :  { %10965 = vrcp.f32 %v6365_v43 }
0x1902   :  { %10967 = vrcp.f32 %v6366_v40 }
0x190c   :  { %v10962_v32 = vpop.eup %10961 }
0x190d   :  { %v10964_v62 = vpop.eup %10963 }
0x190e   :  { %v10966_v63 = vpop.eup %10965  ;;  %v6375_v8 = vmul.f32 %v10964_v62, %v10962_v32 }
0x190f   :  { %v6374_v37 = vmul.f32 0.0, %v10966_v63  ;;  %v10968_v21 = vpop.eup %10967 }
0x1911   :  { %v6376_v15 = vadd.f32 %v6375_v8, %v6374_v37 }
0x1913   :  { %10969 = vtanh.f32 %v6376_v15  ;;  %v6566_v33 = vrot.slane %v6376_v15, 7 }
0x1920   :  { %v10970_v29 = vpop.eup %10969 }
0x1921   :  { %v6378_v9 = vmul.f32 %v10970_v29, %v10968_v21 }
0x1923   :  { %10441 = vmatmul.mubr.msk.f32.vlgmr.msra.gmra.mxu0 %vm482_vm9, %v6378_v9  ;;  %10442 = vmatmul.mubr.msk.f32.vlgmr.msra.gmra.mxu1 %vm482_vm9, %v6378_v9  ;;  %v6382_v29 = vrot.slane %v6378_v9, %v11467_v20 }
0x1924   :  { %6608 = vmatpush1.msra.mxu0 %v12483_v48  ;;  %6679 = vmatpush1.msra.mxu1 %v12485_v50 }
0x1925   :  { %6609 = vmatprep.subr.mxu0 %v12489_v52  ;;  %6680 = vmatprep.subr.mxu1 %v12491_v54  ;;  %v6383_v15 = vsel %vm84_vm0, %v6382_v29, 0.0 }
0x1926   :  { %6610 = vmatpush1.msra.mxu0 %v12495_v51  ;;  %6681 = vmatpush1.msra.mxu1 %v12497_v55 }
0x1927   :  { %6611 = vmatprep.subr.mxu0 %v12501_v53  ;;  %6682 = vmatprep.subr.mxu1 %v12503_v56 }
0x1928   :  { %6612 = vmatpush1.msra.mxu0 %v12507_v57  ;;  %6683 = vmatpush1.msra.mxu1 %v12509_v58 }
0x1929   :  { %6613 = vmatprep.subr.mxu0 %v12513_v59  ;;  %6684 = vmatprep.subr.mxu1 %v12515_v24 }
0x192a   :  { %6614 = vmatpush1.msra.mxu0 %v12519_v35  ;;  %6647 = vmatprep.mubr.f32.mxu0 %v11344_v1 }
0x192b   :  { %6685 = vmatpush1.msra.mxu1 %v12523_v28  ;;  %6718 = vmatprep.mubr.f32.mxu1 %v11344_v1 }
0x192c   :  { %6802 = vmatprep.subr.mxu0 %v12478_v46  ;;  %6873 = vmatprep.subr.mxu1 %v12480_v47 }
0x19e3   :  { %v6454_v19 = vpop.f32.mrf.mxu0  ;;  %v6525_v14 = vpop.f32.mrf.mxu1 }
0x19e4   :  { %v6534_v61 = vrot.slane %v6454_v19, 7  ;;  %v6536_v12 = vrot.slane %v6525_v14, 7 }
0x19e5   :  { %v6456_v49 = vpop.f32.mrf.mxu0  ;;  %v6527_v23 = vpop.f32.mrf.mxu1 }
0x19e6   :  { %v6542_v45 = vadd.f32 %v6534_v61, %v12558_v30  ;;  %v6535_v25 = vrot.slane %v6456_v49, 7  ;;  %v6544_v11 = vadd.f32 %v6536_v12, %v12565_v44  ;;  %v6537_v60 = vrot.slane %v6527_v23, 7 }
0x19e8   :  { %v10443_v16 = vmul.f32 -1.442695, %v6542_v45  ;;  %v6543_v26 = vadd.f32 %v6535_v25, %v12560_v17  ;;  %v10445_v34 = vmul.f32 -1.442695, %v6544_v11  ;;  %v6545_v31 = vadd.f32 %v6537_v60, %v12569_v42 }
0x19e9   :  { %v6384_v45 = vsel %vm126_vm7, %v6382_v29, 0.0 }
0x19ea   :  { %10971 = vpow2.f32 %v10443_v16  ;;  %v10444_v27 = vmul.f32 -1.442695, %v6543_v26 }
0x19ec   :  { %10973 = vpow2.f32 %v10444_v27 }
0x19ed   :  { %10975 = vpow2.f32 %v10445_v34 }
0x19f7   :  { %v10972_v36 = vpop.eup %10971 }
0x19f8   :  { %v6555_v7 = vadd.f32 1.0, %v10972_v36 }
0x19f9   :  { %v10974_v38 = vpop.eup %10973 }
0x19fa   :  { %10977 = vrcp.f32 %v6555_v7  ;;  %v6556_v41 = vadd.f32 1.0, %v10974_v38  ;;  %v10976_v39 = vpop.eup %10975 }
0x19fb   :  { %10979 = vtanh.f32 %v6545_v31  ;;  %v6557_v62 = vadd.f32 1.0, %v10976_v39 }
0x19fc   :  { %10981 = vrcp.f32 %v6556_v41 }
0x19fd   :  { %10983 = vrcp.f32 %v6557_v62 }
0x1a07   :  { %v10978_v22 = vpop.eup %10977 }
0x1a08   :  { %v10980_v43 = vpop.eup %10979 }
0x1a09   :  { %v10982_v32 = vpop.eup %10981  ;;  %v6569_v40 = vmul.f32 %v10980_v43, %v10978_v22 }
0x1a0a   :  { %v6568_v63 = vmul.f32 %v10982_v32, %v6566_v33  ;;  %v10984_v8 = vpop.eup %10983 }
0x1a0c   :  { %v12596_v37 = vadd.f32 %v6569_v40, %v6568_v63 }
0x1a0e   :  { %10985 = vtanh.f32 %v12596_v37 }
0x1a1b   :  { %v10986_v21 = vpop.eup %10985 }
0x1a1c   :  { %v6572_v19 = vmul.f32 %v10986_v21, %v10984_v8  ;;  %v6761_v8 = vrot.slane %v12596_v37, 7 }
0x1a1e   :  { %v6576_v61 = vrot.slane %v6572_v19, %v11461_v18  ;;  %v6580_v49 = vrot.slane %v6572_v19, 1 }
0x1a20   :  { %10446 = vmatmul.mubr.msk.f32.vlgmr.msra.gmra.mxu0 %vm482_vm9, %v6580_v49  ;;  %10447 = vmatmul.mubr.msk.f32.vlgmr.msra.gmra.mxu1 %vm482_vm9, %v6580_v49  ;;  %v12609_v25 = vsel %vm120_vm6, %v6576_v61, %v6384_v45  ;;  %v12613_v9 = vsel %vm90_vm1, %v6576_v61, %v6383_v15 }
0x1a21   :  { %6803 = vmatpush1.msra.mxu0 %v12483_v48  ;;  %6874 = vmatpush1.msra.mxu1 %v12485_v50 }
0x1a22   :  { %6804 = vmatprep.subr.mxu0 %v12489_v52  ;;  %6875 = vmatprep.subr.mxu1 %v12491_v54 }
0x1a23   :  { %6805 = vmatpush1.msra.mxu0 %v12495_v51  ;;  %6876 = vmatpush1.msra.mxu1 %v12497_v55 }
0x1a24   :  { %6806 = vmatprep.subr.mxu0 %v12501_v53  ;;  %6877 = vmatprep.subr.mxu1 %v12503_v56 }
0x1a25   :  { %6807 = vmatpush1.msra.mxu0 %v12507_v57  ;;  %6878 = vmatpush1.msra.mxu1 %v12509_v58 }
0x1a26   :  { %6808 = vmatprep.subr.mxu0 %v12513_v59  ;;  %6879 = vmatprep.subr.mxu1 %v12515_v24 }
0x1a27   :  { %6809 = vmatpush1.msra.mxu0 %v12519_v35  ;;  %6842 = vmatprep.mubr.f32.mxu0 %v11344_v1 }
0x1a28   :  { %6880 = vmatpush1.msra.mxu1 %v12523_v28  ;;  %6913 = vmatprep.mubr.f32.mxu1 %v11344_v1 }
0x1a29   :  { %6997 = vmatprep.subr.mxu0 %v12478_v46  ;;  %7068 = vmatprep.subr.mxu1 %v12480_v47 }
0x1ae0   :  { %v6649_v16 = vpop.f32.mrf.mxu0  ;;  %v6720_v60 = vpop.f32.mrf.mxu1 }
0x1ae1   :  { %v6729_v26 = vrot.slane %v6649_v16, 6  ;;  %v6731_v36 = vrot.slane %v6720_v60, 6 }
0x1ae2   :  { %v6651_v14 = vpop.f32.mrf.mxu0  ;;  %v6722_v31 = vpop.f32.mrf.mxu1 }
0x1ae3   :  { %v6737_v27 = vadd.f32 %v6729_v26, %v12558_v30  ;;  %v6730_v12 = vrot.slane %v6651_v14, 6  ;;  %v6739_v7 = vadd.f32 %v6731_v36, %v12565_v44  ;;  %v6732_v38 = vrot.slane %v6722_v31, 6 }
0x1ae5   :  { %v10448_v23 = vmul.f32 -1.442695, %v6737_v27  ;;  %v6738_v11 = vadd.f32 %v6730_v12, %v12560_v17  ;;  %v10450_v41 = vmul.f32 -1.442695, %v6739_v7  ;;  %v6740_v22 = vadd.f32 %v6732_v38, %v12569_v42 }
0x1ae7   :  { %10987 = vpow2.f32 %v10448_v23  ;;  %v10449_v34 = vmul.f32 -1.442695, %v6738_v11 }
0x1ae9   :  { %10989 = vpow2.f32 %v10449_v34 }
0x1aea   :  { %10991 = vpow2.f32 %v10450_v41 }
0x1af4   :  { %v10988_v39 = vpop.eup %10987 }
0x1af5   :  { %v6750_v43 = vadd.f32 1.0, %v10988_v39 }
0x1af6   :  { %v10990_v33 = vpop.eup %10989 }
0x1af7   :  { %10993 = vrcp.f32 %v6750_v43  ;;  %v6751_v32 = vadd.f32 1.0, %v10990_v33  ;;  %v10992_v62 = vpop.eup %10991 }
0x1af8   :  { %10995 = vtanh.f32 %v6740_v22  ;;  %v6752_v29 = vadd.f32 1.0, %v10992_v62 }
0x1af9   :  { %10997 = vrcp.f32 %v6751_v32 }
0x1afa   :  { %10999 = vrcp.f32 %v6752_v29 }
0x1b04   :  { %v10994_v63 = vpop.eup %10993 }
0x1b05   :  { %v10996_v40 = vpop.eup %10995 }
0x1b06   :  { %v10998_v21 = vpop.eup %10997  ;;  %v6764_v61 = vmul.f32 %v10996_v40, %v10994_v63 }
0x1b07   :  { %v6763_v19 = vmul.f32 %v10998_v21, %v6761_v8  ;;  %v11000_v15 = vpop.eup %10999 }
0x1b09   :  { %v6765_v49 = vadd.f32 %v6764_v61, %v6763_v19 }
0x1b0b   :  { %11001 = vtanh.f32 %v6765_v49  ;;  %v6956_v29 = vrot.slane %v6765_v49, 7 }
0x1b18   :  { %v11002_v45 = vpop.eup %11001 }
0x1b19   :  { %v6767_v16 = vmul.f32 %v11002_v45, %v11000_v15 }
0x1b1b   :  { %v6771_v26 = vrot.slane %v6767_v16, %v11452_v13  ;;  %v6775_v14 = vrot.slane %v6767_v16, 2 }
0x1b1d   :  { %10451 = vmatmul.mubr.msk.f32.vlgmr.msra.gmra.mxu0 %vm482_vm9, %v6775_v14  ;;  %10452 = vmatmul.mubr.msk.f32.vlgmr.msra.gmra.mxu1 %vm482_vm9, %v6775_v14  ;;  %v12644_v37 = vsel %vm114_vm5, %v6771_v26, %v12609_v25  ;;  %v12649_v27 = vsel %vm96_vm2, %v6771_v26, %v12613_v9 }
0x1b1e   :  { %6998 = vmatpush1.msra.mxu0 %v12483_v48  ;;  %7069 = vmatpush1.msra.mxu1 %v12485_v50 }
0x1b1f   :  { %6999 = vmatprep.subr.mxu0 %v12489_v52  ;;  %7070 = vmatprep.subr.mxu1 %v12491_v54 }
0x1b20   :  { %7000 = vmatpush1.msra.mxu0 %v12495_v51  ;;  %7071 = vmatpush1.msra.mxu1 %v12497_v55 }
0x1b21   :  { %7001 = vmatprep.subr.mxu0 %v12501_v53  ;;  %7072 = vmatprep.subr.mxu1 %v12503_v56 }
0x1b22   :  { %7002 = vmatpush1.msra.mxu0 %v12507_v57  ;;  %7073 = vmatpush1.msra.mxu1 %v12509_v58 }
0x1b23   :  { %7003 = vmatprep.subr.mxu0 %v12513_v59  ;;  %7074 = vmatprep.subr.mxu1 %v12515_v24 }
0x1b24   :  { %7004 = vmatpush1.msra.mxu0 %v12519_v35  ;;  %7037 = vmatprep.mubr.f32.mxu0 %v11344_v1 }
0x1b25   :  { %7075 = vmatpush1.msra.mxu1 %v12523_v28  ;;  %7108 = vmatprep.mubr.f32.mxu1 %v11344_v1 }
0x1b26   :  { %7192 = vmatprep.subr.mxu0 %v12478_v46  ;;  %7263 = vmatprep.subr.mxu1 %v12480_v47 }
0x1bdd   :  { %v6844_v25 = vpop.f32.mrf.mxu0  ;;  %v6915_v36 = vpop.f32.mrf.mxu1 }
0x1bde   :  { %v6924_v9 = vrot.slane %v6844_v25, 5  ;;  %v6926_v7 = vrot.slane %v6915_v36, 5 }
0x1bdf   :  { %v6846_v12 = vpop.f32.mrf.mxu0  ;;  %v6917_v38 = vpop.f32.mrf.mxu1 }
0x1be0   :  { %v6932_v23 = vadd.f32 %v6924_v9, %v12558_v30  ;;  %v6925_v11 = vrot.slane %v6846_v12, 5  ;;  %v6934_v41 = vadd.f32 %v6926_v7, %v12565_v44  ;;  %v6927_v39 = vrot.slane %v6917_v38, 5 }
0x1be2   :  { %v10453_v60 = vmul.f32 -1.442695, %v6932_v23  ;;  %v6933_v34 = vadd.f32 %v6925_v11, %v12560_v17  ;;  %v10455_v22 = vmul.f32 -1.442695, %v6934_v41  ;;  %v6935_v33 = vadd.f32 %v6927_v39, %v12569_v42 }
0x1be4   :  { %11003 = vpow2.f32 %v10453_v60  ;;  %v10454_v31 = vmul.f32 -1.442695, %v6933_v34 }
0x1be6   :  { %11005 = vpow2.f32 %v10454_v31 }
0x1be7   :  { %11007 = vpow2.f32 %v10455_v22 }
0x1bf1   :  { %v11004_v43 = vpop.eup %11003 }
0x1bf2   :  { %v6945_v32 = vadd.f32 1.0, %v11004_v43 }
0x1bf3   :  { %v11006_v62 = vpop.eup %11005 }
0x1bf4   :  { %11009 = vrcp.f32 %v6945_v32  ;;  %v6946_v63 = vadd.f32 1.0, %v11006_v62  ;;  %v11008_v40 = vpop.eup %11007 }
0x1bf5   :  { %11011 = vtanh.f32 %v6935_v33  ;;  %v6947_v61 = vadd.f32 1.0, %v11008_v40 }
0x1bf6   :  { %11013 = vrcp.f32 %v6946_v63 }
0x1bf7   :  { %11015 = vrcp.f32 %v6947_v61 }
0x1c01   :  { %v11010_v8 = vpop.eup %11009 }
0x1c02   :  { %v11012_v21 = vpop.eup %11011 }
0x1c03   :  { %v11014_v19 = vpop.eup %11013  ;;  %v6959_v45 = vmul.f32 %v11012_v21, %v11010_v8 }
0x1c04   :  { %v6958_v15 = vmul.f32 %v11014_v19, %v6956_v29  ;;  %v11016_v26 = vpop.eup %11015 }
0x1c06   :  { %v6960_v16 = vadd.f32 %v6959_v45, %v6958_v15 }
0x1c08   :  { %11017 = vtanh.f32 %v6960_v16  ;;  %v7151_v61 = vrot.slane %v6960_v16, 7 }
0x1c15   :  { %v11018_v14 = vpop.eup %11017 }
0x1c16   :  { %v6962_v25 = vmul.f32 %v11018_v14, %v11016_v26 }
0x1c18   :  { %v6966_v9 = vrot.slane %v6962_v25, %v11442_v10  ;;  %v6970_v12 = vrot.slane %v6962_v25, 3 }
0x1c1a   :  { %10456 = vmatmul.mubr.msk.f32.vlgmr.msra.gmra.mxu0 %vm482_vm9, %v6970_v12  ;;  %10457 = vmatmul.mubr.msk.f32.vlgmr.msra.gmra.mxu1 %vm482_vm9, %v6970_v12  ;;  %v12679_v49 = vsel %vm108_vm4, %v6966_v9, %v12644_v37  ;;  %v12684_v23 = vsel %vm102_vm3, %v6966_v9, %v12649_v27 }
0x1c1b   :  { %7193 = vmatpush1.msra.mxu0 %v12483_v48  ;;  %7264 = vmatpush1.msra.mxu1 %v12485_v50 }
0x1c1c   :  { %7194 = vmatprep.subr.mxu0 %v12489_v52  ;;  %7265 = vmatprep.subr.mxu1 %v12491_v54 }
0x1c1d   :  { %7195 = vmatpush1.msra.mxu0 %v12495_v51  ;;  %7266 = vmatpush1.msra.mxu1 %v12497_v55 }
0x1c1e   :  { %7196 = vmatprep.subr.mxu0 %v12501_v53  ;;  %7267 = vmatprep.subr.mxu1 %v12503_v56 }
0x1c1f   :  { %7197 = vmatpush1.msra.mxu0 %v12507_v57  ;;  %7268 = vmatpush1.msra.mxu1 %v12509_v58 }
0x1c20   :  { %7198 = vmatprep.subr.mxu0 %v12513_v59  ;;  %7269 = vmatprep.subr.mxu1 %v12515_v24 }
0x1c21   :  { %7199 = vmatpush1.msra.mxu0 %v12519_v35  ;;  %7232 = vmatprep.mubr.f32.mxu0 %v11344_v1 }
0x1c22   :  { %7270 = vmatpush1.msra.mxu1 %v12523_v28  ;;  %7303 = vmatprep.mubr.f32.mxu1 %v11344_v1 }
0x1c23   :  { %7387 = vmatprep.subr.mxu0 %v12478_v46  ;;  %7458 = vmatprep.subr.mxu1 %v12480_v47 }
0x1cda   :  { %v7039_v37 = vpop.f32.mrf.mxu0  ;;  %v7110_v7 = vpop.f32.mrf.mxu1 }
0x1cdb   :  { %v7119_v27 = vrot.slane %v7039_v37, 4  ;;  %v7121_v41 = vrot.slane %v7110_v7, 4 }
0x1cdc   :  { %v7041_v11 = vpop.f32.mrf.mxu0  ;;  %v7112_v39 = vpop.f32.mrf.mxu1 }
0x1cdd   :  { %v7127_v60 = vadd.f32 %v7119_v27, %v12558_v30  ;;  %v7120_v34 = vrot.slane %v7041_v11, 4  ;;  %v7129_v22 = vadd.f32 %v7121_v41, %v12565_v44  ;;  %v7122_v43 = vrot.slane %v7112_v39, 4 }
0x1cdf   :  { %v10458_v36 = vmul.f32 -1.442695, %v7127_v60  ;;  %v7128_v31 = vadd.f32 %v7120_v34, %v12560_v17  ;;  %v10460_v33 = vmul.f32 -1.442695, %v7129_v22  ;;  %v7130_v62 = vadd.f32 %v7122_v43, %v12569_v42 }
0x1ce1   :  { %11019 = vpow2.f32 %v10458_v36  ;;  %v10459_v38 = vmul.f32 -1.442695, %v7128_v31 }
0x1ce3   :  { %11021 = vpow2.f32 %v10459_v38 }
0x1ce4   :  { %11023 = vpow2.f32 %v10460_v33 }
0x1cee   :  { %v11020_v32 = vpop.eup %11019 }
0x1cef   :  { %v7140_v63 = vadd.f32 1.0, %v11020_v32 }
0x1cf0   :  { %v11022_v40 = vpop.eup %11021 }
0x1cf1   :  { %11025 = vrcp.f32 %v7140_v63  ;;  %v7141_v8 = vadd.f32 1.0, %v11022_v40  ;;  %v11024_v21 = vpop.eup %11023 }
0x1cf2   :  { %11027 = vtanh.f32 %v7130_v62  ;;  %v7142_v45 = vadd.f32 1.0, %v11024_v21 }
0x1cf3   :  { %11029 = vrcp.f32 %v7141_v8 }
0x1cf4   :  { %11031 = vrcp.f32 %v7142_v45 }
0x1cfe   :  { %v11026_v29 = vpop.eup %11025 }
0x1cff   :  { %v11028_v19 = vpop.eup %11027 }
0x1d00   :  { %v11030_v15 = vpop.eup %11029  ;;  %v7154_v14 = vmul.f32 %v11028_v19, %v11026_v29 }
0x1d01   :  { %v7153_v26 = vmul.f32 %v11030_v15, %v7151_v61  ;;  %v11032_v9 = vpop.eup %11031 }
0x1d03   :  { %v7155_v25 = vadd.f32 %v7154_v14, %v7153_v26 }
0x1d05   :  { %11033 = vtanh.f32 %v7155_v25  ;;  %v7346_v61 = vrot.slane %v7155_v25, 7 }
0x1d12   :  { %v11034_v12 = vpop.eup %11033 }
0x1d13   :  { %v7157_v37 = vmul.f32 %v11034_v12, %v11032_v9 }
0x1d15   :  { %v7161_v27 = vrot.slane %v7157_v37, %v11439_v6  ;;  %v7165_v11 = vrot.slane %v7157_v37, 4 }
0x1d17   :  { %10461 = vmatmul.mubr.msk.f32.vlgmr.msra.gmra.mxu0 %vm482_vm9, %v7165_v11  ;;  %10462 = vmatmul.mubr.msk.f32.vlgmr.msra.gmra.mxu1 %vm482_vm9, %v7165_v11  ;;  %v12714_v16 = vsel %vm102_vm3, %v7161_v27, %v12679_v49  ;;  %v12719_v60 = vsel %vm108_vm4, %v7161_v27, %v12684_v23 }
0x1d18   :  { %7388 = vmatpush1.msra.mxu0 %v12483_v48  ;;  %7459 = vmatpush1.msra.mxu1 %v12485_v50 }
0x1d19   :  { %7389 = vmatprep.subr.mxu0 %v12489_v52  ;;  %7460 = vmatprep.subr.mxu1 %v12491_v54 }
0x1d1a   :  { %7390 = vmatpush1.msra.mxu0 %v12495_v51  ;;  %7461 = vmatpush1.msra.mxu1 %v12497_v55 }
0x1d1b   :  { %7391 = vmatprep.subr.mxu0 %v12501_v53  ;;  %7462 = vmatprep.subr.mxu1 %v12503_v56 }
0x1d1c   :  { %7392 = vmatpush1.msra.mxu0 %v12507_v57  ;;  %7463 = vmatpush1.msra.mxu1 %v12509_v58 }
0x1d1d   :  { %7393 = vmatprep.subr.mxu0 %v12513_v59  ;;  %7464 = vmatprep.subr.mxu1 %v12515_v24 }
0x1d1e   :  { %7394 = vmatpush1.msra.mxu0 %v12519_v35  ;;  %7427 = vmatprep.mubr.f32.mxu0 %v11344_v1 }
0x1d1f   :  { %7465 = vmatpush1.msra.mxu1 %v12523_v28  ;;  %7498 = vmatprep.mubr.f32.mxu1 %v11344_v1 }
0x1d20   :  { %7582 = vmatprep.subr.mxu0 %v12478_v46  ;;  %7653 = vmatprep.subr.mxu1 %v12480_v47 }
0x1dd7   :  { %v7234_v49 = vpop.f32.mrf.mxu0  ;;  %v7305_v41 = vpop.f32.mrf.mxu1 }
0x1dd8   :  { %v7314_v23 = vrot.slane %v7234_v49, 3  ;;  %v7316_v22 = vrot.slane %v7305_v41, 3 }
0x1dd9   :  { %v7236_v34 = vpop.f32.mrf.mxu0  ;;  %v7307_v43 = vpop.f32.mrf.mxu1 }
0x1dda   :  { %v7322_v36 = vadd.f32 %v7314_v23, %v12558_v30  ;;  %v7315_v31 = vrot.slane %v7236_v34, 3  ;;  %v7324_v33 = vadd.f32 %v7316_v22, %v12565_v44  ;;  %v7317_v46 = vrot.slane %v7307_v43, 3 }
0x1ddc   :  { %v10463_v7 = vmul.f32 -1.442695, %v7322_v36  ;;  %v7323_v38 = vadd.f32 %v7315_v31, %v12560_v17  ;;  %v10465_v32 = vmul.f32 -1.442695, %v7324_v33  ;;  %v7325_v62 = vadd.f32 %v7317_v46, %v12569_v42 }
0x1dde   :  { %11035 = vpow2.f32 %v10463_v7  ;;  %v10464_v39 = vmul.f32 -1.442695, %v7323_v38 }
0x1de0   :  { %11037 = vpow2.f32 %v10464_v39 }
0x1de1   :  { %11039 = vpow2.f32 %v10465_v32 }
0x1deb   :  { %v11036_v47 = vpop.eup %11035 }
0x1dec   :  { %v7335_v63 = vadd.f32 1.0, %v11036_v47 }
0x1ded   :  { %v11038_v40 = vpop.eup %11037 }
0x1dee   :  { %11041 = vrcp.f32 %v7335_v63  ;;  %v7336_v8 = vadd.f32 1.0, %v11038_v40  ;;  %v11040_v21 = vpop.eup %11039 }
0x1def   :  { %11043 = vtanh.f32 %v7325_v62  ;;  %v7337_v45 = vadd.f32 1.0, %v11040_v21 }
0x1df0   :  { %11045 = vrcp.f32 %v7336_v8 }
0x1df1   :  { %11047 = vrcp.f32 %v7337_v45  ;;  %v7781_v45 = vld [vmem:[#allocation6 + $0x3f0] sm:$0xff] }
0x1dfb   :  { %v11042_v29 = vpop.eup %11041 }
0x1dfc   :  { %v11044_v19 = vpop.eup %11043 }
0x1dfd   :  { %v11046_v15 = vpop.eup %11045  ;;  %v7349_v14 = vmul.f32 %v11044_v19, %v11042_v29  ;;  %v7780_v19 = vld [vmem:[#allocation6 + $0x3e8] sm:$0xff] }
0x1dfe   :  { %v7348_v26 = vmul.f32 %v11046_v15, %v7346_v61  ;;  %v11048_v12 = vpop.eup %11047  ;;  %v7782_v61 = vld [vmem:[#allocation6 + $0x3f8] sm:$0xff]  ;;  %v7779_v15 = vld [vmem:[#allocation6 + $0x3e0] sm:$0xff] }
0x1e00   :  { %v7350_v9 = vadd.f32 %v7349_v14, %v7348_v26  ;;  %v7776_v26 = vld [vmem:[#allocation6 + $0x3c8] sm:$0xff]  ;;  %v7778_v14 = vld [vmem:[#allocation6 + $0x3d8] sm:$0xff] }
0x1e02   :  { %11049 = vtanh.f32 %v7350_v9  ;;  %v7541_v39 = vrot.slane %v7350_v9, 7  ;;  %v7775_v9 = vld [vmem:[#allocation6 + $0x3c0] sm:$0xff] }
0x1e0f   :  { %v11050_v37 = vpop.eup %11049 }
0x1e10   :  { %v7352_v27 = vmul.f32 %v11050_v37, %v11048_v12  ;;  %v7777_v12 = vld [vmem:[#allocation6 + $0x3d0] sm:$0xff]  ;;  %v7772_v37 = vld [vmem:[#allocation6 + $0x3a8] sm:$0xff] }
0x1e12   :  { %v7360_v11 = vrot.slane %v7352_v27, 5  ;;  %v7356_v49 = vrot.slane %v7352_v27, %v11436_v5  ;;  %v7774_v27 = vld [vmem:[#allocation6 + $0x3b8] sm:$0xff] }
0x1e14   :  { %10466 = vmatmul.mubr.msk.f32.vlgmr.msra.gmra.mxu0 %vm482_vm9, %v7360_v11  ;;  %10467 = vmatmul.mubr.msk.f32.vlgmr.msra.gmra.mxu1 %vm482_vm9, %v7360_v11  ;;  %v7358_v25 = vsel %vm96_vm2, %v7356_v49, %v12714_v16  ;;  %v7357_v23 = vsel %vm114_vm5, %v7356_v49, %v12719_v60  ;;  %v7771_v11 = vld [vmem:[#allocation6 + $0x3a0] sm:$0xff]  ;;  %v7773_v49 = vld [vmem:[#allocation6 + $0x3b0] sm:$0xff] }
0x1e15   :  { %7583 = vmatpush1.msra.mxu0 %v12483_v48  ;;  %7654 = vmatpush1.msra.mxu1 %v12485_v50 }
0x1e16   :  { %7584 = vmatprep.subr.mxu0 %v12489_v52  ;;  %7655 = vmatprep.subr.mxu1 %v12491_v54 }
0x1e17   :  { %7585 = vmatpush1.msra.mxu0 %v12495_v51  ;;  %7656 = vmatpush1.msra.mxu1 %v12497_v55 }
0x1e18   :  { %7586 = vmatprep.subr.mxu0 %v12501_v53  ;;  %7657 = vmatprep.subr.mxu1 %v12503_v56 }
0x1e19   :  { %7587 = vmatpush1.msra.mxu0 %v12507_v57  ;;  %7658 = vmatpush1.msra.mxu1 %v12509_v58 }
0x1e1a   :  { %7588 = vmatprep.subr.mxu0 %v12513_v59  ;;  %7659 = vmatprep.subr.mxu1 %v12515_v24 }
0x1e1b   :  { %7589 = vmatpush1.msra.mxu0 %v12519_v35  ;;  %7622 = vmatprep.mubr.f32.mxu0 %v11344_v1 }
0x1e1c   :  { %7660 = vmatpush1.msra.mxu1 %v12523_v28  ;;  %7693 = vmatprep.mubr.f32.mxu1 %v11344_v1 }
0x1e1d   :  { %7810 = vmatprep.subr.mxu0 %v7780_v19  ;;  %7881 = vmatprep.subr.mxu1 %v7782_v61  ;;  %v7762_v19 = vld [vmem:[#allocation6 + $0x360] sm:$0xff]  ;;  %v7764_v61 = vld [vmem:[#allocation6 + $0x370] sm:$0xff] }
0x1ed4   :  { %v7429_v48 = vpop.f32.mrf.mxu0  ;;  %v7500_v56 = vpop.f32.mrf.mxu1 }
0x1ed5   :  { %v7509_v50 = vrot.slane %v7429_v48, 2  ;;  %v7511_v58 = vrot.slane %v7500_v56, 2  ;;  %v7767_v48 = vld [vmem:[#allocation6 + $0x380] sm:$0xff] }
0x1ed6   :  { %v7431_v52 = vpop.f32.mrf.mxu0  ;;  %v7502_v59 = vpop.f32.mrf.mxu1 }
0x1ed7   :  { %v7517_v54 = vadd.f32 %v7509_v50, %v12558_v30  ;;  %v7510_v51 = vrot.slane %v7431_v52, 2  ;;  %v7519_v24 = vadd.f32 %v7511_v58, %v12565_v44  ;;  %v7512_v35 = vrot.slane %v7502_v59, 2  ;;  %v7769_v50 = vld [vmem:[#allocation6 + $0x390] sm:$0xff]  ;;  %v7763_v52 = vld [vmem:[#allocation6 + $0x368] sm:$0xff] }
0x1ed9   :  { %v10468_v55 = vmul.f32 -1.442695, %v7517_v54  ;;  %v7518_v53 = vadd.f32 %v7510_v51, %v12560_v17  ;;  %v10470_v28 = vmul.f32 -1.442695, %v7519_v24  ;;  %v7520_v60 = vadd.f32 %v7512_v35, %v12569_v42  ;;  %v7765_v54 = vld [vmem:[#allocation6 + $0x378] sm:$0xff] }
0x1edb   :  { %11051 = vpow2.f32 %v10468_v55  ;;  %v10469_v57 = vmul.f32 -1.442695, %v7518_v53 }
0x1edd   :  { %11053 = vpow2.f32 %v10469_v57 }
0x1ede   :  { %11055 = vpow2.f32 %v10470_v28 }
0x1ee8   :  { %v11052_v16 = vpop.eup %11051 }
0x1ee9   :  { %v7530_v34 = vadd.f32 1.0, %v11052_v16 }
0x1eea   :  { %v11054_v36 = vpop.eup %11053 }
0x1eeb   :  { %11057 = vrcp.f32 %v7530_v34  ;;  %v7531_v31 = vadd.f32 1.0, %v11054_v36  ;;  %v11056_v7 = vpop.eup %11055 }
0x1eec   :  { %11059 = vtanh.f32 %v7520_v60  ;;  %v7532_v43 = vadd.f32 1.0, %v11056_v7 }
0x1eed   :  { %11061 = vrcp.f32 %v7531_v31 }
0x1eee   :  { %11063 = vrcp.f32 %v7532_v43 }
0x1ef8   :  { %v11058_v38 = vpop.eup %11057 }
0x1ef9   :  { %v11060_v41 = vpop.eup %11059 }
0x1efa   :  { %v11062_v22 = vpop.eup %11061  ;;  %v7544_v46 = vmul.f32 %v11060_v41, %v11058_v38 }
0x1efb   :  { %v7543_v33 = vmul.f32 %v11062_v22, %v7541_v39  ;;  %v11064_v47 = vpop.eup %11063 }
0x1efd   :  { %v12772_v32 = vadd.f32 %v7544_v46, %v7543_v33 }
0x1eff   :  { %11065 = vtanh.f32 %v12772_v32  ;;  %v7736_v43 = vrot.slane %v12772_v32, 7  ;;  %v7761_v32 = vld [vmem:[#allocation6 + $0x358] sm:$0xff] }
0x1f0c   :  { %v11066_v62 = vpop.eup %11065 }
0x1f0d   :  { %v7547_v63 = vmul.f32 %v11066_v62, %v11064_v47 }
0x1f0f   :  { %v7555_v40 = vrot.slane %v7547_v63, 6  ;;  %v7551_v8 = vrot.slane %v7547_v63, %v11433_v4 }
0x1f11   :  { %10471 = vmatmul.mubr.msk.f32.vlgmr.msra.gmra.mxu0 %vm482_vm9, %v7555_v40  ;;  %10472 = vmatmul.mubr.msk.f32.vlgmr.msra.gmra.mxu1 %vm482_vm9, %v7555_v40  ;;  %v12780_v21 = vsel %vm90_vm1, %v7551_v8, %v7358_v25  ;;  %v12784_v29 = vsel %vm120_vm6, %v7551_v8, %v7357_v23  ;;  %v7768_v25 = vld [vmem:[#allocation6 + $0x388] sm:$0xff]  ;;  %v7770_v23 = vld [vmem:[#allocation6 + $0x398] sm:$0xff] }
0x1f12   :  { %7850 = vmatprep.mubr.f32.mxu0 %v11344_v1  ;;  %7921 = vmatprep.mubr.f32.mxu1 %v11344_v1 }
0x1f13   :  { %7811 = vmatpush1.msra.mxu0 %v7779_v15  ;;  %7882 = vmatpush1.msra.mxu1 %v7781_v45  ;;  %v7759_v45 = vld [vmem:[#allocation6 + $0x348] sm:$0xff] }
0x1f14   :  { %7812 = vmatprep.subr.mxu0 %v7776_v26  ;;  %7883 = vmatprep.subr.mxu1 %v7778_v14  ;;  %v7758_v14 = vld [vmem:[#allocation6 + $0x340] sm:$0xff] }
0x1f15   :  { %7813 = vmatpush1.msra.mxu0 %v7775_v9  ;;  %7884 = vmatpush1.msra.mxu1 %v7777_v12  ;;  %v7760_v9 = vld [vmem:[#allocation6 + $0x350] sm:$0xff]  ;;  %v7755_v12 = vld [vmem:[#allocation6 + $0x328] sm:$0xff] }
0x1f16   :  { %7814 = vmatprep.subr.mxu0 %v7772_v37  ;;  %7885 = vmatprep.subr.mxu1 %v7774_v27  ;;  %v7757_v37 = vld [vmem:[#allocation6 + $0x338] sm:$0xff]  ;;  %v7754_v27 = vld [vmem:[#allocation6 + $0x320] sm:$0xff] }
0x1f17   :  { %7815 = vmatpush1.msra.mxu0 %v7771_v11  ;;  %7886 = vmatpush1.msra.mxu1 %v7773_v49  ;;  %v7751_v11 = vld [vmem:[#allocation6 + $0x308] sm:$0xff]  ;;  %v7753_v49 = vld [vmem:[#allocation6 + $0x318] sm:$0xff] }
0x1f18   :  { %7816 = vmatprep.subr.mxu0 %v7768_v25  ;;  %7887 = vmatprep.subr.mxu1 %v7770_v23  ;;  %v7752_v25 = vld [vmem:[#allocation6 + $0x310] sm:$0xff]  ;;  %v12803_v23 = vld [vmem:[#allocation8 + $0x268] sm:$0xff] }
0x1f19   :  { %7817 = vmatpush1.msra.mxu0 %v7767_v48  ;;  %7888 = vmatpush1.msra.mxu1 %v7769_v50  ;;  %v12805_v48 = vld [vmem:[#allocation8 + $0x278] sm:$0xff]  ;;  %v12808_v50 = vld [vmem:[#allocation8 + $0x260] sm:$0xff] }
0x1f1a   :  { %7955 = vmatprep.subr.mxu0 %v7763_v52  ;;  %8026 = vmatprep.subr.mxu1 %v7765_v54  ;;  %v12810_v52 = vld [vmem:[#allocation8 + $0x270] sm:$0xff]  ;;  %v12814_v54 = vld [vmem:[#allocation8 + $0x248] sm:$0xff] }
0x1fd1   :  { %v7624_v51 = vpop.f32.mrf.mxu0  ;;  %v7695_v24 = vpop.f32.mrf.mxu1 }
0x1fd2   :  { %v7704_v55 = vrot.slane %v7624_v51, 1  ;;  %v7706_v28 = vrot.slane %v7695_v24, 1  ;;  %v12816_v51 = vld [vmem:[#allocation8 + $0x258] sm:$0xff]  ;;  %v12838_v24 = vld [vmem:[#allocation8 + $0x208] sm:$0xff] }
0x1fd3   :  { %v7626_v53 = vpop.f32.mrf.mxu0  ;;  %v7697_v16 = vpop.f32.mrf.mxu1 }
0x1fd4   :  { %v7712_v56 = vadd.f32 %v7704_v55, %v12558_v30  ;;  %v7705_v57 = vrot.slane %v7626_v53, 1  ;;  %v7714_v60 = vadd.f32 %v7706_v28, %v12565_v44  ;;  %v7707_v34 = vrot.slane %v7697_v16, 1  ;;  %v12820_v55 = vld [vmem:[#allocation8 + $0x240] sm:$0xff]  ;;  %v12822_v53 = vld [vmem:[#allocation8 + $0x250] sm:$0xff] }
0x1fd5   :  { %v12844_v28 = vld [vmem:[#allocation8 + $0x200] sm:$0xff]  ;;  %v12848_v16 = vld [vmem:[#allocation8 + $0x210] sm:$0xff] }
0x1fd6   :  { %v10473_v58 = vmul.f32 -1.442695, %v7712_v56  ;;  %v7713_v59 = vadd.f32 %v7705_v57, %v12560_v17  ;;  %v10475_v36 = vmul.f32 -1.442695, %v7714_v60  ;;  %v7715_v7 = vadd.f32 %v7707_v34, %v12569_v42  ;;  %v12826_v56 = vld [vmem:[#allocation8 + $0x228] sm:$0xff]  ;;  %v12828_v57 = vld [vmem:[#allocation8 + $0x238] sm:$0xff] }
0x1fd8   :  { %11067 = vpow2.f32 %v10473_v58  ;;  %v10474_v35 = vmul.f32 -1.442695, %v7713_v59  ;;  %v12832_v58 = vld [vmem:[#allocation8 + $0x220] sm:$0xff]  ;;  %v12834_v59 = vld [vmem:[#allocation8 + $0x230] sm:$0xff] }
0x1fda   :  { %11069 = vpow2.f32 %v10474_v35  ;;  %v12840_v35 = vld [vmem:[#allocation8 + $0x218] sm:$0xff] }
0x1fdb   :  { %11071 = vpow2.f32 %v10475_v36 }
0x1fe5   :  { %v11068_v31 = vpop.eup %11067 }
0x1fe6   :  { %v7725_v38 = vadd.f32 1.0, %v11068_v31  ;;  %v10480_v31 = vld [vmem:[%s13310_s4 + $0x10] sm:$0xf] }
0x1fe7   :  { %v11070_v41 = vpop.eup %11069 }
0x1fe8   :  { %11073 = vrcp.f32 %v7725_v38  ;;  %v7726_v30 = vadd.f32 1.0, %v11070_v41  ;;  %v11072_v17 = vpop.eup %11071  ;;  %v8079_v41 = vrot.slane %v10480_v31, %v11467_v20 }
0x1fe9   :  { %11075 = vtanh.f32 %v7715_v7  ;;  %v7727_v46 = vadd.f32 1.0, %v11072_v17 }
0x1fea   :  { %11077 = vrcp.f32 %v7726_v30 }
0x1feb   :  { %11079 = vrcp.f32 %v7727_v46 }
0x1ff5   :  { %v11074_v39 = vpop.eup %11073 }
0x1ff6   :  { %v11076_v22 = vpop.eup %11075 }
0x1ff7   :  { %v11078_v33 = vpop.eup %11077  ;;  %v7739_v47 = vmul.f32 %v11076_v22, %v11074_v39  ;;  %v8083_v39 = vrot.slane %v10480_v31, %v11461_v18 }
0x1ff8   :  { %v7738_v44 = vmul.f32 %v11078_v33, %v7736_v43  ;;  %v11080_v42 = vpop.eup %11079 }
0x1ffa   :  { %v7740_v62 = vadd.f32 %v7739_v47, %v7738_v44 }
0x1ffc   :  { %11081 = vtanh.f32 %v7740_v62 }
0x2009   :  { %v11082_v63 = vpop.eup %11081 }
0x200a   :  { %v7742_v40 = vmul.f32 %v11082_v63, %v11080_v42 }
0x200c   :  { %v7746_v8 = vrot.slane %v7742_v40, %v11430_v3 }
0x200e   :  { %v7748_v15 = vsel %vm84_vm0, %v7746_v8, %v12780_v21  ;;  %v7747_v26 = vsel %vm126_vm7, %v7746_v8, %v12784_v29  ;;  %v7756_v21 = vld [vmem:[#allocation6 + $0x330] sm:$0xff]  ;;  %v7750_v29 = vld [vmem:[#allocation6 + $0x300] sm:$0xff] }
0x200f   :  { %10476 = vmatmul.mubr.msk.f32.vlgmr.msra.gmra.mxu0 %vm482_vm9, %v7748_v15  ;;  %10477 = vmatmul.mubr.msk.f32.vlgmr.msra.gmra.mxu1 %vm482_vm9, %v7748_v15 }
0x2010   :  { %7956 = vmatpush1.msra.mxu0 %v7762_v19  ;;  %8027 = vmatpush1.msra.mxu1 %v7764_v61  ;;  %v8087_v19 = vrot.slane %v10480_v31, %v11452_v13 }
0x2011   :  { %7957 = vmatprep.subr.mxu0 %v7759_v45  ;;  %8028 = vmatprep.subr.mxu1 %v7761_v32 }
0x2012   :  { %7958 = vmatpush1.msra.mxu0 %v7758_v14  ;;  %8029 = vmatpush1.msra.mxu1 %v7760_v9 }
0x2013   :  { %7959 = vmatprep.subr.mxu0 %v7755_v12  ;;  %8030 = vmatprep.subr.mxu1 %v7757_v37 }
0x2014   :  { %7960 = vmatpush1.msra.mxu0 %v7754_v27  ;;  %8031 = vmatpush1.msra.mxu1 %v7756_v21 }
0x2015   :  { %7961 = vmatprep.subr.mxu0 %v7751_v11  ;;  %8032 = vmatprep.subr.mxu1 %v7753_v49 }
0x2016   :  { %7962 = vmatpush1.msra.mxu0 %v7750_v29  ;;  %7995 = vmatprep.mubr.f32.mxu0 %v11344_v1 }
0x2017   :  { %8033 = vmatpush1.msra.mxu1 %v7752_v25  ;;  %8066 = vmatprep.mubr.f32.mxu1 %v11344_v1 }
0x2018   :  { %10478 = vmatmul.mubr.msk.f32.vlgmr.msra.gmra.mxu0 %vm482_vm9, %v7747_v26  ;;  %10479 = vmatmul.mubr.msk.f32.vlgmr.msra.gmra.mxu1 %vm482_vm9, %v7747_v26  ;;  %v8091_v26 = vrot.slane %v10480_v31, %v11442_v10 }
0x2019   :  { %8141 = vmatprep.subr.mxu0 %v12803_v23  ;;  %8212 = vmatprep.subr.mxu1 %v12805_v48 }
0x201a   :  { %8142 = vmatpush1.msra.mxu0 %v12808_v50  ;;  %8213 = vmatpush1.msra.mxu1 %v12810_v52 }
0x201b   :  { %8143 = vmatprep.subr.mxu0 %v12814_v54  ;;  %8214 = vmatprep.subr.mxu1 %v12816_v51 }
0x201c   :  { %8144 = vmatpush1.msra.mxu0 %v12820_v55  ;;  %8215 = vmatpush1.msra.mxu1 %v12822_v53 }
0x201d   :  { %8145 = vmatprep.subr.mxu0 %v12826_v56  ;;  %8216 = vmatprep.subr.mxu1 %v12828_v57 }
0x201e   :  { %8146 = vmatpush1.msra.mxu0 %v12832_v58  ;;  %8217 = vmatpush1.msra.mxu1 %v12834_v59 }
0x201f   :  { %8147 = vmatprep.subr.mxu0 %v12838_v24  ;;  %8218 = vmatprep.subr.mxu1 %v12840_v35 }
0x2020   :  { %8148 = vmatpush1.msra.mxu0 %v12844_v28  ;;  %8181 = vmatprep.mubr.f32.mxu0 %v11344_v1 }
0x2021   :  { %8219 = vmatpush1.msra.mxu1 %v12848_v16  ;;  %8252 = vmatprep.mubr.f32.mxu1 %v11344_v1 }
0x2022   :  { %8182 = vmatmul.mubr.f32.vlgmr.msra.gmra.mxu0 %v11344_v1  ;;  %8253 = vmatmul.mubr.f32.vlgmr.msra.gmra.mxu1 %v11344_v1 }
0x2023   :  { %8320 = vmatprep.subr.mxu0 %v12803_v23  ;;  %8391 = vmatprep.subr.mxu1 %v12805_v48 }
0x2024   :  { %8321 = vmatpush1.msra.mxu0 %v12808_v50  ;;  %8392 = vmatpush1.msra.mxu1 %v12810_v52 }
0x2025   :  { %8322 = vmatprep.subr.mxu0 %v12814_v54  ;;  %8393 = vmatprep.subr.mxu1 %v12816_v51 }
0x2026   :  { %8323 = vmatpush1.msra.mxu0 %v12820_v55  ;;  %8394 = vmatpush1.msra.mxu1 %v12822_v53 }
0x2027   :  { %8324 = vmatprep.subr.mxu0 %v12826_v56  ;;  %8395 = vmatprep.subr.mxu1 %v12828_v57 }
0x2028   :  { %8325 = vmatpush1.msra.mxu0 %v12832_v58  ;;  %8396 = vmatpush1.msra.mxu1 %v12834_v59 }
0x2029   :  { %8326 = vmatprep.subr.mxu0 %v12838_v24  ;;  %8397 = vmatprep.subr.mxu1 %v12840_v35 }
0x202a   :  { %8327 = vmatpush1.msra.mxu0 %v12844_v28  ;;  %8360 = vmatprep.mubr.f32.mxu0 %v11344_v1 }
0x202b   :  { %8398 = vmatpush1.msra.mxu1 %v12848_v16  ;;  %8431 = vmatprep.mubr.f32.mxu1 %v11344_v1 }
0x202c   :  { %8515 = vmatprep.subr.mxu0 %v12803_v23  ;;  %8586 = vmatprep.subr.mxu1 %v12805_v48 }
0x20cf   :  { %v7852_v60 = vpop.f32.mrf.mxu0  ;;  %v7923_v30 = vpop.f32.mrf.mxu1 }
0x20d1   :  { %v7854_v34 = vpop.f32.mrf.mxu0  ;;  %v7925_v33 = vpop.f32.mrf.mxu1 }
0x20d8   :  { %v7997_v36 = vpop.f32.mrf.mxu0  ;;  %v8068_v62 = vpop.f32.mrf.mxu1 }
0x20d9   :  { %v7998_v38 = vadd.f32 %v7997_v36, %v7852_v60  ;;  %v8069_v8 = vadd.f32 %v8068_v62, %v7923_v30 }
0x20da   :  { %v7999_v7 = vpop.f32.mrf.mxu0  ;;  %v8070_v61 = vpop.f32.mrf.mxu1 }
0x20db   :  { %v8000_v17 = vadd.f32 %v7999_v7, %v7854_v34  ;;  %v12883_v22 = vadd.f32 %v8079_v41, %v7998_v38  ;;  %v12890_v45 = vadd.f32 %v8087_v19, %v8069_v8  ;;  %v8071_v32 = vadd.f32 %v8070_v61, %v7925_v33 }
0x20dd   :  { %v12885_v46 = vadd.f32 %v8083_v39, %v8000_v17  ;;  %v12894_v12 = vadd.f32 %v8091_v26, %v8071_v32 }
0x20e2   :  { %v8183_v43 = vpop.f32.mrf.mxu0  ;;  %v8254_v15 = vpop.f32.mrf.mxu1 }
0x20e3   :  { %v8259_v44 = vadd.f32 %v8183_v43, %v12883_v22  ;;  %v8261_v14 = vadd.f32 %v8254_v15, %v12890_v45 }
0x20e4   :  { %v8185_v47 = vpop.f32.mrf.mxu0  ;;  %v8256_v9 = vpop.f32.mrf.mxu1 }
0x20e5   :  { %v10481_v42 = vmul.f32 -1.442695, %v8259_v44  ;;  %v8260_v63 = vadd.f32 %v8185_v47, %v12885_v46  ;;  %v10483_v37 = vmul.f32 -1.442695, %v8261_v14  ;;  %v8262_v21 = vadd.f32 %v8256_v9, %v12894_v12 }
0x20e7   :  { %11083 = vpow2.f32 %v10481_v42  ;;  %v10482_v40 = vmul.f32 -1.442695, %v8260_v63 }
0x20e9   :  { %11085 = vpow2.f32 %v10482_v40 }
0x20ea   :  { %11087 = vpow2.f32 %v10483_v37 }
0x20f4   :  { %v11084_v27 = vpop.eup %11083 }
0x20f5   :  { %v8272_v11 = vadd.f32 1.0, %v11084_v27 }
0x20f6   :  { %v11086_v49 = vpop.eup %11085 }
0x20f7   :  { %11089 = vrcp.f32 %v8272_v11  ;;  %v8273_v29 = vadd.f32 1.0, %v11086_v49  ;;  %v11088_v25 = vpop.eup %11087 }
0x20f8   :  { %11091 = vtanh.f32 %v8262_v21  ;;  %v8274_v31 = vadd.f32 1.0, %v11088_v25 }
0x20f9   :  { %11093 = vrcp.f32 %v8273_v29 }
0x20fa   :  { %11095 = vrcp.f32 %v8274_v31 }
0x2104   :  { %v11090_v60 = vpop.eup %11089 }
0x2105   :  { %v11092_v34 = vpop.eup %11091 }
0x2106   :  { %v11094_v36 = vpop.eup %11093  ;;  %v8283_v38 = vmul.f32 %v11092_v34, %v11090_v60 }
0x2107   :  { %v8282_v7 = vmul.f32 0.0, %v11094_v36  ;;  %v11096_v30 = vpop.eup %11095 }
0x2109   :  { %v8284_v41 = vadd.f32 %v8283_v38, %v8282_v7 }
0x210b   :  { %11097 = vtanh.f32 %v8284_v41  ;;  %v8474_v25 = vrot.slane %v8284_v41, 7 }
0x2118   :  { %v11098_v17 = vpop.eup %11097 }
0x2119   :  { %v8286_v39 = vmul.f32 %v11098_v17, %v11096_v30 }
0x211b   :  { %10484 = vmatmul.mubr.msk.f32.vlgmr.msra.gmra.mxu0 %vm482_vm9, %v8286_v39  ;;  %10485 = vmatmul.mubr.msk.f32.vlgmr.msra.gmra.mxu1 %vm482_vm9, %v8286_v39  ;;  %v8290_v17 = vrot.slane %v8286_v39, %v11467_v20 }
0x211c   :  { %8516 = vmatpush1.msra.mxu0 %v12808_v50  ;;  %8587 = vmatpush1.msra.mxu1 %v12810_v52 }
0x211d   :  { %8517 = vmatprep.subr.mxu0 %v12814_v54  ;;  %8588 = vmatprep.subr.mxu1 %v12816_v51  ;;  %v8291_v41 = vsel %vm84_vm0, %v8290_v17, 0.0 }
0x211e   :  { %8518 = vmatpush1.msra.mxu0 %v12820_v55  ;;  %8589 = vmatpush1.msra.mxu1 %v12822_v53 }
0x211f   :  { %8519 = vmatprep.subr.mxu0 %v12826_v56  ;;  %8590 = vmatprep.subr.mxu1 %v12828_v57 }
0x2120   :  { %8520 = vmatpush1.msra.mxu0 %v12832_v58  ;;  %8591 = vmatpush1.msra.mxu1 %v12834_v59 }
0x2121   :  { %8521 = vmatprep.subr.mxu0 %v12838_v24  ;;  %8592 = vmatprep.subr.mxu1 %v12840_v35 }
0x2122   :  { %8522 = vmatpush1.msra.mxu0 %v12844_v28  ;;  %8555 = vmatprep.mubr.f32.mxu0 %v11344_v1 }
0x2123   :  { %8593 = vmatpush1.msra.mxu1 %v12848_v16  ;;  %8626 = vmatprep.mubr.f32.mxu1 %v11344_v1 }
0x2124   :  { %8710 = vmatprep.subr.mxu0 %v12803_v23  ;;  %8781 = vmatprep.subr.mxu1 %v12805_v48 }
0x21db   :  { %v8362_v43 = vpop.f32.mrf.mxu0  ;;  %v8433_v40 = vpop.f32.mrf.mxu1 }
0x21dc   :  { %v8442_v33 = vrot.slane %v8362_v43, 7  ;;  %v8444_v19 = vrot.slane %v8433_v40, 7 }
0x21dd   :  { %v8364_v44 = vpop.f32.mrf.mxu0  ;;  %v8435_v61 = vpop.f32.mrf.mxu1 }
0x21de   :  { %v8450_v47 = vadd.f32 %v8442_v33, %v12883_v22  ;;  %v8443_v62 = vrot.slane %v8364_v44, 7  ;;  %v8452_v15 = vadd.f32 %v8444_v19, %v12890_v45  ;;  %v8445_v32 = vrot.slane %v8435_v61, 7 }
0x21e0   :  { %v10486_v42 = vmul.f32 -1.442695, %v8450_v47  ;;  %v8451_v63 = vadd.f32 %v8443_v62, %v12885_v46  ;;  %v10488_v26 = vmul.f32 -1.442695, %v8452_v15  ;;  %v8453_v9 = vadd.f32 %v8445_v32, %v12894_v12 }
0x21e1   :  { %v8292_v47 = vsel %vm126_vm7, %v8290_v17, 0.0 }
0x21e2   :  { %11099 = vpow2.f32 %v10486_v42  ;;  %v10487_v8 = vmul.f32 -1.442695, %v8451_v63 }
0x21e4   :  { %11101 = vpow2.f32 %v10487_v8 }
0x21e5   :  { %11103 = vpow2.f32 %v10488_v26 }
0x21ef   :  { %v11100_v14 = vpop.eup %11099 }
0x21f0   :  { %v8463_v37 = vadd.f32 1.0, %v11100_v14 }
0x21f1   :  { %v11102_v27 = vpop.eup %11101 }
0x21f2   :  { %11105 = vrcp.f32 %v8463_v37  ;;  %v8464_v21 = vadd.f32 1.0, %v11102_v27  ;;  %v11104_v11 = vpop.eup %11103 }
0x21f3   :  { %11107 = vtanh.f32 %v8453_v9  ;;  %v8465_v34 = vadd.f32 1.0, %v11104_v11 }
0x21f4   :  { %11109 = vrcp.f32 %v8464_v21 }
0x21f5   :  { %11111 = vrcp.f32 %v8465_v34 }
0x21ff   :  { %v11106_v49 = vpop.eup %11105 }
0x2200   :  { %v11108_v29 = vpop.eup %11107 }
0x2201   :  { %v11110_v60 = vpop.eup %11109  ;;  %v8477_v31 = vmul.f32 %v11108_v29, %v11106_v49 }
0x2202   :  { %v8476_v36 = vmul.f32 %v11110_v60, %v8474_v25  ;;  %v11112_v38 = vpop.eup %11111 }
0x2204   :  { %v12921_v7 = vadd.f32 %v8477_v31, %v8476_v36 }
0x2206   :  { %11113 = vtanh.f32 %v12921_v7 }
0x2213   :  { %v11114_v30 = vpop.eup %11113 }
0x2214   :  { %v8480_v43 = vmul.f32 %v11114_v30, %v11112_v38  ;;  %v8669_v38 = vrot.slane %v12921_v7, 7 }
0x2216   :  { %v8484_v33 = vrot.slane %v8480_v43, %v11461_v18  ;;  %v8488_v44 = vrot.slane %v8480_v43, 1 }
0x2218   :  { %10489 = vmatmul.mubr.msk.f32.vlgmr.msra.gmra.mxu0 %vm482_vm9, %v8488_v44  ;;  %10490 = vmatmul.mubr.msk.f32.vlgmr.msra.gmra.mxu1 %vm482_vm9, %v8488_v44  ;;  %v12934_v62 = vsel %vm120_vm6, %v8484_v33, %v8292_v47  ;;  %v12938_v39 = vsel %vm90_vm1, %v8484_v33, %v8291_v41 }
0x2219   :  { %8711 = vmatpush1.msra.mxu0 %v12808_v50  ;;  %8782 = vmatpush1.msra.mxu1 %v12810_v52 }
0x221a   :  { %8712 = vmatprep.subr.mxu0 %v12814_v54  ;;  %8783 = vmatprep.subr.mxu1 %v12816_v51 }
0x221b   :  { %8713 = vmatpush1.msra.mxu0 %v12820_v55  ;;  %8784 = vmatpush1.msra.mxu1 %v12822_v53 }
0x221c   :  { %8714 = vmatprep.subr.mxu0 %v12826_v56  ;;  %8785 = vmatprep.subr.mxu1 %v12828_v57 }
0x221d   :  { %8715 = vmatpush1.msra.mxu0 %v12832_v58  ;;  %8786 = vmatpush1.msra.mxu1 %v12834_v59 }
0x221e   :  { %8716 = vmatprep.subr.mxu0 %v12838_v24  ;;  %8787 = vmatprep.subr.mxu1 %v12840_v35 }
0x221f   :  { %8717 = vmatpush1.msra.mxu0 %v12844_v28  ;;  %8750 = vmatprep.mubr.f32.mxu0 %v11344_v1 }
0x2220   :  { %8788 = vmatpush1.msra.mxu1 %v12848_v16  ;;  %8821 = vmatprep.mubr.f32.mxu1 %v11344_v1 }
0x2221   :  { %8905 = vmatprep.subr.mxu0 %v12803_v23  ;;  %8976 = vmatprep.subr.mxu1 %v12805_v48 }
0x22d8   :  { %v8557_v42 = vpop.f32.mrf.mxu0  ;;  %v8628_v32 = vpop.f32.mrf.mxu1 }
0x22d9   :  { %v8637_v63 = vrot.slane %v8557_v42, 6  ;;  %v8639_v14 = vrot.slane %v8628_v32, 6 }
0x22da   :  { %v8559_v40 = vpop.f32.mrf.mxu0  ;;  %v8630_v9 = vpop.f32.mrf.mxu1 }
0x22db   :  { %v8645_v8 = vadd.f32 %v8637_v63, %v12883_v22  ;;  %v8638_v19 = vrot.slane %v8559_v40, 6  ;;  %v8647_v37 = vadd.f32 %v8639_v14, %v12890_v45  ;;  %v8640_v27 = vrot.slane %v8630_v9, 6 }
0x22dd   :  { %v10491_v61 = vmul.f32 -1.442695, %v8645_v8  ;;  %v8646_v15 = vadd.f32 %v8638_v19, %v12885_v46  ;;  %v10493_v21 = vmul.f32 -1.442695, %v8647_v37  ;;  %v8648_v49 = vadd.f32 %v8640_v27, %v12894_v12 }
0x22df   :  { %11115 = vpow2.f32 %v10491_v61  ;;  %v10492_v26 = vmul.f32 -1.442695, %v8646_v15 }
0x22e1   :  { %11117 = vpow2.f32 %v10492_v26 }
0x22e2   :  { %11119 = vpow2.f32 %v10493_v21 }
0x22ec   :  { %v11116_v11 = vpop.eup %11115 }
0x22ed   :  { %v8658_v29 = vadd.f32 1.0, %v11116_v11 }
0x22ee   :  { %v11118_v25 = vpop.eup %11117 }
0x22ef   :  { %11121 = vrcp.f32 %v8658_v29  ;;  %v8659_v60 = vadd.f32 1.0, %v11118_v25  ;;  %v11120_v34 = vpop.eup %11119 }
0x22f0   :  { %11123 = vtanh.f32 %v8648_v49  ;;  %v8660_v17 = vadd.f32 1.0, %v11120_v34 }
0x22f1   :  { %11125 = vrcp.f32 %v8659_v60 }
0x22f2   :  { %11127 = vrcp.f32 %v8660_v17 }
0x22fc   :  { %v11122_v36 = vpop.eup %11121 }
0x22fd   :  { %v11124_v31 = vpop.eup %11123 }
0x22fe   :  { %v11126_v30 = vpop.eup %11125  ;;  %v8672_v33 = vmul.f32 %v11124_v31, %v11122_v36 }
0x22ff   :  { %v8671_v43 = vmul.f32 %v11126_v30, %v8669_v38  ;;  %v11128_v41 = vpop.eup %11127 }
0x2301   :  { %v8673_v44 = vadd.f32 %v8672_v33, %v8671_v43 }
0x2303   :  { %11129 = vtanh.f32 %v8673_v44  ;;  %v8864_v17 = vrot.slane %v8673_v44, 7 }
0x2310   :  { %v11130_v47 = vpop.eup %11129 }
0x2311   :  { %v8675_v42 = vmul.f32 %v11130_v47, %v11128_v41 }
0x2313   :  { %v8679_v63 = vrot.slane %v8675_v42, %v11452_v13  ;;  %v8683_v40 = vrot.slane %v8675_v42, 2 }
0x2315   :  { %10494 = vmatmul.mubr.msk.f32.vlgmr.msra.gmra.mxu0 %vm482_vm9, %v8683_v40  ;;  %10495 = vmatmul.mubr.msk.f32.vlgmr.msra.gmra.mxu1 %vm482_vm9, %v8683_v40  ;;  %v12969_v7 = vsel %vm114_vm5, %v8679_v63, %v12934_v62  ;;  %v12974_v8 = vsel %vm96_vm2, %v8679_v63, %v12938_v39 }
0x2316   :  { %8906 = vmatpush1.msra.mxu0 %v12808_v50  ;;  %8977 = vmatpush1.msra.mxu1 %v12810_v52 }
0x2317   :  { %8907 = vmatprep.subr.mxu0 %v12814_v54  ;;  %8978 = vmatprep.subr.mxu1 %v12816_v51 }
0x2318   :  { %8908 = vmatpush1.msra.mxu0 %v12820_v55  ;;  %8979 = vmatpush1.msra.mxu1 %v12822_v53 }
0x2319   :  { %8909 = vmatprep.subr.mxu0 %v12826_v56  ;;  %8980 = vmatprep.subr.mxu1 %v12828_v57 }
0x231a   :  { %8910 = vmatpush1.msra.mxu0 %v12832_v58  ;;  %8981 = vmatpush1.msra.mxu1 %v12834_v59 }
0x231b   :  { %8911 = vmatprep.subr.mxu0 %v12838_v24  ;;  %8982 = vmatprep.subr.mxu1 %v12840_v35 }
0x231c   :  { %8912 = vmatpush1.msra.mxu0 %v12844_v28  ;;  %8945 = vmatprep.mubr.f32.mxu0 %v11344_v1 }
0x231d   :  { %8983 = vmatpush1.msra.mxu1 %v12848_v16  ;;  %9016 = vmatprep.mubr.f32.mxu1 %v11344_v1 }
0x231e   :  { %9100 = vmatprep.subr.mxu0 %v12803_v23  ;;  %9171 = vmatprep.subr.mxu1 %v12805_v48 }
0x23d5   :  { %v8752_v62 = vpop.f32.mrf.mxu0  ;;  %v8823_v14 = vpop.f32.mrf.mxu1 }
0x23d6   :  { %v8832_v39 = vrot.slane %v8752_v62, 5  ;;  %v8834_v37 = vrot.slane %v8823_v14, 5 }
0x23d7   :  { %v8754_v19 = vpop.f32.mrf.mxu0  ;;  %v8825_v27 = vpop.f32.mrf.mxu1 }
0x23d8   :  { %v8840_v61 = vadd.f32 %v8832_v39, %v12883_v22  ;;  %v8833_v15 = vrot.slane %v8754_v19, 5  ;;  %v8842_v21 = vadd.f32 %v8834_v37, %v12890_v45  ;;  %v8835_v11 = vrot.slane %v8825_v27, 5 }
0x23da   :  { %v10496_v32 = vmul.f32 -1.442695, %v8840_v61  ;;  %v8841_v26 = vadd.f32 %v8833_v15, %v12885_v46  ;;  %v10498_v49 = vmul.f32 -1.442695, %v8842_v21  ;;  %v8843_v25 = vadd.f32 %v8835_v11, %v12894_v12 }
0x23dc   :  { %11131 = vpow2.f32 %v10496_v32  ;;  %v10497_v9 = vmul.f32 -1.442695, %v8841_v26 }
0x23de   :  { %11133 = vpow2.f32 %v10497_v9 }
0x23df   :  { %11135 = vpow2.f32 %v10498_v49 }
0x23e9   :  { %v11132_v29 = vpop.eup %11131 }
0x23ea   :  { %v8853_v60 = vadd.f32 1.0, %v11132_v29 }
0x23eb   :  { %v11134_v34 = vpop.eup %11133 }
0x23ec   :  { %11137 = vrcp.f32 %v8853_v60  ;;  %v8854_v36 = vadd.f32 1.0, %v11134_v34  ;;  %v11136_v31 = vpop.eup %11135 }
0x23ed   :  { %11139 = vtanh.f32 %v8843_v25  ;;  %v8855_v33 = vadd.f32 1.0, %v11136_v31 }
0x23ee   :  { %11141 = vrcp.f32 %v8854_v36 }
0x23ef   :  { %11143 = vrcp.f32 %v8855_v33 }
0x23f9   :  { %v11138_v38 = vpop.eup %11137 }
0x23fa   :  { %v11140_v30 = vpop.eup %11139 }
0x23fb   :  { %v11142_v43 = vpop.eup %11141  ;;  %v8867_v47 = vmul.f32 %v11140_v30, %v11138_v38 }
0x23fc   :  { %v8866_v41 = vmul.f32 %v11142_v43, %v8864_v17  ;;  %v11144_v63 = vpop.eup %11143 }
0x23fe   :  { %v8868_v42 = vadd.f32 %v8867_v47, %v8866_v41 }
0x2400   :  { %11145 = vtanh.f32 %v8868_v42  ;;  %v9059_v33 = vrot.slane %v8868_v42, 7 }
0x240d   :  { %v11146_v40 = vpop.eup %11145 }
0x240e   :  { %v8870_v62 = vmul.f32 %v11146_v40, %v11144_v63 }
0x2410   :  { %v8874_v39 = vrot.slane %v8870_v62, %v11442_v10  ;;  %v8878_v19 = vrot.slane %v8870_v62, 3 }
0x2412   :  { %10499 = vmatmul.mubr.msk.f32.vlgmr.msra.gmra.mxu0 %vm482_vm9, %v8878_v19  ;;  %10500 = vmatmul.mubr.msk.f32.vlgmr.msra.gmra.mxu1 %vm482_vm9, %v8878_v19  ;;  %v13004_v44 = vsel %vm108_vm4, %v8874_v39, %v12969_v7  ;;  %v13009_v61 = vsel %vm102_vm3, %v8874_v39, %v12974_v8 }
0x2413   :  { %9101 = vmatpush1.msra.mxu0 %v12808_v50  ;;  %9172 = vmatpush1.msra.mxu1 %v12810_v52 }
0x2414   :  { %9102 = vmatprep.subr.mxu0 %v12814_v54  ;;  %9173 = vmatprep.subr.mxu1 %v12816_v51 }
0x2415   :  { %9103 = vmatpush1.msra.mxu0 %v12820_v55  ;;  %9174 = vmatpush1.msra.mxu1 %v12822_v53 }
0x2416   :  { %9104 = vmatprep.subr.mxu0 %v12826_v56  ;;  %9175 = vmatprep.subr.mxu1 %v12828_v57 }
0x2417   :  { %9105 = vmatpush1.msra.mxu0 %v12832_v58  ;;  %9176 = vmatpush1.msra.mxu1 %v12834_v59 }
0x2418   :  { %9106 = vmatprep.subr.mxu0 %v12838_v24  ;;  %9177 = vmatprep.subr.mxu1 %v12840_v35 }
0x2419   :  { %9107 = vmatpush1.msra.mxu0 %v12844_v28  ;;  %9140 = vmatprep.mubr.f32.mxu0 %v11344_v1 }
0x241a   :  { %9178 = vmatpush1.msra.mxu1 %v12848_v16  ;;  %9211 = vmatprep.mubr.f32.mxu1 %v11344_v1 }
0x241b   :  { %9295 = vmatprep.subr.mxu0 %v12803_v23  ;;  %9366 = vmatprep.subr.mxu1 %v12805_v48 }
0x24d2   :  { %v8947_v7 = vpop.f32.mrf.mxu0  ;;  %v9018_v37 = vpop.f32.mrf.mxu1 }
0x24d3   :  { %v9027_v8 = vrot.slane %v8947_v7, 4  ;;  %v9029_v21 = vrot.slane %v9018_v37, 4 }
0x24d4   :  { %v8949_v15 = vpop.f32.mrf.mxu0  ;;  %v9020_v11 = vpop.f32.mrf.mxu1 }
0x24d5   :  { %v9035_v32 = vadd.f32 %v9027_v8, %v12883_v22  ;;  %v9028_v26 = vrot.slane %v8949_v15, 4  ;;  %v9037_v49 = vadd.f32 %v9029_v21, %v12890_v45  ;;  %v9030_v29 = vrot.slane %v9020_v11, 4 }
0x24d7   :  { %v10501_v14 = vmul.f32 -1.442695, %v9035_v32  ;;  %v9036_v9 = vadd.f32 %v9028_v26, %v12885_v46  ;;  %v10503_v25 = vmul.f32 -1.442695, %v9037_v49  ;;  %v9038_v34 = vadd.f32 %v9030_v29, %v12894_v12 }
0x24d9   :  { %11147 = vpow2.f32 %v10501_v14  ;;  %v10502_v27 = vmul.f32 -1.442695, %v9036_v9 }
0x24db   :  { %11149 = vpow2.f32 %v10502_v27 }
0x24dc   :  { %11151 = vpow2.f32 %v10503_v25 }
0x24e6   :  { %v11148_v60 = vpop.eup %11147 }
0x24e7   :  { %v9048_v36 = vadd.f32 1.0, %v11148_v60 }
0x24e8   :  { %v11150_v31 = vpop.eup %11149 }
0x24e9   :  { %11153 = vrcp.f32 %v9048_v36  ;;  %v9049_v38 = vadd.f32 1.0, %v11150_v31  ;;  %v11152_v30 = vpop.eup %11151 }
0x24ea   :  { %11155 = vtanh.f32 %v9038_v34  ;;  %v9050_v47 = vadd.f32 1.0, %v11152_v30 }
0x24eb   :  { %11157 = vrcp.f32 %v9049_v38 }
0x24ec   :  { %11159 = vrcp.f32 %v9050_v47 }
0x24f6   :  { %v11154_v17 = vpop.eup %11153 }
0x24f7   :  { %v11156_v43 = vpop.eup %11155 }
0x24f8   :  { %v11158_v41 = vpop.eup %11157  ;;  %v9062_v40 = vmul.f32 %v11156_v43, %v11154_v17 }
0x24f9   :  { %v9061_v63 = vmul.f32 %v11158_v41, %v9059_v33  ;;  %v11160_v39 = vpop.eup %11159 }
0x24fb   :  { %v9063_v62 = vadd.f32 %v9062_v40, %v9061_v63 }
0x24fd   :  { %11161 = vtanh.f32 %v9063_v62  ;;  %v9254_v33 = vrot.slane %v9063_v62, 7 }
0x250a   :  { %v11162_v19 = vpop.eup %11161 }
0x250b   :  { %v9065_v7 = vmul.f32 %v11162_v19, %v11160_v39 }
0x250d   :  { %v9069_v8 = vrot.slane %v9065_v7, %v11439_v6  ;;  %v9073_v15 = vrot.slane %v9065_v7, 4 }
0x250f   :  { %10504 = vmatmul.mubr.msk.f32.vlgmr.msra.gmra.mxu0 %vm482_vm9, %v9073_v15  ;;  %10505 = vmatmul.mubr.msk.f32.vlgmr.msra.gmra.mxu1 %vm482_vm9, %v9073_v15  ;;  %v13039_v42 = vsel %vm102_vm3, %v9069_v8, %v13004_v44  ;;  %v13044_v32 = vsel %vm108_vm4, %v9069_v8, %v13009_v61 }
0x2510   :  { %9296 = vmatpush1.msra.mxu0 %v12808_v50  ;;  %9367 = vmatpush1.msra.mxu1 %v12810_v52 }
0x2511   :  { %9297 = vmatprep.subr.mxu0 %v12814_v54  ;;  %9368 = vmatprep.subr.mxu1 %v12816_v51 }
0x2512   :  { %9298 = vmatpush1.msra.mxu0 %v12820_v55  ;;  %9369 = vmatpush1.msra.mxu1 %v12822_v53 }
0x2513   :  { %9299 = vmatprep.subr.mxu0 %v12826_v56  ;;  %9370 = vmatprep.subr.mxu1 %v12828_v57 }
0x2514   :  { %9300 = vmatpush1.msra.mxu0 %v12832_v58  ;;  %9371 = vmatpush1.msra.mxu1 %v12834_v59 }
0x2515   :  { %9301 = vmatprep.subr.mxu0 %v12838_v24  ;;  %9372 = vmatprep.subr.mxu1 %v12840_v35 }
0x2516   :  { %9302 = vmatpush1.msra.mxu0 %v12844_v28  ;;  %9335 = vmatprep.mubr.f32.mxu0 %v11344_v1 }
0x2517   :  { %9373 = vmatpush1.msra.mxu1 %v12848_v16  ;;  %9406 = vmatprep.mubr.f32.mxu1 %v11344_v1 }
0x2518   :  { %9490 = vmatprep.subr.mxu0 %v12803_v23  ;;  %9561 = vmatprep.subr.mxu1 %v12805_v48 }
0x25cf   :  { %v9142_v44 = vpop.f32.mrf.mxu0  ;;  %v9213_v21 = vpop.f32.mrf.mxu1 }
0x25d0   :  { %v9222_v61 = vrot.slane %v9142_v44, 3  ;;  %v9224_v49 = vrot.slane %v9213_v21, 3 }
0x25d1   :  { %v9144_v26 = vpop.f32.mrf.mxu0  ;;  %v9215_v29 = vpop.f32.mrf.mxu1 }
0x25d2   :  { %v9230_v14 = vadd.f32 %v9222_v61, %v12883_v22  ;;  %v9223_v9 = vrot.slane %v9144_v26, 3  ;;  %v9232_v25 = vadd.f32 %v9224_v49, %v12890_v45  ;;  %v9225_v23 = vrot.slane %v9215_v29, 3 }
0x25d4   :  { %v10506_v37 = vmul.f32 -1.442695, %v9230_v14  ;;  %v9231_v27 = vadd.f32 %v9223_v9, %v12885_v46  ;;  %v10508_v60 = vmul.f32 -1.442695, %v9232_v25  ;;  %v9233_v34 = vadd.f32 %v9225_v23, %v12894_v12 }
0x25d6   :  { %11163 = vpow2.f32 %v10506_v37  ;;  %v10507_v11 = vmul.f32 -1.442695, %v9231_v27 }
0x25d8   :  { %11165 = vpow2.f32 %v10507_v11 }
0x25d9   :  { %11167 = vpow2.f32 %v10508_v60 }
0x25e3   :  { %v11164_v48 = vpop.eup %11163 }
0x25e4   :  { %v9243_v36 = vadd.f32 1.0, %v11164_v48 }
0x25e5   :  { %v11166_v31 = vpop.eup %11165 }
0x25e6   :  { %11169 = vrcp.f32 %v9243_v36  ;;  %v9244_v38 = vadd.f32 1.0, %v11166_v31  ;;  %v11168_v30 = vpop.eup %11167 }
0x25e7   :  { %11171 = vtanh.f32 %v9233_v34  ;;  %v9245_v47 = vadd.f32 1.0, %v11168_v30 }
0x25e8   :  { %11173 = vrcp.f32 %v9244_v38 }
0x25e9   :  { %11175 = vrcp.f32 %v9245_v47  ;;  %v9659_v47 = vld [vmem:[%s13311_s5 + $0x10] sm:$0xff] }
0x25f3   :  { %v11170_v17 = vpop.eup %11169 }
0x25f4   :  { %v11172_v43 = vpop.eup %11171 }
0x25f5   :  { %v11174_v41 = vpop.eup %11173  ;;  %v9257_v40 = vmul.f32 %v11172_v43, %v11170_v17  ;;  %v10522_v43 = vld [vmem:[%s13311_s5 + $0x38] sm:$0xff] }
0x25f6   :  { %v9256_v63 = vmul.f32 %v11174_v41, %v9254_v33  ;;  %v11176_v19 = vpop.eup %11175  ;;  %v9660_v33 = vld [vmem:[%s13311_s5 + $0x18] sm:$0xff]  ;;  %v10521_v41 = vld [vmem:[%s13311_s5 + $0x30] sm:$0xff] }
0x25f8   :  { %v9258_v39 = vadd.f32 %v9257_v40, %v9256_v63  ;;  %v10520_v63 = vld [vmem:[%s13311_s5 + $0x28] sm:$0xff] }
0x25f9   :  { %v9658_v40 = vld [vmem:[%s13311_s5 + $0x8] sm:$0xff] }
0x25fa   :  { %11177 = vtanh.f32 %v9258_v39  ;;  %v9449_v11 = vrot.slane %v9258_v39, 7  ;;  %v10519_v39 = vld [vmem:[%s13311_s5 + $0x20] sm:$0xff] }
0x2607   :  { %v11178_v7 = vpop.eup %11177 }
0x2608   :  { %v9260_v8 = vmul.f32 %v11178_v7, %v11176_v19  ;;  %v9657_v19 = vld [vmem:[%s13311_s5] sm:$0xff] }
0x2609   :  { %v9824_v7 = vld [vmem:[%s13315_s9] sm:$0x1f] }
0x260a   :  { %v9268_v15 = vrot.slane %v9260_v8, 5  ;;  %v9264_v44 = vrot.slane %v9260_v8, %v11436_v5  ;;  %v11346_v8 = vmov 0  }
0x260b   :  { %10569 = vset.pattern.permute.xlu0 %v11346_v8  ;;  %10570 = vset.pattern.permute.xlu1 %v11346_v8 }
0x260c   :  { %10509 = vmatmul.mubr.msk.f32.vlgmr.msra.gmra.mxu0 %vm482_vm9, %v9268_v15  ;;  %10510 = vmatmul.mubr.msk.f32.vlgmr.msra.gmra.mxu1 %vm482_vm9, %v9268_v15  ;;  %v13074_v62 = vsel %vm96_vm2, %v9264_v44, %v13039_v42  ;;  %v13079_v61 = vsel %vm114_vm5, %v9264_v44, %v13044_v32 }
0x260d   :  { %9491 = vmatpush1.msra.mxu0 %v12808_v50  ;;  %9562 = vmatpush1.msra.mxu1 %v12810_v52 }
0x260e   :  { %9492 = vmatprep.subr.mxu0 %v12814_v54  ;;  %9563 = vmatprep.subr.mxu1 %v12816_v51 }
0x260f   :  { %9493 = vmatpush1.msra.mxu0 %v12820_v55  ;;  %9564 = vmatpush1.msra.mxu1 %v12822_v53 }
0x2610   :  { %9494 = vmatprep.subr.mxu0 %v12826_v56  ;;  %9565 = vmatprep.subr.mxu1 %v12828_v57 }
0x2611   :  { %9495 = vmatpush1.msra.mxu0 %v12832_v58  ;;  %9566 = vmatpush1.msra.mxu1 %v12834_v59 }
0x2612   :  { %9496 = vmatprep.subr.mxu0 %v12838_v24  ;;  %9567 = vmatprep.subr.mxu1 %v12840_v35 }
0x2613   :  { %9497 = vmatpush1.msra.mxu0 %v12844_v28  ;;  %9530 = vmatprep.mubr.f32.mxu0 %v11344_v1 }
0x2614   :  { %9568 = vmatpush1.msra.mxu1 %v12848_v16  ;;  %9601 = vmatprep.mubr.f32.mxu1 %v11344_v1 }
0x2615   :  { %10536 = vmatprep.subr.mxu0 %v11344_v1  ;;  %10547 = vmatprep.subr.mxu1 %v11344_v1 }
0x2616   :  { %9827 = vperm.xlu0 %10569, %v9824_v7  }
0x26cc   :  { %v9337_v50 = vpop.f32.mrf.mxu0  ;;  %v9408_v57 = vpop.f32.mrf.mxu1 }
0x26cd   :  { %v9417_v52 = vrot.slane %v9337_v50, 2  ;;  %v9419_v59 = vrot.slane %v9408_v57, 2 }
0x26ce   :  { %v9339_v54 = vpop.f32.mrf.mxu0  ;;  %v9410_v24 = vpop.f32.mrf.mxu1 }
0x26cf   :  { %v9425_v51 = vadd.f32 %v9417_v52, %v12883_v22  ;;  %v9418_v55 = vrot.slane %v9339_v54, 2  ;;  %v9427_v35 = vadd.f32 %v9419_v59, %v12890_v45  ;;  %v9420_v28 = vrot.slane %v9410_v24, 2 }
0x26d1   :  { %v10511_v53 = vmul.f32 -1.442695, %v9425_v51  ;;  %v9426_v56 = vadd.f32 %v9418_v55, %v12885_v46  ;;  %v10513_v16 = vmul.f32 -1.442695, %v9427_v35  ;;  %v9428_v32 = vadd.f32 %v9420_v28, %v12894_v12 }
0x26d3   :  { %11179 = vpow2.f32 %v10511_v53  ;;  %v10512_v58 = vmul.f32 -1.442695, %v9426_v56 }
0x26d5   :  { %11181 = vpow2.f32 %v10512_v58 }
0x26d6   :  { %11183 = vpow2.f32 %v10513_v16 }
0x26e0   :  { %v11180_v42 = vpop.eup %11179 }
0x26e1   :  { %v9438_v26 = vadd.f32 1.0, %v11180_v42 }
0x26e2   :  { %v11182_v14 = vpop.eup %11181 }
0x26e3   :  { %11185 = vrcp.f32 %v9438_v26  ;;  %v9439_v9 = vadd.f32 1.0, %v11182_v14  ;;  %v11184_v37 = vpop.eup %11183 }
0x26e4   :  { %11187 = vtanh.f32 %v9428_v32  ;;  %v9440_v29 = vadd.f32 1.0, %v11184_v37 }
0x26e5   :  { %11189 = vrcp.f32 %v9439_v9 }
0x26e6   :  { %11191 = vrcp.f32 %v9440_v29  ;;  %v9828_v29 = vpop.permute.xlu0 %9827 }
0x26f0   :  { %v11186_v27 = vpop.eup %11185 }
0x26f1   :  { %v11188_v21 = vpop.eup %11187 }
0x26f2   :  { %v11190_v49 = vpop.eup %11189  ;;  %v9452_v23 = vmul.f32 %v11188_v21, %v11186_v27 }
0x26f3   :  { %v9451_v25 = vmul.f32 %v11190_v49, %v9449_v11  ;;  %v11192_v48 = vpop.eup %11191  ;;  %v13162_v11 = vld [vmem:[%s13313_s7] sm:$0x1f] }
0x26f5   :  { %v13103_v60 = vadd.f32 %v9452_v23, %v9451_v25  ;;  %v9830_v25 = vadd.f32 %v9828_v29, %v13162_v11 }
0x26f7   :  { %11193 = vtanh.f32 %v13103_v60  ;;  %v9644_v32 = vrot.slane %v13103_v60, 7 }
0x2704   :  { %v11194_v34 = vpop.eup %11193 }
0x2705   :  { %v9455_v36 = vmul.f32 %v11194_v34, %v11192_v48  ;;  %v9832_v48 = vsel %vm9831_vm11, %v9830_v25, -inf }
0x2706   :  { %v9833_v34 = vrot.slane %v9832_v48, 4 }
0x2707   :  { %v9463_v31 = vrot.slane %v9455_v36, 6  ;;  %v9459_v38 = vrot.slane %v9455_v36, %v11433_v4 }
0x2708   :  { %v9834_v36 = vmax.f32 %v9832_v48, %v9833_v34 }
0x2709   :  { %10514 = vmatmul.mubr.msk.f32.vlgmr.msra.gmra.mxu0 %vm482_vm9, %v9463_v31  ;;  %10515 = vmatmul.mubr.msk.f32.vlgmr.msra.gmra.mxu1 %vm482_vm9, %v9463_v31  ;;  %v13112_v30 = vsel %vm90_vm1, %v9459_v38, %v13074_v62  ;;  %v13117_v17 = vsel %vm120_vm6, %v9459_v38, %v13079_v61 }
0x270a   :  { %10537 = vmatpush3.msra.mxu0 %v10522_v43  ;;  %10548 = vmatpush3.msra.mxu1 %v9660_v33  ;;  %v9835_v31 = vrot.slane %v9834_v36, 2 }
0x270b   :  { %10538 = vmatprep.subr.mxu0 %v11344_v1  ;;  %10549 = vmatprep.subr.mxu1 %v11344_v1 }
0x270c   :  { %10539 = vmatpush3.msra.mxu0 %v10521_v41  ;;  %10550 = vmatpush3.msra.mxu1 %v9659_v47  ;;  %v9836_v38 = vmax.f32 %v9834_v36, %v9835_v31 }
0x270d   :  { %10540 = vmatprep.subr.mxu0 %v11344_v1  ;;  %10551 = vmatprep.subr.mxu1 %v11344_v1 }
0x270e   :  { %10541 = vmatpush3.msra.mxu0 %v10520_v63  ;;  %10552 = vmatpush3.msra.mxu1 %v9658_v40  ;;  %v9837_v43 = vrot.slane %v9836_v38, 1 }
0x270f   :  { %10542 = vmatprep.subr.mxu0 %v11344_v1  ;;  %10553 = vmatprep.subr.mxu1 %v11344_v1 }
0x2710   :  { %10543 = vmatpush3.msra.mxu0 %v10519_v39  ;;  %10544 = vmatprep.mubr.msk.f32.mxu0 %vm11345_vm10, %v11344_v1  ;;  %v9838_v33 = vmax.f32 %v9836_v38, %v9837_v43 }
0x2711   :  { %10554 = vmatpush3.msra.mxu1 %v9657_v19  ;;  %10555 = vmatprep.mubr.msk.f32.mxu1 %vm11345_vm10, %v11344_v1 }
0x2712   :  { %vm9839_vm12 = vcmp.eq.f32.partialorder %v9830_v25, %v9838_v33 }
0x2713   :  { %v9840_v41 = vsel %vm9839_vm12, %v11427_v2, 5 }
0x27c9   :  { %v9532_v15 = vpop.f32.mrf.mxu0  ;;  %v9603_v51 = vpop.f32.mrf.mxu1 }
0x27ca   :  { %v9612_v44 = vrot.slane %v9532_v15, 1  ;;  %v9614_v55 = vrot.slane %v9603_v51, 1  ;;  %v10525_v15 = vld [vmem:[%s13312_s6] ss:$0 sm:$0xff] }
0x27cb   :  { %v9534_v62 = vpop.f32.mrf.mxu0  ;;  %v9605_v53 = vpop.f32.mrf.mxu1 }
0x27cc   :  { %v9620_v61 = vadd.f32 %v9612_v44, %v12883_v22  ;;  %v9613_v50 = vrot.slane %v9534_v62, 1  ;;  %v9622_v56 = vadd.f32 %v9614_v55, %v12890_v45  ;;  %v9615_v57 = vrot.slane %v9605_v53, 1 }
0x27ce   :  { %v10516_v52 = vmul.f32 -1.442695, %v9620_v61  ;;  %v9621_v54 = vadd.f32 %v9613_v50, %v12885_v46  ;;  %v10518_v58 = vmul.f32 -1.442695, %v9622_v56  ;;  %v9623_v24 = vadd.f32 %v9615_v57, %v12894_v12 }
0x27cf   :  { %v13182_v50 = vand.u32 127, %v81_v0 }
0x27d0   :  { %11195 = vpow2.f32 %v10516_v52  ;;  %v10517_v1 = vmul.f32 -1.442695, %v9621_v54 }
0x27d1   :  { %vm13189_vm1 = vcmp.eq.s32.totalorder %v11427_v2, %v13182_v50 }
0x27d2   :  { %11197 = vpow2.f32 %v10517_v1 }
0x27d3   :  { %11199 = vpow2.f32 %v10518_v58 }
0x27dd   :  { %v11196_v59 = vpop.eup %11195 }
0x27de   :  { %v9633_v35 = vadd.f32 1.0, %v11196_v59 }
0x27df   :  { %v11198_v28 = vpop.eup %11197 }
0x27e0   :  { %11201 = vrcp.f32 %v9633_v35  ;;  %v9634_v22 = vadd.f32 1.0, %v11198_v28  ;;  %v11200_v46 = vpop.eup %11199 }
0x27e1   :  { %11203 = vtanh.f32 %v9623_v24  ;;  %v9635_v14 = vadd.f32 1.0, %v11200_v46 }
0x27e2   :  { %11205 = vrcp.f32 %v9634_v22 }
0x27e3   :  { %11207 = vrcp.f32 %v9635_v14 }
0x27ed   :  { %v11202_v16 = vpop.eup %11201 }
0x27ee   :  { %v11204_v42 = vpop.eup %11203 }
0x27ef   :  { %v11206_v26 = vpop.eup %11205  ;;  %v9647_v9 = vmul.f32 %v11204_v42, %v11202_v16 }
0x27f0   :  { %v9646_v45 = vmul.f32 %v11206_v26, %v9644_v32  ;;  %v11208_v12 = vpop.eup %11207 }
0x27f2   :  { %v9648_v37 = vadd.f32 %v9647_v9, %v9646_v45 }
0x27f4   :  { %11209 = vtanh.f32 %v9648_v37 }
0x2801   :  { %v11210_v27 = vpop.eup %11209 }
0x2802   :  { %v9650_v21 = vmul.f32 %v11210_v27, %v11208_v12 }
0x2804   :  { %v9654_v49 = vrot.slane %v9650_v21, %v11430_v3 }
0x2806   :  { %v9656_v23 = vsel %vm84_vm0, %v9654_v49, %v13112_v30  ;;  %v9655_v60 = vsel %vm126_vm7, %v9654_v49, %v13117_v17  ;;  %v9841_v30 = vsel %vm9831_vm11, %v9840_v41, 2147483647 }
0x2807   :  { %10545 = vmatmul.mubr.msk.f32.vlgmr.msra.gmra.mxu0 %vm482_vm9, %v9656_v23  ;;  %10556 = vmatmul.mubr.msk.f32.vlgmr.msra.gmra.mxu1 %vm482_vm9, %v9655_v60  ;;  %v9842_v47 = vrot.slane %v9841_v30, 4 }
0x2809   :  { %vm9843_vm13 = vcmp.lt.s32.totalorder %v9841_v30, %v9842_v47 }
0x280a   :  { %v9844_v17 = vsel %vm9843_vm13, %v9841_v30, %v9842_v47 }
0x280b   :  { %v9845_v63 = vrot.slane %v9844_v17, 2 }
0x280d   :  { %vm9846_vm14 = vcmp.lt.s32.totalorder %v9844_v17, %v9845_v63 }
0x280e   :  { %v9847_v40 = vsel %vm9846_vm14, %v9844_v17, %v9845_v63 }
0x280f   :  { %v9848_v39 = vrot.slane %v9847_v40, 1 }
0x2811   :  { %vm9849_vm0 = vcmp.lt.s32.totalorder %v9847_v40, %v9848_v39 }
0x2812   :  { %v9850_v19 = vsel %vm9849_vm0, %v9847_v40, %v9848_v39 }
0x2813   :  { %9852 = vst.msk [vmem:[#allocation2] sm:$0x1] %vm9851_vm15, %v9850_v19 }
0x28c7   :  { %v9735_v7 = vpop.f32.mrf.mxu0  ;;  %v9808_v8 = vpop.f32.mrf.mxu1 }
0x28c8   :  { %v9809_v44 = vadd.f32 %v9808_v8, %v9735_v7 }
0x28c9   :  { %v10546_v62 = vpop.f32.mrf.mxu0  ;;  %v10557_v61 = vpop.f32.mrf.mxu1 }
0x28ca   :  { %v13184_v52 = vadd.f32 %v10525_v15, %v9809_v44 }
0x28cc   :  { %v9853_v54 = vadd.f32 %v9838_v33, %v13184_v52 }
0x28ce   :  { %v9857_v1 = vrot.slane %v9853_v54, %v11467_v20 }
0x28d0   :  { %v9858_v55 = vsel %vm13189_vm1, %v9857_v1, -1e+30 }
0x28d1   :  { %v9859_v53 = vsel %vm9831_vm11, %v9858_v55, -inf }
0x28d2   :  { %9860 = vmax.xlane.f32.xlu0 %v9859_v53 }
0x295b   :  { %v9861_v0 = vpop.xlane.xlu0 %9860 }
0x295c   :  { %v9862_v56 = vadd.f32 %v9861_v0, %v13162_v11 }
0x295e   :  { %v9863_v57 = vsel %vm9831_vm11, %v9862_v56, -inf }
0x295f   :  { %v9864_v58 = vrot.slane %v9863_v57, 4 }
0x2961   :  { %v9865_v59 = vmax.f32 %v9863_v57, %v9864_v58 }
0x2963   :  { %v9866_v24 = vrot.slane %v9865_v59, 2 }
0x2965   :  { %v9867_v35 = vmax.f32 %v9865_v59, %v9866_v24 }
0x2967   :  { %v9868_v28 = vrot.slane %v9867_v35, 1 }
0x2969   :  { %v9869_v22 = vmax.f32 %v9867_v35, %v9868_v28 }
0x296b   :  { %vm9870_vm2 = vcmp.eq.f32.partialorder %v9862_v56, %v9869_v22  ;;  %v9883_v20 = vadd.f32 %v9869_v22, %v13184_v52 }
0x296c   :  { %v9871_v46 = vsel %vm9870_vm2, %v11427_v2, 5 }
0x296d   :  { %v9872_v16 = vsel %vm9831_vm11, %v9871_v46, 2147483647  ;;  %v9887_v42 = vrot.slane %v9883_v20, %v11461_v18 }
0x296e   :  { %v9873_v32 = vrot.slane %v9872_v16, 4 }
0x296f   :  { %v9888_v26 = vsel %vm13189_vm1, %v9887_v42, -1e+30 }
0x2970   :  { %vm9874_vm3 = vcmp.lt.s32.totalorder %v9872_v16, %v9873_v32  ;;  %v9889_v14 = vsel %vm9831_vm11, %v9888_v26, -inf }
0x2971   :  { %v9875_v45 = vsel %vm9874_vm3, %v9872_v16, %v9873_v32  ;;  %9890 = vmax.xlane.f32.xlu1 %v9889_v14 }
0x2972   :  { %v9876_v9 = vrot.slane %v9875_v45, 2 }
0x2974   :  { %vm9877_vm4 = vcmp.lt.s32.totalorder %v9875_v45, %v9876_v9 }
0x2975   :  { %v9878_v37 = vsel %vm9877_vm4, %v9875_v45, %v9876_v9 }
0x2976   :  { %v9879_v12 = vrot.slane %v9878_v37, 1 }
0x2978   :  { %vm9880_vm5 = vcmp.lt.s32.totalorder %v9878_v37, %v9879_v12 }
0x2979   :  { %v9881_v27 = vsel %vm9880_vm5, %v9878_v37, %v9879_v12 }
0x297a   :  { %9882 = vst.msk [vmem:[#allocation2 + $0x1] sm:$0x1] %vm9851_vm15, %v9881_v27 }
0x29fa   :  { %v9891_v21 = vpop.xlane.xlu1 %9890 }
0x29fb   :  { %v9892_v18 = vadd.f32 %v9891_v21, %v13162_v11 }
0x29fd   :  { %v9893_v49 = vsel %vm9831_vm11, %v9892_v18, -inf }
0x29fe   :  { %v9894_v29 = vrot.slane %v9893_v49, 4 }
0x2a00   :  { %v9895_v25 = vmax.f32 %v9893_v49, %v9894_v29 }
0x2a02   :  { %v9896_v23 = vrot.slane %v9895_v25, 2 }
0x2a04   :  { %v9897_v60 = vmax.f32 %v9895_v25, %v9896_v23 }
0x2a06   :  { %v9898_v48 = vrot.slane %v9897_v60, 1 }
0x2a08   :  { %v9899_v34 = vmax.f32 %v9897_v60, %v9898_v48 }
0x2a0a   :  { %vm9900_vm6 = vcmp.eq.f32.partialorder %v9892_v18, %v9899_v34  ;;  %v9913_v36 = vadd.f32 %v9899_v34, %v13184_v52 }
0x2a0b   :  { %v9901_v31 = vsel %vm9900_vm6, %v11427_v2, 5 }
0x2a0c   :  { %v9902_v38 = vsel %vm9831_vm11, %v9901_v31, 2147483647  ;;  %v9917_v43 = vrot.slane %v9913_v36, %v11452_v13 }
0x2a0d   :  { %v9903_v33 = vrot.slane %v9902_v38, 4 }
0x2a0e   :  { %v9918_v41 = vsel %vm13189_vm1, %v9917_v43, -1e+30 }
0x2a0f   :  { %vm9904_vm7 = vcmp.lt.s32.totalorder %v9902_v38, %v9903_v33  ;;  %v9919_v30 = vsel %vm9831_vm11, %v9918_v41, -inf }
0x2a10   :  { %v9905_v47 = vsel %vm9904_vm7, %v9902_v38, %v9903_v33  ;;  %9920 = vmax.xlane.f32.xlu1 %v9919_v30 }
0x2a11   :  { %v9906_v17 = vrot.slane %v9905_v47, 2 }
0x2a13   :  { %vm9907_vm8 = vcmp.lt.s32.totalorder %v9905_v47, %v9906_v17 }
0x2a14   :  { %v9908_v63 = vsel %vm9907_vm8, %v9905_v47, %v9906_v17 }
0x2a15   :  { %v9909_v40 = vrot.slane %v9908_v63, 1 }
0x2a17   :  { %vm9910_vm9 = vcmp.lt.s32.totalorder %v9908_v63, %v9909_v40 }
0x2a18   :  { %v9911_v39 = vsel %vm9910_vm9, %v9908_v63, %v9909_v40 }
0x2a19   :  { %9912 = vst.msk [vmem:[#allocation2 + $0x2] sm:$0x1] %vm9851_vm15, %v9911_v39 }
0x2a99   :  { %v9921_v19 = vpop.xlane.xlu1 %9920 }
0x2a9a   :  { %v9922_v13 = vadd.f32 %v9921_v19, %v13162_v11 }
0x2a9c   :  { %v9923_v7 = vsel %vm9831_vm11, %v9922_v13, -inf }
0x2a9d   :  { %v9924_v8 = vrot.slane %v9923_v7, 4 }
0x2a9f   :  { %v9925_v15 = vmax.f32 %v9923_v7, %v9924_v8 }
0x2aa1   :  { %v9926_v44 = vrot.slane %v9925_v15, 2 }
0x2aa3   :  { %v9927_v62 = vmax.f32 %v9925_v15, %v9926_v44 }
0x2aa5   :  { %v9928_v61 = vrot.slane %v9927_v62, 1 }
0x2aa7   :  { %v9929_v54 = vmax.f32 %v9927_v62, %v9928_v61 }
0x2aa9   :  { %vm9930_vm10 = vcmp.eq.f32.partialorder %v9922_v13, %v9929_v54  ;;  %v9943_v1 = vadd.f32 %v9929_v54, %v13184_v52 }
0x2aaa   :  { %v9931_v55 = vsel %vm9930_vm10, %v11427_v2, 5 }
0x2aab   :  { %v9932_v53 = vsel %vm9831_vm11, %v9931_v55, 2147483647  ;;  %v9947_v0 = vrot.slane %v9943_v1, %v11442_v10 }
0x2aac   :  { %v9933_v56 = vrot.slane %v9932_v53, 4 }
0x2aad   :  { %v9948_v57 = vsel %vm13189_vm1, %v9947_v0, -1e+30 }
0x2aae   :  { %vm9934_vm12 = vcmp.lt.s32.totalorder %v9932_v53, %v9933_v56  ;;  %v9949_v58 = vsel %vm9831_vm11, %v9948_v57, -inf }
0x2aaf   :  { %v9935_v59 = vsel %vm9934_vm12, %v9932_v53, %v9933_v56  ;;  %9950 = vmax.xlane.f32.xlu1 %v9949_v58 }
0x2ab0   :  { %v9936_v24 = vrot.slane %v9935_v59, 2 }
0x2ab2   :  { %vm9937_vm13 = vcmp.lt.s32.totalorder %v9935_v59, %v9936_v24 }
0x2ab3   :  { %v9938_v35 = vsel %vm9937_vm13, %v9935_v59, %v9936_v24 }
0x2ab4   :  { %v9939_v28 = vrot.slane %v9938_v35, 1 }
0x2ab6   :  { %vm9940_vm14 = vcmp.lt.s32.totalorder %v9938_v35, %v9939_v28 }
0x2ab7   :  { %v9941_v22 = vsel %vm9940_vm14, %v9938_v35, %v9939_v28 }
0x2ab8   :  { %9942 = vst.msk [vmem:[#allocation2 + $0x3] sm:$0x1] %vm9851_vm15, %v9941_v22 }
0x2b38   :  { %v9951_v20 = vpop.xlane.xlu1 %9950 }
0x2b39   :  { %v9952_v10 = vadd.f32 %v9951_v20, %v13162_v11 }
0x2b3b   :  { %v9953_v46 = vsel %vm9831_vm11, %v9952_v10, -inf }
0x2b3c   :  { %v9954_v16 = vrot.slane %v9953_v46, 4 }
0x2b3e   :  { %v9955_v42 = vmax.f32 %v9953_v46, %v9954_v16 }
0x2b40   :  { %v9956_v32 = vrot.slane %v9955_v42, 2 }
0x2b42   :  { %v9957_v26 = vmax.f32 %v9955_v42, %v9956_v32 }
0x2b44   :  { %v9958_v14 = vrot.slane %v9957_v26, 1 }
0x2b46   :  { %v9959_v45 = vmax.f32 %v9957_v26, %v9958_v14 }
0x2b48   :  { %vm9960_vm0 = vcmp.eq.f32.partialorder %v9952_v10, %v9959_v45  ;;  %v9973_v9 = vadd.f32 %v9959_v45, %v13184_v52 }
0x2b49   :  { %v9961_v37 = vsel %vm9960_vm0, %v11427_v2, 5 }
0x2b4a   :  { %v9962_v12 = vsel %vm9831_vm11, %v9961_v37, 2147483647  ;;  %v9977_v27 = vrot.slane %v9973_v9, %v11439_v6 }
0x2b4b   :  { %v9963_v21 = vrot.slane %v9962_v12, 4 }
0x2b4c   :  { %v9978_v18 = vsel %vm13189_vm1, %v9977_v27, -1e+30 }
0x2b4d   :  { %vm9964_vm2 = vcmp.lt.s32.totalorder %v9962_v12, %v9963_v21  ;;  %v9979_v49 = vsel %vm9831_vm11, %v9978_v18, -inf }
0x2b4e   :  { %v9965_v29 = vsel %vm9964_vm2, %v9962_v12, %v9963_v21  ;;  %9980 = vmax.xlane.f32.xlu1 %v9979_v49 }
0x2b4f   :  { %v9966_v25 = vrot.slane %v9965_v29, 2 }
0x2b51   :  { %vm9967_vm3 = vcmp.lt.s32.totalorder %v9965_v29, %v9966_v25 }
0x2b52   :  { %v9968_v23 = vsel %vm9967_vm3, %v9965_v29, %v9966_v25 }
0x2b53   :  { %v9969_v60 = vrot.slane %v9968_v23, 1 }
0x2b55   :  { %vm9970_vm4 = vcmp.lt.s32.totalorder %v9968_v23, %v9969_v60 }
0x2b56   :  { %v9971_v48 = vsel %vm9970_vm4, %v9968_v23, %v9969_v60  ;;  %vm10074_vm4 = vcmask 4096  }
0x2b57   :  { %9972 = vst.msk [vmem:[#allocation2 + $0x4] sm:$0x1] %vm9851_vm15, %v9971_v48 }
0x2bd7   :  { %v9981_v34 = vpop.xlane.xlu1 %9980 }
0x2bd8   :  { %v9982_v6 = vadd.f32 %v9981_v34, %v13162_v11 }
0x2bda   :  { %v9983_v36 = vsel %vm9831_vm11, %v9982_v6, -inf }
0x2bdb   :  { %v9984_v31 = vrot.slane %v9983_v36, 4 }
0x2bdd   :  { %v9985_v38 = vmax.f32 %v9983_v36, %v9984_v31 }
0x2bdf   :  { %v9986_v43 = vrot.slane %v9985_v38, 2 }
0x2be1   :  { %v9987_v33 = vmax.f32 %v9985_v38, %v9986_v43 }
0x2be3   :  { %v9988_v41 = vrot.slane %v9987_v33, 1 }
0x2be5   :  { %v9989_v30 = vmax.f32 %v9987_v33, %v9988_v41 }
0x2be7   :  { %vm9990_vm5 = vcmp.eq.f32.partialorder %v9982_v6, %v9989_v30  ;;  %v10003_v47 = vadd.f32 %v9989_v30, %v13184_v52 }
0x2be8   :  { %v9991_v17 = vsel %vm9990_vm5, %v11427_v2, 5 }
0x2be9   :  { %v9992_v63 = vsel %vm9831_vm11, %v9991_v17, 2147483647  ;;  %v10007_v40 = vrot.slane %v10003_v47, %v11436_v5 }
0x2bea   :  { %v9993_v39 = vrot.slane %v9992_v63, 4 }
0x2beb   :  { %v10008_v19 = vsel %vm13189_vm1, %v10007_v40, -1e+30 }
0x2bec   :  { %vm9994_vm6 = vcmp.lt.s32.totalorder %v9992_v63, %v9993_v39  ;;  %v10009_v13 = vsel %vm9831_vm11, %v10008_v19, -inf }
0x2bed   :  { %v9995_v7 = vsel %vm9994_vm6, %v9992_v63, %v9993_v39  ;;  %10010 = vmax.xlane.f32.xlu1 %v10009_v13 }
0x2bee   :  { %v9996_v8 = vrot.slane %v9995_v7, 2 }
0x2bf0   :  { %vm9997_vm7 = vcmp.lt.s32.totalorder %v9995_v7, %v9996_v8 }
0x2bf1   :  { %v9998_v15 = vsel %vm9997_vm7, %v9995_v7, %v9996_v8 }
0x2bf2   :  { %v9999_v44 = vrot.slane %v9998_v15, 1 }
0x2bf4   :  { %vm10000_vm8 = vcmp.lt.s32.totalorder %v9998_v15, %v9999_v44 }
0x2bf5   :  { %v10001_v62 = vsel %vm10000_vm8, %v9998_v15, %v9999_v44 }
0x2bf6   :  { %10002 = vst.msk [vmem:[#allocation2 + $0x5] sm:$0x1] %vm9851_vm15, %v10001_v62 }
0x2c76   :  { %v10011_v61 = vpop.xlane.xlu1 %10010 }
0x2c77   :  { %v10012_v5 = vadd.f32 %v10011_v61, %v13162_v11 }
0x2c79   :  { %v10013_v54 = vsel %vm9831_vm11, %v10012_v5, -inf }
0x2c7a   :  { %v10014_v1 = vrot.slane %v10013_v54, 4 }
0x2c7c   :  { %v10015_v55 = vmax.f32 %v10013_v54, %v10014_v1 }
0x2c7e   :  { %v10016_v53 = vrot.slane %v10015_v55, 2 }
0x2c80   :  { %v10017_v0 = vmax.f32 %v10015_v55, %v10016_v53 }
0x2c82   :  { %v10018_v56 = vrot.slane %v10017_v0, 1 }
0x2c84   :  { %v10019_v57 = vmax.f32 %v10017_v0, %v10018_v56 }
0x2c86   :  { %vm10020_vm9 = vcmp.eq.f32.partialorder %v10012_v5, %v10019_v57  ;;  %v10033_v58 = vadd.f32 %v10019_v57, %v13184_v52 }
0x2c87   :  { %v10021_v59 = vsel %vm10020_vm9, %v11427_v2, 5 }
0x2c88   :  { %v10022_v24 = vsel %vm9831_vm11, %v10021_v59, 2147483647  ;;  %v10037_v35 = vrot.slane %v10033_v58, %v11433_v4 }
0x2c89   :  { %v10023_v28 = vrot.slane %v10022_v24, 4 }
0x2c8a   :  { %v10038_v22 = vsel %vm13189_vm1, %v10037_v35, -1e+30 }
0x2c8b   :  { %vm10024_vm10 = vcmp.lt.s32.totalorder %v10022_v24, %v10023_v28  ;;  %v10039_v20 = vsel %vm9831_vm11, %v10038_v22, -inf }
0x2c8c   :  { %v10025_v10 = vsel %vm10024_vm10, %v10022_v24, %v10023_v28  ;;  %10040 = vmax.xlane.f32.xlu1 %v10039_v20 }
0x2c8d   :  { %v10026_v46 = vrot.slane %v10025_v10, 2 }
0x2c8f   :  { %vm10027_vm12 = vcmp.lt.s32.totalorder %v10025_v10, %v10026_v46 }
0x2c90   :  { %v10028_v16 = vsel %vm10027_vm12, %v10025_v10, %v10026_v46 }
0x2c91   :  { %v10029_v42 = vrot.slane %v10028_v16, 1 }
0x2c93   :  { %vm10030_vm13 = vcmp.lt.s32.totalorder %v10028_v16, %v10029_v42 }
0x2c94   :  { %v10031_v32 = vsel %vm10030_vm13, %v10028_v16, %v10029_v42  ;;  %vm10096_vm13 = vcmp.eq.s32.totalorder %v13182_v50, 7 }
0x2c95   :  { %10032 = vst.msk [vmem:[#allocation2 + $0x6] sm:$0x1] %vm9851_vm15, %v10031_v32 }
0x2c9c   :  { %v10121_v35 = vld [vmem:[#allocation2 + $0x6] sm:$0x1] }
0x2d15   :  { %v10041_v26 = vpop.xlane.xlu1 %10040 }
0x2d16   :  { %v10042_v4 = vadd.f32 %v10041_v26, %v13162_v11 }
0x2d18   :  { %v10043_v14 = vsel %vm9831_vm11, %v10042_v4, -inf }
0x2d19   :  { %v10044_v45 = vrot.slane %v10043_v14, 4 }
0x2d1b   :  { %v10045_v9 = vmax.f32 %v10043_v14, %v10044_v45 }
0x2d1d   :  { %v10046_v37 = vrot.slane %v10045_v9, 2 }
0x2d1f   :  { %v10047_v12 = vmax.f32 %v10045_v9, %v10046_v37 }
0x2d21   :  { %v10048_v27 = vrot.slane %v10047_v12, 1 }
0x2d23   :  { %v10049_v21 = vmax.f32 %v10047_v12, %v10048_v27 }
0x2d25   :  { %vm10050_vm14 = vcmp.eq.f32.partialorder %v10042_v4, %v10049_v21  ;;  %v10063_v18 = vadd.f32 %v10049_v21, %v13184_v52  ;;  %v10141_v21 = vld [vmem:[#allocation2 + $0x5] sm:$0x1] }
0x2d26   :  { %v10051_v49 = vsel %vm10050_vm14, %v11427_v2, 5  ;;  %vm10119_vm14 = vcmp.eq.s32.totalorder %v13182_v50, 6 }
0x2d27   :  { %v10052_v29 = vsel %vm9831_vm11, %v10051_v49, 2147483647  ;;  %v10067_v25 = vrot.slane %v10063_v18, %v11430_v3  ;;  %v10072_v3 = vld [vmem:[%s13314_s8] sm:$0x1f]  ;;  %s11347_s8 = smov [#allocation10]  }
0x2d28   :  { %v10053_v23 = vrot.slane %v10052_v29, 4  ;;  %s10278_s25 = sshll.u32 %s11347_s8, 4  ;;  %s10279_s25 = int_to_ptr.vmem [resolvable:$true] %s10278_s25 }
0x2d29   :  { %v10068_v11 = vsel %vm13189_vm1, %v10067_v25, -1e+30  ;;  %s11271_s4 = scalar_lea.vmem %s10279_s25, 16  ;;  %s11275_s28 = scalar_lea.vmem %s10279_s25, 32 }
0x2d2a   :  { %vm10054_vm0 = vcmp.lt.s32.totalorder %v10052_v29, %v10053_v23  ;;  %v10069_v60 = vsel %vm9831_vm11, %v10068_v11, -inf  ;;  %vm10094_vm11 = vcmask 0   ;;  %p11272_p1 = scmp.ne.s32.totalorder %s10279_s25, %s11271_s4  ;;  %p11276_p2 = scmp.lt.s32.totalorder %s10279_s25, %s10279_s25 }
0x2d2b   :  { %v10055_v48 = vsel %vm10054_vm0, %v10052_v29, %v10053_v23  ;;  %10070 = vmax.xlane.f32.xlu1 %v10069_v60  ;;  %vm10139_vm0 = vcmp.eq.s32.totalorder %v13182_v50, 5  ;;  %p11277_p3 = scmp.lt.s32.totalorder %s11275_s28, %s11271_s4 }
0x2d2c   :  { %v10056_v34 = vrot.slane %v10055_v48, 2 }
0x2d2d   :  { %p11278_p4 = por %p11277_p3, %p11276_p2 }
0x2d2e   :  { %vm10057_vm2 = vcmp.lt.s32.totalorder %v10055_v48, %v10056_v34 }
0x2d2f   :  { %v10058_v6 = vsel %vm10057_vm2, %v10055_v48, %v10056_v34  ;;  %p11279_p5 = pnand %p11278_p4, %p11272_p1 }
0x2d30   :  { %v10059_v36 = vrot.slane %v10058_v6, 1 }
0x2d32   :  { %vm10060_vm3 = vcmp.lt.s32.totalorder %v10058_v6, %v10059_v36 }
0x2d33   :  { %v10061_v52 = vsel %vm10060_vm3, %v10058_v6, %v10059_v36 }
0x2d34   :  { %10062 = vst.msk [vmem:[#allocation2 + $0x7] sm:$0x1] %vm9851_vm15, %v10061_v52 }
0x2d3b   :  { %v10101_v62 = vld [vmem:[#allocation2 + $0x7] sm:$0x1] }
0x2db4   :  { %v10071_v51 = vpop.xlane.xlu1 %10070 }
0x2db5   :  { %v10073_v31 = vadd.f32 %v10072_v3, %v10071_v51 }
0x2db7   :  { %v10075_v38 = vsel %vm10074_vm4, %v10073_v31, -inf }
0x2db8   :  { %v10076_v43 = vrot.slane %v10075_v38, 4 }
0x2dba   :  { %v10077_v33 = vmax.f32 %v10075_v38, %v10076_v43 }
0x2dbc   :  { %v10078_v41 = vrot.slane %v10077_v33, 2 }
0x2dbe   :  { %v10079_v30 = vmax.f32 %v10077_v33, %v10078_v41 }
0x2dc0   :  { %v10080_v47 = vrot.slane %v10079_v30, 1 }
0x2dc2   :  { %v10081_v17 = vmax.f32 %v10079_v30, %v10080_v47 }
0x2dc4   :  { %vm10082_vm1 = vcmp.eq.f32.partialorder %v10073_v31, %v10081_v17  ;;  %10095 = vst.msk [vmem:[#allocation9] sm:$0x1] %vm10094_vm11, %v10081_v17  ;;  %v10161_v31 = vld [vmem:[#allocation2 + $0x4] sm:$0x1] }
0x2dc5   :  { %v10083_v63 = vsel %vm10082_vm1, %v11427_v2, 5 }
0x2dc6   :  { %v10084_v40 = vsel %vm10074_vm4, %v10083_v63, 2147483647  ;;  %vm10159_vm4 = vcmp.eq.s32.totalorder %v13182_v50, 4 }
0x2dc7   :  { %v10085_v39 = vrot.slane %v10084_v40, 4 }
0x2dc9   :  { %vm10086_vm5 = vcmp.lt.s32.totalorder %v10084_v40, %v10085_v39 }
0x2dca   :  { %v10087_v19 = vsel %vm10086_vm5, %v10084_v40, %v10085_v39 }
0x2dcb   :  { %v10088_v13 = vrot.slane %v10087_v19, 2 }
0x2dcd   :  { %vm10089_vm6 = vcmp.lt.s32.totalorder %v10087_v19, %v10088_v13 }
0x2dce   :  { %v10090_v7 = vsel %vm10089_vm6, %v10087_v19, %v10088_v13  ;;  %vm10179_vm6 = vcmp.eq.s32.totalorder %v13182_v50, 3 }
0x2dcf   :  { %v10091_v8 = vrot.slane %v10090_v7, 1 }
0x2dd1   :  { %vm10092_vm7 = vcmp.lt.s32.totalorder %v10090_v7, %v10091_v8 }
0x2dd2   :  { %v10093_v15 = vsel %vm10092_vm7, %v10090_v7, %v10091_v8 }
0x2dd3   :  { %10098 = vperm.xlu1 %10570, %v10093_v15   ;;  %v10181_v15 = vld [vmem:[#allocation2 + $0x3] sm:$0x1] }
0x2e4e   :  { %v10099_v44 = vpop.permute.xlu1 %10098 }
0x2e4f   :  { %vm10102_vm8 = vcmp.eq.s32.totalorder %v13182_v50, %v10099_v44  ;;  %v10100_v9 = vsel %vm10096_vm13, %v10099_v44, 0  ;;  %vm10219_vm13 = vcmp.eq.s32.totalorder %v13182_v50, 1 }
0x2e50   :  { %v10103_v61 = vsel %vm10102_vm8, %v10101_v62, 5 }
0x2e51   :  { %v10104_v5 = vsel %vm9851_vm15, %v10103_v61, 2147483647 }
0x2e52   :  { %v10106_v54 = vshra.s32 %v10104_v5, 16  ;;  %v10105_v1 = vand.u32 65535, %v10104_v5 }
0x2e54   :  { %v10108_v2 = vcvt.s32.f32 %v10106_v54  ;;  %v10107_v53 = vcvt.s32.f32 %v10105_v1 }
0x2e56   :  { %10109 = vmin.xlane.f32.xlu0 %v10108_v2 }
0x2edf   :  { %v10110_v55 = vpop.xlane.xlu0 %10109 }
0x2ee0   :  { %vm10111_vm9 = vcmp.eq.f32.partialorder %v10108_v2, %v10110_v55  ;;  %v10116_v56 = vcvt.f32.s32 %v10110_v55 }
0x2ee1   :  { %v10112_v0 = vsel %vm10111_vm9, %v10107_v53, inf  ;;  %vm10199_vm9 = vcmp.eq.s32.totalorder %v13182_v50, 2 }
0x2ee2   :  { %10113 = vmin.xlane.f32.xlu0 %v10112_v0  ;;  %v10117_v58 = vshll.u32 %v10116_v56, 16 }
0x2f6b   :  { %v10114_v57 = vpop.xlane.xlu0 %10113 }
0x2f6c   :  { %v10115_v59 = vcvt.f32.s32 %v10114_v57 }
0x2f6e   :  { %v10118_v24 = vadd.s32 %v10117_v58, %v10115_v59 }
0x2f70   :  { %vm10122_vm10 = vcmp.eq.s32.totalorder %v13182_v50, %v10118_v24  ;;  %v10120_v12 = vsel %vm10119_vm14, %v10118_v24, %v10100_v9  ;;  %v10201_v24 = vld [vmem:[#allocation2 + $0x2] sm:$0x1]  ;;  %v10221_v9 = vld [vmem:[#allocation2 + $0x1] sm:$0x1] }
0x2f71   :  { %v10123_v28 = vsel %vm10122_vm10, %v10121_v35, 5 }
0x2f72   :  { %v10124_v22 = vsel %vm9851_vm15, %v10123_v28, 2147483647 }
0x2f73   :  { %v10126_v20 = vshra.s32 %v10124_v22, 16  ;;  %v10125_v46 = vand.u32 65535, %v10124_v22 }
0x2f75   :  { %v10128_v10 = vcvt.s32.f32 %v10126_v20  ;;  %v10127_v42 = vcvt.s32.f32 %v10125_v46 }
0x2f77   :  { %10129 = vmin.xlane.f32.xlu0 %v10128_v10 }
0x3000   :  { %v10130_v16 = vpop.xlane.xlu0 %10129 }
0x3001   :  { %vm10131_vm12 = vcmp.eq.f32.partialorder %v10128_v10, %v10130_v16  ;;  %v10136_v26 = vcvt.f32.s32 %v10130_v16 }
0x3002   :  { %v10132_v32 = vsel %vm10131_vm12, %v10127_v42, inf }
0x3003   :  { %10133 = vmin.xlane.f32.xlu1 %v10132_v32  ;;  %v10137_v14 = vshll.u32 %v10136_v26, 16 }
0x308c   :  { %v10134_v4 = vpop.xlane.xlu1 %10133 }
0x308d   :  { %v10135_v45 = vcvt.f32.s32 %v10134_v4 }
0x308f   :  { %v10138_v37 = vadd.s32 %v10137_v14, %v10135_v45 }
0x3091   :  { %v10140_v27 = vsel %vm10139_vm0, %v10138_v37, %v10120_v12  ;;  %vm10142_vm2 = vcmp.eq.s32.totalorder %v13182_v50, %v10138_v37 }
0x3092   :  { %v10143_v18 = vsel %vm10142_vm2, %v10141_v21, 5  ;;  %vm10239_vm2 = vcmp.eq.s32.totalorder %v13182_v50, 0 }
0x3093   :  { %v10144_v49 = vsel %vm9851_vm15, %v10143_v18, 2147483647 }
0x3094   :  { %v10146_v29 = vshra.s32 %v10144_v49, 16  ;;  %v10145_v23 = vand.u32 65535, %v10144_v49 }
0x3096   :  { %v10148_v25 = vcvt.s32.f32 %v10146_v29  ;;  %v10147_v60 = vcvt.s32.f32 %v10145_v23 }
0x3098   :  { %10149 = vmin.xlane.f32.xlu0 %v10148_v25 }
0x3121   :  { %v10150_v11 = vpop.xlane.xlu0 %10149 }
0x3122   :  { %vm10151_vm3 = vcmp.eq.f32.partialorder %v10148_v25, %v10150_v11  ;;  %v10156_v34 = vcvt.f32.s32 %v10150_v11 }
0x3123   :  { %v10152_v48 = vsel %vm10151_vm3, %v10147_v60, inf  ;;  %vm10241_vm3 = vcmask 57344  }
0x3124   :  { %10153 = vmin.xlane.f32.xlu0 %v10152_v48  ;;  %v10157_v36 = vshll.u32 %v10156_v34, 16 }
0x31ad   :  { %v10154_v6 = vpop.xlane.xlu0 %10153 }
0x31ae   :  { %v10155_v52 = vcvt.f32.s32 %v10154_v6 }
0x31b0   :  { %v10158_v3 = vadd.s32 %v10157_v36, %v10155_v52  ;;  %v10244_v36 = vld [vmem:[#allocation2] sm:$0x1] }
0x31b2   :  { %v10160_v51 = vsel %vm10159_vm4, %v10158_v3, %v10140_v27  ;;  %vm10162_vm1 = vcmp.eq.s32.totalorder %v13182_v50, %v10158_v3 }
0x31b3   :  { %v10163_v38 = vsel %vm10162_vm1, %v10161_v31, 5 }
0x31b4   :  { %v10164_v43 = vsel %vm9851_vm15, %v10163_v38, 2147483647 }
0x31b5   :  { %v10166_v33 = vshra.s32 %v10164_v43, 16  ;;  %v10165_v30 = vand.u32 65535, %v10164_v43 }
0x31b7   :  { %v10168_v41 = vcvt.s32.f32 %v10166_v33  ;;  %v10167_v17 = vcvt.s32.f32 %v10165_v30 }
0x31b9   :  { %10169 = vmin.xlane.f32.xlu0 %v10168_v41 }
0x3242   :  { %v10170_v47 = vpop.xlane.xlu0 %10169 }
0x3243   :  { %vm10171_vm5 = vcmp.eq.f32.partialorder %v10168_v41, %v10170_v47  ;;  %v10176_v40 = vcvt.f32.s32 %v10170_v47 }
0x3244   :  { %v10172_v63 = vsel %vm10171_vm5, %v10167_v17, inf }
0x3245   :  { %10173 = vmin.xlane.f32.xlu0 %v10172_v63  ;;  %v10177_v19 = vshll.u32 %v10176_v40, 16 }
0x32ce   :  { %v10174_v39 = vpop.xlane.xlu0 %10173 }
0x32cf   :  { %v10175_v13 = vcvt.f32.s32 %v10174_v39 }
0x32d1   :  { %v10178_v7 = vadd.s32 %v10177_v19, %v10175_v13 }
0x32d3   :  { %v10180_v8 = vsel %vm10179_vm6, %v10178_v7, %v10160_v51  ;;  %vm10182_vm7 = vcmp.eq.s32.totalorder %v13182_v50, %v10178_v7 }
0x32d4   :  { %v10183_v44 = vsel %vm10182_vm7, %v10181_v15, 5 }
0x32d5   :  { %v10184_v62 = vsel %vm9851_vm15, %v10183_v44, 2147483647 }
0x32d6   :  { %v10186_v61 = vshra.s32 %v10184_v62, 16  ;;  %v10185_v54 = vand.u32 65535, %v10184_v62 }
0x32d8   :  { %v10188_v5 = vcvt.s32.f32 %v10186_v61  ;;  %v10187_v1 = vcvt.s32.f32 %v10185_v54 }
0x32da   :  { %10189 = vmin.xlane.f32.xlu0 %v10188_v5 }
0x3363   :  { %v10190_v2 = vpop.xlane.xlu0 %10189 }
0x3364   :  { %vm10191_vm8 = vcmp.eq.f32.partialorder %v10188_v5, %v10190_v2  ;;  %v10196_v53 = vcvt.f32.s32 %v10190_v2 }
0x3365   :  { %v10192_v55 = vsel %vm10191_vm8, %v10187_v1, inf }
0x3366   :  { %10193 = vmin.xlane.f32.xlu0 %v10192_v55  ;;  %v10197_v56 = vshll.u32 %v10196_v53, 16 }
0x33ef   :  { %v10194_v0 = vpop.xlane.xlu0 %10193 }
0x33f0   :  { %v10195_v57 = vcvt.f32.s32 %v10194_v0 }
0x33f2   :  { %v10198_v58 = vadd.s32 %v10197_v56, %v10195_v57 }
0x33f4   :  { %v10200_v59 = vsel %vm10199_vm9, %v10198_v58, %v10180_v8  ;;  %vm10202_vm10 = vcmp.eq.s32.totalorder %v13182_v50, %v10198_v58 }
0x33f5   :  { %v10203_v35 = vsel %vm10202_vm10, %v10201_v24, 5 }
0x33f6   :  { %v10204_v28 = vsel %vm9851_vm15, %v10203_v35, 2147483647 }
0x33f7   :  { %v10206_v22 = vshra.s32 %v10204_v28, 16  ;;  %v10205_v10 = vand.u32 65535, %v10204_v28 }
0x33f9   :  { %v10208_v20 = vcvt.s32.f32 %v10206_v22  ;;  %v10207_v16 = vcvt.s32.f32 %v10205_v10 }
0x33fb   :  { %10209 = vmin.xlane.f32.xlu0 %v10208_v20 }
0x3484   :  { %v10210_v46 = vpop.xlane.xlu0 %10209 }
0x3485   :  { %vm10211_vm12 = vcmp.eq.f32.partialorder %v10208_v20, %v10210_v46  ;;  %v10216_v32 = vcvt.f32.s32 %v10210_v46 }
0x3486   :  { %v10212_v42 = vsel %vm10211_vm12, %v10207_v16, inf }
0x3487   :  { %10213 = vmin.xlane.f32.xlu0 %v10212_v42  ;;  %v10217_v4 = vshll.u32 %v10216_v32, 16 }
0x3510   :  { %v10214_v26 = vpop.xlane.xlu0 %10213 }
0x3511   :  { %v10215_v14 = vcvt.f32.s32 %v10214_v26 }
0x3513   :  { %v10218_v45 = vadd.s32 %v10217_v4, %v10215_v14 }
0x3515   :  { %vm10222_vm14 = vcmp.eq.s32.totalorder %v13182_v50, %v10218_v45  ;;  %v10220_v37 = vsel %vm10219_vm13, %v10218_v45, %v10200_v59 }
0x3516   :  { %v10223_v12 = vsel %vm10222_vm14, %v10221_v9, 5 }
0x3517   :  { %v10224_v27 = vsel %vm9851_vm15, %v10223_v12, 2147483647 }
0x3518   :  { %v10226_v21 = vshra.s32 %v10224_v27, 16  ;;  %v10225_v49 = vand.u32 65535, %v10224_v27 }
0x351a   :  { %v10228_v18 = vcvt.s32.f32 %v10226_v21  ;;  %v10227_v25 = vcvt.s32.f32 %v10225_v49 }
0x351c   :  { %10229 = vmin.xlane.f32.xlu0 %v10228_v18 }
0x35a5   :  { %v10230_v29 = vpop.xlane.xlu0 %10229 }
0x35a6   :  { %vm10231_vm0 = vcmp.eq.f32.partialorder %v10228_v18, %v10230_v29  ;;  %v10236_v11 = vcvt.f32.s32 %v10230_v29 }
0x35a7   :  { %v10232_v23 = vsel %vm10231_vm0, %v10227_v25, inf }
0x35a8   :  { %10233 = vmin.xlane.f32.xlu1 %v10232_v23  ;;  %v10237_v48 = vshll.u32 %v10236_v11, 16 }
0x3631   :  { %v10234_v60 = vpop.xlane.xlu1 %10233 }
0x3632   :  { %v10235_v34 = vcvt.f32.s32 %v10234_v60 }
0x3634   :  { %v10238_v6 = vadd.s32 %v10237_v48, %v10235_v34 }
0x3636   :  { %vm10243_vm4 = vcmp.eq.s32.totalorder %v13182_v50, %v10238_v6  ;;  %v10240_v52 = vsel %vm10239_vm2, %v10238_v6, %v10220_v37 }
0x3637   :  { %v10245_v3 = vsel %vm10243_vm4, %v10244_v36, 5  ;;  %10242 = vst.msk [vmem:[#allocation10] sm:$0x1] %vm10241_vm3, %v10240_v52 }
0x3638   :  { %v10246_v51 = vsel %vm9851_vm15, %v10245_v3, 2147483647 }
0x3639   :  { %v10248_v31 = vshra.s32 %v10246_v51, 16  ;;  %v10247_v43 = vand.u32 65535, %v10246_v51 }
0x363b   :  { %v10250_v38 = vcvt.s32.f32 %v10248_v31  ;;  %v10249_v41 = vcvt.s32.f32 %v10247_v43 }
0x363d   :  { %10251 = vmin.xlane.f32.xlu0 %v10250_v38 }
0x36c6   :  { %v10252_v33 = vpop.xlane.xlu0 %10251 }
0x36c7   :  { %vm10253_vm1 = vcmp.eq.f32.partialorder %v10250_v38, %v10252_v33 }
0x36c8   :  { %v10254_v30 = vsel %vm10253_vm1, %v10249_v41, inf }
0x36c9   :  { %10255 = vmin.xlane.f32.xlu1 %v10254_v30 }
0x36ca   :  { %11282 = shalt.err (!%p11279_p5)
}
0x36cb   :  { %10281 = dma.vmem_to_hbm [thread:$0]  %s10279_s25, 16, %s13317_s11, [#allocation11]  }
0x36cc   :  { %s11291_s13 = scalar_lea.vmem %s10269_s27, 16  ;;  %s11295_s14 = scalar_lea.vmem %s10269_s27, 32 }
0x36cd   :  { %p11292_p6 = scmp.ne.s32.totalorder %s10269_s27, %s11291_s13  ;;  %p11296_p7 = scmp.lt.s32.totalorder %s10269_s27, %s10269_s27 }
0x36ce   :  { %p11297_p8 = scmp.lt.s32.totalorder %s11295_s14, %s11291_s13 }
0x36d0   :  { %p11298_p9 = por %p11297_p8, %p11296_p7 }
0x36d2   :  { %p11299_p10 = pnand %p11298_p9, %p11292_p6 }
0x36d4   :  { %11302 = shalt.err (!%p11299_p10)
}
0x36d5   :  { %10271 = dma.vmem_to_hbm [thread:$0]  %s10269_s27, 16, %s13316_s10, [#allocation5]   ;;  %v10258_v50 = vcvt.f32.s32 %v10252_v33 }
0x36d6   :  { %s11349_s17 = smov [#allocation12]  }
0x36d7   :  { %s10288_s2 = sshll.u32 %s11349_s17, 4  ;;  %v10259_v17 = vshll.u32 %v10258_v50, 16  ;;  %s10289_s2 = int_to_ptr.vmem [resolvable:$true] %s10288_s2 }
0x36d8   :  { %s11311_s11 = scalar_lea.vmem %s10289_s2, 16  ;;  %s11315_s18 = scalar_lea.vmem %s10289_s2, 32 }
0x36d9   :  { %p11312_p11 = scmp.ne.s32.totalorder %s10289_s2, %s11311_s11  ;;  %p11316_p12 = scmp.lt.s32.totalorder %s10289_s2, %s10289_s2 }
0x36da   :  { %p11317_p13 = scmp.lt.s32.totalorder %s11315_s18, %s11311_s11 }
0x36dc   :  { %p11318_p0 = por %p11317_p13, %p11316_p12 }
0x36de   :  { %p11319_p1 = pnand %p11318_p0, %p11312_p11 }
0x3752   :  { %v10256_v47 = vpop.xlane.xlu1 %10255 }
0x3753   :  { %v10257_v63 = vcvt.f32.s32 %v10256_v47 }
0x3755   :  { %v10260_v40 = vadd.s32 %v10259_v17, %v10257_v63 }
0x3757   :  { %10261 = vst.msk [vmem:[#allocation12] sm:$0x1] %vm10094_vm11, %v10260_v40 }
0x3758   :  { %11322 = shalt.err (!%p11319_p1)
}
0x3759   :  { %10291 = dma.vmem_to_hbm [thread:$0]  %s10289_s2, 16, %s13318_s12, [#allocation11]  }
0x375a   :  { %11335 = dma.done.wait [#allocation5], 16  }
0x375b   :  { %11336 = vsyncadd [#allocation5], 4294967280 }
0x375c   :  { %11337 = dma.done.wait [#allocation11], 32  }
0x375d   :  { %11338 = vsyncadd [#allocation11], 4294967264 }
0x375e   :  { %10301 = vsyncpa [#allocation4], 1 }
0x375f   :  { %10302 = vsyncpa [#allocation7], 1 }
0x3760   :  { %10303 = vsyncpa [#allocation5], 1 }
0x3761   :  { %10304 = vsyncpa [#allocation11], 1 }

</bundles_post_ra>
